<compile_context>
chip_gen: v7x
topology: tpu7x:2x2x1
jax: 0.10.0
libtpu: 0.0.40
codegen_flags: <defaults>
</compile_context>

<pallas_src>
import jax
import jax.numpy as jnp
from jax.experimental import pallas as pl
from jax.experimental.pallas import tpu as pltpu


def _corr_kernel(a_ref, b_ref, o_ref):
    # a_ref: (1, TH, C, Wo)         first image rows for this tile, (row, C, col)
    # b_ref: (1, TH + 6, C, Wo + 6) second image rows with +6 halo (zero padded)
    # o_ref: (1, 49, TH, Wo)        correlation output for this (batch, row-tile)
    _, TH, C, Wo = a_ref.shape

    inv_c = jnp.float32(1.0 / C)
    # f32 accumulation regardless of input dtype; fold 1/C into the smaller
    # operand (a is read once, the 49 products are not).
    a = a_ref[0].astype(jnp.float32)                     # (TH, C, Wo)
    scale_first = C <= 49
    if scale_first:
        a = a * inv_c

    # Single hoisted f32 cast of the halo window (review item 1).
    b = b_ref[0].astype(jnp.float32)                     # (TH+6, C, Wo+6)

    # 7x7 displacements.  Only the 7 width shifts need a lane-offset slice
    # (hoisted out of the dp loop); height shifts are leading-axis offsets into
    # the halo window and cost nothing.  The loops are a fixed 7x7 unroll whose
    # per-iteration product is reduced and stored immediately, so live ranges
    # stay bounded; switch to lax.fori_loop(..., unroll=True) only if a bundle
    # dump shows spills.
    for do in range(7):
        bw = b[:, :, do:do + Wo]                         # (TH+6, C, Wo)
        for dp in range(7):
            win = bw[dp:dp + TH]                         # (TH, C, Wo): free view
            corr = jnp.sum(a * win, axis=1)              # sublane reduce over C
            if not scale_first:
                corr = corr * inv_c
            o_ref[0, dp * 7 + do, :, :] = corr.astype(o_ref.dtype)


def _vmem_budget_bytes():
    """Physical VMEM of the local TPU generation, minus ~20% headroom."""
    cap = 0
    try:
        info = pltpu.get_tpu_info()
        for name in ("vmem_capacity_bytes", "vmem_bytes"):
            v = getattr(info, name, None)
            if isinstance(v, (int, float)) and v > 0:
                cap = int(v)
                break
    except Exception:
        cap = 0
    if cap <= 0:
        cap = 64 << 20            # conservative default: v7x has 64 MiB per TC
    return (cap * 4) // 5         # leave ~20% headroom for compiler scratch


def _select_tiling(B, C, Ho, Wo, dtype, budget):
    """Row-tile height TH: dtype-aware sublane pack, VMEM-aware size, and at
    least two grid steps when possible (v7x has two TensorCores)."""
    itemsize = jnp.dtype(dtype).itemsize
    pack = {4: 8, 2: 16, 1: 32}.get(itemsize, 8)

    def need_bytes(th):
        a_blk = th * C * Wo * itemsize
        b_blk = (th + 6) * C * (Wo + 6) * itemsize
        o_blk = 49 * th * Wo * itemsize
        # generous bound on in-kernel f32 temporaries (a32, b32, width-shifted
        # window, product), each <= the halo-window volume
        f32_tmp = 4 * (th + 6) * C * (Wo + 6) * 4
        return 2 * (a_blk + b_blk + o_blk) + f32_tmp      # 2x: double buffering

    max_th = min(512, max(pack, -(-Ho // pack) * pack))
    th = max_th
    while th > pack and need_bytes(th) > budget:
        th -= pack
    if B * (-(-Ho // th)) < 2 and th > pack:              # keep both TCs busy
        th = max(pack, (th // 2) // pack * pack)
    hp = -(-Ho // th) * th
    return th, hp, hp // th, need_bytes(th)


def module_correlation(ten_first, ten_second, int_stride):
    """Forward of ModuleCorrelation.  Inputs are NCHW; output is
    (B, 49, ceil(H/stride), ceil(W/stride)) — identical to the CUDA kernel."""
    B, C, H, W = ten_first.shape
    s = int(int_stride)
    Ho = -(-H // s)
    Wo = -(-W // s)
    dtype = ten_first.dtype

    budget = _vmem_budget_bytes()
    TH, Hp, n_rt, need = _select_tiling(B, C, Ho, Wo, dtype, budget)
    vmem_limit = int(min(max(budget, need), max(need + (16 << 20), 32 << 20)))

    # ---- glue (plain JAX): stride, (row, C, col) layout, pad, halo windows ----
    a = jnp.transpose(ten_first[:, :, ::s, ::s], (0, 2, 1, 3))       # (B, Ho, C, Wo)
    a = jnp.pad(a, ((0, 0), (0, Hp - Ho), (0, 0), (0, 0)))           # (B, Hp, C, Wo)

    b = jnp.transpose(ten_second[:, :, ::s, ::s], (0, 2, 1, 3))      # (B, Ho, C, Wo)
    b = jnp.pad(b, ((0, 0), (3, Hp - Ho + 3), (0, 0), (3, 3)))       # (B, Hp+6, C, Wo+6)
    # Overlapping row windows with a +6 halo: bounds per-step VMEM to the tile
    # instead of keeping the whole padded image resident (v7x feedback).
    rows = jnp.arange(n_rt)[:, None] * TH + jnp.arange(TH + 6)[None, :]
    b_win = b[:, rows]                                               # (B, n_rt, TH+6, C, Wo+6)
    b_win = b_win.reshape(B * n_rt, TH + 6, C, Wo + 6)

    # ---- hot path: Pallas kernel, grid over (batch, row tiles) ---------------
    out = pl.pallas_call(
        _corr_kernel,
        out_shape=jax.ShapeDtypeStruct((B, 49, Hp, Wo), dtype),
        grid=(B, n_rt),
        in_specs=[
            pl.BlockSpec((1, TH, C, Wo), lambda bi, ri: (bi, ri, 0, 0)),
            pl.BlockSpec((1, TH + 6, C, Wo + 6),
                         lambda bi, ri: (bi * n_rt + ri, 0, 0, 0)),
        ],
        out_specs=pl.BlockSpec((1, 49, TH, Wo), lambda bi, ri: (bi, 0, ri, 0)),
        compiler_params=pltpu.CompilerParams(
            dimension_semantics=("parallel", "parallel"),
            vmem_limit_bytes=vmem_limit),
    )(a, b_win)
    return out[:, :, :Ho, :]


def _correlation_ref(first, second, s):
    """Plain-JAX reference with the original pad-by-3s-then-stride formulation."""
    B, C, H, W = first.shape
    Ho = -(-H // s)
    Wo = -(-W // s)
    a = first[:, :, ::s, ::s]                                        # (B,C,Ho,Wo)
    pad = jnp.pad(second, ((0, 0), (0, 0), (3 * s, 3 * s), (3 * s, 3 * s)))
    bg = pad[:, :, ::s, ::s]                                         # (B,C,Ho+6,Wo+6)
    outs = []
    for dp in range(7):
        for do in range(7):
            win = bg[:, :, dp:dp + Ho, do:do + Wo]
            outs.append(jnp.mean(a * win, axis=1))
    return jnp.stack(outs, axis=1)                                   # (B,49,Ho,Wo)


if __name__ == "__main__":
    key = jax.random.PRNGKey(0)
    k1, k2 = jax.random.split(key)
    B, C, H, W = 2, 8, 16, 16

    ten_first = jax.random.normal(k1, (B, C, H, W), dtype=jnp.float32)
    ten_second = jax.random.normal(k2, (B, C, H, W), dtype=jnp.float32)

    # primary case (stride=2); stride=3 also exercises the padded-rows path
    for stride in (2, 3):
        out = module_correlation(ten_first, ten_second, stride)
        out = jax.block_until_ready(out)
        Ho, Wo = -(-H // stride), -(-W // stride)
        assert out.shape == (B, 49, Ho, Wo), (stride, out.shape)
        ref = _correlation_ref(ten_first, ten_second, stride)
        assert jnp.allclose(out, ref, atol=1e-5, rtol=1e-5), \
            (stride, float(jnp.max(jnp.abs(out - ref))))

    print("KERNEL_OK")
</pallas_src>

<mosaic_0001>
module attributes {stable_mosaic.version = 11 : i64} {
  func.func @_corr_kernel(%arg0: i32, %arg1: i32, %arg2: memref<1x8x8x8xf32, #tpu.memory_space<vmem>>, %arg3: memref<1x14x8x14xf32, #tpu.memory_space<vmem>>, %arg4: memref<1x49x8x8xf32, #tpu.memory_space<vmem>>) attributes {dimension_semantics = [#tpu.dimension_semantics<parallel>, #tpu.dimension_semantics<parallel>], iteration_bounds = array<i64: 2, 1>, scalar_prefetch = 0 : i64, scratch_operands = 0 : i64, tpu.core_type = #tpu.core_type<tc>, window_params = [{transform_indices = @transform_0, window_bounds = array<i64: 1, 8, 8, 8>}, {transform_indices = @transform_1, window_bounds = array<i64: 1, 14, 8, 14>}, {transform_indices = @transform_2, window_bounds = array<i64: 1, 49, 8, 8>}]} {
    %c0 = arith.constant 0 : index
    %c0_0 = arith.constant 0 : index
    %c0_1 = arith.constant 0 : index
    %c0_2 = arith.constant 0 : index
    %0 = vector.load %arg2[%c0, %c0_0, %c0_1, %c0_2] : memref<1x8x8x8xf32, #tpu.memory_space<vmem>>, vector<1x8x8x8xf32>
    %1 = vector.shape_cast %0 : vector<1x8x8x8xf32> to vector<8x8x8xf32>
    %cst = arith.constant 1.250000e-01 : f32
    %2 = vector.broadcast %cst : f32 to vector<8x8x8xf32>
    %3 = arith.mulf %1, %2 : vector<8x8x8xf32>
    %c0_3 = arith.constant 0 : index
    %c0_4 = arith.constant 0 : index
    %c0_5 = arith.constant 0 : index
    %c0_6 = arith.constant 0 : index
    %4 = vector.load %arg3[%c0_3, %c0_4, %c0_5, %c0_6] : memref<1x14x8x14xf32, #tpu.memory_space<vmem>>, vector<1x14x8x14xf32>
    %5 = vector.shape_cast %4 : vector<1x14x8x14xf32> to vector<14x8x14xf32>
    %6 = vector.extract_strided_slice %5 {offsets = [0, 0, 0], sizes = [14, 8, 8], strides = [1, 1, 1]} : vector<14x8x14xf32> to vector<14x8x8xf32>
    %7 = vector.extract_strided_slice %6 {offsets = [0, 0, 0], sizes = [8, 8, 8], strides = [1, 1, 1]} : vector<14x8x8xf32> to vector<8x8x8xf32>
    %8 = arith.mulf %3, %7 : vector<8x8x8xf32>
    %cst_7 = arith.constant dense<0.000000e+00> : vector<8x8xf32>
    %9 = vector.multi_reduction <add>, %8, %cst_7 [1] : vector<8x8x8xf32> to vector<8x8xf32>
    %c0_8 = arith.constant 0 : index
    %c0_9 = arith.constant 0 : index
    %c0_10 = arith.constant 0 : index
    %c0_11 = arith.constant 0 : index
    %10 = vector.load %arg4[%c0_8, %c0_9, %c0_10, %c0_11] : memref<1x49x8x8xf32, #tpu.memory_space<vmem>>, vector<1x1x8x8xf32>
    %11 = vector.shape_cast %10 : vector<1x1x8x8xf32> to vector<8x8xf32>
    %12 = vector.shape_cast %9 : vector<8x8xf32> to vector<1x1x8x8xf32>
    tpu.vector_store %arg4[%c0_8, %c0_9, %c0_10, %c0_11], %12 {strides = array<i32>} : memref<1x49x8x8xf32, #tpu.memory_space<vmem>>, vector<1x1x8x8xf32>,
    %13 = vector.extract_strided_slice %6 {offsets = [1, 0, 0], sizes = [8, 8, 8], strides = [1, 1, 1]} : vector<14x8x8xf32> to vector<8x8x8xf32>
    %14 = arith.mulf %3, %13 : vector<8x8x8xf32>
    %cst_12 = arith.constant dense<0.000000e+00> : vector<8x8xf32>
    %15 = vector.multi_reduction <add>, %14, %cst_12 [1] : vector<8x8x8xf32> to vector<8x8xf32>
    %c0_13 = arith.constant 0 : index
    %c7 = arith.constant 7 : index
    %c0_14 = arith.constant 0 : index
    %c0_15 = arith.constant 0 : index
    %16 = vector.load %arg4[%c0_13, %c7, %c0_14, %c0_15] : memref<1x49x8x8xf32, #tpu.memory_space<vmem>>, vector<1x1x8x8xf32>
    %17 = vector.shape_cast %16 : vector<1x1x8x8xf32> to vector<8x8xf32>
    %18 = vector.shape_cast %15 : vector<8x8xf32> to vector<1x1x8x8xf32>
    tpu.vector_store %arg4[%c0_13, %c7, %c0_14, %c0_15], %18 {strides = array<i32>} : memref<1x49x8x8xf32, #tpu.memory_space<vmem>>, vector<1x1x8x8xf32>,
    %19 = vector.extract_strided_slice %6 {offsets = [2, 0, 0], sizes = [8, 8, 8], strides = [1, 1, 1]} : vector<14x8x8xf32> to vector<8x8x8xf32>
    %20 = arith.mulf %3, %19 : vector<8x8x8xf32>
    %cst_16 = arith.constant dense<0.000000e+00> : vector<8x8xf32>
    %21 = vector.multi_reduction <add>, %20, %cst_16 [1] : vector<8x8x8xf32> to vector<8x8xf32>
    %c0_17 = arith.constant 0 : index
    %c14 = arith.constant 14 : index
    %c0_18 = arith.constant 0 : index
    %c0_19 = arith.constant 0 : index
    %22 = vector.load %arg4[%c0_17, %c14, %c0_18, %c0_19] : memref<1x49x8x8xf32, #tpu.memory_space<vmem>>, vector<1x1x8x8xf32>
    %23 = vector.shape_cast %22 : vector<1x1x8x8xf32> to vector<8x8xf32>
    %24 = vector.shape_cast %21 : vector<8x8xf32> to vector<1x1x8x8xf32>
    tpu.vector_store %arg4[%c0_17, %c14, %c0_18, %c0_19], %24 {strides = array<i32>} : memref<1x49x8x8xf32, #tpu.memory_space<vmem>>, vector<1x1x8x8xf32>,
    %25 = vector.extract_strided_slice %6 {offsets = [3, 0, 0], sizes = [8, 8, 8], strides = [1, 1, 1]} : vector<14x8x8xf32> to vector<8x8x8xf32>
    %26 = arith.mulf %3, %25 : vector<8x8x8xf32>
    %cst_20 = arith.constant dense<0.000000e+00> : vector<8x8xf32>
    %27 = vector.multi_reduction <add>, %26, %cst_20 [1] : vector<8x8x8xf32> to vector<8x8xf32>
    %c0_21 = arith.constant 0 : index
    %c21 = arith.constant 21 : index
    %c0_22 = arith.constant 0 : index
    %c0_23 = arith.constant 0 : index
    %28 = vector.load %arg4[%c0_21, %c21, %c0_22, %c0_23] : memref<1x49x8x8xf32, #tpu.memory_space<vmem>>, vector<1x1x8x8xf32>
    %29 = vector.shape_cast %28 : vector<1x1x8x8xf32> to vector<8x8xf32>
    %30 = vector.shape_cast %27 : vector<8x8xf32> to vector<1x1x8x8xf32>
    tpu.vector_store %arg4[%c0_21, %c21, %c0_22, %c0_23], %30 {strides = array<i32>} : memref<1x49x8x8xf32, #tpu.memory_space<vmem>>, vector<1x1x8x8xf32>,
    %31 = vector.extract_strided_slice %6 {offsets = [4, 0, 0], sizes = [8, 8, 8], strides = [1, 1, 1]} : vector<14x8x8xf32> to vector<8x8x8xf32>
    %32 = arith.mulf %3, %31 : vector<8x8x8xf32>
    %cst_24 = arith.constant dense<0.000000e+00> : vector<8x8xf32>
    %33 = vector.multi_reduction <add>, %32, %cst_24 [1] : vector<8x8x8xf32> to vector<8x8xf32>
    %c0_25 = arith.constant 0 : index
    %c28 = arith.constant 28 : index
    %c0_26 = arith.constant 0 : index
    %c0_27 = arith.constant 0 : index
    %34 = vector.load %arg4[%c0_25, %c28, %c0_26, %c0_27] : memref<1x49x8x8xf32, #tpu.memory_space<vmem>>, vector<1x1x8x8xf32>
    %35 = vector.shape_cast %34 : vector<1x1x8x8xf32> to vector<8x8xf32>
    %36 = vector.shape_cast %33 : vector<8x8xf32> to vector<1x1x8x8xf32>
    tpu.vector_store %arg4[%c0_25, %c28, %c0_26, %c0_27], %36 {strides = array<i32>} : memref<1x49x8x8xf32, #tpu.memory_space<vmem>>, vector<1x1x8x8xf32>,
    %37 = vector.extract_strided_slice %6 {offsets = [5, 0, 0], sizes = [8, 8, 8], strides = [1, 1, 1]} : vector<14x8x8xf32> to vector<8x8x8xf32>
    %38 = arith.mulf %3, %37 : vector<8x8x8xf32>
    %cst_28 = arith.constant dense<0.000000e+00> : vector<8x8xf32>
    %39 = vector.multi_reduction <add>, %38, %cst_28 [1] : vector<8x8x8xf32> to vector<8x8xf32>
    %c0_29 = arith.constant 0 : index
    %c35 = arith.constant 35 : index
    %c0_30 = arith.constant 0 : index
    %c0_31 = arith.constant 0 : index
    %40 = vector.load %arg4[%c0_29, %c35, %c0_30, %c0_31] : memref<1x49x8x8xf32, #tpu.memory_space<vmem>>, vector<1x1x8x8xf32>
    %41 = vector.shape_cast %40 : vector<1x1x8x8xf32> to vector<8x8xf32>
    %42 = vector.shape_cast %39 : vector<8x8xf32> to vector<1x1x8x8xf32>
    tpu.vector_store %arg4[%c0_29, %c35, %c0_30, %c0_31], %42 {strides = array<i32>} : memref<1x49x8x8xf32, #tpu.memory_space<vmem>>, vector<1x1x8x8xf32>,
    %43 = vector.extract_strided_slice %6 {offsets = [6, 0, 0], sizes = [8, 8, 8], strides = [1, 1, 1]} : vector<14x8x8xf32> to vector<8x8x8xf32>
    %44 = arith.mulf %3, %43 : vector<8x8x8xf32>
    %cst_32 = arith.constant dense<0.000000e+00> : vector<8x8xf32>
    %45 = vector.multi_reduction <add>, %44, %cst_32 [1] : vector<8x8x8xf32> to vector<8x8xf32>
    %c0_33 = arith.constant 0 : index
    %c42 = arith.constant 42 : index
    %c0_34 = arith.constant 0 : index
    %c0_35 = arith.constant 0 : index
    %46 = vector.load %arg4[%c0_33, %c42, %c0_34, %c0_35] : memref<1x49x8x8xf32, #tpu.memory_space<vmem>>, vector<1x1x8x8xf32>
    %47 = vector.shape_cast %46 : vector<1x1x8x8xf32> to vector<8x8xf32>
    %48 = vector.shape_cast %45 : vector<8x8xf32> to vector<1x1x8x8xf32>
    tpu.vector_store %arg4[%c0_33, %c42, %c0_34, %c0_35], %48 {strides = array<i32>} : memref<1x49x8x8xf32, #tpu.memory_space<vmem>>, vector<1x1x8x8xf32>,
    %49 = vector.extract_strided_slice %5 {offsets = [0, 0, 1], sizes = [14, 8, 8], strides = [1, 1, 1]} : vector<14x8x14xf32> to vector<14x8x8xf32>
    %50 = vector.extract_strided_slice %49 {offsets = [0, 0, 0], sizes = [8, 8, 8], strides = [1, 1, 1]} : vector<14x8x8xf32> to vector<8x8x8xf32>
    %51 = arith.mulf %3, %50 : vector<8x8x8xf32>
    %cst_36 = arith.constant dense<0.000000e+00> : vector<8x8xf32>
    %52 = vector.multi_reduction <add>, %51, %cst_36 [1] : vector<8x8x8xf32> to vector<8x8xf32>
    %c0_37 = arith.constant 0 : index
    %c1 = arith.constant 1 : index
    %c0_38 = arith.constant 0 : index
    %c0_39 = arith.constant 0 : index
    %53 = vector.load %arg4[%c0_37, %c1, %c0_38, %c0_39] : memref<1x49x8x8xf32, #tpu.memory_space<vmem>>, vector<1x1x8x8xf32>
    %54 = vector.shape_cast %53 : vector<1x1x8x8xf32> to vector<8x8xf32>
    %55 = vector.shape_cast %52 : vector<8x8xf32> to vector<1x1x8x8xf32>
    tpu.vector_store %arg4[%c0_37, %c1, %c0_38, %c0_39], %55 {strides = array<i32>} : memref<1x49x8x8xf32, #tpu.memory_space<vmem>>, vector<1x1x8x8xf32>,
    %56 = vector.extract_strided_slice %49 {offsets = [1, 0, 0], sizes = [8, 8, 8], strides = [1, 1, 1]} : vector<14x8x8xf32> to vector<8x8x8xf32>
    %57 = arith.mulf %3, %56 : vector<8x8x8xf32>
    %cst_40 = arith.constant dense<0.000000e+00> : vector<8x8xf32>
    %58 = vector.multi_reduction <add>, %57, %cst_40 [1] : vector<8x8x8xf32> to vector<8x8xf32>
    %c0_41 = arith.constant 0 : index
    %c8 = arith.constant 8 : index
    %c0_42 = arith.constant 0 : index
    %c0_43 = arith.constant 0 : index
    %59 = vector.load %arg4[%c0_41, %c8, %c0_42, %c0_43] : memref<1x49x8x8xf32, #tpu.memory_space<vmem>>, vector<1x1x8x8xf32>
    %60 = vector.shape_cast %59 : vector<1x1x8x8xf32> to vector<8x8xf32>
    %61 = vector.shape_cast %58 : vector<8x8xf32> to vector<1x1x8x8xf32>
    tpu.vector_store %arg4[%c0_41, %c8, %c0_42, %c0_43], %61 {strides = array<i32>} : memref<1x49x8x8xf32, #tpu.memory_space<vmem>>, vector<1x1x8x8xf32>,
    %62 = vector.extract_strided_slice %49 {offsets = [2, 0, 0], sizes = [8, 8, 8], strides = [1, 1, 1]} : vector<14x8x8xf32> to vector<8x8x8xf32>
    %63 = arith.mulf %3, %62 : vector<8x8x8xf32>
    %cst_44 = arith.constant dense<0.000000e+00> : vector<8x8xf32>
    %64 = vector.multi_reduction <add>, %63, %cst_44 [1] : vector<8x8x8xf32> to vector<8x8xf32>
    %c0_45 = arith.constant 0 : index
    %c15 = arith.constant 15 : index
    %c0_46 = arith.constant 0 : index
    %c0_47 = arith.constant 0 : index
    %65 = vector.load %arg4[%c0_45, %c15, %c0_46, %c0_47] : memref<1x49x8x8xf32, #tpu.memory_space<vmem>>, vector<1x1x8x8xf32>
    %66 = vector.shape_cast %65 : vector<1x1x8x8xf32> to vector<8x8xf32>
    %67 = vector.shape_cast %64 : vector<8x8xf32> to vector<1x1x8x8xf32>
    tpu.vector_store %arg4[%c0_45, %c15, %c0_46, %c0_47], %67 {strides = array<i32>} : memref<1x49x8x8xf32, #tpu.memory_space<vmem>>, vector<1x1x8x8xf32>,
    %68 = vector.extract_strided_slice %49 {offsets = [3, 0, 0], sizes = [8, 8, 8], strides = [1, 1, 1]} : vector<14x8x8xf32> to vector<8x8x8xf32>
    %69 = arith.mulf %3, %68 : vector<8x8x8xf32>
    %cst_48 = arith.constant dense<0.000000e+00> : vector<8x8xf32>
    %70 = vector.multi_reduction <add>, %69, %cst_48 [1] : vector<8x8x8xf32> to vector<8x8xf32>
    %c0_49 = arith.constant 0 : index
    %c22 = arith.constant 22 : index
    %c0_50 = arith.constant 0 : index
    %c0_51 = arith.constant 0 : index
    %71 = vector.load %arg4[%c0_49, %c22, %c0_50, %c0_51] : memref<1x49x8x8xf32, #tpu.memory_space<vmem>>, vector<1x1x8x8xf32>
    %72 = vector.shape_cast %71 : vector<1x1x8x8xf32> to vector<8x8xf32>
    %73 = vector.shape_cast %70 : vector<8x8xf32> to vector<1x1x8x8xf32>
    tpu.vector_store %arg4[%c0_49, %c22, %c0_50, %c0_51], %73 {strides = array<i32>} : memref<1x49x8x8xf32, #tpu.memory_space<vmem>>, vector<1x1x8x8xf32>,
    %74 = vector.extract_strided_slice %49 {offsets = [4, 0, 0], sizes = [8, 8, 8], strides = [1, 1, 1]} : vector<14x8x8xf32> to vector<8x8x8xf32>
    %75 = arith.mulf %3, %74 : vector<8x8x8xf32>
    %cst_52 = arith.constant dense<0.000000e+00> : vector<8x8xf32>
    %76 = vector.multi_reduction <add>, %75, %cst_52 [1] : vector<8x8x8xf32> to vector<8x8xf32>
    %c0_53 = arith.constant 0 : index
    %c29 = arith.constant 29 : index
    %c0_54 = arith.constant 0 : index
    %c0_55 = arith.constant 0 : index
    %77 = vector.load %arg4[%c0_53, %c29, %c0_54, %c0_55] : memref<1x49x8x8xf32, #tpu.memory_space<vmem>>, vector<1x1x8x8xf32>
    %78 = vector.shape_cast %77 : vector<1x1x8x8xf32> to vector<8x8xf32>
    %79 = vector.shape_cast %76 : vector<8x8xf32> to vector<1x1x8x8xf32>
    tpu.vector_store %arg4[%c0_53, %c29, %c0_54, %c0_55], %79 {strides = array<i32>} : memref<1x49x8x8xf32, #tpu.memory_space<vmem>>, vector<1x1x8x8xf32>,
    %80 = vector.extract_strided_slice %49 {offsets = [5, 0, 0], sizes = [8, 8, 8], strides = [1, 1, 1]} : vector<14x8x8xf32> to vector<8x8x8xf32>
    %81 = arith.mulf %3, %80 : vector<8x8x8xf32>
    %cst_56 = arith.constant dense<0.000000e+00> : vector<8x8xf32>
    %82 = vector.multi_reduction <add>, %81, %cst_56 [1] : vector<8x8x8xf32> to vector<8x8xf32>
    %c0_57 = arith.constant 0 : index
    %c36 = arith.constant 36 : index
    %c0_58 = arith.constant 0 : index
    %c0_59 = arith.constant 0 : index
    %83 = vector.load %arg4[%c0_57, %c36, %c0_58, %c0_59] : memref<1x49x8x8xf32, #tpu.memory_space<vmem>>, vector<1x1x8x8xf32>
    %84 = vector.shape_cast %83 : vector<1x1x8x8xf32> to vector<8x8xf32>
    %85 = vector.shape_cast %82 : vector<8x8xf32> to vector<1x1x8x8xf32>
    tpu.vector_store %arg4[%c0_57, %c36, %c0_58, %c0_59], %85 {strides = array<i32>} : memref<1x49x8x8xf32, #tpu.memory_space<vmem>>, vector<1x1x8x8xf32>,
    %86 = vector.extract_strided_slice %49 {offsets = [6, 0, 0], sizes = [8, 8, 8], strides = [1, 1, 1]} : vector<14x8x8xf32> to vector<8x8x8xf32>
    %87 = arith.mulf %3, %86 : vector<8x8x8xf32>
    %cst_60 = arith.constant dense<0.000000e+00> : vector<8x8xf32>
    %88 = vector.multi_reduction <add>, %87, %cst_60 [1] : vector<8x8x8xf32> to vector<8x8xf32>
    %c0_61 = arith.constant 0 : index
    %c43 = arith.constant 43 : index
    %c0_62 = arith.constant 0 : index
    %c0_63 = arith.constant 0 : index
    %89 = vector.load %arg4[%c0_61, %c43, %c0_62, %c0_63] : memref<1x49x8x8xf32, #tpu.memory_space<vmem>>, vector<1x1x8x8xf32>
    %90 = vector.shape_cast %89 : vector<1x1x8x8xf32> to vector<8x8xf32>
    %91 = vector.shape_cast %88 : vector<8x8xf32> to vector<1x1x8x8xf32>
    tpu.vector_store %arg4[%c0_61, %c43, %c0_62, %c0_63], %91 {strides = array<i32>} : memref<1x49x8x8xf32, #tpu.memory_space<vmem>>, vector<1x1x8x8xf32>,
    %92 = vector.extract_strided_slice %5 {offsets = [0, 0, 2], sizes = [14, 8, 8], strides = [1, 1, 1]} : vector<14x8x14xf32> to vector<14x8x8xf32>
    %93 = vector.extract_strided_slice %92 {offsets = [0, 0, 0], sizes = [8, 8, 8], strides = [1, 1, 1]} : vector<14x8x8xf32> to vector<8x8x8xf32>
    %94 = arith.mulf %3, %93 : vector<8x8x8xf32>
    %cst_64 = arith.constant dense<0.000000e+00> : vector<8x8xf32>
    %95 = vector.multi_reduction <add>, %94, %cst_64 [1] : vector<8x8x8xf32> to vector<8x8xf32>
    %c0_65 = arith.constant 0 : index
    %c2 = arith.constant 2 : index
    %c0_66 = arith.constant 0 : index
    %c0_67 = arith.constant 0 : index
    %96 = vector.load %arg4[%c0_65, %c2, %c0_66, %c0_67] : memref<1x49x8x8xf32, #tpu.memory_space<vmem>>, vector<1x1x8x8xf32>
    %97 = vector.shape_cast %96 : vector<1x1x8x8xf32> to vector<8x8xf32>
    %98 = vector.shape_cast %95 : vector<8x8xf32> to vector<1x1x8x8xf32>
    tpu.vector_store %arg4[%c0_65, %c2, %c0_66, %c0_67], %98 {strides = array<i32>} : memref<1x49x8x8xf32, #tpu.memory_space<vmem>>, vector<1x1x8x8xf32>,
    %99 = vector.extract_strided_slice %92 {offsets = [1, 0, 0], sizes = [8, 8, 8], strides = [1, 1, 1]} : vector<14x8x8xf32> to vector<8x8x8xf32>
    %100 = arith.mulf %3, %99 : vector<8x8x8xf32>
    %cst_68 = arith.constant dense<0.000000e+00> : vector<8x8xf32>
    %101 = vector.multi_reduction <add>, %100, %cst_68 [1] : vector<8x8x8xf32> to vector<8x8xf32>
    %c0_69 = arith.constant 0 : index
    %c9 = arith.constant 9 : index
    %c0_70 = arith.constant 0 : index
    %c0_71 = arith.constant 0 : index
    %102 = vector.load %arg4[%c0_69, %c9, %c0_70, %c0_71] : memref<1x49x8x8xf32, #tpu.memory_space<vmem>>, vector<1x1x8x8xf32>
    %103 = vector.shape_cast %102 : vector<1x1x8x8xf32> to vector<8x8xf32>
    %104 = vector.shape_cast %101 : vector<8x8xf32> to vector<1x1x8x8xf32>
    tpu.vector_store %arg4[%c0_69, %c9, %c0_70, %c0_71], %104 {strides = array<i32>} : memref<1x49x8x8xf32, #tpu.memory_space<vmem>>, vector<1x1x8x8xf32>,
    %105 = vector.extract_strided_slice %92 {offsets = [2, 0, 0], sizes = [8, 8, 8], strides = [1, 1, 1]} : vector<14x8x8xf32> to vector<8x8x8xf32>
    %106 = arith.mulf %3, %105 : vector<8x8x8xf32>
    %cst_72 = arith.constant dense<0.000000e+00> : vector<8x8xf32>
    %107 = vector.multi_reduction <add>, %106, %cst_72 [1] : vector<8x8x8xf32> to vector<8x8xf32>
    %c0_73 = arith.constant 0 : index
    %c16 = arith.constant 16 : index
    %c0_74 = arith.constant 0 : index
    %c0_75 = arith.constant 0 : index
    %108 = vector.load %arg4[%c0_73, %c16, %c0_74, %c0_75] : memref<1x49x8x8xf32, #tpu.memory_space<vmem>>, vector<1x1x8x8xf32>
    %109 = vector.shape_cast %108 : vector<1x1x8x8xf32> to vector<8x8xf32>
    %110 = vector.shape_cast %107 : vector<8x8xf32> to vector<1x1x8x8xf32>
    tpu.vector_store %arg4[%c0_73, %c16, %c0_74, %c0_75], %110 {strides = array<i32>} : memref<1x49x8x8xf32, #tpu.memory_space<vmem>>, vector<1x1x8x8xf32>,
    %111 = vector.extract_strided_slice %92 {offsets = [3, 0, 0], sizes = [8, 8, 8], strides = [1, 1, 1]} : vector<14x8x8xf32> to vector<8x8x8xf32>
    %112 = arith.mulf %3, %111 : vector<8x8x8xf32>
    %cst_76 = arith.constant dense<0.000000e+00> : vector<8x8xf32>
    %113 = vector.multi_reduction <add>, %112, %cst_76 [1] : vector<8x8x8xf32> to vector<8x8xf32>
    %c0_77 = arith.constant 0 : index
    %c23 = arith.constant 23 : index
    %c0_78 = arith.constant 0 : index
    %c0_79 = arith.constant 0 : index
    %114 = vector.load %arg4[%c0_77, %c23, %c0_78, %c0_79] : memref<1x49x8x8xf32, #tpu.memory_space<vmem>>, vector<1x1x8x8xf32>
    %115 = vector.shape_cast %114 : vector<1x1x8x8xf32> to vector<8x8xf32>
    %116 = vector.shape_cast %113 : vector<8x8xf32> to vector<1x1x8x8xf32>
    tpu.vector_store %arg4[%c0_77, %c23, %c0_78, %c0_79], %116 {strides = array<i32>} : memref<1x49x8x8xf32, #tpu.memory_space<vmem>>, vector<1x1x8x8xf32>,
    %117 = vector.extract_strided_slice %92 {offsets = [4, 0, 0], sizes = [8, 8, 8], strides = [1, 1, 1]} : vector<14x8x8xf32> to vector<8x8x8xf32>
    %118 = arith.mulf %3, %117 : vector<8x8x8xf32>
    %cst_80 = arith.constant dense<0.000000e+00> : vector<8x8xf32>
    %119 = vector.multi_reduction <add>, %118, %cst_80 [1] : vector<8x8x8xf32> to vector<8x8xf32>
    %c0_81 = arith.constant 0 : index
    %c30 = arith.constant 30 : index
    %c0_82 = arith.constant 0 : index
    %c0_83 = arith.constant 0 : index
    %120 = vector.load %arg4[%c0_81, %c30, %c0_82, %c0_83] : memref<1x49x8x8xf32, #tpu.memory_space<vmem>>, vector<1x1x8x8xf32>
    %121 = vector.shape_cast %120 : vector<1x1x8x8xf32> to vector<8x8xf32>
    %122 = vector.shape_cast %119 : vector<8x8xf32> to vector<1x1x8x8xf32>
    tpu.vector_store %arg4[%c0_81, %c30, %c0_82, %c0_83], %122 {strides = array<i32>} : memref<1x49x8x8xf32, #tpu.memory_space<vmem>>, vector<1x1x8x8xf32>,
    %123 = vector.extract_strided_slice %92 {offsets = [5, 0, 0], sizes = [8, 8, 8], strides = [1, 1, 1]} : vector<14x8x8xf32> to vector<8x8x8xf32>
    %124 = arith.mulf %3, %123 : vector<8x8x8xf32>
    %cst_84 = arith.constant dense<0.000000e+00> : vector<8x8xf32>
    %125 = vector.multi_reduction <add>, %124, %cst_84 [1] : vector<8x8x8xf32> to vector<8x8xf32>
    %c0_85 = arith.constant 0 : index
    %c37 = arith.constant 37 : index
    %c0_86 = arith.constant 0 : index
    %c0_87 = arith.constant 0 : index
    %126 = vector.load %arg4[%c0_85, %c37, %c0_86, %c0_87] : memref<1x49x8x8xf32, #tpu.memory_space<vmem>>, vector<1x1x8x8xf32>
    %127 = vector.shape_cast %126 : vector<1x1x8x8xf32> to vector<8x8xf32>
    %128 = vector.shape_cast %125 : vector<8x8xf32> to vector<1x1x8x8xf32>
    tpu.vector_store %arg4[%c0_85, %c37, %c0_86, %c0_87], %128 {strides = array<i32>} : memref<1x49x8x8xf32, #tpu.memory_space<vmem>>, vector<1x1x8x8xf32>,
    %129 = vector.extract_strided_slice %92 {offsets = [6, 0, 0], sizes = [8, 8, 8], strides = [1, 1, 1]} : vector<14x8x8xf32> to vector<8x8x8xf32>
    %130 = arith.mulf %3, %129 : vector<8x8x8xf32>
    %cst_88 = arith.constant dense<0.000000e+00> : vector<8x8xf32>
    %131 = vector.multi_reduction <add>, %130, %cst_88 [1] : vector<8x8x8xf32> to vector<8x8xf32>
    %c0_89 = arith.constant 0 : index
    %c44 = arith.constant 44 : index
    %c0_90 = arith.constant 0 : index
    %c0_91 = arith.constant 0 : index
    %132 = vector.load %arg4[%c0_89, %c44, %c0_90, %c0_91] : memref<1x49x8x8xf32, #tpu.memory_space<vmem>>, vector<1x1x8x8xf32>
    %133 = vector.shape_cast %132 : vector<1x1x8x8xf32> to vector<8x8xf32>
    %134 = vector.shape_cast %131 : vector<8x8xf32> to vector<1x1x8x8xf32>
    tpu.vector_store %arg4[%c0_89, %c44, %c0_90, %c0_91], %134 {strides = array<i32>} : memref<1x49x8x8xf32, #tpu.memory_space<vmem>>, vector<1x1x8x8xf32>,
    %135 = vector.extract_strided_slice %5 {offsets = [0, 0, 3], sizes = [14, 8, 8], strides = [1, 1, 1]} : vector<14x8x14xf32> to vector<14x8x8xf32>
    %136 = vector.extract_strided_slice %135 {offsets = [0, 0, 0], sizes = [8, 8, 8], strides = [1, 1, 1]} : vector<14x8x8xf32> to vector<8x8x8xf32>
    %137 = arith.mulf %3, %136 : vector<8x8x8xf32>
    %cst_92 = arith.constant dense<0.000000e+00> : vector<8x8xf32>
    %138 = vector.multi_reduction <add>, %137, %cst_92 [1] : vector<8x8x8xf32> to vector<8x8xf32>
    %c0_93 = arith.constant 0 : index
    %c3 = arith.constant 3 : index
    %c0_94 = arith.constant 0 : index
    %c0_95 = arith.constant 0 : index
    %139 = vector.load %arg4[%c0_93, %c3, %c0_94, %c0_95] : memref<1x49x8x8xf32, #tpu.memory_space<vmem>>, vector<1x1x8x8xf32>
    %140 = vector.shape_cast %139 : vector<1x1x8x8xf32> to vector<8x8xf32>
    %141 = vector.shape_cast %138 : vector<8x8xf32> to vector<1x1x8x8xf32>
    tpu.vector_store %arg4[%c0_93, %c3, %c0_94, %c0_95], %141 {strides = array<i32>} : memref<1x49x8x8xf32, #tpu.memory_space<vmem>>, vector<1x1x8x8xf32>,
    %142 = vector.extract_strided_slice %135 {offsets = [1, 0, 0], sizes = [8, 8, 8], strides = [1, 1, 1]} : vector<14x8x8xf32> to vector<8x8x8xf32>
    %143 = arith.mulf %3, %142 : vector<8x8x8xf32>
    %cst_96 = arith.constant dense<0.000000e+00> : vector<8x8xf32>
    %144 = vector.multi_reduction <add>, %143, %cst_96 [1] : vector<8x8x8xf32> to vector<8x8xf32>
    %c0_97 = arith.constant 0 : index
    %c10 = arith.constant 10 : index
    %c0_98 = arith.constant 0 : index
    %c0_99 = arith.constant 0 : index
    %145 = vector.load %arg4[%c0_97, %c10, %c0_98, %c0_99] : memref<1x49x8x8xf32, #tpu.memory_space<vmem>>, vector<1x1x8x8xf32>
    %146 = vector.shape_cast %145 : vector<1x1x8x8xf32> to vector<8x8xf32>
    %147 = vector.shape_cast %144 : vector<8x8xf32> to vector<1x1x8x8xf32>
    tpu.vector_store %arg4[%c0_97, %c10, %c0_98, %c0_99], %147 {strides = array<i32>} : memref<1x49x8x8xf32, #tpu.memory_space<vmem>>, vector<1x1x8x8xf32>,
    %148 = vector.extract_strided_slice %135 {offsets = [2, 0, 0], sizes = [8, 8, 8], strides = [1, 1, 1]} : vector<14x8x8xf32> to vector<8x8x8xf32>
    %149 = arith.mulf %3, %148 : vector<8x8x8xf32>
    %cst_100 = arith.constant dense<0.000000e+00> : vector<8x8xf32>
    %150 = vector.multi_reduction <add>, %149, %cst_100 [1] : vector<8x8x8xf32> to vector<8x8xf32>
    %c0_101 = arith.constant 0 : index
    %c17 = arith.constant 17 : index
    %c0_102 = arith.constant 0 : index
    %c0_103 = arith.constant 0 : index
    %151 = vector.load %arg4[%c0_101, %c17, %c0_102, %c0_103] : memref<1x49x8x8xf32, #tpu.memory_space<vmem>>, vector<1x1x8x8xf32>
    %152 = vector.shape_cast %151 : vector<1x1x8x8xf32> to vector<8x8xf32>
    %153 = vector.shape_cast %150 : vector<8x8xf32> to vector<1x1x8x8xf32>
    tpu.vector_store %arg4[%c0_101, %c17, %c0_102, %c0_103], %153 {strides = array<i32>} : memref<1x49x8x8xf32, #tpu.memory_space<vmem>>, vector<1x1x8x8xf32>,
    %154 = vector.extract_strided_slice %135 {offsets = [3, 0, 0], sizes = [8, 8, 8], strides = [1, 1, 1]} : vector<14x8x8xf32> to vector<8x8x8xf32>
    %155 = arith.mulf %3, %154 : vector<8x8x8xf32>
    %cst_104 = arith.constant dense<0.000000e+00> : vector<8x8xf32>
    %156 = vector.multi_reduction <add>, %155, %cst_104 [1] : vector<8x8x8xf32> to vector<8x8xf32>
    %c0_105 = arith.constant 0 : index
    %c24 = arith.constant 24 : index
    %c0_106 = arith.constant 0 : index
    %c0_107 = arith.constant 0 : index
    %157 = vector.load %arg4[%c0_105, %c24, %c0_106, %c0_107] : memref<1x49x8x8xf32, #tpu.memory_space<vmem>>, vector<1x1x8x8xf32>
    %158 = vector.shape_cast %157 : vector<1x1x8x8xf32> to vector<8x8xf32>
    %159 = vector.shape_cast %156 : vector<8x8xf32> to vector<1x1x8x8xf32>
    tpu.vector_store %arg4[%c0_105, %c24, %c0_106, %c0_107], %159 {strides = array<i32>} : memref<1x49x8x8xf32, #tpu.memory_space<vmem>>, vector<1x1x8x8xf32>,
    %160 = vector.extract_strided_slice %135 {offsets = [4, 0, 0], sizes = [8, 8, 8], strides = [1, 1, 1]} : vector<14x8x8xf32> to vector<8x8x8xf32>
    %161 = arith.mulf %3, %160 : vector<8x8x8xf32>
    %cst_108 = arith.constant dense<0.000000e+00> : vector<8x8xf32>
    %162 = vector.multi_reduction <add>, %161, %cst_108 [1] : vector<8x8x8xf32> to vector<8x8xf32>
    %c0_109 = arith.constant 0 : index
    %c31 = arith.constant 31 : index
    %c0_110 = arith.constant 0 : index
    %c0_111 = arith.constant 0 : index
    %163 = vector.load %arg4[%c0_109, %c31, %c0_110, %c0_111] : memref<1x49x8x8xf32, #tpu.memory_space<vmem>>, vector<1x1x8x8xf32>
    %164 = vector.shape_cast %163 : vector<1x1x8x8xf32> to vector<8x8xf32>
    %165 = vector.shape_cast %162 : vector<8x8xf32> to vector<1x1x8x8xf32>
    tpu.vector_store %arg4[%c0_109, %c31, %c0_110, %c0_111], %165 {strides = array<i32>} : memref<1x49x8x8xf32, #tpu.memory_space<vmem>>, vector<1x1x8x8xf32>,
    %166 = vector.extract_strided_slice %135 {offsets = [5, 0, 0], sizes = [8, 8, 8], strides = [1, 1, 1]} : vector<14x8x8xf32> to vector<8x8x8xf32>
    %167 = arith.mulf %3, %166 : vector<8x8x8xf32>
    %cst_112 = arith.constant dense<0.000000e+00> : vector<8x8xf32>
    %168 = vector.multi_reduction <add>, %167, %cst_112 [1] : vector<8x8x8xf32> to vector<8x8xf32>
    %c0_113 = arith.constant 0 : index
    %c38 = arith.constant 38 : index
    %c0_114 = arith.constant 0 : index
    %c0_115 = arith.constant 0 : index
    %169 = vector.load %arg4[%c0_113, %c38, %c0_114, %c0_115] : memref<1x49x8x8xf32, #tpu.memory_space<vmem>>, vector<1x1x8x8xf32>
    %170 = vector.shape_cast %169 : vector<1x1x8x8xf32> to vector<8x8xf32>
    %171 = vector.shape_cast %168 : vector<8x8xf32> to vector<1x1x8x8xf32>
    tpu.vector_store %arg4[%c0_113, %c38, %c0_114, %c0_115], %171 {strides = array<i32>} : memref<1x49x8x8xf32, #tpu.memory_space<vmem>>, vector<1x1x8x8xf32>,
    %172 = vector.extract_strided_slice %135 {offsets = [6, 0, 0], sizes = [8, 8, 8], strides = [1, 1, 1]} : vector<14x8x8xf32> to vector<8x8x8xf32>
    %173 = arith.mulf %3, %172 : vector<8x8x8xf32>
    %cst_116 = arith.constant dense<0.000000e+00> : vector<8x8xf32>
    %174 = vector.multi_reduction <add>, %173, %cst_116 [1] : vector<8x8x8xf32> to vector<8x8xf32>
    %c0_117 = arith.constant 0 : index
    %c45 = arith.constant 45 : index
    %c0_118 = arith.constant 0 : index
    %c0_119 = arith.constant 0 : index
    %175 = vector.load %arg4[%c0_117, %c45, %c0_118, %c0_119] : memref<1x49x8x8xf32, #tpu.memory_space<vmem>>, vector<1x1x8x8xf32>
    %176 = vector.shape_cast %175 : vector<1x1x8x8xf32> to vector<8x8xf32>
    %177 = vector.shape_cast %174 : vector<8x8xf32> to vector<1x1x8x8xf32>
    tpu.vector_store %arg4[%c0_117, %c45, %c0_118, %c0_119], %177 {strides = array<i32>} : memref<1x49x8x8xf32, #tpu.memory_space<vmem>>, vector<1x1x8x8xf32>,
    %178 = vector.extract_strided_slice %5 {offsets = [0, 0, 4], sizes = [14, 8, 8], strides = [1, 1, 1]} : vector<14x8x14xf32> to vector<14x8x8xf32>
    %179 = vector.extract_strided_slice %178 {offsets = [0, 0, 0], sizes = [8, 8, 8], strides = [1, 1, 1]} : vector<14x8x8xf32> to vector<8x8x8xf32>
    %180 = arith.mulf %3, %179 : vector<8x8x8xf32>
    %cst_120 = arith.constant dense<0.000000e+00> : vector<8x8xf32>
    %181 = vector.multi_reduction <add>, %180, %cst_120 [1] : vector<8x8x8xf32> to vector<8x8xf32>
    %c0_121 = arith.constant 0 : index
    %c4 = arith.constant 4 : index
    %c0_122 = arith.constant 0 : index
    %c0_123 = arith.constant 0 : index
    %182 = vector.load %arg4[%c0_121, %c4, %c0_122, %c0_123] : memref<1x49x8x8xf32, #tpu.memory_space<vmem>>, vector<1x1x8x8xf32>
    %183 = vector.shape_cast %182 : vector<1x1x8x8xf32> to vector<8x8xf32>
    %184 = vector.shape_cast %181 : vector<8x8xf32> to vector<1x1x8x8xf32>
    tpu.vector_store %arg4[%c0_121, %c4, %c0_122, %c0_123], %184 {strides = array<i32>} : memref<1x49x8x8xf32, #tpu.memory_space<vmem>>, vector<1x1x8x8xf32>,
    %185 = vector.extract_strided_slice %178 {offsets = [1, 0, 0], sizes = [8, 8, 8], strides = [1, 1, 1]} : vector<14x8x8xf32> to vector<8x8x8xf32>
    %186 = arith.mulf %3, %185 : vector<8x8x8xf32>
    %cst_124 = arith.constant dense<0.000000e+00> : vector<8x8xf32>
    %187 = vector.multi_reduction <add>, %186, %cst_124 [1] : vector<8x8x8xf32> to vector<8x8xf32>
    %c0_125 = arith.constant 0 : index
    %c11 = arith.constant 11 : index
    %c0_126 = arith.constant 0 : index
    %c0_127 = arith.constant 0 : index
    %188 = vector.load %arg4[%c0_125, %c11, %c0_126, %c0_127] : memref<1x49x8x8xf32, #tpu.memory_space<vmem>>, vector<1x1x8x8xf32>
    %189 = vector.shape_cast %188 : vector<1x1x8x8xf32> to vector<8x8xf32>
    %190 = vector.shape_cast %187 : vector<8x8xf32> to vector<1x1x8x8xf32>
    tpu.vector_store %arg4[%c0_125, %c11, %c0_126, %c0_127], %190 {strides = array<i32>} : memref<1x49x8x8xf32, #tpu.memory_space<vmem>>, vector<1x1x8x8xf32>,
    %191 = vector.extract_strided_slice %178 {offsets = [2, 0, 0], sizes = [8, 8, 8], strides = [1, 1, 1]} : vector<14x8x8xf32> to vector<8x8x8xf32>
    %192 = arith.mulf %3, %191 : vector<8x8x8xf32>
    %cst_128 = arith.constant dense<0.000000e+00> : vector<8x8xf32>
    %193 = vector.multi_reduction <add>, %192, %cst_128 [1] : vector<8x8x8xf32> to vector<8x8xf32>
    %c0_129 = arith.constant 0 : index
    %c18 = arith.constant 18 : index
    %c0_130 = arith.constant 0 : index
    %c0_131 = arith.constant 0 : index
    %194 = vector.load %arg4[%c0_129, %c18, %c0_130, %c0_131] : memref<1x49x8x8xf32, #tpu.memory_space<vmem>>, vector<1x1x8x8xf32>
    %195 = vector.shape_cast %194 : vector<1x1x8x8xf32> to vector<8x8xf32>
    %196 = vector.shape_cast %193 : vector<8x8xf32> to vector<1x1x8x8xf32>
    tpu.vector_store %arg4[%c0_129, %c18, %c0_130, %c0_131], %196 {strides = array<i32>} : memref<1x49x8x8xf32, #tpu.memory_space<vmem>>, vector<1x1x8x8xf32>,
    %197 = vector.extract_strided_slice %178 {offsets = [3, 0, 0], sizes = [8, 8, 8], strides = [1, 1, 1]} : vector<14x8x8xf32> to vector<8x8x8xf32>
    %198 = arith.mulf %3, %197 : vector<8x8x8xf32>
    %cst_132 = arith.constant dense<0.000000e+00> : vector<8x8xf32>
    %199 = vector.multi_reduction <add>, %198, %cst_132 [1] : vector<8x8x8xf32> to vector<8x8xf32>
    %c0_133 = arith.constant 0 : index
    %c25 = arith.constant 25 : index
    %c0_134 = arith.constant 0 : index
    %c0_135 = arith.constant 0 : index
    %200 = vector.load %arg4[%c0_133, %c25, %c0_134, %c0_135] : memref<1x49x8x8xf32, #tpu.memory_space<vmem>>, vector<1x1x8x8xf32>
    %201 = vector.shape_cast %200 : vector<1x1x8x8xf32> to vector<8x8xf32>
    %202 = vector.shape_cast %199 : vector<8x8xf32> to vector<1x1x8x8xf32>
    tpu.vector_store %arg4[%c0_133, %c25, %c0_134, %c0_135], %202 {strides = array<i32>} : memref<1x49x8x8xf32, #tpu.memory_space<vmem>>, vector<1x1x8x8xf32>,
    %203 = vector.extract_strided_slice %178 {offsets = [4, 0, 0], sizes = [8, 8, 8], strides = [1, 1, 1]} : vector<14x8x8xf32> to vector<8x8x8xf32>
    %204 = arith.mulf %3, %203 : vector<8x8x8xf32>
    %cst_136 = arith.constant dense<0.000000e+00> : vector<8x8xf32>
    %205 = vector.multi_reduction <add>, %204, %cst_136 [1] : vector<8x8x8xf32> to vector<8x8xf32>
    %c0_137 = arith.constant 0 : index
    %c32 = arith.constant 32 : index
    %c0_138 = arith.constant 0 : index
    %c0_139 = arith.constant 0 : index
    %206 = vector.load %arg4[%c0_137, %c32, %c0_138, %c0_139] : memref<1x49x8x8xf32, #tpu.memory_space<vmem>>, vector<1x1x8x8xf32>
    %207 = vector.shape_cast %206 : vector<1x1x8x8xf32> to vector<8x8xf32>
    %208 = vector.shape_cast %205 : vector<8x8xf32> to vector<1x1x8x8xf32>
    tpu.vector_store %arg4[%c0_137, %c32, %c0_138, %c0_139], %208 {strides = array<i32>} : memref<1x49x8x8xf32, #tpu.memory_space<vmem>>, vector<1x1x8x8xf32>,
    %209 = vector.extract_strided_slice %178 {offsets = [5, 0, 0], sizes = [8, 8, 8], strides = [1, 1, 1]} : vector<14x8x8xf32> to vector<8x8x8xf32>
    %210 = arith.mulf %3, %209 : vector<8x8x8xf32>
    %cst_140 = arith.constant dense<0.000000e+00> : vector<8x8xf32>
    %211 = vector.multi_reduction <add>, %210, %cst_140 [1] : vector<8x8x8xf32> to vector<8x8xf32>
    %c0_141 = arith.constant 0 : index
    %c39 = arith.constant 39 : index
    %c0_142 = arith.constant 0 : index
    %c0_143 = arith.constant 0 : index
    %212 = vector.load %arg4[%c0_141, %c39, %c0_142, %c0_143] : memref<1x49x8x8xf32, #tpu.memory_space<vmem>>, vector<1x1x8x8xf32>
    %213 = vector.shape_cast %212 : vector<1x1x8x8xf32> to vector<8x8xf32>
    %214 = vector.shape_cast %211 : vector<8x8xf32> to vector<1x1x8x8xf32>
    tpu.vector_store %arg4[%c0_141, %c39, %c0_142, %c0_143], %214 {strides = array<i32>} : memref<1x49x8x8xf32, #tpu.memory_space<vmem>>, vector<1x1x8x8xf32>,
    %215 = vector.extract_strided_slice %178 {offsets = [6, 0, 0], sizes = [8, 8, 8], strides = [1, 1, 1]} : vector<14x8x8xf32> to vector<8x8x8xf32>
    %216 = arith.mulf %3, %215 : vector<8x8x8xf32>
    %cst_144 = arith.constant dense<0.000000e+00> : vector<8x8xf32>
    %217 = vector.multi_reduction <add>, %216, %cst_144 [1] : vector<8x8x8xf32> to vector<8x8xf32>
    %c0_145 = arith.constant 0 : index
    %c46 = arith.constant 46 : index
    %c0_146 = arith.constant 0 : index
    %c0_147 = arith.constant 0 : index
    %218 = vector.load %arg4[%c0_145, %c46, %c0_146, %c0_147] : memref<1x49x8x8xf32, #tpu.memory_space<vmem>>, vector<1x1x8x8xf32>
    %219 = vector.shape_cast %218 : vector<1x1x8x8xf32> to vector<8x8xf32>
    %220 = vector.shape_cast %217 : vector<8x8xf32> to vector<1x1x8x8xf32>
    tpu.vector_store %arg4[%c0_145, %c46, %c0_146, %c0_147], %220 {strides = array<i32>} : memref<1x49x8x8xf32, #tpu.memory_space<vmem>>, vector<1x1x8x8xf32>,
    %221 = vector.extract_strided_slice %5 {offsets = [0, 0, 5], sizes = [14, 8, 8], strides = [1, 1, 1]} : vector<14x8x14xf32> to vector<14x8x8xf32>
    %222 = vector.extract_strided_slice %221 {offsets = [0, 0, 0], sizes = [8, 8, 8], strides = [1, 1, 1]} : vector<14x8x8xf32> to vector<8x8x8xf32>
    %223 = arith.mulf %3, %222 : vector<8x8x8xf32>
    %cst_148 = arith.constant dense<0.000000e+00> : vector<8x8xf32>
    %224 = vector.multi_reduction <add>, %223, %cst_148 [1] : vector<8x8x8xf32> to vector<8x8xf32>
    %c0_149 = arith.constant 0 : index
    %c5 = arith.constant 5 : index
    %c0_150 = arith.constant 0 : index
    %c0_151 = arith.constant 0 : index
    %225 = vector.load %arg4[%c0_149, %c5, %c0_150, %c0_151] : memref<1x49x8x8xf32, #tpu.memory_space<vmem>>, vector<1x1x8x8xf32>
    %226 = vector.shape_cast %225 : vector<1x1x8x8xf32> to vector<8x8xf32>
    %227 = vector.shape_cast %224 : vector<8x8xf32> to vector<1x1x8x8xf32>
    tpu.vector_store %arg4[%c0_149, %c5, %c0_150, %c0_151], %227 {strides = array<i32>} : memref<1x49x8x8xf32, #tpu.memory_space<vmem>>, vector<1x1x8x8xf32>,
    %228 = vector.extract_strided_slice %221 {offsets = [1, 0, 0], sizes = [8, 8, 8], strides = [1, 1, 1]} : vector<14x8x8xf32> to vector<8x8x8xf32>
    %229 = arith.mulf %3, %228 : vector<8x8x8xf32>
    %cst_152 = arith.constant dense<0.000000e+00> : vector<8x8xf32>
    %230 = vector.multi_reduction <add>, %229, %cst_152 [1] : vector<8x8x8xf32> to vector<8x8xf32>
    %c0_153 = arith.constant 0 : index
    %c12 = arith.constant 12 : index
    %c0_154 = arith.constant 0 : index
    %c0_155 = arith.constant 0 : index
    %231 = vector.load %arg4[%c0_153, %c12, %c0_154, %c0_155] : memref<1x49x8x8xf32, #tpu.memory_space<vmem>>, vector<1x1x8x8xf32>
    %232 = vector.shape_cast %231 : vector<1x1x8x8xf32> to vector<8x8xf32>
    %233 = vector.shape_cast %230 : vector<8x8xf32> to vector<1x1x8x8xf32>
    tpu.vector_store %arg4[%c0_153, %c12, %c0_154, %c0_155], %233 {strides = array<i32>} : memref<1x49x8x8xf32, #tpu.memory_space<vmem>>, vector<1x1x8x8xf32>,
    %234 = vector.extract_strided_slice %221 {offsets = [2, 0, 0], sizes = [8, 8, 8], strides = [1, 1, 1]} : vector<14x8x8xf32> to vector<8x8x8xf32>
    %235 = arith.mulf %3, %234 : vector<8x8x8xf32>
    %cst_156 = arith.constant dense<0.000000e+00> : vector<8x8xf32>
    %236 = vector.multi_reduction <add>, %235, %cst_156 [1] : vector<8x8x8xf32> to vector<8x8xf32>
    %c0_157 = arith.constant 0 : index
    %c19 = arith.constant 19 : index
    %c0_158 = arith.constant 0 : index
    %c0_159 = arith.constant 0 : index
    %237 = vector.load %arg4[%c0_157, %c19, %c0_158, %c0_159] : memref<1x49x8x8xf32, #tpu.memory_space<vmem>>, vector<1x1x8x8xf32>
    %238 = vector.shape_cast %237 : vector<1x1x8x8xf32> to vector<8x8xf32>
    %239 = vector.shape_cast %236 : vector<8x8xf32> to vector<1x1x8x8xf32>
    tpu.vector_store %arg4[%c0_157, %c19, %c0_158, %c0_159], %239 {strides = array<i32>} : memref<1x49x8x8xf32, #tpu.memory_space<vmem>>, vector<1x1x8x8xf32>,
    %240 = vector.extract_strided_slice %221 {offsets = [3, 0, 0], sizes = [8, 8, 8], strides = [1, 1, 1]} : vector<14x8x8xf32> to vector<8x8x8xf32>
    %241 = arith.mulf %3, %240 : vector<8x8x8xf32>
    %cst_160 = arith.constant dense<0.000000e+00> : vector<8x8xf32>
    %242 = vector.multi_reduction <add>, %241, %cst_160 [1] : vector<8x8x8xf32> to vector<8x8xf32>
    %c0_161 = arith.constant 0 : index
    %c26 = arith.constant 26 : index
    %c0_162 = arith.constant 0 : index
    %c0_163 = arith.constant 0 : index
    %243 = vector.load %arg4[%c0_161, %c26, %c0_162, %c0_163] : memref<1x49x8x8xf32, #tpu.memory_space<vmem>>, vector<1x1x8x8xf32>
    %244 = vector.shape_cast %243 : vector<1x1x8x8xf32> to vector<8x8xf32>
    %245 = vector.shape_cast %242 : vector<8x8xf32> to vector<1x1x8x8xf32>
    tpu.vector_store %arg4[%c0_161, %c26, %c0_162, %c0_163], %245 {strides = array<i32>} : memref<1x49x8x8xf32, #tpu.memory_space<vmem>>, vector<1x1x8x8xf32>,
    %246 = vector.extract_strided_slice %221 {offsets = [4, 0, 0], sizes = [8, 8, 8], strides = [1, 1, 1]} : vector<14x8x8xf32> to vector<8x8x8xf32>
    %247 = arith.mulf %3, %246 : vector<8x8x8xf32>
    %cst_164 = arith.constant dense<0.000000e+00> : vector<8x8xf32>
    %248 = vector.multi_reduction <add>, %247, %cst_164 [1] : vector<8x8x8xf32> to vector<8x8xf32>
    %c0_165 = arith.constant 0 : index
    %c33 = arith.constant 33 : index
    %c0_166 = arith.constant 0 : index
    %c0_167 = arith.constant 0 : index
    %249 = vector.load %arg4[%c0_165, %c33, %c0_166, %c0_167] : memref<1x49x8x8xf32, #tpu.memory_space<vmem>>, vector<1x1x8x8xf32>
    %250 = vector.shape_cast %249 : vector<1x1x8x8xf32> to vector<8x8xf32>
    %251 = vector.shape_cast %248 : vector<8x8xf32> to vector<1x1x8x8xf32>
    tpu.vector_store %arg4[%c0_165, %c33, %c0_166, %c0_167], %251 {strides = array<i32>} : memref<1x49x8x8xf32, #tpu.memory_space<vmem>>, vector<1x1x8x8xf32>,
    %252 = vector.extract_strided_slice %221 {offsets = [5, 0, 0], sizes = [8, 8, 8], strides = [1, 1, 1]} : vector<14x8x8xf32> to vector<8x8x8xf32>
    %253 = arith.mulf %3, %252 : vector<8x8x8xf32>
    %cst_168 = arith.constant dense<0.000000e+00> : vector<8x8xf32>
    %254 = vector.multi_reduction <add>, %253, %cst_168 [1] : vector<8x8x8xf32> to vector<8x8xf32>
    %c0_169 = arith.constant 0 : index
    %c40 = arith.constant 40 : index
    %c0_170 = arith.constant 0 : index
    %c0_171 = arith.constant 0 : index
    %255 = vector.load %arg4[%c0_169, %c40, %c0_170, %c0_171] : memref<1x49x8x8xf32, #tpu.memory_space<vmem>>, vector<1x1x8x8xf32>
    %256 = vector.shape_cast %255 : vector<1x1x8x8xf32> to vector<8x8xf32>
    %257 = vector.shape_cast %254 : vector<8x8xf32> to vector<1x1x8x8xf32>
    tpu.vector_store %arg4[%c0_169, %c40, %c0_170, %c0_171], %257 {strides = array<i32>} : memref<1x49x8x8xf32, #tpu.memory_space<vmem>>, vector<1x1x8x8xf32>,
    %258 = vector.extract_strided_slice %221 {offsets = [6, 0, 0], sizes = [8, 8, 8], strides = [1, 1, 1]} : vector<14x8x8xf32> to vector<8x8x8xf32>
    %259 = arith.mulf %3, %258 : vector<8x8x8xf32>
    %cst_172 = arith.constant dense<0.000000e+00> : vector<8x8xf32>
    %260 = vector.multi_reduction <add>, %259, %cst_172 [1] : vector<8x8x8xf32> to vector<8x8xf32>
    %c0_173 = arith.constant 0 : index
    %c47 = arith.constant 47 : index
    %c0_174 = arith.constant 0 : index
    %c0_175 = arith.constant 0 : index
    %261 = vector.load %arg4[%c0_173, %c47, %c0_174, %c0_175] : memref<1x49x8x8xf32, #tpu.memory_space<vmem>>, vector<1x1x8x8xf32>
    %262 = vector.shape_cast %261 : vector<1x1x8x8xf32> to vector<8x8xf32>
    %263 = vector.shape_cast %260 : vector<8x8xf32> to vector<1x1x8x8xf32>
    tpu.vector_store %arg4[%c0_173, %c47, %c0_174, %c0_175], %263 {strides = array<i32>} : memref<1x49x8x8xf32, #tpu.memory_space<vmem>>, vector<1x1x8x8xf32>,
    %264 = vector.extract_strided_slice %5 {offsets = [0, 0, 6], sizes = [14, 8, 8], strides = [1, 1, 1]} : vector<14x8x14xf32> to vector<14x8x8xf32>
    %265 = vector.extract_strided_slice %264 {offsets = [0, 0, 0], sizes = [8, 8, 8], strides = [1, 1, 1]} : vector<14x8x8xf32> to vector<8x8x8xf32>
    %266 = arith.mulf %3, %265 : vector<8x8x8xf32>
    %cst_176 = arith.constant dense<0.000000e+00> : vector<8x8xf32>
    %267 = vector.multi_reduction <add>, %266, %cst_176 [1] : vector<8x8x8xf32> to vector<8x8xf32>
    %c0_177 = arith.constant 0 : index
    %c6 = arith.constant 6 : index
    %c0_178 = arith.constant 0 : index
    %c0_179 = arith.constant 0 : index
    %268 = vector.load %arg4[%c0_177, %c6, %c0_178, %c0_179] : memref<1x49x8x8xf32, #tpu.memory_space<vmem>>, vector<1x1x8x8xf32>
    %269 = vector.shape_cast %268 : vector<1x1x8x8xf32> to vector<8x8xf32>
    %270 = vector.shape_cast %267 : vector<8x8xf32> to vector<1x1x8x8xf32>
    tpu.vector_store %arg4[%c0_177, %c6, %c0_178, %c0_179], %270 {strides = array<i32>} : memref<1x49x8x8xf32, #tpu.memory_space<vmem>>, vector<1x1x8x8xf32>,
    %271 = vector.extract_strided_slice %264 {offsets = [1, 0, 0], sizes = [8, 8, 8], strides = [1, 1, 1]} : vector<14x8x8xf32> to vector<8x8x8xf32>
    %272 = arith.mulf %3, %271 : vector<8x8x8xf32>
    %cst_180 = arith.constant dense<0.000000e+00> : vector<8x8xf32>
    %273 = vector.multi_reduction <add>, %272, %cst_180 [1] : vector<8x8x8xf32> to vector<8x8xf32>
    %c0_181 = arith.constant 0 : index
    %c13 = arith.constant 13 : index
    %c0_182 = arith.constant 0 : index
    %c0_183 = arith.constant 0 : index
    %274 = vector.load %arg4[%c0_181, %c13, %c0_182, %c0_183] : memref<1x49x8x8xf32, #tpu.memory_space<vmem>>, vector<1x1x8x8xf32>
    %275 = vector.shape_cast %274 : vector<1x1x8x8xf32> to vector<8x8xf32>
    %276 = vector.shape_cast %273 : vector<8x8xf32> to vector<1x1x8x8xf32>
    tpu.vector_store %arg4[%c0_181, %c13, %c0_182, %c0_183], %276 {strides = array<i32>} : memref<1x49x8x8xf32, #tpu.memory_space<vmem>>, vector<1x1x8x8xf32>,
    %277 = vector.extract_strided_slice %264 {offsets = [2, 0, 0], sizes = [8, 8, 8], strides = [1, 1, 1]} : vector<14x8x8xf32> to vector<8x8x8xf32>
    %278 = arith.mulf %3, %277 : vector<8x8x8xf32>
    %cst_184 = arith.constant dense<0.000000e+00> : vector<8x8xf32>
    %279 = vector.multi_reduction <add>, %278, %cst_184 [1] : vector<8x8x8xf32> to vector<8x8xf32>
    %c0_185 = arith.constant 0 : index
    %c20 = arith.constant 20 : index
    %c0_186 = arith.constant 0 : index
    %c0_187 = arith.constant 0 : index
    %280 = vector.load %arg4[%c0_185, %c20, %c0_186, %c0_187] : memref<1x49x8x8xf32, #tpu.memory_space<vmem>>, vector<1x1x8x8xf32>
    %281 = vector.shape_cast %280 : vector<1x1x8x8xf32> to vector<8x8xf32>
    %282 = vector.shape_cast %279 : vector<8x8xf32> to vector<1x1x8x8xf32>
    tpu.vector_store %arg4[%c0_185, %c20, %c0_186, %c0_187], %282 {strides = array<i32>} : memref<1x49x8x8xf32, #tpu.memory_space<vmem>>, vector<1x1x8x8xf32>,
    %283 = vector.extract_strided_slice %264 {offsets = [3, 0, 0], sizes = [8, 8, 8], strides = [1, 1, 1]} : vector<14x8x8xf32> to vector<8x8x8xf32>
    %284 = arith.mulf %3, %283 : vector<8x8x8xf32>
    %cst_188 = arith.constant dense<0.000000e+00> : vector<8x8xf32>
    %285 = vector.multi_reduction <add>, %284, %cst_188 [1] : vector<8x8x8xf32> to vector<8x8xf32>
    %c0_189 = arith.constant 0 : index
    %c27 = arith.constant 27 : index
    %c0_190 = arith.constant 0 : index
    %c0_191 = arith.constant 0 : index
    %286 = vector.load %arg4[%c0_189, %c27, %c0_190, %c0_191] : memref<1x49x8x8xf32, #tpu.memory_space<vmem>>, vector<1x1x8x8xf32>
    %287 = vector.shape_cast %286 : vector<1x1x8x8xf32> to vector<8x8xf32>
    %288 = vector.shape_cast %285 : vector<8x8xf32> to vector<1x1x8x8xf32>
    tpu.vector_store %arg4[%c0_189, %c27, %c0_190, %c0_191], %288 {strides = array<i32>} : memref<1x49x8x8xf32, #tpu.memory_space<vmem>>, vector<1x1x8x8xf32>,
    %289 = vector.extract_strided_slice %264 {offsets = [4, 0, 0], sizes = [8, 8, 8], strides = [1, 1, 1]} : vector<14x8x8xf32> to vector<8x8x8xf32>
    %290 = arith.mulf %3, %289 : vector<8x8x8xf32>
    %cst_192 = arith.constant dense<0.000000e+00> : vector<8x8xf32>
    %291 = vector.multi_reduction <add>, %290, %cst_192 [1] : vector<8x8x8xf32> to vector<8x8xf32>
    %c0_193 = arith.constant 0 : index
    %c34 = arith.constant 34 : index
    %c0_194 = arith.constant 0 : index
    %c0_195 = arith.constant 0 : index
    %292 = vector.load %arg4[%c0_193, %c34, %c0_194, %c0_195] : memref<1x49x8x8xf32, #tpu.memory_space<vmem>>, vector<1x1x8x8xf32>
    %293 = vector.shape_cast %292 : vector<1x1x8x8xf32> to vector<8x8xf32>
    %294 = vector.shape_cast %291 : vector<8x8xf32> to vector<1x1x8x8xf32>
    tpu.vector_store %arg4[%c0_193, %c34, %c0_194, %c0_195], %294 {strides = array<i32>} : memref<1x49x8x8xf32, #tpu.memory_space<vmem>>, vector<1x1x8x8xf32>,
    %295 = vector.extract_strided_slice %264 {offsets = [5, 0, 0], sizes = [8, 8, 8], strides = [1, 1, 1]} : vector<14x8x8xf32> to vector<8x8x8xf32>
    %296 = arith.mulf %3, %295 : vector<8x8x8xf32>
    %cst_196 = arith.constant dense<0.000000e+00> : vector<8x8xf32>
    %297 = vector.multi_reduction <add>, %296, %cst_196 [1] : vector<8x8x8xf32> to vector<8x8xf32>
    %c0_197 = arith.constant 0 : index
    %c41 = arith.constant 41 : index
    %c0_198 = arith.constant 0 : index
    %c0_199 = arith.constant 0 : index
    %298 = vector.load %arg4[%c0_197, %c41, %c0_198, %c0_199] : memref<1x49x8x8xf32, #tpu.memory_space<vmem>>, vector<1x1x8x8xf32>
    %299 = vector.shape_cast %298 : vector<1x1x8x8xf32> to vector<8x8xf32>
    %300 = vector.shape_cast %297 : vector<8x8xf32> to vector<1x1x8x8xf32>
    tpu.vector_store %arg4[%c0_197, %c41, %c0_198, %c0_199], %300 {strides = array<i32>} : memref<1x49x8x8xf32, #tpu.memory_space<vmem>>, vector<1x1x8x8xf32>,
    %301 = vector.extract_strided_slice %264 {offsets = [6, 0, 0], sizes = [8, 8, 8], strides = [1, 1, 1]} : vector<14x8x8xf32> to vector<8x8x8xf32>
    %302 = arith.mulf %3, %301 : vector<8x8x8xf32>
    %cst_200 = arith.constant dense<0.000000e+00> : vector<8x8xf32>
    %303 = vector.multi_reduction <add>, %302, %cst_200 [1] : vector<8x8x8xf32> to vector<8x8xf32>
    %c0_201 = arith.constant 0 : index
    %c48 = arith.constant 48 : index
    %c0_202 = arith.constant 0 : index
    %c0_203 = arith.constant 0 : index
    %304 = vector.load %arg4[%c0_201, %c48, %c0_202, %c0_203] : memref<1x49x8x8xf32, #tpu.memory_space<vmem>>, vector<1x1x8x8xf32>
    %305 = vector.shape_cast %304 : vector<1x1x8x8xf32> to vector<8x8xf32>
    %306 = vector.shape_cast %303 : vector<8x8xf32> to vector<1x1x8x8xf32>
    tpu.vector_store %arg4[%c0_201, %c48, %c0_202, %c0_203], %306 {strides = array<i32>} : memref<1x49x8x8xf32, #tpu.memory_space<vmem>>, vector<1x1x8x8xf32>,
    return
  }
  func.func @transform_0(%arg0: i32, %arg1: i32) -> (i32, i32, i32, i32) {
    %c0_i32 = arith.constant 0 : i32
    %c0_i32_0 = arith.constant 0 : i32
    %c0_i32_1 = arith.constant 0 : i32
    return %arg0, %arg1, %c0_i32, %c0_i32_0 : i32, i32, i32, i32
  }
  func.func @transform_1(%arg0: i32, %arg1: i32) -> (i32, i32, i32, i32) {
    %c1_i32 = arith.constant 1 : i32
    %0 = arith.muli %arg0, %c1_i32 : i32
    %1 = arith.addi %0, %arg1 : i32
    %c0_i32 = arith.constant 0 : i32
    %c0_i32_0 = arith.constant 0 : i32
    %c0_i32_1 = arith.constant 0 : i32
    %c0_i32_2 = arith.constant 0 : i32
    return %1, %c0_i32, %c0_i32_0, %c0_i32_1 : i32, i32, i32, i32
  }
  func.func @transform_2(%arg0: i32, %arg1: i32) -> (i32, i32, i32, i32) {
    %c0_i32 = arith.constant 0 : i32
    %c0_i32_0 = arith.constant 0 : i32
    %c0_i32_1 = arith.constant 0 : i32
    return %arg0, %c0_i32, %arg1, %c0_i32_0 : i32, i32, i32, i32
  }
}

</mosaic_0001>

<bundles_post_ra>
// kernel: tpu_custom_call.1
= control target key start
LH: loop header
LB: loop body
LE: loop exit
PB: predicated region body
PF: predicated region fallthrough
CT: control target
= control target key end

     0   :  { %7 = vsyncpa [#allocation3], 0  ;;  %s7475_s0 = inlined_call_operand.hbm [shape: f32[2,8,8,8], index: 0, kind: input, shape index: {}]   ;;  %s7476_s1 = inlined_call_operand.hbm [shape: f32[2,14,8,14], index: 1, kind: input, shape index: {}]   ;;  %s7477_s2 = inlined_call_operand.vmem [shape: f32[2,49,8,8], index: 2, kind: output, shape index: {}]  }
   0x1   :  { %9 = vsyncpa [#allocation3 + $0x1], 0 }
   0x2   :  { %10 = vsyncpa [#allocation5], 0 }
   0x3   :  { %12 = vsyncpa [#allocation5 + $0x1], 0  ;;  %s4959_s9 = smov 0   ;;  %s4961_s10 = smov 0  }
   0x4   :  { %s4963_s11 = smov 0   ;;  %s4965_s12 = smov 0  }
   0x5   :  { %s4967_s13 = smov 0   ;;  %s4969_s14 = smov 0  }
   0x6 LB: > { %s4670_s15 = sadd.s32 4294967295, %s4932_s14   ;;  %s30_s16 = sadd.s32 1, %s4928_s13  ;;  %s4932_s14 = sphi %s4969_s14, %s18_s14   ;;  %s4928_s13 = sphi %s4967_s13, %s7545_s13   ;;  %s4924_s12 = sphi %s4965_s12, %s7544_s12   ;;  %s4920_s11 = sphi %s4963_s11, %s7543_s11   ;;  %s4916_s10 = sphi %s4961_s10, %s7542_s10   ;;  %s4912_s9 = sphi %s4959_s9, %s7541_s9  }
   0x7   : > { %p32_p0 = scmp.ge.s32.totalorder %s30_s16, 2  ;;  %s39_s17 = sadd.s32 1, %s4920_s11 }
   0x8   : > { %p46_p1 = scmp.ne.s32.totalorder %s4920_s11, %s4916_s10  ;;  %p47_p2 = scmp.eq.s32.totalorder %s4932_s14, 0 }
   0x9   : > { %s7547_s16 = smov (%p32_p0, %s30_s16), 0  ;;  %p52_p4 = scmp.ne.s32.totalorder %s4916_s10, %s4912_s9 }
   0xa   : > { %p4995_p3 = por %p47_p2, %p46_p1  ;;  %s34_s19 = ssub.s32 %s4928_s13, %s7547_s16 }
   0xb   : > { %p53_p5 = scmp.eq.s32.totalorder %s4670_s15, 0  ;;  %p37_p6 = scmp.eq.s32.totalorder %s34_s19, 0 }
   0xc   : > { %p4747_p8 = scmp.lt.s32.totalorder %s4932_s14, 2  ;;  %s5011_s22 = sand.u32 1, %s4920_s11  }
   0xd   : > { %p5002_p7 = por %p53_p5, %p52_p4  ;;  %s4731_s23 = sshll.u32 %s4928_s13, 10 }
   0xe   : > { %s5008_s21 = scalar_select %p37_p6, %s4920_s11, %s39_s17  }
   0xf   : > { %s7480_s20 = scalar_select %p5002_p7, 1, 0 }
  0x10   : > { %s4674_s24 = sshll.u32 %s5011_s22, 6  ;;  %s5018_s27 = scalar_lea.hbm %s7475_s0, %s4731_s23 }
  0x11   : > { %s136_s28 = scalar_lea.vmem [#allocation2], %s4674_s24  ;;  %p5022_p9 = pnand %p4747_p8, %p4995_p3 }
  0x12   : > { %s145_s29 = sshll.u32 %s136_s28, 4  ;;  %s133_s3 = scalar_lea.sflag [#allocation3], %s5011_s22  ;;  %s5026_s29 = int_to_ptr.vmem [resolvable:$true] %s145_s29 }
  0x13   : > { %s4818_s4 = scalar_lea.hbm %s5018_s27, 1024  ;;  %p4820_p11 = pneg %p5022_p9 }
  0x14   : > { %p4819_p10 = scmp.ne.s32.totalorder %s5018_s27, %s4818_s4  ;;  %s4823_s7 = scalar_lea.hbm %s7475_s0, 2048 }
  0x15   : > { %p4824_p0 = scmp.lt.u32.totalorder %s5018_s27, %s7475_s0  ;;  %p4825_p1 = scmp.lt.u32.totalorder %s4823_s7, %s4818_s4 }
  0x16   : > { %p4821_p12 = pnand %p4820_p11, %p4819_p10  ;;  %p4827_p3 = scmp.lt.u32.totalorder %s4818_s4, %s5018_s27 }
  0x17   : > { %p4826_p2 = por %p4825_p1, %p4824_p0 }
  0x18   : > { %p4822_p13 = pneg %p4821_p12 }
  0x19   : > { %p4828_p4 = por %p4827_p3, %p4826_p2 }
  0x1b   : > { %p4829_p5 = pnand %p4828_p4, %p4822_p13 }
  0x1d   : > { %4832 = shalt.err (!%p4829_p5)
}
  0x1e   : > { %s4833_s15 = scalar_lea.vmem %s5026_s29, 1024  ;;  %s4934_s17 = smov [#allocation2]  }
  0x1f   : > { %p4834_p6 = scmp.ne.s32.totalorder %s5026_s29, %s4833_s15  ;;  %s4838_s18 = sshll.u32 %s4934_s17, 4  ;;  %s4839_s18 = int_to_ptr.vmem [resolvable:$false] %s4838_s18 }
  0x20   : > { %s4840_s19 = scalar_lea.vmem %s4839_s18, 2048  ;;  %p4841_p12 = scmp.lt.s32.totalorder %s5026_s29, %s4839_s18 }
  0x21   : > { %p4836_p8 = pnand %p4834_p6, %p4820_p11  ;;  %p4842_p0 = scmp.lt.s32.totalorder %s4840_s19, %s4833_s15 }
  0x23   : > { %p4837_p10 = pneg %p4836_p8  ;;  %p4843_p1 = por %p4842_p0, %p4841_p12 }
  0x25   : > { %p4844_p2 = pnand %p4843_p1, %p4837_p10 }
  0x27   : > { %4847 = shalt.err (!%p4844_p2)
}
  0x28   : > { %s4935_s23 = smov 128   ;;  %s4936_s24 = smov 8  }
  0x29   : > { %4743 = dma.hbm_to_vmem [thread:$0]  (!%p5022_p9), %s5018_s27, 1024, %s5026_s29, %s133_s3, %s4935_s23, %s4935_s23, %s4936_s24  }
  0x2a   : > { %p4678_p13 = scmp.ge.s32.totalorder %s4932_s14, 1  ;;  %p175_p3 = scmp.lt.s32.totalorder %s4932_s14, 3 }
  0x2b   : > { %s4732_s25 = smul.u32 112, %s5011_s22  ;;  %s156_s27 = scalar_lea.sflag [#allocation5], %s5011_s22 }
  0x2c   : > { %p5062_p4 = pnand %p4678_p13, %p175_p3  ;;  %s4733_s28 = smul.u32 1792, %s4928_s13 }
  0x2d   : > { %s159_s7 = scalar_lea.vmem [#allocation4], %s4732_s25  ;;  %s4853_s15 = scalar_lea.hbm %s7476_s1, 3584 }
  0x2e   : > { %s5070_s6 = scalar_lea.hbm %s7476_s1, %s4733_s28  ;;  %s167_s8 = sshll.u32 %s159_s7, 4  ;;  %s5072_s8 = int_to_ptr.vmem [resolvable:$true] %s167_s8 }
  0x2f   : > { %s4848_s29 = scalar_lea.hbm %s5070_s6, 1792  ;;  %p4854_p10 = scmp.lt.u32.totalorder %s5070_s6, %s7476_s1 }
  0x30   : > { %p4849_p5 = scmp.ne.s32.totalorder %s5070_s6, %s4848_s29  ;;  %p4855_p12 = scmp.lt.u32.totalorder %s4853_s15, %s4848_s29 }
  0x31   : > { %p4857_p1 = scmp.lt.u32.totalorder %s4848_s29, %s5070_s6 }
  0x32   : > { %p4851_p6 = pnand %p4849_p5, %p4820_p11  ;;  %p4856_p0 = por %p4855_p12, %p4854_p10 }
  0x34   : > { %p4852_p8 = pneg %p4851_p6  ;;  %p4858_p2 = por %p4857_p1, %p4856_p0 }
  0x36   : > { %p4859_p13 = pnand %p4858_p2, %p4852_p8 }
  0x38   : > { %4862 = shalt.err (!%p4859_p13)
}
  0x39   : > { %s4863_s19 = scalar_lea.vmem %s5072_s8, 1792  ;;  %s4937_s25 = smov [#allocation4]  }
  0x3a   : > { %p4864_p3 = scmp.ne.s32.totalorder %s5072_s8, %s4863_s19  ;;  %s4868_s28 = sshll.u32 %s4937_s25, 4  ;;  %s4869_s28 = int_to_ptr.vmem [resolvable:$false] %s4868_s28 }
  0x3b   : > { %s4870_s4 = scalar_lea.vmem %s4869_s28, 3584  ;;  %p4871_p7 = scmp.lt.s32.totalorder %s5072_s8, %s4869_s28 }
  0x3c   : > { %p4866_p5 = pnand %p4864_p3, %p4820_p11  ;;  %p4872_p10 = scmp.lt.s32.totalorder %s4870_s4, %s4863_s19 }
  0x3e   : > { %p4867_p6 = pneg %p4866_p5  ;;  %p4873_p12 = por %p4872_p10, %p4871_p7 }
  0x40   : > { %p4874_p0 = pnand %p4873_p12, %p4867_p6 }
  0x42   : > { %4877 = shalt.err (!%p4874_p0)
}
  0x43   : > { %4746 = dma.hbm_to_vmem [thread:$0]  (!%p5022_p9), %s5070_s6, 1792, %s5072_s8, %s156_s27, %s4935_s23, %s4935_s23, %s4936_s24  }
  0x44   : > { %179 = sbr.rel (%p5062_p4) target bundleno = 963 (0x3c3), region = 28 }
  0x4b   : > { %s181_s5 = sand.u32 1, %s4916_s10   ;;  %p7483_p7 = scmp.ne.s32.totalorder %s7480_s20, 0 }
  0x4c   : > { %s4679_s7 = sshll.u32 %s181_s5, 6  ;;  %s182_s29 = scalar_lea.sflag [#allocation3], %s181_s5 }
  0x4d   : > { %s5106_s3 = scalar_lea.vmem [#allocation2], %s4679_s7 }
  0x4e   : > { %4903 = dma.done.wait (%p7483_p7), %s182_s29, 1024  }
  0x4f   : > { %4905 = vsyncadd (%p7483_p7), %s182_s29, 4294966272  ;;  %s4734_s22 = smul.u32 112, %s181_s5  ;;  %s191_s30 = scalar_lea.sflag [#allocation5], %s181_s5 }
  0x51   : > { %s5112_s9 = scalar_lea.vmem [#allocation4], %s4734_s22 }
  0x52   : > { %4907 = dma.done.wait (%p7483_p7), %s191_s30, 1792  }
  0x53   : > { %4909 = vsyncadd (%p7483_p7), %s191_s30, 4294965504  ;;  %v5119_v0 = vld [vmem:[%s5112_s9 + $0x10] sm:$0xff]  ;;  %v234_v2 = vld [vmem:[%s5106_s3 + $0x8] sm:$0xff]  ;;  %s4938_s23 = smov 127   ;;  %vm271_vm0 = vcmask 64512   ;;  %vm336_vm1 = vcmask 1041409  }
  0x54   : > { %v233_v1 = vld [vmem:[%s5106_s3] sm:$0xff]  ;;  %856 = vrot.lane.b32.xlu1 %v5119_v0, %s4938_s23  ;;  %v235_v3 = vld [vmem:[%s5106_s3 + $0x10] sm:$0xff]  ;;  %v5128_v5 = vmul.f32 0.125, %v234_v2  ;;  %v5138_v8 = vld [vmem:[%s5112_s9 + $0x18] sm:$0xff]  ;;  %vm338_vm2 = vcmask 1042434   ;;  %vm340_vm3 = vcmask 1043459  }
  0x55   : > { %v5126_v4 = vmul.f32 0.125, %v233_v1  ;;  %v5131_v6 = vld [vmem:[%s5112_s9] sm:$0xff]  ;;  %v5133_v7 = vmul.f32 0.125, %v235_v3  ;;  %v236_v9 = vld [vmem:[%s5106_s3 + $0x18] sm:$0xff]  ;;  %v5188_v50 = vld [vmem:[%s5112_s9 + $0x30] sm:$0xff]  ;;  %s4939_s20 = smov 126  }
  0x56   : > { %852 = vrot.lane.b32.xlu0 %v5131_v6, %s4938_s23  ;;  %v353_v10 = vmul.f32 %v5119_v0, %v5128_v5  ;;  %v5147_v13 = vmul.f32 0.125, %v236_v9  ;;  %v5150_v14 = vld [vmem:[%s5112_s9 + $0x8] sm:$0xff]  ;;  %v435_v17 = vmul.f32 %v5138_v8, %v5128_v5  ;;  %v5177_v32 = vld [vmem:[%s5112_s9 + $0x20] sm:$0xff]  ;;  %v5185_v45 = vld [vmem:[%s5112_s9 + $0x38] sm:$0xff]  ;;  %vm342_vm4 = vcmask 1044484   ;;  %p225_p9 = scmp.lt.s32.totalorder %s4924_s12, 1 }
  0x57   : > { %v434_v11 = vmul.f32 %v5119_v0, %v5126_v4  ;;  %v263_v12 = vmul.f32 %v5131_v6, %v5126_v4  ;;  %v265_v15 = vmul.f32 %v5119_v0, %v5133_v7  ;;  %v354_v16 = vmul.f32 %v5138_v8, %v5133_v7  ;;  %v5171_v27 = vld [vmem:[%s5112_s9 + $0x28] sm:$0xff]  ;;  %s4940_s24 = smov 125   ;;  %s4941_s27 = smov 124  }
  0x58   : > { %v516_v18 = vmul.f32 %v5138_v8, %v5126_v4  ;;  %v367_v19 = vsel %vm271_vm0, %v353_v10, 0.0  ;;  %858 = vrot.lane.b32.xlu1 %v5138_v8, %s4938_s23  ;;  %v266_v22 = vmul.f32 %v5138_v8, %v5147_v13  ;;  %v449_v31 = vsel %vm271_vm0, %v435_v17, 0.0  ;;  %v5197_v63 = vld [vmem:[%s5112_s9 + $0x48] sm:$0xff]  ;;  %v237_v10 = vld [vmem:[%s5106_s3 + $0x20] sm:$0xff]  ;;  %s7549_s12 = smov (!%p225_p9, %s4924_s12), 1  ;;  %s4942_s15 = smov 123  }
  0x59   : > { %v442_v20 = vsel %vm271_vm0, %v434_v11, 0.0  ;;  %v272_v21 = vsel %vm271_vm0, %v263_v12, 0.0  ;;  %v286_v23 = vsel %vm271_vm0, %v265_v15, 0.0  ;;  %v368_v24 = vrot.slane %v367_v19, 4  ;;  %v5202_v11 = vld [vmem:[%s5112_s9 + $0x40] sm:$0xff]  ;;  %s4735_s26 = smul.u32 392, %s7549_s12 }
  0x5a   : > { %v443_v25 = vrot.slane %v442_v20, 4  ;;  %v273_v26 = vrot.slane %v272_v21, 4  ;;  %854 = vrot.lane.b32.xlu0 %v5150_v14, %s4938_s23  ;;  %v287_v28 = vrot.slane %v286_v23, 4  ;;  %v293_v29 = vsel %vm271_vm0, %v266_v22, 0.0  ;;  %s4943_s17 = smov 122  }
  0x5b   : > { %v374_v30 = vsel %vm271_vm0, %v354_v16, 0.0  ;;  %v369_v33 = vadd.f32 %v368_v24, %v367_v19  ;;  %v294_v36 = vrot.slane %v293_v29, 4  ;;  %v450_v39 = vrot.slane %v449_v31, 4  ;;  %s5411_s8 = scalar_lea.vmem %s7477_s2, %s4735_s26 }
  0x5c   : > { %v444_v34 = vadd.f32 %v443_v25, %v442_v20  ;;  %v274_v35 = vadd.f32 %v273_v26, %v272_v21  ;;  %v288_v37 = vadd.f32 %v287_v28, %v286_v23  ;;  %v375_v38 = vrot.slane %v374_v30, 4  ;;  %862 = vrot.lane.b32.xlu1 %v5171_v27, %s4938_s23  ;;  %v5216_v28 = vld [vmem:[%s5112_s9 + $0x58] sm:$0xff] }
  0x5d   : > { %v524_v40 = vsel %vm271_vm0, %v516_v18, 0.0  ;;  %v370_v41 = vrot.slane %v369_v33, 2  ;;  %v295_v44 = vadd.f32 %v294_v36, %v293_v29  ;;  %v451_v48 = vadd.f32 %v450_v39, %v449_v31  ;;  %v238_v18 = vld [vmem:[%s5106_s3 + $0x28] sm:$0xff] }
  0x5e   : > { %v445_v42 = vrot.slane %v444_v34, 2  ;;  %v275_v43 = vrot.slane %v274_v35, 2  ;;  %860 = vrot.lane.b32.xlu0 %v5177_v32, %s4938_s23  ;;  %v289_v46 = vrot.slane %v288_v37, 2  ;;  %v376_v47 = vadd.f32 %v375_v38, %v374_v30 }
  0x5f   : > { %v525_v49 = vrot.slane %v524_v40, 4  ;;  %v371_v51 = vadd.f32 %v370_v41, %v369_v33  ;;  %v296_v54 = vrot.slane %v295_v44, 2  ;;  %v452_v56 = vrot.slane %v451_v48, 2 }
  0x60   : > { %v446_v52 = vadd.f32 %v445_v42, %v444_v34  ;;  %v276_v53 = vadd.f32 %v275_v43, %v274_v35  ;;  %v290_v55 = vadd.f32 %v289_v46, %v288_v37  ;;  %v264_v58 = vmul.f32 %v5150_v14, %v5128_v5  ;;  %866 = vrot.lane.b32.xlu1 %v5185_v45, %s4938_s23  ;;  %v5221_v34 = vld [vmem:[%s5112_s9 + $0x50] sm:$0xff] }
  0x61   : > { %v526_v57 = vadd.f32 %v525_v49, %v524_v40  ;;  %v372_v59 = vrot.slane %v371_v51, 1  ;;  %v297_v62 = vadd.f32 %v296_v54, %v295_v44  ;;  %v453_v2 = vadd.f32 %v452_v56, %v451_v48  ;;  %v5241_v48 = vld [vmem:[%s5112_s9 + $0x68] sm:$0xff]  ;;  %v5247_v54 = vld [vmem:[%s5112_s9 + $0x60] sm:$0xff] }
  0x62   : > { %v447_v60 = vrot.slane %v446_v52, 1  ;;  %v277_v61 = vrot.slane %v276_v53, 1  ;;  %864 = vrot.lane.b32.xlu0 %v5188_v50, %s4938_s23  ;;  %v291_v1 = vrot.slane %v290_v55, 1  ;;  %v279_v9 = vsel %vm271_vm0, %v264_v58, 0.0 }
  0x63   : > { %v527_v3 = vrot.slane %v526_v57, 2  ;;  %v5204_v12 = vadd.f32 %v372_v59, %v371_v51  ;;  %v280_v17 = vrot.slane %v279_v9, 4  ;;  %v454_v20 = vrot.slane %v453_v2, 1 }
  0x64   : > { %v448_v15 = vadd.f32 %v447_v60, %v446_v52  ;;  %v278_v16 = vadd.f32 %v277_v61, %v276_v53  ;;  %v292_v19 = vadd.f32 %v291_v1, %v290_v55  ;;  %v298_v22 = vrot.slane %v297_v62, 1  ;;  %1045 = vrot.lane.b32.xlu1 %v5197_v63, %s4938_s23 }
  0x65   : > { %v528_v21 = vadd.f32 %v527_v3, %v526_v57  ;;  %v281_v23 = vadd.f32 %v280_v17, %v279_v9  ;;  %v352_v24 = vmul.f32 %v5150_v14, %v5126_v4  ;;  %v377_v25 = vrot.slane %v376_v47, 2 }
  0x66   : > { %v5211_v26 = vmul.f32 0.125, %v237_v10  ;;  %959 = vrot.lane.b32.xlu0 %v5202_v11, %s4938_s23  ;;  %v455_v29 = vadd.f32 %v454_v20, %v453_v2  ;;  %v299_v31 = vadd.f32 %v298_v22, %v297_v62  ;;  %v5218_v33 = vmul.f32 0.125, %v238_v18 }
  0x67   : > { %v529_v30 = vrot.slane %v528_v21, 1  ;;  %v282_v35 = vrot.slane %v281_v23, 2  ;;  %v360_v36 = vsel %vm271_vm0, %v352_v24, 0.0  ;;  %v378_v37 = vadd.f32 %v377_v25, %v376_v47 }
  0x68   : > { %v356_v38 = vmul.f32 %v5171_v27, %v5211_v26  ;;  %v5227_v39 = vsel %vm336_vm1, %v455_v29, %v448_v15  ;;  %v361_v41 = vrot.slane %v360_v36, 4  ;;  %v268_v42 = vmul.f32 %v5171_v27, %v5218_v33  ;;  %1217 = vrot.lane.b32.xlu1 %v5216_v28, %s4938_s23 }
  0x69   : > { %v5229_v40 = vadd.f32 %v529_v30, %v528_v21  ;;  %v283_v43 = vadd.f32 %v282_v35, %v281_v23  ;;  %v379_v44 = vrot.slane %v378_v37, 1  ;;  %v437_v47 = vmul.f32 %v5171_v27, %v5147_v13 }
  0x6a   : > { %v388_v46 = vsel %vm271_vm0, %v356_v38, 0.0  ;;  %1131 = vrot.lane.b32.xlu0 %v5221_v34, %s4938_s23  ;;  %v362_v49 = vadd.f32 %v361_v41, %v360_v36  ;;  %v307_v51 = vsel %vm271_vm0, %v268_v42, 0.0  ;;  %v518_v53 = vmul.f32 %v5171_v27, %v5133_v7 }
  0x6b   : > { %v389_v52 = vrot.slane %v388_v46, 4  ;;  %v284_v55 = vrot.slane %v283_v43, 1  ;;  %v380_v56 = vadd.f32 %v379_v44, %v378_v37  ;;  %v308_v57 = vrot.slane %v307_v51, 4 }
  0x6c   : > { %v463_v58 = vsel %vm271_vm0, %v437_v47, 0.0  ;;  %v363_v59 = vrot.slane %v362_v49, 2  ;;  %v538_v62 = vsel %vm271_vm0, %v518_v53, 0.0  ;;  %1389 = vrot.lane.b32.xlu1 %v5241_v48, %s4938_s23  ;;  %v599_v9 = vmul.f32 %v5171_v27, %v5128_v5 }
  0x6d   : > { %v390_v60 = vadd.f32 %v389_v52, %v388_v46  ;;  %v464_v61 = vrot.slane %v463_v58, 4  ;;  %v285_v1 = vadd.f32 %v284_v55, %v283_v43  ;;  %v309_v2 = vadd.f32 %v308_v57, %v307_v51 }
  0x6e   : > { %v539_v3 = vrot.slane %v538_v62, 4  ;;  %1303 = vrot.lane.b32.xlu0 %v5247_v54, %s4938_s23  ;;  %v364_v10 = vadd.f32 %v363_v59, %v362_v49  ;;  %v267_v18 = vmul.f32 %v5177_v32, %v5211_v26  ;;  %v613_v23 = vsel %vm271_vm0, %v599_v9, 0.0  ;;  %v239_v59 = vld [vmem:[%s5106_s3 + $0x30] sm:$0xff] }
  0x6f   : > { %v391_v15 = vrot.slane %v390_v60, 2  ;;  %v465_v17 = vadd.f32 %v464_v61, %v463_v58  ;;  %v337_v20 = vsel %vm336_vm1, %v285_v1, %v278_v16  ;;  %v310_v21 = vrot.slane %v309_v2, 2 }
  0x70   : > { %v540_v22 = vadd.f32 %v539_v3, %v538_v62  ;;  %v339_v24 = vsel %vm338_vm2, %v292_v19, %v337_v20  ;;  %v365_v25 = vrot.slane %v364_v10, 1  ;;  %1476 = vrot.lane.b32.xlu1 %v5150_v14, %s4939_s20  ;;  %v614_v38 = vrot.slane %v613_v23, 4 }
  0x71   : > { %v392_v29 = vadd.f32 %v391_v15, %v390_v60  ;;  %v466_v30 = vrot.slane %v465_v17, 2  ;;  %v5265_v35 = vsel %vm340_vm3, %v299_v31, %v339_v24  ;;  %v311_v36 = vadd.f32 %v310_v21, %v309_v2  ;;  %v240_v60 = vld [vmem:[%s5106_s3 + $0x38] sm:$0xff] }
  0x72   : > { %v541_v37 = vrot.slane %v540_v22, 2  ;;  %1474 = vrot.lane.b32.xlu0 %v5131_v6, %s4939_s20  ;;  %v366_v16 = vadd.f32 %v365_v25, %v364_v10  ;;  %v300_v42 = vsel %vm271_vm0, %v267_v18, 0.0  ;;  %v615_v46 = vadd.f32 %v614_v38, %v613_v23 }
  0x73   : > { %v393_v41 = vrot.slane %v392_v29, 1  ;;  %v467_v19 = vadd.f32 %v466_v30, %v465_v17  ;;  %v312_v43 = vrot.slane %v311_v36, 1  ;;  %v301_v47 = vrot.slane %v300_v42, 4 }
  0x74   : > { %v5270_v44 = vadd.f32 %v541_v37, %v540_v22  ;;  %v424_v31 = vsel %vm336_vm1, %v5204_v12, %v366_v16  ;;  %v355_v51 = vmul.f32 %v5177_v32, %v5147_v13  ;;  %1480 = vrot.lane.b32.xlu1 %v5138_v8, %s4939_s20  ;;  %v616_v57 = vrot.slane %v615_v46, 2 }
  0x75   : > { %v468_v49 = vrot.slane %v467_v19, 1  ;;  %v5276_v52 = vadd.f32 %v393_v41, %v392_v29  ;;  %v5281_v53 = vsel %vm338_vm2, %v380_v56, %v424_v31  ;;  %v302_v58 = vadd.f32 %v301_v47, %v300_v42 }
  0x76   : > { %v543_v55 = vrot.slane %v5270_v44, 1  ;;  %1478 = vrot.lane.b32.xlu0 %v5119_v0, %s4939_s20  ;;  %v313_v12 = vadd.f32 %v312_v43, %v311_v36  ;;  %v381_v61 = vsel %vm271_vm0, %v355_v51, 0.0  ;;  %v436_v62 = vmul.f32 %v5177_v32, %v5133_v7 }
  0x77   : > { %v5291_v1 = vadd.f32 %v468_v49, %v467_v19  ;;  %v617_v56 = vadd.f32 %v616_v57, %v615_v46  ;;  %vm344_vm5 = vcmask 1045509   ;;  %v303_v2 = vrot.slane %v302_v58, 2 }
  0x78   : > { %v382_v3 = vrot.slane %v381_v61, 4  ;;  %v517_v9 = vmul.f32 %v5177_v32, %v5128_v5  ;;  %v456_v10 = vsel %vm271_vm0, %v436_v62, 0.0  ;;  %v598_v15 = vmul.f32 %v5177_v32, %v5126_v4  ;;  %1484 = vrot.lane.b32.xlu1 %v5171_v27, %s4939_s20 }
  0x79   : > { %v5298_v17 = vmul.f32 0.125, %v239_v59  ;;  %v5300_v18 = vmul.f32 0.125, %v240_v60  ;;  %v304_v20 = vadd.f32 %v303_v2, %v302_v58  ;;  %v457_v22 = vrot.slane %v456_v10, 4 }
  0x7a   : > { %v383_v21 = vadd.f32 %v382_v3, %v381_v61  ;;  %v531_v23 = vsel %vm271_vm0, %v517_v9, 0.0  ;;  %1482 = vrot.lane.b32.xlu0 %v5177_v32, %s4939_s20  ;;  %v606_v25 = vsel %vm271_vm0, %v598_v15, 0.0  ;;  %v618_v29 = vrot.slane %v617_v56, 1 }
  0x7b   : > { %v532_v24 = vrot.slane %v531_v23, 4  ;;  %v270_v30 = vmul.f32 %v5185_v45, %v5300_v18  ;;  %v305_v36 = vrot.slane %v304_v20, 1  ;;  %v458_v38 = vadd.f32 %v457_v22, %v456_v10 }
  0x7c   : > { %v384_v37 = vrot.slane %v383_v21, 2  ;;  %v607_v16 = vrot.slane %v606_v25, 4  ;;  %v619_v19 = vadd.f32 %v618_v29, %v617_v56  ;;  %v358_v43 = vmul.f32 %v5185_v45, %v5298_v17  ;;  %1488 = vrot.lane.b32.xlu1 %v5185_v45, %s4939_s20 }
  0x7d   : > { %v533_v41 = vadd.f32 %v532_v24, %v531_v23  ;;  %v321_v42 = vsel %vm271_vm0, %v270_v30, 0.0  ;;  %v306_v46 = vadd.f32 %v305_v36, %v304_v20  ;;  %v459_v31 = vrot.slane %v458_v38, 2 }
  0x7e   : > { %v385_v47 = vadd.f32 %v384_v37, %v383_v21  ;;  %v608_v49 = vadd.f32 %v607_v16, %v606_v25  ;;  %1486 = vrot.lane.b32.xlu0 %v5188_v50, %s4939_s20  ;;  %v322_v57 = vrot.slane %v321_v42, 4  ;;  %v402_v58 = vsel %vm271_vm0, %v358_v43, 0.0 }
  0x7f   : > { %v534_v51 = vrot.slane %v533_v41, 2  ;;  %v439_v59 = vmul.f32 %v5185_v45, %v5218_v33  ;;  %v343_v60 = vsel %vm342_vm4, %v306_v46, %v5265_v35  ;;  %v460_v62 = vadd.f32 %v459_v31, %v458_v38 }
  0x80   : > { %v386_v61 = vrot.slane %v385_v47, 1  ;;  %v609_v56 = vrot.slane %v608_v49, 2  ;;  %v5323_v2 = vsel %vm344_vm5, %v313_v12, %v343_v60  ;;  %v323_v9 = vadd.f32 %v322_v57, %v321_v42  ;;  %1665 = vrot.lane.b32.xlu1 %v5197_v63, %s4939_s20 }
  0x81   : > { %v535_v3 = vadd.f32 %v534_v51, %v533_v41  ;;  %v403_v10 = vrot.slane %v402_v58, 4  ;;  %v461_v20 = vrot.slane %v460_v62, 1  ;;  %v477_v22 = vsel %vm271_vm0, %v439_v59, 0.0 }
  0x82   : > { %v387_v15 = vadd.f32 %v386_v61, %v385_v47  ;;  %v610_v21 = vadd.f32 %v609_v56, %v608_v49  ;;  %1580 = vrot.lane.b32.xlu0 %v5202_v11, %s4939_s20  ;;  %v324_v23 = vrot.slane %v323_v9, 2  ;;  %v478_v25 = vrot.slane %v477_v22, 4 }
  0x83   : > { %v536_v35 = vrot.slane %v535_v3, 1  ;;  %v404_v24 = vadd.f32 %v403_v10, %v402_v58  ;;  %v462_v29 = vadd.f32 %v461_v20, %v460_v62  ;;  %v269_v36 = vmul.f32 %v5188_v50, %v5298_v17 }
  0x84   : > { %v426_v12 = vsel %vm340_vm3, %v387_v15, %v5281_v53  ;;  %v611_v30 = vrot.slane %v610_v21, 1  ;;  %v325_v16 = vadd.f32 %v324_v23, %v323_v9  ;;  %1835 = vrot.lane.b32.xlu1 %v5216_v28, %s4939_s20  ;;  %v479_v43 = vadd.f32 %v478_v25, %v477_v22 }
  0x85   : > { %v5336_v37 = vsel %vm342_vm4, %v5276_v52, %v426_v12  ;;  %v537_v38 = vadd.f32 %v536_v35, %v535_v3  ;;  %v405_v41 = vrot.slane %v404_v24, 2  ;;  %v507_v42 = vsel %vm338_vm2, %v462_v29, %v5227_v39 }
  0x86   : > { %v612_v53 = vadd.f32 %v611_v30, %v610_v21  ;;  %v314_v46 = vsel %vm271_vm0, %v269_v36, 0.0  ;;  %1750 = vrot.lane.b32.xlu0 %v5221_v34, %s4939_s20  ;;  %v5347_v52 = vsel %vm340_vm3, %v5291_v1, %v507_v42  ;;  %v326_v31 = vrot.slane %v325_v16, 1 }
  0x87   : > { %v5351_v47 = vsel %vm336_vm1, %v537_v38, %v5229_v40  ;;  %v406_v49 = vadd.f32 %v405_v41, %v404_v24  ;;  %v480_v39 = vrot.slane %v479_v43, 2  ;;  %v315_v57 = vrot.slane %v314_v46, 4 }
  0x88   : > { %v5354_v51 = vsel %vm336_vm1, %v619_v19, %v612_v53  ;;  %v357_v58 = vmul.f32 %v5188_v50, %v5218_v33  ;;  %v327_v59 = vadd.f32 %v326_v31, %v325_v16  ;;  %v438_v1 = vmul.f32 %v5188_v50, %v5211_v26  ;;  %2005 = vrot.lane.b32.xlu1 %v5241_v48, %s4939_s20 }
  0x89   : > { %v407_v60 = vrot.slane %v406_v49, 1  ;;  %v441_v40 = vmul.f32 %v5197_v63, %v5300_v18  ;;  %v481_v19 = vadd.f32 %v480_v39, %v479_v43  ;;  %v316_v61 = vadd.f32 %v315_v57, %v314_v46 }
  0x8a   : > { %v395_v62 = vsel %vm271_vm0, %v357_v58, 0.0  ;;  %v522_v56 = vmul.f32 %v5197_v63, %v5298_v17  ;;  %1920 = vrot.lane.b32.xlu0 %v5247_v54, %s4939_s20  ;;  %vm346_vm6 = vcmask 1046534   ;;  %v470_v10 = vsel %vm271_vm0, %v438_v1, 0.0 }
  0x8b   : > { %v5370_v3 = vadd.f32 %v407_v60, %v406_v49  ;;  %v396_v9 = vrot.slane %v395_v62, 4  ;;  %v491_v15 = vsel %vm271_vm0, %v441_v40, 0.0  ;;  %v482_v20 = vrot.slane %v481_v19, 1 }
  0x8c   : > { %vm348_vm7 = vcmask 1047559   ;;  %v317_v21 = vrot.slane %v316_v61, 2  ;;  %v471_v22 = vrot.slane %v470_v10, 4  ;;  %v492_v35 = vrot.slane %v491_v15, 4  ;;  %2092 = vrot.lane.b32.xlu1 %v5150_v14, %s4940_s24 }
  0x8d   : > { %v397_v23 = vadd.f32 %v396_v9, %v395_v62  ;;  %v566_v24 = vsel %vm271_vm0, %v522_v56, 0.0  ;;  %v603_v25 = vmul.f32 %v5197_v63, %v5218_v33  ;;  %v5384_v12 = vmul.f32 %v5197_v63, %v5211_v26 }
  0x8e   : > { %v483_v29 = vadd.f32 %v482_v20, %v481_v19  ;;  %v318_v30 = vadd.f32 %v317_v21, %v316_v61  ;;  %v472_v36 = vadd.f32 %v471_v22, %v470_v10  ;;  %v493_v38 = vadd.f32 %v492_v35, %v491_v15  ;;  %2090 = vrot.lane.b32.xlu0 %v5131_v6, %s4940_s24 }
  0x8f   : > { %v398_v16 = vrot.slane %v397_v23, 2  ;;  %v567_v41 = vrot.slane %v566_v24, 4  ;;  %v641_v42 = vsel %vm271_vm0, %v603_v25, 0.0  ;;  %v5393_v53 = vmul.f32 %v5197_v63, %v5147_v13 }
  0x90   : > { %v319_v43 = vrot.slane %v318_v30, 1  ;;  %v473_v46 = vrot.slane %v472_v36, 2  ;;  %v494_v31 = vrot.slane %v493_v38, 2  ;;  %v642_v49 = vrot.slane %v641_v42, 4  ;;  %2096 = vrot.lane.b32.xlu1 %v5138_v8, %s4940_s24 }
  0x91   : > { %v399_v39 = vadd.f32 %v398_v16, %v397_v23  ;;  %v568_v57 = vadd.f32 %v567_v41, %v566_v24  ;;  %v359_v58 = vmul.f32 %v5202_v11, %v5300_v18  ;;  %v440_v60 = vmul.f32 %v5202_v11, %v5298_v17 }
  0x92   : > { %v320_v1 = vadd.f32 %v319_v43, %v318_v30  ;;  %v474_v40 = vadd.f32 %v473_v46, %v472_v36  ;;  %v495_v19 = vadd.f32 %v494_v31, %v493_v38  ;;  %v643_v61 = vadd.f32 %v642_v49, %v641_v42  ;;  %2094 = vrot.lane.b32.xlu0 %v5119_v0, %s4940_s24 }
  0x93   : > { %v400_v62 = vrot.slane %v399_v39, 1  ;;  %v569_v56 = vrot.slane %v568_v57, 2  ;;  %v409_v9 = vsel %vm271_vm0, %v359_v58, 0.0  ;;  %v484_v10 = vsel %vm271_vm0, %v440_v60, 0.0 }
  0x94   : > { %v347_v15 = vsel %vm346_vm6, %v320_v1, %v5323_v2  ;;  %v475_v20 = vrot.slane %v474_v40, 1  ;;  %v496_v21 = vrot.slane %v495_v19, 1  ;;  %v644_v22 = vrot.slane %v643_v61, 2  ;;  %2100 = vrot.lane.b32.xlu1 %v5171_v27, %s4940_s24 }
  0x95   : > { %v349_v35 = vsel %vm348_vm7, %v327_v59, %v347_v15  ;;  %v401_v23 = vadd.f32 %v400_v62, %v399_v39  ;;  %v570_v24 = vadd.f32 %v569_v56, %v568_v57  ;;  %v410_v25 = vrot.slane %v409_v9, 4 }
  0x96   : > { %351 = vst.msk [vmem:[%s5411_s8] sm:$0xff] %vm271_vm0, %v349_v35  ;;  %v476_v2 = vadd.f32 %v475_v20, %v474_v40  ;;  %v497_v30 = vadd.f32 %v496_v21, %v495_v19  ;;  %v645_v36 = vadd.f32 %v644_v22, %v643_v61  ;;  %v485_v38 = vrot.slane %v484_v10, 4  ;;  %2098 = vrot.lane.b32.xlu0 %v5177_v32, %s4940_s24 }
  0x97   : > { %v428_v16 = vsel %vm344_vm5, %v401_v23, %v5336_v37  ;;  %v571_v41 = vrot.slane %v570_v24, 1  ;;  %v411_v59 = vadd.f32 %v410_v25, %v409_v9  ;;  %v521_v42 = vmul.f32 %v5202_v11, %v5218_v33 }
  0x98   : > { %v429_v43 = vsel %vm346_vm6, %v5370_v3, %v428_v16  ;;  %v509_v46 = vsel %vm342_vm4, %v476_v2, %v5347_v52  ;;  %v646_v31 = vrot.slane %v645_v36, 1  ;;  %v486_v49 = vadd.f32 %v485_v38, %v484_v10  ;;  %2104 = vrot.lane.b32.xlu1 %v5185_v45, %s4940_s24 }
  0x99   : > { %v510_v39 = vsel %vm344_vm5, %v483_v29, %v509_v46  ;;  %v5429_v57 = vadd.f32 %v571_v41, %v570_v24  ;;  %v412_v58 = vrot.slane %v411_v59, 2  ;;  %v559_v37 = vsel %vm271_vm0, %v521_v42, 0.0 }
  0x9a   : > { %v5434_v60 = vadd.f32 %v646_v31, %v645_v36  ;;  %v487_v1 = vrot.slane %v486_v49, 2  ;;  %v560_v40 = vrot.slane %v559_v37, 4  ;;  %v602_v3 = vmul.f32 %v5202_v11, %v5211_v26  ;;  %2102 = vrot.lane.b32.xlu0 %v5188_v50, %s4940_s24 }
  0x9b   : > { %v413_v52 = vadd.f32 %v412_v58, %v411_v59  ;;  %v605_v29 = vmul.f32 %v5216_v28, %v5300_v18  ;;  %v686_v19 = vmul.f32 %v5216_v28, %v5298_v17  ;;  %v767_v61 = vmul.f32 %v5216_v28, %v5218_v33 }
  0x9c   : > { %v488_v62 = vadd.f32 %v487_v1, %v486_v49  ;;  %v5447_v56 = vsel %vm271_vm0, %v602_v3, 0.0  ;;  %v519_v9 = vmul.f32 %v5188_v50, %v5147_v13  ;;  %v520_v10 = vmul.f32 %v5185_v45, %v5211_v26  ;;  %2281 = vrot.lane.b32.xlu1 %v5197_v63, %s4940_s24 }
  0x9d   : > { %v414_v15 = vrot.slane %v413_v52, 1  ;;  %v635_v20 = vrot.slane %v5447_v56, 4  ;;  %v655_v21 = vsel %vm271_vm0, %v605_v29, 0.0  ;;  %v730_v22 = vsel %vm271_vm0, %v686_v19, 0.0 }
  0x9e   : > { %v489_v35 = vrot.slane %v488_v62, 1  ;;  %v656_v23 = vrot.slane %v655_v21, 4  ;;  %v731_v24 = vrot.slane %v730_v22, 4  ;;  %v805_v25 = vsel %vm271_vm0, %v767_v61, 0.0  ;;  %2196 = vrot.lane.b32.xlu0 %v5202_v11, %s4940_s24 }
  0x9f   : > { %v415_v2 = vadd.f32 %v414_v15, %v413_v52  ;;  %v806_v36 = vrot.slane %v805_v25, 4  ;;  %v523_v38 = vmul.f32 %v5221_v34, %v5300_v18  ;;  %v544_v16 = vadd.f32 %v543_v55, %v5270_v44 }
  0xa0   : > { %v490_v41 = vadd.f32 %v489_v35, %v488_v62  ;;  %v657_v63 = vadd.f32 %v656_v23, %v655_v21  ;;  %v732_v59 = vadd.f32 %v731_v24, %v730_v22  ;;  %v545_v42 = vsel %vm271_vm0, %v519_v9, 0.0  ;;  %2451 = vrot.lane.b32.xlu1 %v5216_v28, %s4940_s24 }
  0xa1   : > { %v430_v46 = vsel %vm348_vm7, %v415_v2, %v429_v43  ;;  %v807_v31 = vadd.f32 %v806_v36, %v805_v25  ;;  %v546_v49 = vrot.slane %v545_v42, 4  ;;  %v552_v58 = vsel %vm271_vm0, %v520_v10, 0.0 }
  0xa2   : > { %4681 = vst.msk [vmem:[%s5411_s8 + $0x38] sm:$0xff] %vm271_vm0, %v430_v46  ;;  %v511_v1 = vsel %vm346_vm6, %v490_v41, %v510_v39  ;;  %v658_v44 = vrot.slane %v657_v63, 2  ;;  %v733_v55 = vrot.slane %v732_v59, 2  ;;  %v553_v3 = vrot.slane %v552_v58, 4  ;;  %2366 = vrot.lane.b32.xlu0 %v5221_v34, %s4940_s24 }
  0xa3   : > { %v512_v52 = vsel %vm348_vm7, %v497_v30, %v511_v1  ;;  %v808_v43 = vrot.slane %v807_v31, 2  ;;  %v547_v29 = vadd.f32 %v546_v49, %v545_v42  ;;  %v561_v19 = vadd.f32 %v560_v40, %v559_v37 }
  0xa4   : > { %4682 = vst.msk [vmem:[%s5411_s8 + $0x70] sm:$0xff] %vm271_vm0, %v512_v52  ;;  %v659_v61 = vadd.f32 %v658_v44, %v657_v63  ;;  %v734_v62 = vadd.f32 %v733_v55, %v732_v59  ;;  %v554_v28 = vadd.f32 %v553_v3, %v552_v58  ;;  %v573_v9 = vsel %vm271_vm0, %v523_v38, 0.0  ;;  %2621 = vrot.lane.b32.xlu1 %v5241_v48, %s4940_s24 }
  0xa5   : > { %v809_v10 = vadd.f32 %v808_v43, %v807_v31  ;;  %v548_v39 = vrot.slane %v547_v29, 2  ;;  %v562_v15 = vrot.slane %v561_v19, 2  ;;  %v574_v21 = vrot.slane %v573_v9, 4 }
  0xa6   : > { %v660_v22 = vrot.slane %v659_v61, 1  ;;  %v735_v35 = vrot.slane %v734_v62, 1  ;;  %v555_v30 = vrot.slane %v554_v28, 2  ;;  %v589_v37 = vsel %vm338_vm2, %v544_v16, %v5351_v47  ;;  %2536 = vrot.lane.b32.xlu0 %v5247_v54, %s4940_s24 }
  0xa7   : > { %v810_v40 = vrot.slane %v809_v10, 1  ;;  %v549_v23 = vadd.f32 %v548_v39, %v547_v29  ;;  %v563_v24 = vadd.f32 %v562_v15, %v561_v19  ;;  %v575_v25 = vadd.f32 %v574_v21, %v573_v9 }
  0xa8   : > { %v5486_v2 = vadd.f32 %v660_v22, %v659_v61  ;;  %v5488_v36 = vadd.f32 %v735_v35, %v734_v62  ;;  %v556_v38 = vadd.f32 %v555_v30, %v554_v28  ;;  %v600_v41 = vmul.f32 %v5188_v50, %v5133_v7  ;;  %2708 = vrot.lane.b32.xlu1 %v5150_v14, %s4941_s27 }
  0xa9   : > { %v5492_v63 = vadd.f32 %v810_v40, %v809_v10  ;;  %v550_v59 = vrot.slane %v549_v23, 1  ;;  %v564_v42 = vrot.slane %v563_v24, 1  ;;  %v576_v47 = vrot.slane %v575_v25, 2 }
  0xaa   : > { %v557_v16 = vrot.slane %v556_v38, 1  ;;  %v601_v46 = vmul.f32 %v5185_v45, %v5147_v13  ;;  %v604_v31 = vmul.f32 %v5221_v34, %v5298_v17  ;;  %v620_v49 = vsel %vm271_vm0, %v600_v41, 0.0  ;;  %2706 = vrot.lane.b32.xlu0 %v5131_v6, %s4941_s27 }
  0xab   : > { %v551_v58 = vadd.f32 %v550_v59, %v549_v23  ;;  %v565_v1 = vadd.f32 %v564_v42, %v563_v24  ;;  %v577_v44 = vadd.f32 %v576_v47, %v575_v25  ;;  %v621_v55 = vrot.slane %v620_v49, 4 }
  0xac   : > { %v558_v3 = vadd.f32 %v557_v16, %v556_v38  ;;  %v627_v52 = vsel %vm271_vm0, %v601_v46, 0.0  ;;  %v636_v43 = vadd.f32 %v635_v20, %v5447_v56  ;;  %v648_v29 = vsel %vm271_vm0, %v604_v31, 0.0  ;;  %2712 = vrot.lane.b32.xlu1 %v5138_v8, %s4941_s27 }
  0xad   : > { %v578_v19 = vrot.slane %v577_v44, 1  ;;  %v590_v61 = vsel %vm340_vm3, %v551_v58, %v589_v37  ;;  %v622_v62 = vadd.f32 %v621_v55, %v620_v49  ;;  %v628_v28 = vrot.slane %v627_v52, 4 }
  0xae   : > { %v591_v9 = vsel %vm342_vm4, %v558_v3, %v590_v61  ;;  %v637_v10 = vrot.slane %v636_v43, 2  ;;  %v649_v39 = vrot.slane %v648_v29, 4  ;;  %v685_v15 = vmul.f32 %v5221_v34, %v5218_v33  ;;  %2710 = vrot.lane.b32.xlu0 %v5119_v0, %s4941_s27 }
  0xaf   : > { %v579_v56 = vadd.f32 %v578_v19, %v577_v44  ;;  %v592_v20 = vsel %vm344_vm5, %v565_v1, %v591_v9  ;;  %v623_v21 = vrot.slane %v622_v62, 2  ;;  %v629_v22 = vadd.f32 %v628_v28, %v627_v52 }
  0xb0   : > { %v593_v35 = vsel %vm346_vm6, %v5429_v57, %v592_v20  ;;  %v638_v30 = vadd.f32 %v637_v10, %v636_v43  ;;  %v650_v37 = vadd.f32 %v649_v39, %v648_v29  ;;  %v723_v40 = vsel %vm271_vm0, %v685_v15, 0.0  ;;  %2716 = vrot.lane.b32.xlu1 %v5171_v27, %s4941_s27 }
  0xb1   : > { %v594_v23 = vsel %vm348_vm7, %v579_v56, %v593_v35  ;;  %v624_v24 = vadd.f32 %v623_v21, %v622_v62  ;;  %v630_v25 = vrot.slane %v629_v22, 2  ;;  %v724_v38 = vrot.slane %v723_v40, 4 }
  0xb2   : > { %4683 = vst.msk [vmem:[%s5411_s8 + $0xa8] sm:$0xff] %vm271_vm0, %v594_v23  ;;  %v639_v0 = vrot.slane %v638_v30, 1  ;;  %v651_v41 = vrot.slane %v650_v37, 2  ;;  %v766_v59 = vmul.f32 %v5221_v34, %v5211_v26  ;;  %v769_v57 = vmul.f32 %v5241_v48, %v5300_v18  ;;  %2714 = vrot.lane.b32.xlu0 %v5177_v32, %s4941_s27 }
  0xb3   : > { %v625_v42 = vrot.slane %v624_v24, 1  ;;  %v631_v47 = vadd.f32 %v630_v25, %v629_v22  ;;  %v725_v16 = vadd.f32 %v724_v38, %v723_v40  ;;  %v680_v46 = vmul.f32 %v5171_v27, %v5126_v4 }
  0xb4   : > { %v640_v31 = vadd.f32 %v639_v0, %v638_v30  ;;  %v652_v49 = vadd.f32 %v651_v41, %v650_v37  ;;  %v798_v58 = vsel %vm271_vm0, %v766_v59, 0.0  ;;  %v819_v1 = vsel %vm271_vm0, %v769_v57, 0.0  ;;  %2720 = vrot.lane.b32.xlu1 %v5185_v45, %s4941_s27 }
  0xb5   : > { %v626_v44 = vadd.f32 %v625_v42, %v624_v24  ;;  %v632_v34 = vrot.slane %v631_v47, 1  ;;  %v726_v55 = vrot.slane %v725_v16, 2  ;;  %v799_v3 = vrot.slane %v798_v58, 4 }
  0xb6   : > { %v653_v48 = vrot.slane %v652_v49, 1  ;;  %v820_v52 = vrot.slane %v819_v1, 4  ;;  %v681_v43 = vmul.f32 %v5188_v50, %v5128_v5  ;;  %v682_v29 = vmul.f32 %v5185_v45, %v5133_v7  ;;  %2718 = vrot.lane.b32.xlu0 %v5188_v50, %s4941_s27 }
  0xb7   : > { %v633_v19 = vadd.f32 %v632_v34, %v631_v47  ;;  %v671_v61 = vsel %vm338_vm2, %v626_v44, %v5354_v51  ;;  %v5545_v62 = vadd.f32 %v799_v3, %v798_v58  ;;  %v683_v28 = vmul.f32 %v5202_v11, %v5147_v13 }
  0xb8   : > { %v654_v9 = vadd.f32 %v653_v48, %v652_v49  ;;  %v821_v10 = vadd.f32 %v820_v52, %v819_v1  ;;  %v687_v39 = vmul.f32 %v5247_v54, %v5300_v18  ;;  %v688_v15 = vsel %vm271_vm0, %v680_v46, 0.0  ;;  %3324 = vrot.lane.b32.xlu1 %v5150_v14, %s4942_s15  ;;  %v5574_v49 = vld [vmem:[%s5112_s9 + $0x10] sm:$0xff] }
  0xb9   : > { %v672_v56 = vsel %vm340_vm3, %v633_v19, %v671_v61  ;;  %v801_v20 = vrot.slane %v5545_v62, 2  ;;  %v689_v21 = vrot.slane %v688_v15, 4  ;;  %v695_v22 = vsel %vm271_vm0, %v681_v43, 0.0 }
  0xba   : > { %v673_v51 = vsel %vm342_vm4, %v640_v31, %v672_v56  ;;  %v822_v35 = vrot.slane %v821_v10, 2  ;;  %v696_v30 = vrot.slane %v695_v22, 4  ;;  %v702_v37 = vsel %vm271_vm0, %v682_v29, 0.0  ;;  %3322 = vrot.lane.b32.xlu0 %v5131_v6, %s4942_s15 }
  0xbb   : > { %v674_v40 = vsel %vm344_vm5, %v5434_v60, %v673_v51  ;;  %v690_v23 = vadd.f32 %v689_v21, %v688_v15  ;;  %v703_v24 = vrot.slane %v702_v37, 4  ;;  %v709_v25 = vsel %vm271_vm0, %v683_v28, 0.0 }
  0xbc   : > { %v675_v14 = vsel %vm346_vm6, %v654_v9, %v674_v40  ;;  %v823_v38 = vadd.f32 %v822_v35, %v821_v10  ;;  %v697_v0 = vadd.f32 %v696_v30, %v695_v22  ;;  %v710_v41 = vrot.slane %v709_v25, 4  ;;  %3328 = vrot.lane.b32.xlu1 %v5138_v8, %s4942_s15 }
  0xbd   : > { %v676_v59 = vsel %vm348_vm7, %v5486_v2, %v675_v14  ;;  %v691_v57 = vrot.slane %v690_v23, 2  ;;  %v704_v42 = vadd.f32 %v703_v24, %v702_v37  ;;  %v716_v6 = vsel %vm271_vm0, %v5384_v12, 0.0 }
  0xbe   : > { %4684 = vst.msk [vmem:[%s5411_s8 + $0xe0] sm:$0xff] %vm271_vm0, %v676_v59  ;;  %v824_v60 = vrot.slane %v823_v38, 1  ;;  %v698_v47 = vrot.slane %v697_v0, 2  ;;  %v711_v46 = vadd.f32 %v710_v41, %v709_v25  ;;  %v717_v31 = vrot.slane %v716_v6, 4  ;;  %3326 = vrot.lane.b32.xlu0 %v5574_v49, %s4942_s15 }
  0xbf   : > { %v692_v2 = vadd.f32 %v691_v57, %v690_v23  ;;  %v705_v58 = vrot.slane %v704_v42, 2  ;;  %v727_v1 = vadd.f32 %v726_v55, %v725_v16  ;;  %v737_v44 = vsel %vm271_vm0, %v687_v39, 0.0 }
  0xc0   : > { %v5579_v12 = vadd.f32 %v824_v60, %v823_v38  ;;  %v699_v34 = vadd.f32 %v698_v47, %v697_v0  ;;  %v712_v8 = vrot.slane %v711_v46, 2  ;;  %v718_v3 = vadd.f32 %v717_v31, %v716_v6  ;;  %3332 = vrot.lane.b32.xlu1 %v5171_v27, %s4942_s15  ;;  %v4806_v31 = vld [vmem:[%s5112_s9] sm:$0xff] }
  0xc1   : > { %v693_v48 = vrot.slane %v692_v2, 1  ;;  %v706_v52 = vadd.f32 %v705_v58, %v704_v42  ;;  %v728_v43 = vrot.slane %v727_v1, 1  ;;  %v738_v29 = vrot.slane %v737_v44, 4 }
  0xc2   : > { %v700_v19 = vrot.slane %v699_v34, 1  ;;  %v713_v61 = vadd.f32 %v712_v8, %v711_v46  ;;  %v719_v28 = vrot.slane %v718_v3, 2  ;;  %v762_v16 = vmul.f32 %v5188_v50, %v5126_v4  ;;  %3330 = vrot.lane.b32.xlu0 %v5177_v32, %s4942_s15 }
  0xc3   : > { %v694_v55 = vadd.f32 %v693_v48, %v692_v2  ;;  %v707_v9 = vrot.slane %v706_v52, 1  ;;  %v729_v10 = vadd.f32 %v728_v43, %v727_v1  ;;  %v739_v39 = vadd.f32 %v738_v29, %v737_v44  ;;  %v4807_v29 = vld [vmem:[%s5112_s9 + $0x18] sm:$0xff] }
  0xc4   : > { %v701_v15 = vadd.f32 %v700_v19, %v699_v34  ;;  %v714_v56 = vrot.slane %v713_v61, 1  ;;  %v720_v21 = vadd.f32 %v719_v28, %v718_v3  ;;  %v763_v22 = vmul.f32 %v5185_v45, %v5128_v5  ;;  %3336 = vrot.lane.b32.xlu1 %v5185_v45, %s4942_s15 }
  0xc5   : > { %v708_v27 = vadd.f32 %v707_v9, %v706_v52  ;;  %v740_v51 = vrot.slane %v739_v39, 2  ;;  %v764_v35 = vmul.f32 %v5202_v11, %v5133_v7  ;;  %v768_v30 = vmul.f32 %v5247_v54, %v5298_v17 }
  0xc6   : > { %v715_v32 = vadd.f32 %v714_v56, %v713_v61  ;;  %v721_v37 = vrot.slane %v720_v21, 1  ;;  %v752_v40 = vsel %vm336_vm1, %v701_v15, %v694_v55  ;;  %v770_v23 = vsel %vm271_vm0, %v762_v16, 0.0  ;;  %3334 = vrot.lane.b32.xlu0 %v5188_v50, %s4942_s15  ;;  %v4805_v50 = vld [vmem:[%s5112_s9 + $0x8] sm:$0xff]  ;;  %v857_v48 = vpop.permute.xlu1 %856 }
  0xc7   : > { %v741_v24 = vadd.f32 %v740_v51, %v739_v39  ;;  %v753_v25 = vsel %vm338_vm2, %v708_v27, %v752_v40  ;;  %v771_v11 = vrot.slane %v770_v23, 4  ;;  %v777_v14 = vsel %vm271_vm0, %v763_v22, 0.0 }
  0xc8   : > { %v722_v54 = vadd.f32 %v721_v37, %v720_v21  ;;  %v754_v45 = vsel %vm340_vm3, %v715_v32, %v753_v25  ;;  %v778_v38 = vrot.slane %v777_v14, 4  ;;  %v784_v0 = vsel %vm271_vm0, %v764_v35, 0.0  ;;  %3940 = vrot.lane.b32.xlu1 %v4805_v50, %s4943_s17  ;;  %v853_v22 = vpop.permute.xlu0 %852 }
  0xc9   : > { %v742_v41 = vrot.slane %v741_v24, 1  ;;  %v772_v59 = vadd.f32 %v771_v11, %v770_v23  ;;  %v785_v57 = vrot.slane %v784_v0, 4  ;;  %v791_v42 = vsel %vm271_vm0, %v5393_v53, 0.0 }
  0xca   : > { %v755_v6 = vsel %vm342_vm4, %v722_v54, %v754_v45  ;;  %v779_v60 = vadd.f32 %v778_v38, %v777_v14  ;;  %v792_v47 = vrot.slane %v791_v42, 4  ;;  %v802_v46 = vadd.f32 %v801_v20, %v5545_v62  ;;  %3938 = vrot.lane.b32.xlu0 %v4806_v31, %s4943_s17 }
  0xcb   : > { %v743_v2 = vadd.f32 %v742_v41, %v741_v24  ;;  %v756_v53 = vsel %vm344_vm5, %v729_v10, %v755_v6  ;;  %v773_v58 = vrot.slane %v772_v59, 2  ;;  %v786_v1 = vadd.f32 %v785_v57, %v784_v0  ;;  %v4809_v24 = vld [vmem:[%s5112_s9 + $0x20] sm:$0xff] }
  0xcc   : > { %v757_v44 = vsel %vm346_vm6, %v5488_v36, %v756_v53  ;;  %v780_v34 = vrot.slane %v779_v60, 2  ;;  %v793_v8 = vadd.f32 %v792_v47, %v791_v42  ;;  %v803_v3 = vrot.slane %v802_v46, 1  ;;  %3944 = vrot.lane.b32.xlu1 %v4807_v29, %s4943_s17  ;;  %v4811_v53 = vld [vmem:[%s5112_s9 + $0x30] sm:$0xff] }
  0xcd   : > { %v758_v52 = vsel %vm348_vm7, %v743_v2, %v757_v44  ;;  %v774_v62 = vadd.f32 %v773_v58, %v772_v59  ;;  %v787_v20 = vrot.slane %v786_v1, 2  ;;  %v812_v43 = vsel %vm271_vm0, %v768_v30, 0.0  ;;  %v859_v59 = vpop.permute.xlu1 %858 }
  0xce   : > { %4685 = vst.msk [vmem:[%s5411_s8 + $0x118] sm:$0xff] %vm271_vm0, %v758_v52  ;;  %v781_v19 = vadd.f32 %v780_v34, %v779_v60  ;;  %v794_v61 = vrot.slane %v793_v8, 2  ;;  %v804_v28 = vadd.f32 %v803_v3, %v802_v46  ;;  %v813_v36 = vrot.slane %v812_v43, 4  ;;  %3942 = vrot.lane.b32.xlu0 %v5574_v49, %s4943_s17  ;;  %v4808_v49 = vld [vmem:[%s5112_s9 + $0x28] sm:$0xff]  ;;  %v4810_v60 = vld [vmem:[%s5112_s9 + $0x38] sm:$0xff] }
  0xcf   : > { %v775_v16 = vrot.slane %v774_v62, 1  ;;  %v788_v55 = vadd.f32 %v787_v20, %v786_v1  ;;  %v878_v9 = vmul.f32 %v857_v48, %v5133_v7  ;;  %v963_v10 = vmul.f32 %v857_v48, %v5128_v5 }
  0xd0   : > { %v782_v39 = vrot.slane %v781_v19, 1  ;;  %v795_v15 = vadd.f32 %v794_v61, %v793_v8  ;;  %v814_v56 = vadd.f32 %v813_v36, %v812_v43  ;;  %v1048_v21 = vmul.f32 %v857_v48, %v5126_v4  ;;  %3948 = vrot.lane.b32.xlu1 %v4808_v49, %s4943_s17 }
  0xd1   : > { %v776_v27 = vadd.f32 %v775_v16, %v774_v62  ;;  %v789_v51 = vrot.slane %v788_v55, 1  ;;  %v898_v35 = vsel %vm271_vm0, %v878_v9, 0.0  ;;  %v977_v30 = vsel %vm271_vm0, %v963_v10, 0.0 }
  0xd2   : > { %v783_v32 = vadd.f32 %v782_v39, %v781_v19  ;;  %v796_v37 = vrot.slane %v795_v15, 1  ;;  %v815_v40 = vrot.slane %v814_v56, 2  ;;  %v899_v23 = vrot.slane %v898_v35, 4  ;;  %3946 = vrot.lane.b32.xlu0 %v4809_v24, %s4943_s17  ;;  %v4812_v19 = vld [vmem:[%s5112_s9 + $0x40] sm:$0xff]  ;;  %v855_v39 = vpop.permute.xlu0 %854 }
  0xd3   : > { %v790_v25 = vadd.f32 %v789_v51, %v788_v55  ;;  %v978_v11 = vrot.slane %v977_v30, 4  ;;  %v1056_v14 = vsel %vm271_vm0, %v1048_v21, 0.0  ;;  %v876_v54 = vmul.f32 %v853_v22, %v5126_v4 }
  0xd4   : > { %v797_v45 = vadd.f32 %v796_v37, %v795_v15  ;;  %v816_v38 = vadd.f32 %v815_v40, %v814_v56  ;;  %v834_v0 = vsel %vm336_vm1, %v783_v32, %v776_v27  ;;  %v900_v41 = vadd.f32 %v899_v23, %v898_v35  ;;  %3952 = vrot.lane.b32.xlu1 %v4810_v60, %s4943_s17  ;;  %v5667_v40 = vpop.permute.xlu1 %862 }
  0xd5   : > { %v835_v57 = vsel %vm338_vm2, %v790_v25, %v834_v0  ;;  %v979_v42 = vadd.f32 %v978_v11, %v977_v30  ;;  %v1057_v50 = vrot.slane %v1056_v14, 4  ;;  %v884_v6 = vsel %vm271_vm0, %v876_v54, 0.0  ;;  %v4813_v30 = vld [vmem:[%s5112_s9 + $0x48] sm:$0xff] }
  0xd6   : > { %v817_v47 = vrot.slane %v816_v38, 1  ;;  %v836_v46 = vsel %vm340_vm3, %v797_v45, %v835_v57  ;;  %v901_v31 = vrot.slane %v900_v41, 2  ;;  %v885_v2 = vrot.slane %v884_v6, 4  ;;  %3950 = vrot.lane.b32.xlu0 %v4811_v53, %s4943_s17 }
  0xd7   : > { %v837_v58 = vsel %vm342_vm4, %v804_v28, %v836_v46  ;;  %v980_v1 = vrot.slane %v979_v42, 2  ;;  %v1058_v44 = vadd.f32 %v1057_v50, %v1056_v14  ;;  %v879_v34 = vmul.f32 %v859_v59, %v5147_v13 }
  0xd8   : > { %v818_v8 = vadd.f32 %v817_v47, %v816_v38  ;;  %v838_v3 = vsel %vm344_vm5, %v5492_v63, %v837_v58  ;;  %v902_v48 = vadd.f32 %v901_v31, %v900_v41  ;;  %v886_v52 = vadd.f32 %v885_v2, %v884_v6  ;;  %3428 = vrot.lane.b32.xlu1 %v4812_v19, %s4942_s15 }
  0xd9   : > { %v981_v62 = vadd.f32 %v980_v1, %v979_v42  ;;  %v1059_v20 = vrot.slane %v1058_v44, 2  ;;  %v905_v43 = vsel %vm271_vm0, %v879_v34, 0.0  ;;  %v964_v29 = vmul.f32 %v859_v59, %v5133_v7 }
  0xda   : > { %v839_v61 = vsel %vm346_vm6, %v818_v8, %v838_v3  ;;  %v903_v28 = vrot.slane %v902_v48, 1  ;;  %v887_v36 = vrot.slane %v886_v52, 2  ;;  %v906_v16 = vrot.slane %v905_v43, 4  ;;  %2812 = vrot.lane.b32.xlu0 %v4812_v19, %s4941_s27 }
  0xdb   : > { %v840_v63 = vsel %vm348_vm7, %v5579_v12, %v839_v61  ;;  %v982_v55 = vrot.slane %v981_v62, 1  ;;  %v1060_v9 = vadd.f32 %v1059_v20, %v1058_v44  ;;  %v984_v10 = vsel %vm271_vm0, %v964_v29, 0.0 }
  0xdc   : > { %4686 = vst.msk [vmem:[%s5411_s8 + $0x150] sm:$0xff] %vm271_vm0, %v840_v63  ;;  %v888_v15 = vadd.f32 %v887_v36, %v886_v52  ;;  %v907_v56 = vadd.f32 %v906_v16, %v905_v43  ;;  %v985_v21 = vrot.slane %v984_v10, 4  ;;  %v5658_v22 = vadd.f32 %v903_v28, %v902_v48  ;;  %2897 = vrot.lane.b32.xlu1 %v4813_v30, %s4941_s27  ;;  %v4814_v52 = vld [vmem:[%s5112_s9 + $0x50] sm:$0xff] }
  0xdd   : > { %v1061_v27 = vrot.slane %v1060_v9, 1  ;;  %v1049_v51 = vmul.f32 %v859_v59, %v5128_v5  ;;  %v1134_v35 = vmul.f32 %v859_v59, %v5126_v4  ;;  %v5664_v12 = vadd.f32 %v982_v55, %v981_v62 }
  0xde   : > { %v908_v49 = vrot.slane %v907_v56, 2  ;;  %v986_v32 = vadd.f32 %v985_v21, %v984_v10  ;;  %v877_v37 = vmul.f32 %v855_v39, %v5128_v5  ;;  %4044 = vrot.lane.b32.xlu0 %v4812_v19, %s4943_s17  ;;  %v889_v23 = vrot.slane %v888_v15, 1  ;;  %v4815_v21 = vld [vmem:[%s5112_s9 + $0x58] sm:$0xff] }
  0xdf   : > { %v1063_v24 = vsel %vm271_vm0, %v1049_v51, 0.0  ;;  %v1142_v25 = vsel %vm271_vm0, %v1134_v35, 0.0  ;;  %v962_v11 = vmul.f32 %v855_v39, %v5126_v4  ;;  %v5673_v14 = vadd.f32 %v1061_v27, %v1060_v9 }
  0xe0   : > { %v909_v54 = vadd.f32 %v908_v49, %v907_v56  ;;  %v987_v45 = vrot.slane %v986_v32, 2  ;;  %v1064_v38 = vrot.slane %v1063_v24, 4  ;;  %v1143_v0 = vrot.slane %v1142_v25, 4  ;;  %4129 = vrot.lane.b32.xlu1 %v4813_v30, %s4943_s17 }
  0xe1   : > { %v891_v41 = vsel %vm271_vm0, %v877_v37, 0.0  ;;  %v970_v59 = vsel %vm271_vm0, %v962_v11, 0.0  ;;  %v881_v57 = vmul.f32 %v5667_v40, %v5218_v33  ;;  %v966_v2 = vmul.f32 %v5667_v40, %v5211_v26 }
  0xe2   : > { %v910_v42 = vrot.slane %v909_v54, 1  ;;  %v988_v50 = vadd.f32 %v987_v45, %v986_v32  ;;  %v1065_v6 = vadd.f32 %v1064_v38, %v1063_v24  ;;  %v892_v60 = vrot.slane %v891_v41, 4  ;;  %3513 = vrot.lane.b32.xlu0 %v4813_v30, %s4942_s15 }
  0xe3   : > { %v1144_v47 = vadd.f32 %v1143_v0, %v1142_v25  ;;  %v971_v46 = vrot.slane %v970_v59, 4  ;;  %v919_v31 = vsel %vm271_vm0, %v881_v57, 0.0  ;;  %v890_v53 = vadd.f32 %v889_v23, %v888_v15 }
  0xe4   : > { %v911_v58 = vadd.f32 %v910_v42, %v909_v54  ;;  %v1066_v1 = vrot.slane %v1065_v6, 2  ;;  %v893_v44 = vadd.f32 %v892_v60, %v891_v41  ;;  %v920_v3 = vrot.slane %v919_v31, 4  ;;  %3598 = vrot.lane.b32.xlu1 %v4814_v52, %s4942_s15 }
  0xe5   : > { %v1145_v34 = vrot.slane %v1144_v47, 2  ;;  %v972_v8 = vadd.f32 %v971_v46, %v970_v59  ;;  %v998_v48 = vsel %vm271_vm0, %v966_v2, 0.0  ;;  %v989_v62 = vrot.slane %v988_v50, 1 }
  0xe6   : > { %v1067_v20 = vadd.f32 %v1066_v1, %v1065_v6  ;;  %v894_v43 = vrot.slane %v893_v44, 2  ;;  %v999_v29 = vrot.slane %v998_v48, 4  ;;  %2982 = vrot.lane.b32.xlu0 %v4814_v52, %s4941_s27  ;;  %v921_v28 = vadd.f32 %v920_v3, %v919_v31  ;;  %v861_v6 = vpop.permute.xlu0 %860 }
  0xe7   : > { %v1146_v19 = vadd.f32 %v1145_v34, %v1144_v47  ;;  %v973_v61 = vrot.slane %v972_v8, 2  ;;  %v1051_v36 = vmul.f32 %v5667_v40, %v5147_v13  ;;  %v1136_v9 = vmul.f32 %v5667_v40, %v5133_v7 }
  0xe8   : > { %v1068_v16 = vrot.slane %v1067_v20, 1  ;;  %v895_v63 = vadd.f32 %v894_v43, %v893_v44  ;;  %v1000_v55 = vadd.f32 %v999_v29, %v998_v48  ;;  %v922_v15 = vrot.slane %v921_v28, 2  ;;  %3067 = vrot.lane.b32.xlu1 %v4815_v21, %s4941_s27 }
  0xe9   : > { %v1147_v10 = vrot.slane %v1146_v19, 1  ;;  %v974_v39 = vadd.f32 %v973_v61, %v972_v8  ;;  %v1077_v56 = vsel %vm271_vm0, %v1051_v36, 0.0  ;;  %v990_v49 = vadd.f32 %v989_v62, %v988_v50  ;;  %v4816_v8 = vld [vmem:[%s5112_s9 + $0x60] sm:$0xff] }
  0xea   : > { %v1069_v27 = vadd.f32 %v1068_v16, %v1067_v20  ;;  %v896_v51 = vrot.slane %v895_v63, 1  ;;  %v1001_v35 = vrot.slane %v1000_v55, 2  ;;  %v1078_v30 = vrot.slane %v1077_v56, 4  ;;  %4214 = vrot.lane.b32.xlu0 %v4814_v52, %s4943_s17 }
  0xeb   : > { %v975_v32 = vrot.slane %v974_v39, 1  ;;  %v923_v37 = vadd.f32 %v922_v15, %v921_v28  ;;  %v1156_v23 = vsel %vm271_vm0, %v1136_v9, 0.0  ;;  %v5697_v24 = vadd.f32 %v1147_v10, %v1146_v19  ;;  %v4817_v9 = vld [vmem:[%s5112_s9 + $0x68] sm:$0xff] }
  0xec   : > { %v897_v25 = vadd.f32 %v896_v51, %v895_v63  ;;  %v1002_v11 = vadd.f32 %v1001_v35, %v1000_v55  ;;  %v1079_v54 = vadd.f32 %v1078_v30, %v1077_v56  ;;  %v1157_v0 = vrot.slane %v1156_v23, 4  ;;  %4299 = vrot.lane.b32.xlu1 %v4815_v21, %s4943_s17 }
  0xed   : > { %v976_v45 = vadd.f32 %v975_v32, %v974_v39  ;;  %v924_v38 = vrot.slane %v923_v37, 1  ;;  %v1221_v41 = vmul.f32 %v5667_v40, %v5128_v5  ;;  %v5704_v59 = vsel %vm336_vm1, %v1069_v27, %v5673_v14 }
  0xee   : > { %v948_v57 = vsel %vm336_vm1, %v897_v25, %v890_v53  ;;  %v1080_v42 = vrot.slane %v1079_v54, 2  ;;  %v1306_v50 = vmul.f32 %v5667_v40, %v5126_v4  ;;  %3683 = vrot.lane.b32.xlu0 %v4815_v21, %s4942_s15  ;;  %v1003_v46 = vrot.slane %v1002_v11, 1  ;;  %v5739_v21 = vpop.permute.xlu1 %866 }
  0xef   : > { %v949_v60 = vsel %vm338_vm2, %v5658_v22, %v948_v57  ;;  %v1034_v47 = vsel %vm336_vm1, %v5664_v12, %v976_v45  ;;  %v1158_v31 = vadd.f32 %v1157_v0, %v1156_v23  ;;  %v5720_v53 = vadd.f32 %v924_v38, %v923_v37 }
  0xf0   : > { %v5715_v14 = vsel %vm340_vm3, %v911_v58, %v949_v60  ;;  %v5718_v2 = vsel %vm338_vm2, %v990_v49, %v1034_v47  ;;  %v1081_v40 = vadd.f32 %v1080_v42, %v1079_v54  ;;  %v1235_v44 = vsel %vm271_vm0, %v1221_v41, 0.0  ;;  %3768 = vrot.lane.b32.xlu1 %v4816_v8, %s4942_s15 }
  0xf1   : > { %v1159_v1 = vrot.slane %v1158_v31, 2  ;;  %v1314_v34 = vsel %vm271_vm0, %v1306_v50, 0.0  ;;  %v880_v22 = vmul.f32 %v861_v6, %v5211_v26  ;;  %v1236_v3 = vrot.slane %v1235_v44, 4 }
  0xf2   : > { %v1082_v12 = vrot.slane %v1081_v40, 1  ;;  %v1315_v58 = vrot.slane %v1314_v34, 4  ;;  %v965_v48 = vmul.f32 %v861_v6, %v5147_v13  ;;  %3152 = vrot.lane.b32.xlu0 %v4816_v8, %s4941_s27  ;;  %v1050_v20 = vmul.f32 %v861_v6, %v5133_v7 }
  0xf3   : > { %v1160_v52 = vadd.f32 %v1159_v1, %v1158_v31  ;;  %v912_v62 = vsel %vm271_vm0, %v880_v22, 0.0  ;;  %v1135_v43 = vmul.f32 %v861_v6, %v5128_v5  ;;  %v5732_v29 = vadd.f32 %v1003_v46, %v1002_v11 }
  0xf4   : > { %v1237_v19 = vadd.f32 %v1236_v3, %v1235_v44  ;;  %v1316_v61 = vadd.f32 %v1315_v58, %v1314_v34  ;;  %v913_v28 = vrot.slane %v912_v62, 4  ;;  %v991_v16 = vsel %vm271_vm0, %v965_v48, 0.0  ;;  %3237 = vrot.lane.b32.xlu1 %v4817_v9, %s4941_s27 }
  0xf5   : > { %v1161_v36 = vrot.slane %v1160_v52, 1  ;;  %v1070_v63 = vsel %vm271_vm0, %v1050_v20, 0.0  ;;  %v1149_v55 = vsel %vm271_vm0, %v1135_v43, 0.0  ;;  %v992_v56 = vrot.slane %v991_v16, 4 }
  0xf6   : > { %v1238_v10 = vrot.slane %v1237_v19, 2  ;;  %v1317_v39 = vrot.slane %v1316_v61, 2  ;;  %v914_v15 = vadd.f32 %v913_v28, %v912_v62  ;;  %4384 = vrot.lane.b32.xlu0 %v4816_v8, %s4943_s17  ;;  %v1083_v27 = vadd.f32 %v1082_v12, %v1081_v40 }
  0xf7   : > { %v1071_v51 = vrot.slane %v1070_v63, 4  ;;  %v1150_v35 = vrot.slane %v1149_v55, 4  ;;  %v1220_v30 = vmul.f32 %v861_v6, %v5126_v4  ;;  %v993_v23 = vadd.f32 %v992_v56, %v991_v16 }
  0xf8   : > { %v1239_v49 = vadd.f32 %v1238_v10, %v1237_v19  ;;  %v1318_v32 = vadd.f32 %v1317_v39, %v1316_v61  ;;  %v915_v37 = vrot.slane %v914_v15, 2  ;;  %v883_v45 = vmul.f32 %v5739_v21, %v5300_v18  ;;  %4469 = vrot.lane.b32.xlu1 %v4817_v9, %s4943_s17 }
  0xf9   : > { %v1072_v25 = vadd.f32 %v1071_v51, %v1070_v63  ;;  %v1151_v11 = vadd.f32 %v1150_v35, %v1149_v55  ;;  %v1228_v54 = vsel %vm271_vm0, %v1220_v30, 0.0  ;;  %v1162_v38 = vadd.f32 %v1161_v36, %v1160_v52 }
  0xfa   : > { %v1240_v0 = vrot.slane %v1239_v49, 1  ;;  %v916_v41 = vadd.f32 %v915_v37, %v914_v15  ;;  %v994_v57 = vrot.slane %v993_v23, 2  ;;  %3853 = vrot.lane.b32.xlu0 %v4817_v9, %s4942_s15  ;;  %v1229_v6 = vrot.slane %v1228_v54, 4 }
  0xfb   : > { %v1073_v42 = vrot.slane %v1072_v25, 2  ;;  %v1152_v50 = vrot.slane %v1151_v11, 2  ;;  %v933_v60 = vsel %vm271_vm0, %v883_v45, 0.0  ;;  %v1319_v46 = vrot.slane %v1318_v32, 1 }
  0xfc   : > { %v1241_v47 = vadd.f32 %v1240_v0, %v1239_v49  ;;  %v917_v31 = vrot.slane %v916_v41, 1  ;;  %v995_v40 = vadd.f32 %v994_v57, %v993_v23  ;;  %v1230_v34 = vadd.f32 %v1229_v6, %v1228_v54 }
  0xfd   : > { %v1074_v1 = vadd.f32 %v1073_v42, %v1072_v25  ;;  %v1153_v44 = vadd.f32 %v1152_v50, %v1151_v11  ;;  %v934_v22 = vrot.slane %v933_v60, 4  ;;  %v968_v3 = vmul.f32 %v5739_v21, %v5298_v17  ;;  %v5787_v11 = vpop.permute.xlu0 %864 }
  0xfe   : > { %v918_v8 = vadd.f32 %v917_v31, %v916_v41  ;;  %v996_v12 = vrot.slane %v995_v40, 1  ;;  %v1053_v58 = vmul.f32 %v5739_v21, %v5218_v33  ;;  %v1231_v62 = vrot.slane %v1230_v34, 2 }
  0xff   : > { %v1075_v48 = vrot.slane %v1074_v1, 1  ;;  %v1154_v52 = vrot.slane %v1153_v44, 1  ;;  %v935_v20 = vadd.f32 %v934_v22, %v933_v60  ;;  %v1012_v61 = vsel %vm271_vm0, %v968_v3, 0.0 }
 0x100   : > { %v951_v43 = vsel %vm342_vm4, %v918_v8, %v5715_v14  ;;  %v997_v19 = vadd.f32 %v996_v12, %v995_v40  ;;  %v1091_v28 = vsel %vm271_vm0, %v1053_v58, 0.0  ;;  %v5757_v36 = vadd.f32 %v1319_v46, %v1318_v32 }
 0x101   : > { %v1076_v16 = vadd.f32 %v1075_v48, %v1074_v1  ;;  %v1155_v63 = vadd.f32 %v1154_v52, %v1153_v44  ;;  %v1232_v55 = vadd.f32 %v1231_v62, %v1230_v34  ;;  %v936_v10 = vrot.slane %v935_v20, 2 }
 0x102   : > { %v1036_v9 = vsel %vm340_vm3, %v997_v19, %v5718_v2  ;;  %v1013_v39 = vrot.slane %v1012_v61, 4  ;;  %v1092_v15 = vrot.slane %v1091_v28, 4  ;;  %v5763_v56 = vsel %vm344_vm5, %v5720_v53, %v951_v43 }
 0x103   : > { %v1121_v14 = vsel %vm338_vm2, %v1076_v16, %v5704_v59  ;;  %v1206_v51 = vsel %vm336_vm1, %v1155_v63, %v5697_v24  ;;  %v1233_v35 = vrot.slane %v1232_v55, 1  ;;  %v5771_v30 = vsel %vm342_vm4, %v5732_v29, %v1036_v9 }
 0x104   : > { %v5774_v2 = vsel %vm340_vm3, %v1083_v27, %v1121_v14  ;;  %v937_v49 = vadd.f32 %v936_v10, %v935_v20  ;;  %v1014_v32 = vadd.f32 %v1013_v39, %v1012_v61  ;;  %v1093_v23 = vadd.f32 %v1092_v15, %v1091_v28 }
 0x105   : > { %v1234_v37 = vadd.f32 %v1233_v35, %v1232_v55  ;;  %v1138_v53 = vmul.f32 %v5739_v21, %v5211_v26  ;;  %v1223_v59 = vmul.f32 %v5739_v21, %v5147_v13  ;;  %v5781_v24 = vsel %vm338_vm2, %v1162_v38, %v1206_v51 }
 0x106   : > { %v1015_v25 = vrot.slane %v1014_v32, 2  ;;  %v1308_v29 = vmul.f32 %v5739_v21, %v5133_v7  ;;  %v1393_v27 = vmul.f32 %v5739_v21, %v5128_v5  ;;  %v938_v54 = vrot.slane %v937_v49, 1 }
 0x107   : > { %v1094_v45 = vrot.slane %v1093_v23, 2  ;;  %v1170_v0 = vsel %vm271_vm0, %v1138_v53, 0.0  ;;  %v1249_v41 = vsel %vm271_vm0, %v1223_v59, 0.0  ;;  %v5792_v57 = vsel %vm336_vm1, %v1241_v47, %v1234_v37 }
 0x108   : > { %v1016_v38 = vadd.f32 %v1015_v25, %v1014_v32  ;;  %v1171_v42 = vrot.slane %v1170_v0, 4  ;;  %v1250_v50 = vrot.slane %v1249_v41, 4  ;;  %v1328_v60 = vsel %vm271_vm0, %v1308_v29, 0.0 }
 0x109   : > { %v1095_v6 = vadd.f32 %v1094_v45, %v1093_v23  ;;  %v1407_v46 = vsel %vm271_vm0, %v1393_v27, 0.0  ;;  %v882_v21 = vmul.f32 %v5787_v11, %v5298_v17  ;;  %v1329_v44 = vrot.slane %v1328_v60, 4 }
 0x10a   : > { %v1017_v31 = vrot.slane %v1016_v38, 1  ;;  %v1172_v40 = vadd.f32 %v1171_v42, %v1170_v0  ;;  %v1251_v1 = vadd.f32 %v1250_v50, %v1249_v41  ;;  %v5798_v34 = vadd.f32 %v938_v54, %v937_v49 }
 0x10b   : > { %v1408_v22 = vrot.slane %v1407_v46, 4  ;;  %v926_v47 = vsel %vm271_vm0, %v882_v21, 0.0  ;;  %v967_v8 = vmul.f32 %v5787_v11, %v5218_v33  ;;  %v1096_v12 = vrot.slane %v1095_v6, 1  ;;  %v1046_v21 = vpop.permute.xlu1 %1045 }
 0x10c   : > { %v1173_v3 = vrot.slane %v1172_v40, 2  ;;  %v1252_v58 = vrot.slane %v1251_v1, 2  ;;  %v1330_v48 = vadd.f32 %v1329_v44, %v1328_v60  ;;  %v5803_v52 = vadd.f32 %v1017_v31, %v1016_v38 }
 0x10d   : > { %v1409_v62 = vadd.f32 %v1408_v22, %v1407_v46  ;;  %v927_v20 = vrot.slane %v926_v47, 4  ;;  %v1005_v43 = vsel %vm271_vm0, %v967_v8, 0.0  ;;  %v1052_v9 = vmul.f32 %v5787_v11, %v5211_v26 }
 0x10e   : > { %v1174_v19 = vadd.f32 %v1173_v3, %v1172_v40  ;;  %v1253_v61 = vadd.f32 %v1252_v58, %v1251_v1  ;;  %v1331_v28 = vrot.slane %v1330_v48, 2  ;;  %v1006_v16 = vrot.slane %v1005_v43, 4 }
 0x10f   : > { %v1410_v63 = vrot.slane %v1409_v62, 2  ;;  %v928_v55 = vadd.f32 %v927_v20, %v926_v47  ;;  %v1137_v10 = vmul.f32 %v5787_v11, %v5147_v13  ;;  %v1084_v32 = vsel %vm271_vm0, %v1052_v9, 0.0 }
 0x110   : > { %v1175_v39 = vrot.slane %v1174_v19, 1  ;;  %v1254_v15 = vrot.slane %v1253_v61, 1  ;;  %v1332_v14 = vadd.f32 %v1331_v28, %v1330_v48  ;;  %v1007_v51 = vadd.f32 %v1006_v16, %v1005_v43 }
 0x111   : > { %v1411_v35 = vadd.f32 %v1410_v63, %v1409_v62  ;;  %v929_v49 = vrot.slane %v928_v55, 2  ;;  %v1163_v37 = vsel %vm271_vm0, %v1137_v10, 0.0  ;;  %v5812_v23 = vadd.f32 %v1096_v12, %v1095_v6 }
 0x112   : > { %v5814_v53 = vadd.f32 %v1175_v39, %v1174_v19  ;;  %v1333_v59 = vrot.slane %v1332_v14, 1  ;;  %v1008_v25 = vrot.slane %v1007_v51, 2  ;;  %v5816_v29 = vadd.f32 %v1254_v15, %v1253_v61 }
 0x113   : > { %v930_v27 = vadd.f32 %v929_v49, %v928_v55  ;;  %v1085_v54 = vrot.slane %v1084_v32, 4  ;;  %v1164_v45 = vrot.slane %v1163_v37, 4  ;;  %v1412_v0 = vrot.slane %v1411_v35, 1 }
 0x114   : > { %v1009_v41 = vadd.f32 %v1008_v25, %v1007_v51  ;;  %v1222_v38 = vmul.f32 %v5787_v11, %v5133_v7  ;;  %v1307_v42 = vmul.f32 %v5787_v11, %v5128_v5  ;;  %v5822_v50 = vadd.f32 %v1333_v59, %v1332_v14 }
 0x115   : > { %v931_v6 = vrot.slane %v930_v27, 1  ;;  %v1086_v60 = vadd.f32 %v1085_v54, %v1084_v32  ;;  %v1165_v46 = vadd.f32 %v1164_v45, %v1163_v37  ;;  %v1392_v44 = vmul.f32 %v5787_v11, %v5126_v4 }
 0x116   : > { %v1010_v31 = vrot.slane %v1009_v41, 1  ;;  %v1242_v40 = vsel %vm271_vm0, %v1222_v38, 0.0  ;;  %v1321_v1 = vsel %vm271_vm0, %v1307_v42, 0.0  ;;  %v1055_v62 = vmul.f32 %v1046_v21, %v5300_v18 }
 0x117   : > { %v932_v22 = vadd.f32 %v931_v6, %v930_v27  ;;  %v1087_v47 = vrot.slane %v1086_v60, 2  ;;  %v1166_v8 = vrot.slane %v1165_v46, 2  ;;  %v1243_v12 = vrot.slane %v1242_v40, 4 }
 0x118   : > { %v1011_v3 = vadd.f32 %v1010_v31, %v1009_v41  ;;  %v1322_v58 = vrot.slane %v1321_v1, 4  ;;  %v1400_v48 = vsel %vm271_vm0, %v1392_v44, 0.0  ;;  %v5832_v28 = vadd.f32 %v1412_v0, %v1411_v35 }
 0x119   : > { %v953_v20 = vsel %vm346_vm6, %v932_v22, %v5763_v56  ;;  %v1088_v43 = vadd.f32 %v1087_v47, %v1086_v60  ;;  %v1167_v19 = vadd.f32 %v1166_v8, %v1165_v46  ;;  %v1244_v61 = vadd.f32 %v1243_v12, %v1242_v40 }
 0x11a   : > { %v954_v11 = vsel %vm348_vm7, %v5798_v34, %v953_v20  ;;  %v1323_v16 = vadd.f32 %v1322_v58, %v1321_v1  ;;  %v1401_v63 = vrot.slane %v1400_v48, 4  ;;  %v1105_v39 = vsel %vm271_vm0, %v1055_v62, 0.0 }
 0x11b   : > { %4687 = vst.msk [vmem:[%s5411_s8 + $0x8] sm:$0xff] %vm271_vm0, %v954_v11  ;;  %v1089_v55 = vrot.slane %v1088_v43, 1  ;;  %v1168_v9 = vrot.slane %v1167_v19, 1  ;;  %v1245_v10 = vrot.slane %v1244_v61, 2  ;;  %v1106_v56 = vrot.slane %v1105_v39, 4 }
 0x11c   : > { %v1324_v15 = vrot.slane %v1323_v16, 2  ;;  %v1402_v14 = vadd.f32 %v1401_v63, %v1400_v48  ;;  %v1140_v51 = vmul.f32 %v1046_v21, %v5298_v17  ;;  %v1038_v35 = vsel %vm344_vm5, %v1011_v3, %v5771_v30  ;;  %v960_v30 = vpop.permute.xlu0 %959 }
 0x11d   : > { %v1090_v49 = vadd.f32 %v1089_v55, %v1088_v43  ;;  %v1246_v32 = vadd.f32 %v1245_v10, %v1244_v61  ;;  %v1225_v34 = vmul.f32 %v1046_v21, %v5218_v33  ;;  %v1107_v25 = vadd.f32 %v1106_v56, %v1105_v39 }
 0x11e   : > { %v1325_v37 = vadd.f32 %v1324_v15, %v1323_v16  ;;  %v1403_v59 = vrot.slane %v1402_v14, 2  ;;  %v1184_v27 = vsel %vm271_vm0, %v1140_v51, 0.0  ;;  %v5844_v54 = vadd.f32 %v1168_v9, %v1167_v19 }
 0x11f   : > { %v1247_v45 = vrot.slane %v1246_v32, 1  ;;  %v1185_v0 = vrot.slane %v1184_v27, 4  ;;  %v1263_v41 = vsel %vm271_vm0, %v1225_v34, 0.0  ;;  %v1108_v6 = vrot.slane %v1107_v25, 2 }
 0x120   : > { %v1326_v38 = vrot.slane %v1325_v37, 1  ;;  %v1404_v42 = vadd.f32 %v1403_v59, %v1402_v14  ;;  %v1264_v60 = vrot.slane %v1263_v41, 4  ;;  %v1123_v46 = vsel %vm342_vm4, %v1090_v49, %v5774_v2 }
 0x121   : > { %v1186_v31 = vadd.f32 %v1185_v0, %v1184_v27  ;;  %v1310_v40 = vmul.f32 %v1046_v21, %v5211_v26  ;;  %v1395_v1 = vmul.f32 %v1046_v21, %v5147_v13  ;;  %v5851_v44 = vadd.f32 %v1247_v45, %v1246_v32 }
 0x122   : > { %v1405_v22 = vrot.slane %v1404_v42, 1  ;;  %v1109_v47 = vadd.f32 %v1108_v6, %v1107_v25  ;;  %v1265_v8 = vadd.f32 %v1264_v60, %v1263_v41  ;;  %v969_v48 = vmul.f32 %v960_v30, %v5300_v18 }
 0x123   : > { %v1187_v12 = vrot.slane %v1186_v31, 2  ;;  %v1342_v3 = vsel %vm271_vm0, %v1310_v40, 0.0  ;;  %v1421_v58 = vsel %vm271_vm0, %v1395_v1, 0.0  ;;  %v5856_v62 = vadd.f32 %v1326_v38, %v1325_v37 }
 0x124   : > { %v1110_v2 = vrot.slane %v1109_v47, 1  ;;  %v1266_v20 = vrot.slane %v1265_v8, 2  ;;  %v1343_v43 = vrot.slane %v1342_v3, 4  ;;  %v5858_v19 = vadd.f32 %v1405_v22, %v1404_v42 }
 0x125   : > { %v1188_v21 = vadd.f32 %v1187_v12, %v1186_v31  ;;  %v1422_v61 = vrot.slane %v1421_v58, 4  ;;  %v1019_v11 = vsel %vm271_vm0, %v969_v48, 0.0  ;;  %v1039_v9 = vsel %vm346_vm6, %v5803_v52, %v1038_v35 }
 0x126   : > { %v1267_v16 = vadd.f32 %v1266_v20, %v1265_v8  ;;  %v1344_v63 = vadd.f32 %v1343_v43, %v1342_v3  ;;  %v1020_v55 = vrot.slane %v1019_v11, 4  ;;  %v5863_v10 = vadd.f32 %v1110_v2, %v1109_v47 }
 0x127   : > { %v1189_v39 = vrot.slane %v1188_v21, 1  ;;  %v1423_v15 = vadd.f32 %v1422_v61, %v1421_v58  ;;  %v1054_v14 = vmul.f32 %v960_v30, %v5298_v17  ;;  %v1124_v49 = vsel %vm344_vm5, %v5812_v23, %v1123_v46  ;;  %v1218_v58 = vpop.permute.xlu1 %1217 }
 0x128   : > { %v1345_v56 = vrot.slane %v1344_v63, 2  ;;  %v1021_v51 = vadd.f32 %v1020_v55, %v1019_v11  ;;  %v1139_v32 = vmul.f32 %v960_v30, %v5218_v33  ;;  %v1268_v34 = vrot.slane %v1267_v16, 1 }
 0x129   : > { %v1424_v37 = vrot.slane %v1423_v15, 2  ;;  %v1098_v59 = vsel %vm271_vm0, %v1054_v14, 0.0  ;;  %v1224_v25 = vmul.f32 %v960_v30, %v5211_v26  ;;  %v5871_v52 = vadd.f32 %v1189_v39, %v1188_v21 }
 0x12a   : > { %v1346_v35 = vadd.f32 %v1345_v56, %v1344_v63  ;;  %v1022_v27 = vrot.slane %v1021_v51, 2  ;;  %v1099_v45 = vrot.slane %v1098_v59, 4  ;;  %v1177_v41 = vsel %vm271_vm0, %v1139_v32, 0.0 }
 0x12b   : > { %v1425_v0 = vadd.f32 %v1424_v37, %v1423_v15  ;;  %v1256_v38 = vsel %vm271_vm0, %v1224_v25, 0.0  ;;  %v1309_v23 = vmul.f32 %v960_v30, %v5147_v13  ;;  %v1178_v46 = vrot.slane %v1177_v41, 4 }
 0x12c   : > { %v1347_v42 = vrot.slane %v1346_v35, 1  ;;  %v1023_v6 = vadd.f32 %v1022_v27, %v1021_v51  ;;  %v1100_v60 = vadd.f32 %v1099_v45, %v1098_v59  ;;  %v5876_v31 = vadd.f32 %v1268_v34, %v1267_v16 }
 0x12d   : > { %v1257_v40 = vrot.slane %v1256_v38, 4  ;;  %v1335_v1 = vsel %vm271_vm0, %v1309_v23, 0.0  ;;  %v1394_v22 = vmul.f32 %v960_v30, %v5133_v7  ;;  %v1426_v47 = vrot.slane %v1425_v0, 1 }
 0x12e   : > { %v1024_v8 = vrot.slane %v1023_v6, 1  ;;  %v1101_v12 = vrot.slane %v1100_v60, 2  ;;  %v1179_v3 = vadd.f32 %v1178_v46, %v1177_v41  ;;  %v5880_v48 = vadd.f32 %v1347_v42, %v1346_v35  ;;  %v1132_v42 = vpop.permute.xlu0 %1131 }
 0x12f   : > { %v1258_v2 = vadd.f32 %v1257_v40, %v1256_v38  ;;  %v1336_v20 = vrot.slane %v1335_v1, 4  ;;  %v1414_v43 = vsel %vm271_vm0, %v1394_v22, 0.0  ;;  %v1227_v30 = vmul.f32 %v1218_v58, %v5300_v18 }
 0x130   : > { %v1025_v21 = vadd.f32 %v1024_v8, %v1023_v6  ;;  %v1102_v61 = vadd.f32 %v1101_v12, %v1100_v60  ;;  %v1180_v11 = vrot.slane %v1179_v3, 2  ;;  %v1415_v16 = vrot.slane %v1414_v43, 4 }
 0x131   : > { %v1259_v63 = vrot.slane %v1258_v2, 2  ;;  %v1337_v55 = vadd.f32 %v1336_v20, %v1335_v1  ;;  %v1312_v39 = vmul.f32 %v1218_v58, %v5298_v17  ;;  %v1277_v37 = vsel %vm271_vm0, %v1227_v30, 0.0 }
 0x132   : > { %v1040_v15 = vsel %vm348_vm7, %v1025_v21, %v1039_v9  ;;  %v1103_v14 = vrot.slane %v1102_v61, 1  ;;  %v1181_v56 = vadd.f32 %v1180_v11, %v1179_v3  ;;  %v1416_v51 = vadd.f32 %v1415_v16, %v1414_v43 }
 0x133   : > { %4688 = vst.msk [vmem:[%s5411_s8 + $0x40] sm:$0xff] %vm271_vm0, %v1040_v15  ;;  %v1260_v32 = vadd.f32 %v1259_v63, %v1258_v2  ;;  %v1338_v34 = vrot.slane %v1337_v55, 2  ;;  %v1356_v59 = vsel %vm271_vm0, %v1312_v39, 0.0  ;;  %v1278_v45 = vrot.slane %v1277_v37, 4 }
 0x134   : > { %v1104_v25 = vadd.f32 %v1103_v14, %v1102_v61  ;;  %v1182_v35 = vrot.slane %v1181_v56, 1  ;;  %v1417_v27 = vrot.slane %v1416_v51, 2  ;;  %v1357_v23 = vrot.slane %v1356_v59, 4 }
 0x135   : > { %v1261_v41 = vrot.slane %v1260_v32, 1  ;;  %v1339_v38 = vadd.f32 %v1338_v34, %v1337_v55  ;;  %v1397_v9 = vmul.f32 %v1218_v58, %v5218_v33  ;;  %v5891_v6 = vadd.f32 %v1426_v47, %v1425_v0 }
 0x136   : > { %v1125_v60 = vsel %vm346_vm6, %v1104_v25, %v1124_v49  ;;  %v1418_v46 = vadd.f32 %v1417_v27, %v1416_v51  ;;  %v1279_v40 = vadd.f32 %v1278_v45, %v1277_v37  ;;  %v1183_v22 = vadd.f32 %v1182_v35, %v1181_v56 }
 0x137   : > { %v1126_v1 = vsel %vm348_vm7, %v5863_v10, %v1125_v60  ;;  %v1340_v8 = vrot.slane %v1339_v38, 1  ;;  %v1358_v12 = vadd.f32 %v1357_v23, %v1356_v59  ;;  %v1435_v20 = vsel %vm271_vm0, %v1397_v9, 0.0 }
 0x138   : > { %4689 = vst.msk [vmem:[%s5411_s8 + $0x78] sm:$0xff] %vm271_vm0, %v1126_v1  ;;  %v1419_v3 = vrot.slane %v1418_v46, 1  ;;  %v1280_v2 = vrot.slane %v1279_v40, 2  ;;  %v1141_v58 = vmul.f32 %v1132_v42, %v5300_v18  ;;  %v1262_v0 = vadd.f32 %v1261_v41, %v1260_v32 }
 0x139   : > { %v1359_v47 = vrot.slane %v1358_v12, 2  ;;  %v1436_v43 = vrot.slane %v1435_v20, 4  ;;  %v1208_v49 = vsel %vm340_vm3, %v5844_v54, %v5781_v24  ;;  %v1341_v21 = vadd.f32 %v1340_v8, %v1339_v38 }
 0x13a   : > { %v1281_v10 = vadd.f32 %v1280_v2, %v1279_v40  ;;  %v1191_v61 = vsel %vm271_vm0, %v1141_v58, 0.0  ;;  %v1209_v11 = vsel %vm342_vm4, %v5814_v53, %v1208_v49  ;;  %v1420_v39 = vadd.f32 %v1419_v3, %v1418_v46 }
 0x13b   : > { %v1360_v16 = vadd.f32 %v1359_v47, %v1358_v12  ;;  %v1437_v63 = vadd.f32 %v1436_v43, %v1435_v20  ;;  %v1192_v55 = vrot.slane %v1191_v61, 4  ;;  %v1210_v30 = vsel %vm344_vm5, %v1183_v22, %v1209_v11 }
 0x13c   : > { %v1282_v15 = vrot.slane %v1281_v10, 1  ;;  %v1226_v14 = vmul.f32 %v1132_v42, %v5298_v17  ;;  %v1293_v24 = vsel %vm338_vm2, %v5851_v44, %v5792_v57  ;;  %v1211_v32 = vsel %vm346_vm6, %v5871_v52, %v1210_v30  ;;  %v1390_v57 = vpop.permute.xlu1 %1389 }
 0x13d   : > { %v1361_v54 = vrot.slane %v1360_v16, 1  ;;  %v1438_v56 = vrot.slane %v1437_v63, 2  ;;  %v1193_v51 = vadd.f32 %v1192_v55, %v1191_v61  ;;  %v1294_v37 = vsel %vm340_vm3, %v5816_v29, %v1293_v24 }
 0x13e   : > { %v1283_v53 = vadd.f32 %v1282_v15, %v1281_v10  ;;  %v1270_v34 = vsel %vm271_vm0, %v1226_v14, 0.0  ;;  %v1311_v59 = vmul.f32 %v1132_v42, %v5218_v33  ;;  %v1295_v45 = vsel %vm342_vm4, %v1262_v0, %v1294_v37 }
 0x13f   : > { %v1439_v25 = vadd.f32 %v1438_v56, %v1437_v63  ;;  %v1194_v35 = vrot.slane %v1193_v51, 2  ;;  %v1271_v27 = vrot.slane %v1270_v34, 4  ;;  %v5918_v44 = vadd.f32 %v1361_v54, %v1360_v16 }
 0x140   : > { %v1349_v41 = vsel %vm271_vm0, %v1311_v59, 0.0  ;;  %v1378_v52 = vsel %vm336_vm1, %v5856_v62, %v5757_v36  ;;  %v1396_v38 = vmul.f32 %v1132_v42, %v5211_v26  ;;  %v1296_v46 = vsel %vm344_vm5, %v5876_v31, %v1295_v45  ;;  %v1304_v62 = vpop.permute.xlu0 %1303  ;;  %v1477_v43 = vpop.permute.xlu1 %1476 }
 0x141   : > { %v1440_v23 = vrot.slane %v1439_v25, 1  ;;  %v1195_v29 = vadd.f32 %v1194_v35, %v1193_v51  ;;  %v1272_v9 = vadd.f32 %v1271_v27, %v1270_v34  ;;  %v1350_v60 = vrot.slane %v1349_v41, 4 }
 0x142   : > { %v1379_v40 = vsel %vm338_vm2, %v5822_v50, %v1378_v52  ;;  %v1428_v1 = vsel %vm271_vm0, %v1396_v38, 0.0  ;;  %v1399_v22 = vmul.f32 %v1390_v57, %v5300_v18  ;;  %v1464_v36 = vsel %vm336_vm1, %v5832_v28, %v5858_v19 }
 0x143   : > { %v1196_v8 = vrot.slane %v1195_v29, 1  ;;  %v1273_v12 = vrot.slane %v1272_v9, 2  ;;  %v1351_v3 = vadd.f32 %v1350_v60, %v1349_v41  ;;  %v5934_v42 = vadd.f32 %v1440_v23, %v1439_v25 }
 0x144   : > { %v1380_v2 = vsel %vm340_vm3, %v1341_v21, %v1379_v40  ;;  %v1429_v31 = vrot.slane %v1428_v1, 4  ;;  %v1449_v50 = vsel %vm271_vm0, %v1399_v22, 0.0  ;;  %v1465_v47 = vsel %vm338_vm2, %v1420_v39, %v1464_v36  ;;  %v1475_v41 = vpop.permute.xlu0 %1474 }
 0x145   : > { %v1197_v20 = vadd.f32 %v1196_v8, %v1195_v29  ;;  %v1274_v58 = vadd.f32 %v1273_v12, %v1272_v9  ;;  %v1352_v0 = vrot.slane %v1351_v3, 2  ;;  %v1381_v49 = vsel %vm342_vm4, %v5880_v48, %v1380_v2  ;;  %v1481_v12 = vpop.permute.xlu1 %1480 }
 0x146   : > { %v1430_v10 = vadd.f32 %v1429_v31, %v1428_v1  ;;  %v1450_v28 = vrot.slane %v1449_v50, 4  ;;  %v1313_v19 = vmul.f32 %v1304_v62, %v5300_v18  ;;  %v1398_v16 = vmul.f32 %v1304_v62, %v5298_v17 }
 0x147   : > { %v1212_v61 = vsel %vm348_vm7, %v1197_v20, %v1211_v32  ;;  %v1275_v21 = vrot.slane %v1274_v58, 1  ;;  %v1353_v11 = vadd.f32 %v1352_v0, %v1351_v3  ;;  %v1499_v39 = vmul.f32 %v1477_v43, %v5128_v5 }
 0x148   : > { %4690 = vst.msk [vmem:[%s5411_s8 + $0xb0] sm:$0xff] %vm271_vm0, %v1212_v61  ;;  %v1431_v63 = vrot.slane %v1430_v10, 2  ;;  %v1451_v55 = vadd.f32 %v1450_v28, %v1449_v50  ;;  %v1363_v30 = vsel %vm271_vm0, %v1313_v19, 0.0  ;;  %v1442_v24 = vsel %vm271_vm0, %v1398_v16, 0.0 }
 0x149   : > { %v1276_v15 = vadd.f32 %v1275_v21, %v1274_v58  ;;  %v1354_v48 = vrot.slane %v1353_v11, 1  ;;  %v1364_v14 = vrot.slane %v1363_v30, 4  ;;  %v1443_v51 = vrot.slane %v1442_v24, 4 }
 0x14a   : > { %v1432_v54 = vadd.f32 %v1431_v63, %v1430_v10  ;;  %v1452_v56 = vrot.slane %v1451_v55, 2  ;;  %v1513_v32 = vsel %vm271_vm0, %v1499_v39, 0.0  ;;  %v1583_v29 = vmul.f32 %v1477_v43, %v5126_v4 }
 0x14b   : > { %v1297_v34 = vsel %vm346_vm6, %v1276_v15, %v1296_v46  ;;  %v1355_v37 = vadd.f32 %v1354_v48, %v1353_v11  ;;  %v1365_v59 = vadd.f32 %v1364_v14, %v1363_v30  ;;  %v1514_v25 = vrot.slane %v1513_v32, 4 }
 0x14c   : > { %v1298_v35 = vsel %vm348_vm7, %v1283_v53, %v1297_v34  ;;  %v1433_v27 = vrot.slane %v1432_v54, 1  ;;  %v1453_v45 = vadd.f32 %v1452_v56, %v1451_v55  ;;  %v1444_v57 = vadd.f32 %v1443_v51, %v1442_v24  ;;  %v1479_v24 = vpop.permute.xlu0 %1478 }
 0x14d   : > { %4691 = vst.msk [vmem:[%s5411_s8 + $0xe8] sm:$0xff] %vm271_vm0, %v1298_v35  ;;  %v1382_v52 = vsel %vm344_vm5, %v1355_v37, %v1381_v49  ;;  %v1366_v38 = vrot.slane %v1365_v59, 2  ;;  %v1515_v23 = vadd.f32 %v1514_v25, %v1513_v32  ;;  %v1466_v60 = vsel %vm340_vm3, %v5891_v6, %v1465_v47 }
 0x14e   : > { %v1434_v9 = vadd.f32 %v1433_v27, %v1432_v54  ;;  %v1454_v46 = vrot.slane %v1453_v45, 1  ;;  %v1445_v40 = vrot.slane %v1444_v57, 2  ;;  %v1591_v22 = vsel %vm271_vm0, %v1583_v29, 0.0 }
 0x14f   : > { %v1367_v1 = vadd.f32 %v1366_v38, %v1365_v59  ;;  %v1516_v53 = vrot.slane %v1515_v23, 2  ;;  %v1498_v8 = vmul.f32 %v1475_v41, %v5126_v4  ;;  %v1383_v36 = vsel %vm346_vm6, %v5918_v44, %v1382_v52 }
 0x150   : > { %v1467_v3 = vsel %vm342_vm4, %v1434_v9, %v1466_v60  ;;  %v1446_v62 = vadd.f32 %v1445_v40, %v1444_v57  ;;  %v1592_v2 = vrot.slane %v1591_v22, 4  ;;  %v1455_v31 = vadd.f32 %v1454_v46, %v1453_v45 }
 0x151   : > { %v1368_v50 = vrot.slane %v1367_v1, 1  ;;  %v1517_v20 = vadd.f32 %v1516_v53, %v1515_v23  ;;  %v1506_v6 = vsel %vm271_vm0, %v1498_v8, 0.0  ;;  %v1501_v43 = vmul.f32 %v1481_v12, %v5147_v13 }
 0x152   : > { %v1447_v58 = vrot.slane %v1446_v62, 1  ;;  %v1593_v0 = vadd.f32 %v1592_v2, %v1591_v22  ;;  %v1507_v47 = vrot.slane %v1506_v6, 4  ;;  %v1585_v28 = vmul.f32 %v1481_v12, %v5133_v7 }
 0x153   : > { %v1369_v49 = vadd.f32 %v1368_v50, %v1367_v1  ;;  %v1518_v10 = vrot.slane %v1517_v20, 1  ;;  %v1669_v19 = vmul.f32 %v1481_v12, %v5128_v5  ;;  %v1527_v11 = vsel %vm271_vm0, %v1501_v43, 0.0 }
 0x154   : > { %v1448_v44 = vadd.f32 %v1447_v58, %v1446_v62  ;;  %v1594_v61 = vrot.slane %v1593_v0, 2  ;;  %v1508_v21 = vadd.f32 %v1507_v47, %v1506_v6  ;;  %v1468_v63 = vsel %vm344_vm5, %v5934_v42, %v1467_v3 }
 0x155   : > { %v1384_v16 = vsel %vm348_vm7, %v1369_v49, %v1383_v36  ;;  %v1528_v55 = vrot.slane %v1527_v11, 4  ;;  %v1605_v30 = vsel %vm271_vm0, %v1585_v28, 0.0  ;;  %v1683_v51 = vsel %vm271_vm0, %v1669_v19, 0.0 }
 0x156   : > { %4692 = vst.msk [vmem:[%s5411_s8 + $0x120] sm:$0xff] %vm271_vm0, %v1384_v16  ;;  %v1469_v39 = vsel %vm346_vm6, %v1448_v44, %v1468_v63  ;;  %v1595_v15 = vadd.f32 %v1594_v61, %v1593_v0  ;;  %v1509_v48 = vrot.slane %v1508_v21, 2  ;;  %v1606_v14 = vrot.slane %v1605_v30, 4 }
 0x157   : > { %v1470_v54 = vsel %vm348_vm7, %v1455_v31, %v1469_v39  ;;  %v1529_v56 = vadd.f32 %v1528_v55, %v1527_v11  ;;  %v1753_v32 = vmul.f32 %v1481_v12, %v5126_v4  ;;  %v1519_v42 = vadd.f32 %v1518_v10, %v1517_v20  ;;  %v1485_v31 = vpop.permute.xlu1 %1484 }
 0x158   : > { %4693 = vst.msk [vmem:[%s5411_s8 + $0x158] sm:$0xff] %vm271_vm0, %v1470_v54  ;;  %v1510_v34 = vadd.f32 %v1509_v48, %v1508_v21  ;;  %v1607_v37 = vadd.f32 %v1606_v14, %v1605_v30  ;;  %v1684_v59 = vrot.slane %v1683_v51, 4  ;;  %v1500_v27 = vmul.f32 %v1479_v24, %v5133_v7 }
 0x159   : > { %v1530_v25 = vrot.slane %v1529_v56, 2  ;;  %v1761_v35 = vsel %vm271_vm0, %v1753_v32, 0.0  ;;  %v1584_v45 = vmul.f32 %v1479_v24, %v5128_v5  ;;  %v1596_v57 = vrot.slane %v1595_v15, 1 }
 0x15a   : > { %v1511_v41 = vrot.slane %v1510_v34, 1  ;;  %v1608_v52 = vrot.slane %v1607_v37, 2  ;;  %v1685_v38 = vadd.f32 %v1684_v59, %v1683_v51  ;;  %v1762_v29 = vrot.slane %v1761_v35, 4 }
 0x15b   : > { %v1531_v23 = vadd.f32 %v1530_v25, %v1529_v56  ;;  %v1520_v9 = vsel %vm271_vm0, %v1500_v27, 0.0  ;;  %v1598_v60 = vsel %vm271_vm0, %v1584_v45, 0.0  ;;  %v1668_v3 = vmul.f32 %v1479_v24, %v5126_v4 }
 0x15c   : > { %v1512_v46 = vadd.f32 %v1511_v41, %v1510_v34  ;;  %v1609_v40 = vadd.f32 %v1608_v52, %v1607_v37  ;;  %v1686_v1 = vrot.slane %v1685_v38, 2  ;;  %v1521_v53 = vrot.slane %v1520_v9, 4 }
 0x15d   : > { %v1532_v22 = vrot.slane %v1531_v23, 1  ;;  %v1763_v8 = vadd.f32 %v1762_v29, %v1761_v35  ;;  %v1599_v12 = vrot.slane %v1598_v60, 4  ;;  %v1597_v36 = vadd.f32 %v1596_v57, %v1595_v15 }
 0x15e   : > { %v1610_v62 = vrot.slane %v1609_v40, 1  ;;  %v1522_v2 = vadd.f32 %v1521_v53, %v1520_v9  ;;  %v1687_v50 = vadd.f32 %v1686_v1, %v1685_v38  ;;  %v1676_v58 = vsel %vm271_vm0, %v1668_v3, 0.0 }
 0x15f   : > { %v1764_v20 = vrot.slane %v1763_v8, 2  ;;  %v1600_v6 = vadd.f32 %v1599_v12, %v1598_v60  ;;  %v1570_v0 = vsel %vm336_vm1, %v1519_v42, %v1512_v46  ;;  %v1533_v47 = vadd.f32 %v1532_v22, %v1531_v23  ;;  %v1483_v22 = vpop.permute.xlu0 %1482 }
 0x160   : > { %v1523_v43 = vrot.slane %v1522_v2, 2  ;;  %v1677_v49 = vrot.slane %v1676_v58, 4  ;;  %v1503_v19 = vmul.f32 %v1485_v31, %v5218_v33  ;;  %v1587_v44 = vmul.f32 %v1485_v31, %v5211_v26 }
 0x161   : > { %v1765_v10 = vadd.f32 %v1764_v20, %v1763_v8  ;;  %v1601_v28 = vrot.slane %v1600_v6, 2  ;;  %v1611_v61 = vadd.f32 %v1610_v62, %v1609_v40  ;;  %v1671_v16 = vmul.f32 %v1485_v31, %v5147_v13 }
 0x162   : > { %v1524_v21 = vadd.f32 %v1523_v43, %v1522_v2  ;;  %v1678_v11 = vadd.f32 %v1677_v49, %v1676_v58  ;;  %v1688_v63 = vrot.slane %v1687_v50, 1  ;;  %v1541_v30 = vsel %vm271_vm0, %v1503_v19, 0.0 }
 0x163   : > { %v1602_v55 = vadd.f32 %v1601_v28, %v1600_v6  ;;  %v1619_v39 = vsel %vm271_vm0, %v1587_v44, 0.0  ;;  %v1542_v14 = vrot.slane %v1541_v30, 4  ;;  %v1766_v54 = vrot.slane %v1765_v10, 1 }
 0x164   : > { %v1525_v15 = vrot.slane %v1524_v21, 1  ;;  %v1679_v48 = vrot.slane %v1678_v11, 2  ;;  %v1620_v24 = vrot.slane %v1619_v39, 4  ;;  %v1697_v51 = vsel %vm271_vm0, %v1671_v16, 0.0 }
 0x165   : > { %v1603_v56 = vrot.slane %v1602_v55, 1  ;;  %v1755_v32 = vmul.f32 %v1485_v31, %v5133_v7  ;;  %v1543_v37 = vadd.f32 %v1542_v14, %v1541_v30  ;;  %v1698_v35 = vrot.slane %v1697_v51, 4 }
 0x166   : > { %v1526_v42 = vadd.f32 %v1525_v15, %v1524_v21  ;;  %v1680_v34 = vadd.f32 %v1679_v48, %v1678_v11  ;;  %v1621_v59 = vadd.f32 %v1620_v24, %v1619_v39  ;;  %v1839_v45 = vmul.f32 %v1485_v31, %v5128_v5 }
 0x167   : > { %v1604_v25 = vadd.f32 %v1603_v56, %v1602_v55  ;;  %v1775_v27 = vsel %vm271_vm0, %v1755_v32, 0.0  ;;  %v1689_v57 = vadd.f32 %v1688_v63, %v1687_v50  ;;  %v1544_v52 = vrot.slane %v1543_v37, 2  ;;  %v6021_v56 = vpop.permute.xlu1 %1488 }
 0x168   : > { %v1681_v41 = vrot.slane %v1680_v34, 1  ;;  %v1622_v38 = vrot.slane %v1621_v59, 2  ;;  %v1571_v23 = vsel %vm338_vm2, %v1526_v42, %v1570_v0  ;;  %v1699_v9 = vadd.f32 %v1698_v35, %v1697_v51 }
 0x169   : > { %v1655_v29 = vsel %vm336_vm1, %v1604_v25, %v1597_v36  ;;  %v1776_v60 = vrot.slane %v1775_v27, 4  ;;  %v5999_v46 = vadd.f32 %v1766_v54, %v1765_v10  ;;  %v1545_v1 = vadd.f32 %v1544_v52, %v1543_v37 }
 0x16a   : > { %v1682_v40 = vadd.f32 %v1681_v41, %v1680_v34  ;;  %v1623_v53 = vadd.f32 %v1622_v38, %v1621_v59  ;;  %v1700_v8 = vrot.slane %v1699_v9, 2  ;;  %v1853_v3 = vsel %vm271_vm0, %v1839_v45, 0.0 }
 0x16b   : > { %v1777_v12 = vadd.f32 %v1776_v60, %v1775_v27  ;;  %v1923_v62 = vmul.f32 %v1485_v31, %v5126_v4  ;;  %v6004_v2 = vsel %vm340_vm3, %v1533_v47, %v1571_v23  ;;  %v6007_v50 = vsel %vm338_vm2, %v1611_v61, %v1655_v29 }
 0x16c   : > { %v1546_v36 = vrot.slane %v1545_v1, 1  ;;  %v1854_v20 = vrot.slane %v1853_v3, 4  ;;  %v1701_v6 = vadd.f32 %v1700_v8, %v1699_v9  ;;  %v1502_v43 = vmul.f32 %v1483_v22, %v5211_v26 }
 0x16d   : > { %v1778_v58 = vrot.slane %v1777_v12, 2  ;;  %v1931_v0 = vsel %vm271_vm0, %v1923_v62, 0.0  ;;  %v6012_v49 = vsel %vm336_vm1, %v1689_v57, %v1682_v40  ;;  %v1624_v10 = vrot.slane %v1623_v53, 1 }
 0x16e   : > { %v1855_v28 = vadd.f32 %v1854_v20, %v1853_v3  ;;  %v1932_v31 = vrot.slane %v1931_v0, 4  ;;  %v1702_v19 = vrot.slane %v1701_v6, 1  ;;  %v1534_v44 = vsel %vm271_vm0, %v1502_v43, 0.0 }
 0x16f   : > { %v1779_v47 = vadd.f32 %v1778_v58, %v1777_v12  ;;  %v1586_v61 = vmul.f32 %v1483_v22, %v5147_v13  ;;  %v1535_v16 = vrot.slane %v1534_v44, 4  ;;  %v1670_v63 = vmul.f32 %v1483_v22, %v5133_v7 }
 0x170   : > { %v1856_v21 = vrot.slane %v1855_v28, 2  ;;  %v1933_v11 = vadd.f32 %v1932_v31, %v1931_v0  ;;  %v6017_v55 = vadd.f32 %v1546_v36, %v1545_v1  ;;  %v1754_v15 = vmul.f32 %v1483_v22, %v5128_v5 }
 0x171   : > { %v1780_v30 = vrot.slane %v1779_v47, 1  ;;  %v1612_v39 = vsel %vm271_vm0, %v1586_v61, 0.0  ;;  %v1536_v24 = vadd.f32 %v1535_v16, %v1534_v44  ;;  %v1625_v51 = vadd.f32 %v1624_v10, %v1623_v53 }
 0x172   : > { %v1857_v48 = vadd.f32 %v1856_v21, %v1855_v28  ;;  %v1934_v14 = vrot.slane %v1933_v11, 2  ;;  %v1613_v54 = vrot.slane %v1612_v39, 4  ;;  %v1690_v32 = vsel %vm271_vm0, %v1670_v63, 0.0 }
 0x173   : > { %v1768_v42 = vsel %vm271_vm0, %v1754_v15, 0.0  ;;  %v1838_v34 = vmul.f32 %v1483_v22, %v5126_v4  ;;  %v1703_v37 = vadd.f32 %v1702_v19, %v1701_v6  ;;  %v1537_v25 = vrot.slane %v1536_v24, 2 }
 0x174   : > { %v1935_v59 = vadd.f32 %v1934_v14, %v1933_v11  ;;  %v1614_v35 = vadd.f32 %v1613_v54, %v1612_v39  ;;  %v1691_v27 = vrot.slane %v1690_v32, 4  ;;  %v1769_v45 = vrot.slane %v1768_v42, 4 }
 0x175   : > { %v1846_v57 = vsel %vm271_vm0, %v1838_v34, 0.0  ;;  %v1505_v41 = vmul.f32 %v6021_v56, %v5300_v18  ;;  %v1781_v52 = vadd.f32 %v1780_v30, %v1779_v47  ;;  %v1858_v38 = vrot.slane %v1857_v48, 1 }
 0x176   : > { %v1538_v23 = vadd.f32 %v1537_v25, %v1536_v24  ;;  %v1615_v29 = vrot.slane %v1614_v35, 2  ;;  %v1692_v9 = vadd.f32 %v1691_v27, %v1690_v32  ;;  %v1770_v60 = vadd.f32 %v1769_v45, %v1768_v42 }
 0x177   : > { %v1847_v40 = vrot.slane %v1846_v57, 4  ;;  %v1555_v1 = vsel %vm271_vm0, %v1505_v41, 0.0  ;;  %v1936_v53 = vrot.slane %v1935_v59, 1  ;;  %v1589_v20 = vmul.f32 %v6021_v56, %v5298_v17 }
 0x178   : > { %v1539_v22 = vrot.slane %v1538_v23, 1  ;;  %v1616_v8 = vadd.f32 %v1615_v29, %v1614_v35  ;;  %v1556_v12 = vrot.slane %v1555_v1, 4  ;;  %v1693_v3 = vrot.slane %v1692_v9, 2  ;;  %v6060_v29 = vpop.permute.xlu0 %1486 }
 0x179   : > { %v1771_v62 = vrot.slane %v1770_v60, 2  ;;  %v1848_v36 = vadd.f32 %v1847_v40, %v1846_v57  ;;  %v1673_v43 = vmul.f32 %v6021_v56, %v5218_v33  ;;  %v1633_v19 = vsel %vm271_vm0, %v1589_v20, 0.0 }
 0x17a   : > { %v1540_v6 = vadd.f32 %v1539_v22, %v1538_v23  ;;  %v1617_v58 = vrot.slane %v1616_v8, 1  ;;  %v1557_v0 = vadd.f32 %v1556_v12, %v1555_v1  ;;  %v1694_v10 = vadd.f32 %v1693_v3, %v1692_v9 }
 0x17b   : > { %v1772_v28 = vadd.f32 %v1771_v62, %v1770_v60  ;;  %v1849_v31 = vrot.slane %v1848_v36, 2  ;;  %v1859_v47 = vadd.f32 %v1858_v38, %v1857_v48  ;;  %v1634_v21 = vrot.slane %v1633_v19, 4 }
 0x17c   : > { %v1618_v44 = vadd.f32 %v1617_v58, %v1616_v8  ;;  %v1558_v61 = vrot.slane %v1557_v0, 2  ;;  %v6035_v11 = vadd.f32 %v1936_v53, %v1935_v59  ;;  %v1695_v16 = vrot.slane %v1694_v10, 1 }
 0x17d   : > { %v1773_v63 = vrot.slane %v1772_v28, 1  ;;  %v1850_v30 = vadd.f32 %v1849_v31, %v1848_v36  ;;  %v1573_v39 = vsel %vm342_vm4, %v1540_v6, %v6004_v2  ;;  %v1635_v14 = vadd.f32 %v1634_v21, %v1633_v19 }
 0x17e   : > { %v1559_v15 = vadd.f32 %v1558_v61, %v1557_v0  ;;  %v1711_v24 = vsel %vm271_vm0, %v1673_v43, 0.0  ;;  %v1657_v54 = vsel %vm340_vm3, %v1618_v44, %v6007_v50  ;;  %v1696_v32 = vadd.f32 %v1695_v16, %v1694_v10 }
 0x17f   : > { %v1774_v48 = vadd.f32 %v1773_v63, %v1772_v28  ;;  %v1851_v42 = vrot.slane %v1850_v30, 1  ;;  %v1636_v25 = vrot.slane %v1635_v14, 2  ;;  %v1712_v59 = vrot.slane %v1711_v24, 4 }
 0x180   : > { %v1560_v34 = vrot.slane %v1559_v15, 1  ;;  %v1757_v35 = vmul.f32 %v6021_v56, %v5211_v26  ;;  %v6046_v27 = vsel %vm344_vm5, %v6017_v55, %v1573_v39  ;;  %v1741_v2 = vsel %vm338_vm2, %v1696_v32, %v6012_v49 }
 0x181   : > { %v1825_v45 = vsel %vm336_vm1, %v1774_v48, %v5999_v46  ;;  %v1841_v50 = vmul.f32 %v6021_v56, %v5147_v13  ;;  %v6055_v57 = vsel %vm342_vm4, %v1625_v51, %v1657_v54  ;;  %v6058_v41 = vsel %vm340_vm3, %v1703_v37, %v1741_v2 }
 0x182   : > { %v1852_v38 = vadd.f32 %v1851_v42, %v1850_v30  ;;  %v1637_v23 = vadd.f32 %v1636_v25, %v1635_v14  ;;  %v6063_v55 = vsel %vm338_vm2, %v1781_v52, %v1825_v45  ;;  %v1713_v49 = vadd.f32 %v1712_v59, %v1711_v24 }
 0x183   : > { %v1789_v9 = vsel %vm271_vm0, %v1757_v35, 0.0  ;;  %v1867_v46 = vsel %vm271_vm0, %v1841_v50, 0.0  ;;  %v6067_v60 = vadd.f32 %v1560_v34, %v1559_v15  ;;  %v1925_v37 = vmul.f32 %v6021_v56, %v5133_v7 }
 0x184   : > { %v1790_v40 = vrot.slane %v1789_v9, 4  ;;  %v1868_v51 = vrot.slane %v1867_v46, 4  ;;  %v1714_v1 = vrot.slane %v1713_v49, 2  ;;  %v2009_v53 = vmul.f32 %v6021_v56, %v5128_v5 }
 0x185   : > { %v1504_v52 = vmul.f32 %v6060_v29, %v5298_v17  ;;  %v1588_v22 = vmul.f32 %v6060_v29, %v5218_v33  ;;  %v1638_v8 = vrot.slane %v1637_v23, 1  ;;  %v1945_v62 = vsel %vm271_vm0, %v1925_v37, 0.0 }
 0x186   : > { %v1791_v12 = vadd.f32 %v1790_v40, %v1789_v9  ;;  %v1869_v3 = vadd.f32 %v1868_v51, %v1867_v46  ;;  %v1715_v36 = vadd.f32 %v1714_v1, %v1713_v49  ;;  %v1946_v20 = vrot.slane %v1945_v62, 4 }
 0x187   : > { %v2023_v6 = vsel %vm271_vm0, %v2009_v53, 0.0  ;;  %v1548_v58 = vsel %vm271_vm0, %v1504_v52, 0.0  ;;  %v1626_v19 = vsel %vm271_vm0, %v1588_v22, 0.0  ;;  %v1672_v44 = vmul.f32 %v6060_v29, %v5211_v26 }
 0x188   : > { %v1792_v0 = vrot.slane %v1791_v12, 2  ;;  %v1870_v43 = vrot.slane %v1869_v3, 2  ;;  %v2024_v56 = vrot.slane %v2023_v6, 4  ;;  %v1549_v10 = vrot.slane %v1548_v58, 4 }
 0x189   : > { %v1716_v28 = vrot.slane %v1715_v36, 1  ;;  %v1947_v31 = vadd.f32 %v1946_v20, %v1945_v62  ;;  %v6084_v30 = vsel %vm336_vm1, %v1859_v47, %v1852_v38  ;;  %v1627_v15 = vrot.slane %v1626_v19, 4 }
 0x18a   : > { %v1793_v61 = vadd.f32 %v1792_v0, %v1791_v12  ;;  %v1871_v21 = vadd.f32 %v1870_v43, %v1869_v3  ;;  %v2025_v16 = vadd.f32 %v2024_v56, %v2023_v6  ;;  %v1550_v63 = vadd.f32 %v1549_v10, %v1548_v58  ;;  %v1666_v58 = vpop.permute.xlu1 %1665 }
 0x18b   : > { %v1948_v39 = vrot.slane %v1947_v31, 2  ;;  %v1704_v14 = vsel %vm271_vm0, %v1672_v44, 0.0  ;;  %v1628_v34 = vadd.f32 %v1627_v15, %v1626_v19  ;;  %v1756_v59 = vmul.f32 %v6060_v29, %v5147_v13 }
 0x18c   : > { %v1794_v24 = vrot.slane %v1793_v61, 1  ;;  %v1872_v54 = vrot.slane %v1871_v21, 1  ;;  %v2026_v32 = vrot.slane %v2025_v16, 2  ;;  %v1551_v48 = vrot.slane %v1550_v63, 2 }
 0x18d   : > { %v1949_v42 = vadd.f32 %v1948_v39, %v1947_v31  ;;  %v1705_v25 = vrot.slane %v1704_v14, 4  ;;  %v6089_v35 = vadd.f32 %v1638_v8, %v1637_v23  ;;  %v6091_v2 = vadd.f32 %v1716_v28, %v1715_v36 }
 0x18e   : > { %v2027_v47 = vadd.f32 %v2026_v32, %v2025_v16  ;;  %v1552_v45 = vadd.f32 %v1551_v48, %v1550_v63  ;;  %v6093_v50 = vadd.f32 %v1794_v24, %v1793_v61  ;;  %v1629_v38 = vrot.slane %v1628_v34, 2 }
 0x18f   : > { %v1706_v49 = vadd.f32 %v1705_v25, %v1704_v14  ;;  %v1782_v9 = vsel %vm271_vm0, %v1756_v59, 0.0  ;;  %v6096_v46 = vadd.f32 %v1872_v54, %v1871_v21  ;;  %v1840_v37 = vmul.f32 %v6060_v29, %v5133_v7 }
 0x190   : > { %v1553_v40 = vrot.slane %v1552_v45, 1  ;;  %v1783_v51 = vrot.slane %v1782_v9, 4  ;;  %v1950_v1 = vrot.slane %v1949_v42, 1  ;;  %v1630_v23 = vadd.f32 %v1629_v38, %v1628_v34 }
 0x191   : > { %v1707_v53 = vrot.slane %v1706_v49, 2  ;;  %v1924_v52 = vmul.f32 %v6060_v29, %v5128_v5  ;;  %v2028_v22 = vrot.slane %v2027_v47, 1  ;;  %v1860_v3 = vsel %vm271_vm0, %v1840_v37, 0.0 }
 0x192   : > { %v1554_v8 = vadd.f32 %v1553_v40, %v1552_v45  ;;  %v1784_v12 = vadd.f32 %v1783_v51, %v1782_v9  ;;  %v1631_v62 = vrot.slane %v1630_v23, 1  ;;  %v1861_v20 = vrot.slane %v1860_v3, 4 }
 0x193   : > { %v1708_v36 = vadd.f32 %v1707_v53, %v1706_v49  ;;  %v1938_v6 = vsel %vm271_vm0, %v1924_v52, 0.0  ;;  %v2008_v10 = vmul.f32 %v6060_v29, %v5126_v4  ;;  %v1675_v63 = vmul.f32 %v1666_v58, %v5300_v18 }
 0x194   : > { %v1575_v0 = vsel %vm346_vm6, %v1554_v8, %v6046_v27  ;;  %v1785_v43 = vrot.slane %v1784_v12, 2  ;;  %v1939_v56 = vrot.slane %v1938_v6, 4  ;;  %v1632_v31 = vadd.f32 %v1631_v62, %v1630_v23  ;;  %v1581_v8 = vpop.permute.xlu0 %1580 }
 0x195   : > { %v1576_v28 = vsel %vm348_vm7, %v6067_v60, %v1575_v0  ;;  %v1709_v19 = vrot.slane %v1708_v36, 1  ;;  %v1862_v44 = vadd.f32 %v1861_v20, %v1860_v3  ;;  %v2016_v16 = vsel %vm271_vm0, %v2008_v10, 0.0 }
 0x196   : > { %4694 = vst.msk [vmem:[%s5411_s8 + $0x10] sm:$0xff] %vm271_vm0, %v1576_v28  ;;  %v1786_v61 = vadd.f32 %v1785_v43, %v1784_v12  ;;  %v1940_v21 = vadd.f32 %v1939_v56, %v1938_v6  ;;  %v6114_v27 = vadd.f32 %v1950_v1, %v1949_v42  ;;  %v2017_v14 = vrot.slane %v2016_v16, 4 }
 0x197   : > { %v1710_v39 = vadd.f32 %v1709_v19, %v1708_v36  ;;  %v1863_v15 = vrot.slane %v1862_v44, 2  ;;  %v6116_v29 = vadd.f32 %v2028_v22, %v2027_v47  ;;  %v1725_v60 = vsel %vm271_vm0, %v1675_v63, 0.0 }
 0x198   : > { %v1941_v24 = vrot.slane %v1940_v21, 2  ;;  %v1759_v54 = vmul.f32 %v1666_v58, %v5298_v17  ;;  %v1659_v32 = vsel %vm344_vm5, %v1632_v31, %v6055_v57  ;;  %v2018_v34 = vadd.f32 %v2017_v14, %v2016_v16 }
 0x199   : > { %v1864_v48 = vadd.f32 %v1863_v15, %v1862_v44  ;;  %v1726_v25 = vrot.slane %v1725_v60, 4  ;;  %v1787_v59 = vrot.slane %v1786_v61, 1  ;;  %v1843_v38 = vmul.f32 %v1666_v58, %v5218_v33 }
 0x19a   : > { %v1942_v45 = vadd.f32 %v1941_v24, %v1940_v21  ;;  %v1803_v42 = vsel %vm271_vm0, %v1759_v54, 0.0  ;;  %v1743_v47 = vsel %vm342_vm4, %v1710_v39, %v6058_v41  ;;  %v2019_v49 = vrot.slane %v2018_v34, 2 }
 0x19b   : > { %v1727_v9 = vadd.f32 %v1726_v25, %v1725_v60  ;;  %v1804_v40 = vrot.slane %v1803_v42, 4  ;;  %v1865_v51 = vrot.slane %v1864_v48, 1  ;;  %v1881_v37 = vsel %vm271_vm0, %v1843_v38, 0.0 }
 0x19c   : > { %v1927_v57 = vmul.f32 %v1666_v58, %v5211_v26  ;;  %v2011_v1 = vmul.f32 %v1666_v58, %v5147_v13  ;;  %v1943_v23 = vrot.slane %v1942_v45, 1  ;;  %v2020_v53 = vadd.f32 %v2019_v49, %v2018_v34 }
 0x19d   : > { %v1728_v52 = vrot.slane %v1727_v9, 2  ;;  %v1805_v22 = vadd.f32 %v1804_v40, %v1803_v42  ;;  %v6129_v12 = vadd.f32 %v1787_v59, %v1786_v61  ;;  %v1882_v3 = vrot.slane %v1881_v37, 4 }
 0x19e   : > { %v1959_v41 = vsel %vm271_vm0, %v1927_v57, 0.0  ;;  %v2037_v62 = vsel %vm271_vm0, %v2011_v1, 0.0  ;;  %v2021_v36 = vrot.slane %v2020_v53, 1  ;;  %v6133_v43 = vadd.f32 %v1865_v51, %v1864_v48 }
 0x19f   : > { %v1729_v20 = vadd.f32 %v1728_v52, %v1727_v9  ;;  %v1806_v6 = vrot.slane %v1805_v22, 2  ;;  %v1960_v0 = vrot.slane %v1959_v41, 4  ;;  %v1883_v56 = vadd.f32 %v1882_v3, %v1881_v37 }
 0x1a0   : > { %v2038_v58 = vrot.slane %v2037_v62, 4  ;;  %v1590_v10 = vmul.f32 %v1581_v8, %v5300_v18  ;;  %v6136_v28 = vadd.f32 %v1943_v23, %v1942_v45  ;;  %v1674_v63 = vmul.f32 %v1581_v8, %v5298_v17 }
 0x1a1   : > { %v1730_v31 = vrot.slane %v1729_v20, 1  ;;  %v1807_v19 = vadd.f32 %v1806_v6, %v1805_v22  ;;  %v1961_v44 = vadd.f32 %v1960_v0, %v1959_v41  ;;  %v1884_v61 = vrot.slane %v1883_v56, 2 }
 0x1a2   : > { %v2039_v21 = vadd.f32 %v2038_v58, %v2037_v62  ;;  %v1640_v16 = vsel %vm271_vm0, %v1590_v10, 0.0  ;;  %v6140_v39 = vadd.f32 %v2021_v36, %v2020_v53  ;;  %v1660_v24 = vsel %vm346_vm6, %v6089_v35, %v1659_v32  ;;  %v1836_v62 = vpop.permute.xlu1 %1835 }
 0x1a3   : > { %v1962_v15 = vrot.slane %v1961_v44, 2  ;;  %v1641_v14 = vrot.slane %v1640_v16, 4  ;;  %v1808_v60 = vrot.slane %v1807_v19, 1  ;;  %v1885_v54 = vadd.f32 %v1884_v61, %v1883_v56 }
 0x1a4   : > { %v2040_v48 = vrot.slane %v2039_v21, 2  ;;  %v1718_v34 = vsel %vm271_vm0, %v1674_v63, 0.0  ;;  %v1731_v25 = vadd.f32 %v1730_v31, %v1729_v20  ;;  %v1758_v9 = vmul.f32 %v1581_v8, %v5218_v33 }
 0x1a5   : > { %v1963_v59 = vadd.f32 %v1962_v15, %v1961_v44  ;;  %v1642_v45 = vadd.f32 %v1641_v14, %v1640_v16  ;;  %v1719_v42 = vrot.slane %v1718_v34, 4  ;;  %v1886_v38 = vrot.slane %v1885_v54, 1 }
 0x1a6   : > { %v2041_v49 = vadd.f32 %v2040_v48, %v2039_v21  ;;  %v1842_v40 = vmul.f32 %v1581_v8, %v5211_v26  ;;  %v1744_v35 = vsel %vm344_vm5, %v6091_v2, %v1743_v47  ;;  %v1926_v32 = vmul.f32 %v1581_v8, %v5147_v13 }
 0x1a7   : > { %v1643_v51 = vrot.slane %v1642_v45, 2  ;;  %v1720_v37 = vadd.f32 %v1719_v42, %v1718_v34  ;;  %v6150_v57 = vadd.f32 %v1808_v60, %v1807_v19  ;;  %v1964_v1 = vrot.slane %v1963_v59, 1 }
 0x1a8   : > { %v1796_v23 = vsel %vm271_vm0, %v1758_v9, 0.0  ;;  %v1874_v53 = vsel %vm271_vm0, %v1842_v40, 0.0  ;;  %v6154_v52 = vadd.f32 %v1886_v38, %v1885_v54  ;;  %v2042_v36 = vrot.slane %v2041_v49, 1 }
 0x1a9   : > { %v1644_v22 = vadd.f32 %v1643_v51, %v1642_v45  ;;  %v1721_v3 = vrot.slane %v1720_v37, 2  ;;  %v1797_v41 = vrot.slane %v1796_v23, 4  ;;  %v1875_v20 = vrot.slane %v1874_v53, 4 }
 0x1aa   : > { %v1952_v6 = vsel %vm271_vm0, %v1926_v32, 0.0  ;;  %v2010_v2 = vmul.f32 %v1581_v8, %v5133_v7  ;;  %v1845_v19 = vmul.f32 %v1836_v62, %v5300_v18  ;;  %v1929_v44 = vmul.f32 %v1836_v62, %v5298_v17 }
 0x1ab   : > { %v1645_v47 = vrot.slane %v1644_v22, 1  ;;  %v1722_v0 = vadd.f32 %v1721_v3, %v1720_v37  ;;  %v1798_v56 = vadd.f32 %v1797_v41, %v1796_v23  ;;  %v1953_v58 = vrot.slane %v1952_v6, 4  ;;  %v1751_v41 = vpop.permute.xlu0 %1750 }
 0x1ac   : > { %v1876_v10 = vadd.f32 %v1875_v20, %v1874_v53  ;;  %v2030_v31 = vsel %vm271_vm0, %v2010_v2, 0.0  ;;  %v1895_v8 = vsel %vm271_vm0, %v1845_v19, 0.0  ;;  %v1973_v60 = vsel %vm271_vm0, %v1929_v44, 0.0 }
 0x1ad   : > { %v1646_v61 = vadd.f32 %v1645_v47, %v1644_v22  ;;  %v1723_v21 = vrot.slane %v1722_v0, 1  ;;  %v1799_v16 = vrot.slane %v1798_v56, 2  ;;  %v1954_v63 = vadd.f32 %v1953_v58, %v1952_v6 }
 0x1ae   : > { %v1877_v15 = vrot.slane %v1876_v10, 2  ;;  %v2031_v14 = vrot.slane %v2030_v31, 4  ;;  %v1896_v9 = vrot.slane %v1895_v8, 4  ;;  %v1974_v40 = vrot.slane %v1973_v60, 4 }
 0x1af   : > { %v1661_v54 = vsel %vm348_vm7, %v1646_v61, %v1660_v24  ;;  %v1724_v48 = vadd.f32 %v1723_v21, %v1722_v0  ;;  %v1800_v34 = vadd.f32 %v1799_v16, %v1798_v56  ;;  %v1955_v45 = vrot.slane %v1954_v63, 2 }
 0x1b0   : > { %4695 = vst.msk [vmem:[%s5411_s8 + $0x48] sm:$0xff] %vm271_vm0, %v1661_v54  ;;  %v1878_v42 = vadd.f32 %v1877_v15, %v1876_v10  ;;  %v2032_v38 = vadd.f32 %v2031_v14, %v2030_v31  ;;  %v2013_v23 = vmul.f32 %v1836_v62, %v5218_v33  ;;  %v1897_v3 = vadd.f32 %v1896_v9, %v1895_v8 }
 0x1b1   : > { %v1745_v51 = vsel %vm346_vm6, %v1724_v48, %v1744_v35  ;;  %v1801_v37 = vrot.slane %v1800_v34, 1  ;;  %v1956_v32 = vadd.f32 %v1955_v45, %v1954_v63  ;;  %v1965_v20 = vadd.f32 %v1964_v1, %v1963_v59 }
 0x1b2   : > { %v1746_v53 = vsel %vm348_vm7, %v1731_v25, %v1745_v51  ;;  %v1879_v22 = vrot.slane %v1878_v42, 1  ;;  %v2033_v24 = vrot.slane %v2032_v38, 2  ;;  %v6169_v6 = vadd.f32 %v2042_v36, %v2041_v49 }
 0x1b3   : > { %4696 = vst.msk [vmem:[%s5411_s8 + $0x80] sm:$0xff] %vm271_vm0, %v1746_v53  ;;  %v1975_v2 = vadd.f32 %v1974_v40, %v1973_v60  ;;  %v2051_v47 = vsel %vm271_vm0, %v2013_v23, 0.0  ;;  %v1802_v0 = vadd.f32 %v1801_v37, %v1800_v34  ;;  %v1898_v56 = vrot.slane %v1897_v3, 2  ;;  %v2006_v37 = vpop.permute.xlu1 %2005 }
 0x1b4   : > { %v2034_v35 = vadd.f32 %v2033_v24, %v2032_v38  ;;  %v2052_v58 = vrot.slane %v2051_v47, 4  ;;  %v1957_v10 = vrot.slane %v1956_v32, 1  ;;  %v1760_v25 = vmul.f32 %v1751_v41, %v5300_v18 }
 0x1b5   : > { %v1976_v62 = vrot.slane %v1975_v2, 2  ;;  %v1827_v31 = vsel %vm340_vm3, %v6129_v12, %v6063_v55  ;;  %v1880_v59 = vadd.f32 %v1879_v22, %v1878_v42  ;;  %v1899_v1 = vadd.f32 %v1898_v56, %v1897_v3 }
 0x1b6   : > { %v2035_v49 = vrot.slane %v2034_v35, 1  ;;  %v2053_v36 = vadd.f32 %v2052_v58, %v2051_v47  ;;  %v1810_v44 = vsel %vm271_vm0, %v1760_v25, 0.0  ;;  %v1828_v61 = vsel %vm342_vm4, %v6093_v50, %v1827_v31 }
 0x1b7   : > { %v1977_v19 = vadd.f32 %v1976_v62, %v1975_v2  ;;  %v1844_v21 = vmul.f32 %v1751_v41, %v5298_v17  ;;  %v1900_v16 = vrot.slane %v1899_v1, 1  ;;  %v1811_v15 = vrot.slane %v1810_v44, 4 }
 0x1b8   : > { %v2054_v63 = vrot.slane %v2053_v36, 2  ;;  %v1829_v14 = vsel %vm344_vm5, %v1802_v0, %v1828_v61  ;;  %v1958_v8 = vadd.f32 %v1957_v10, %v1956_v32  ;;  %v1911_v12 = vsel %vm338_vm2, %v6133_v43, %v6084_v30 }
 0x1b9   : > { %v1978_v60 = vrot.slane %v1977_v19, 1  ;;  %v1888_v55 = vsel %vm271_vm0, %v1844_v21, 0.0  ;;  %v2036_v54 = vadd.f32 %v2035_v49, %v2034_v35  ;;  %v1812_v34 = vadd.f32 %v1811_v15, %v1810_v44 }
 0x1ba   : > { %v6187_v48 = vadd.f32 %v2054_v63, %v2053_v36  ;;  %v1889_v50 = vrot.slane %v1888_v55, 4  ;;  %v1830_v45 = vsel %vm346_vm6, %v6150_v57, %v1829_v14  ;;  %v1912_v42 = vsel %vm340_vm3, %v6096_v46, %v1911_v12 }
 0x1bb   : > { %v1928_v38 = vmul.f32 %v1751_v41, %v5218_v33  ;;  %v1995_v9 = vsel %vm336_vm1, %v6136_v28, %v6035_v11  ;;  %v1901_v40 = vadd.f32 %v1900_v16, %v1899_v1  ;;  %v1813_v51 = vrot.slane %v1812_v34, 2  ;;  %v1921_v28 = vpop.permute.xlu0 %1920  ;;  %v2093_v1 = vpop.permute.xlu1 %2092 }
 0x1bc   : > { %v1890_v30 = vadd.f32 %v1889_v50, %v1888_v55  ;;  %v1913_v43 = vsel %vm342_vm4, %v1880_v59, %v1912_v42  ;;  %v6198_v32 = vadd.f32 %v1978_v60, %v1977_v19  ;;  %v2056_v23 = vrot.slane %v6187_v48, 1 }
 0x1bd   : > { %v1966_v57 = vsel %vm271_vm0, %v1928_v38, 0.0  ;;  %v2012_v46 = vmul.f32 %v1751_v41, %v5211_v26  ;;  %v1814_v53 = vadd.f32 %v1813_v51, %v1812_v34  ;;  %v1996_v11 = vsel %vm338_vm2, %v6114_v27, %v1995_v9 }
 0x1be   : > { %v1891_v22 = vrot.slane %v1890_v30, 2  ;;  %v1967_v24 = vrot.slane %v1966_v57, 4  ;;  %v1914_v3 = vsel %vm344_vm5, %v6154_v52, %v1913_v43  ;;  %v1997_v2 = vsel %vm340_vm3, %v1958_v8, %v1996_v11 }
 0x1bf   : > { %v2044_v47 = vsel %vm271_vm0, %v2012_v46, 0.0  ;;  %v2015_v0 = vmul.f32 %v2006_v37, %v5300_v18  ;;  %v1815_v35 = vrot.slane %v1814_v53, 1  ;;  %v2080_v41 = vsel %vm336_vm1, %v6116_v29, %v6140_v39  ;;  %v2097_v11 = vpop.permute.xlu1 %2096 }
 0x1c0   : > { %v1892_v56 = vadd.f32 %v1891_v22, %v1890_v30  ;;  %v1968_v58 = vadd.f32 %v1967_v24, %v1966_v57  ;;  %v1998_v10 = vsel %vm342_vm4, %v1965_v20, %v1997_v2  ;;  %v2045_v27 = vrot.slane %v2044_v47, 4 }
 0x1c1   : > { %v2065_v62 = vsel %vm271_vm0, %v2015_v0, 0.0  ;;  %v1930_v52 = vmul.f32 %v1921_v28, %v5300_v18  ;;  %v1816_v25 = vadd.f32 %v1815_v35, %v1814_v53  ;;  %v2081_v49 = vsel %vm338_vm2, %v2036_v54, %v2080_v41  ;;  %v2091_v54 = vpop.permute.xlu0 %2090 }
 0x1c2   : > { %v1893_v31 = vrot.slane %v1892_v56, 1  ;;  %v1969_v59 = vrot.slane %v1968_v58, 2  ;;  %v2046_v36 = vadd.f32 %v2045_v27, %v2044_v47  ;;  %v2066_v19 = vrot.slane %v2065_v62, 4 }
 0x1c3   : > { %v1980_v44 = vsel %vm271_vm0, %v1930_v52, 0.0  ;;  %v2014_v29 = vmul.f32 %v1921_v28, %v5298_v17  ;;  %v1831_v39 = vsel %vm348_vm7, %v1816_v25, %v1830_v45  ;;  %v2115_v14 = vmul.f32 %v2093_v1, %v5128_v5 }
 0x1c4   : > { %v1894_v20 = vadd.f32 %v1893_v31, %v1892_v56  ;;  %v1970_v61 = vadd.f32 %v1969_v59, %v1968_v58  ;;  %v1981_v21 = vrot.slane %v1980_v44, 4  ;;  %4697 = vst.msk [vmem:[%s5411_s8 + $0xb8] sm:$0xff] %vm271_vm0, %v1831_v39  ;;  %v2047_v16 = vrot.slane %v2046_v36, 2 }
 0x1c5   : > { %v2067_v63 = vadd.f32 %v2066_v19, %v2065_v62  ;;  %v2058_v15 = vsel %vm271_vm0, %v2014_v29, 0.0  ;;  %v2129_v42 = vsel %vm271_vm0, %v2115_v14, 0.0  ;;  %v2199_v57 = vmul.f32 %v2093_v1, %v5126_v4 }
 0x1c6   : > { %v1915_v8 = vsel %vm346_vm6, %v1894_v20, %v1914_v3  ;;  %v1971_v60 = vrot.slane %v1970_v61, 1  ;;  %v1982_v55 = vadd.f32 %v1981_v21, %v1980_v44  ;;  %v2059_v12 = vrot.slane %v2058_v15, 4 }
 0x1c7   : > { %v1916_v34 = vsel %vm348_vm7, %v1901_v40, %v1915_v8  ;;  %v2048_v50 = vadd.f32 %v2047_v16, %v2046_v36  ;;  %v2068_v45 = vrot.slane %v2067_v63, 2  ;;  %v2130_v30 = vrot.slane %v2129_v42, 4 }
 0x1c8   : > { %4698 = vst.msk [vmem:[%s5411_s8 + $0xf0] sm:$0xff] %vm271_vm0, %v1916_v34  ;;  %v1972_v38 = vadd.f32 %v1971_v60, %v1970_v61  ;;  %v1983_v9 = vrot.slane %v1982_v55, 2  ;;  %v2060_v51 = vadd.f32 %v2059_v12, %v2058_v15  ;;  %v2114_v46 = vmul.f32 %v2091_v54, %v5126_v4 }
 0x1c9   : > { %v2049_v43 = vrot.slane %v2048_v50, 1  ;;  %v2069_v37 = vadd.f32 %v2068_v45, %v2067_v63  ;;  %v2131_v24 = vadd.f32 %v2130_v30, %v2129_v42  ;;  %v2057_v28 = vadd.f32 %v2056_v23, %v6187_v48  ;;  %v2095_v63 = vpop.permute.xlu0 %2094 }
 0x1ca   : > { %v1999_v53 = vsel %vm344_vm5, %v1972_v38, %v1998_v10  ;;  %v1984_v22 = vadd.f32 %v1983_v9, %v1982_v55  ;;  %v2061_v40 = vrot.slane %v2060_v51, 2  ;;  %v2207_v47 = vsel %vm271_vm0, %v2199_v57, 0.0 }
 0x1cb   : > { %v2050_v3 = vadd.f32 %v2049_v43, %v2048_v50  ;;  %v2070_v2 = vrot.slane %v2069_v37, 1  ;;  %v2082_v0 = vsel %vm340_vm3, %v6169_v6, %v2081_v49  ;;  %v2208_v58 = vrot.slane %v2207_v47, 4 }
 0x1cc   : > { %v1985_v35 = vrot.slane %v1984_v22, 1  ;;  %v2062_v56 = vadd.f32 %v2061_v40, %v2060_v51  ;;  %v2000_v41 = vsel %vm346_vm6, %v6198_v32, %v1999_v53  ;;  %v2132_v10 = vrot.slane %v2131_v24, 2 }
 0x1cd   : > { %v2122_v27 = vsel %vm271_vm0, %v2114_v46, 0.0  ;;  %v2117_v62 = vmul.f32 %v2097_v11, %v5147_v13  ;;  %v2083_v48 = vsel %vm342_vm4, %v2050_v3, %v2082_v0  ;;  %v2071_v23 = vadd.f32 %v2070_v2, %v2069_v37  ;;  %v2101_v2 = vpop.permute.xlu1 %2100 }
 0x1ce   : > { %v1986_v52 = vadd.f32 %v1985_v35, %v1984_v22  ;;  %v2063_v25 = vrot.slane %v2062_v56, 1  ;;  %v2209_v31 = vadd.f32 %v2208_v58, %v2207_v47  ;;  %v2123_v59 = vrot.slane %v2122_v27, 4 }
 0x1cf   : > { %v2143_v6 = vsel %vm271_vm0, %v2117_v62, 0.0  ;;  %v2201_v49 = vmul.f32 %v2097_v11, %v5133_v7  ;;  %v2084_v19 = vsel %vm344_vm5, %v2057_v28, %v2083_v48  ;;  %v2285_v39 = vmul.f32 %v2097_v11, %v5128_v5 }
 0x1d0   : > { %v2001_v1 = vsel %vm348_vm7, %v1986_v52, %v2000_v41  ;;  %v2064_v32 = vadd.f32 %v2063_v25, %v2062_v56  ;;  %v2144_v36 = vrot.slane %v2143_v6, 4  ;;  %v2124_v44 = vadd.f32 %v2123_v59, %v2122_v27 }
 0x1d1   : > { %4699 = vst.msk [vmem:[%s5411_s8 + $0x128] sm:$0xff] %vm271_vm0, %v2001_v1  ;;  %v2221_v29 = vsel %vm271_vm0, %v2201_v49, 0.0  ;;  %v2133_v61 = vadd.f32 %v2132_v10, %v2131_v24  ;;  %v2210_v14 = vrot.slane %v2209_v31, 2  ;;  %v2299_v8 = vsel %vm271_vm0, %v2285_v39, 0.0 }
 0x1d2   : > { %v2085_v20 = vsel %vm346_vm6, %v2064_v32, %v2084_v19  ;;  %v2145_v21 = vadd.f32 %v2144_v36, %v2143_v6  ;;  %v2222_v16 = vrot.slane %v2221_v29, 4  ;;  %v2125_v60 = vrot.slane %v2124_v44, 2 }
 0x1d3   : > { %v2086_v15 = vsel %vm348_vm7, %v2071_v23, %v2085_v20  ;;  %v2300_v12 = vrot.slane %v2299_v8, 4  ;;  %v2369_v54 = vmul.f32 %v2097_v11, %v5126_v4  ;;  %v2116_v50 = vmul.f32 %v2095_v63, %v5133_v7 }
 0x1d4   : > { %4700 = vst.msk [vmem:[%s5411_s8 + $0x160] sm:$0xff] %vm271_vm0, %v2086_v15  ;;  %v2146_v55 = vrot.slane %v2145_v21, 2  ;;  %v2223_v34 = vadd.f32 %v2222_v16, %v2221_v29  ;;  %v2200_v45 = vmul.f32 %v2095_v63, %v5128_v5  ;;  %v2134_v42 = vrot.slane %v2133_v61, 1 }
 0x1d5   : > { %v2301_v38 = vadd.f32 %v2300_v12, %v2299_v8  ;;  %v2377_v9 = vsel %vm271_vm0, %v2369_v54, 0.0  ;;  %v6258_v51 = vadd.f32 %v2210_v14, %v2209_v31  ;;  %v2136_v43 = vsel %vm271_vm0, %v2116_v50, 0.0 }
 0x1d6   : > { %v2378_v30 = vrot.slane %v2377_v9, 4  ;;  %v2126_v37 = vadd.f32 %v2125_v60, %v2124_v44  ;;  %v2147_v57 = vadd.f32 %v2146_v55, %v2145_v21  ;;  %v2137_v46 = vrot.slane %v2136_v43, 4 }
 0x1d7   : > { %v2224_v53 = vrot.slane %v2223_v34, 2  ;;  %v2214_v40 = vsel %vm271_vm0, %v2200_v45, 0.0  ;;  %v2284_v24 = vmul.f32 %v2095_v63, %v5126_v4  ;;  %v2135_v11 = vadd.f32 %v2134_v42, %v2133_v61 }
 0x1d8   : > { %v2379_v22 = vadd.f32 %v2378_v30, %v2377_v9  ;;  %v2302_v28 = vrot.slane %v2301_v38, 2  ;;  %v2138_v3 = vadd.f32 %v2137_v46, %v2136_v43  ;;  %v2212_v47 = vrot.slane %v6258_v51, 1 }
 0x1d9   : > { %v2215_v35 = vrot.slane %v2214_v40, 4  ;;  %v2292_v56 = vsel %vm271_vm0, %v2284_v24, 0.0  ;;  %v2127_v58 = vrot.slane %v2126_v37, 1  ;;  %v2148_v41 = vrot.slane %v2147_v57, 1 }
 0x1da   : > { %v2380_v0 = vrot.slane %v2379_v22, 2  ;;  %v2139_v10 = vrot.slane %v2138_v3, 2  ;;  %v2293_v27 = vrot.slane %v2292_v56, 4  ;;  %v2225_v62 = vadd.f32 %v2224_v53, %v2223_v34 }
 0x1db   : > { %v2216_v48 = vadd.f32 %v2215_v35, %v2214_v40  ;;  %v2119_v23 = vmul.f32 %v2101_v2, %v5218_v33  ;;  %v2203_v52 = vmul.f32 %v2101_v2, %v5211_v26  ;;  %v2303_v25 = vadd.f32 %v2302_v28, %v2301_v38 }
 0x1dc   : > { %v2140_v31 = vadd.f32 %v2139_v10, %v2138_v3  ;;  %v2294_v59 = vadd.f32 %v2293_v27, %v2292_v56  ;;  %v2287_v6 = vmul.f32 %v2101_v2, %v5147_v13  ;;  %v2381_v49 = vadd.f32 %v2380_v0, %v2379_v22  ;;  %v2099_v0 = vpop.permute.xlu0 %2098 }
 0x1dd   : > { %v2217_v1 = vrot.slane %v2216_v48, 2  ;;  %v2157_v32 = vsel %vm271_vm0, %v2119_v23, 0.0  ;;  %v2235_v36 = vsel %vm271_vm0, %v2203_v52, 0.0  ;;  %v2128_v20 = vadd.f32 %v2127_v58, %v2126_v37 }
 0x1de   : > { %v2141_v19 = vrot.slane %v2140_v31, 1  ;;  %v2295_v44 = vrot.slane %v2294_v59, 2  ;;  %v2158_v29 = vrot.slane %v2157_v32, 4  ;;  %v2236_v39 = vrot.slane %v2235_v36, 4 }
 0x1df   : > { %v2218_v61 = vadd.f32 %v2217_v1, %v2216_v48  ;;  %v2313_v21 = vsel %vm271_vm0, %v2287_v6, 0.0  ;;  %v2371_v16 = vmul.f32 %v2101_v2, %v5133_v7  ;;  %v2455_v54 = vmul.f32 %v2101_v2, %v5128_v5 }
 0x1e0   : > { %v2142_v63 = vadd.f32 %v2141_v19, %v2140_v31  ;;  %v2296_v15 = vadd.f32 %v2295_v44, %v2294_v59  ;;  %v2159_v14 = vadd.f32 %v2158_v29, %v2157_v32  ;;  %v2237_v8 = vadd.f32 %v2236_v39, %v2235_v36 }
 0x1e1   : > { %v2219_v60 = vrot.slane %v2218_v61, 1  ;;  %v2314_v55 = vrot.slane %v2313_v21, 4  ;;  %v2391_v12 = vsel %vm271_vm0, %v2371_v16, 0.0  ;;  %v2149_v34 = vadd.f32 %v2148_v41, %v2147_v57 }
 0x1e2   : > { %v2226_v50 = vrot.slane %v2225_v62, 1  ;;  %v2304_v45 = vrot.slane %v2303_v25, 1  ;;  %v2382_v42 = vrot.slane %v2381_v49, 1  ;;  %v2186_v38 = vsel %vm336_vm1, %v2135_v11, %v2128_v20 }
 0x1e3   : > { %v2160_v9 = vrot.slane %v2159_v14, 2  ;;  %v2315_v30 = vadd.f32 %v2314_v55, %v2313_v21  ;;  %v2392_v43 = vrot.slane %v2391_v12, 4  ;;  %v2187_v37 = vsel %vm338_vm2, %v2142_v63, %v2186_v38 }
 0x1e4   : > { %v2297_v46 = vrot.slane %v2296_v15, 1  ;;  %v2238_v53 = vrot.slane %v2237_v8, 2  ;;  %v2469_v22 = vsel %vm271_vm0, %v2455_v54, 0.0  ;;  %v2220_v40 = vadd.f32 %v2219_v60, %v2218_v61 }
 0x1e5   : > { %v2316_v24 = vrot.slane %v2315_v30, 2  ;;  %v2393_v28 = vadd.f32 %v2392_v43, %v2391_v12  ;;  %v2470_v3 = vrot.slane %v2469_v22, 4  ;;  %v2213_v57 = vadd.f32 %v2212_v47, %v6258_v51 }
 0x1e6   : > { %v6278_v35 = vadd.f32 %v2226_v50, %v2225_v62  ;;  %v6280_v56 = vadd.f32 %v2304_v45, %v2303_v25  ;;  %v6282_v11 = vadd.f32 %v2382_v42, %v2381_v49  ;;  %v6284_v58 = vadd.f32 %v2160_v9, %v2159_v14 }
 0x1e7   : > { %v2394_v41 = vrot.slane %v2393_v28, 2  ;;  %v2471_v10 = vadd.f32 %v2470_v3, %v2469_v22  ;;  %v2539_v27 = vmul.f32 %v2101_v2, %v5126_v4  ;;  %v6288_v48 = vsel %vm340_vm3, %v2149_v34, %v2187_v37 }
 0x1e8   : > { %v2298_v23 = vadd.f32 %v2297_v46, %v2296_v15  ;;  %v2118_v52 = vmul.f32 %v2099_v0, %v5211_v26  ;;  %v2202_v51 = vmul.f32 %v2099_v0, %v5147_v13  ;;  %v2271_v47 = vsel %vm336_vm1, %v2220_v40, %v2213_v57  ;;  %v6303_v15 = vpop.permute.xlu1 %2104 }
 0x1e9   : > { %v2239_v62 = vadd.f32 %v2238_v53, %v2237_v8  ;;  %v6293_v25 = vadd.f32 %v2316_v24, %v2315_v30  ;;  %v2547_v31 = vsel %vm271_vm0, %v2539_v27, 0.0  ;;  %v2286_v49 = vmul.f32 %v2099_v0, %v5133_v7 }
 0x1ea   : > { %v2548_v59 = vrot.slane %v2547_v31, 4  ;;  %v2150_v6 = vsel %vm271_vm0, %v2118_v52, 0.0  ;;  %v2228_v2 = vsel %vm271_vm0, %v2202_v51, 0.0  ;;  %v2162_v1 = vrot.slane %v6284_v58, 1 }
 0x1eb   : > { %v2395_v32 = vadd.f32 %v2394_v41, %v2393_v28  ;;  %v2472_v36 = vrot.slane %v2471_v10, 2  ;;  %v2151_v19 = vrot.slane %v2150_v6, 4  ;;  %v2229_v29 = vrot.slane %v2228_v2, 4 }
 0x1ec   : > { %v2549_v44 = vadd.f32 %v2548_v59, %v2547_v31  ;;  %v2306_v39 = vsel %vm271_vm0, %v2286_v49, 0.0  ;;  %v2370_v20 = vmul.f32 %v2099_v0, %v5128_v5  ;;  %v2240_v61 = vrot.slane %v2239_v62, 1 }
 0x1ed   : > { %v2318_v21 = vrot.slane %v6293_v25, 1  ;;  %v2152_v16 = vadd.f32 %v2151_v19, %v2150_v6  ;;  %v2307_v63 = vrot.slane %v2306_v39, 4  ;;  %v2230_v8 = vadd.f32 %v2229_v29, %v2228_v2 }
 0x1ee   : > { %v2550_v14 = vrot.slane %v2549_v44, 2  ;;  %v2384_v60 = vsel %vm271_vm0, %v2370_v20, 0.0  ;;  %v2454_v55 = vmul.f32 %v2099_v0, %v5126_v4  ;;  %v2396_v12 = vrot.slane %v2395_v32, 1 }
 0x1ef   : > { %v2153_v54 = vrot.slane %v2152_v16, 2  ;;  %v2308_v34 = vadd.f32 %v2307_v63, %v2306_v39  ;;  %v2385_v50 = vrot.slane %v2384_v60, 4  ;;  %v2473_v45 = vadd.f32 %v2472_v36, %v2471_v10 }
 0x1f0   : > { %v2231_v42 = vrot.slane %v2230_v8, 2  ;;  %v2462_v38 = vsel %vm271_vm0, %v2454_v55, 0.0  ;;  %v2121_v9 = vmul.f32 %v6303_v15, %v5300_v18  ;;  %v2551_v53 = vadd.f32 %v2550_v14, %v2549_v44 }
 0x1f1   : > { %v2154_v30 = vadd.f32 %v2153_v54, %v2152_v16  ;;  %v2309_v43 = vrot.slane %v2308_v34, 2  ;;  %v2386_v37 = vadd.f32 %v2385_v50, %v2384_v60  ;;  %v2463_v46 = vrot.slane %v2462_v38, 4 }
 0x1f2   : > { %v2232_v22 = vadd.f32 %v2231_v42, %v2230_v8  ;;  %v2171_v40 = vsel %vm271_vm0, %v2121_v9, 0.0  ;;  %v2205_v24 = vmul.f32 %v6303_v15, %v5298_v17  ;;  %v2474_v41 = vrot.slane %v2473_v45, 1 }
 0x1f3   : > { %v2155_v28 = vrot.slane %v2154_v30, 1  ;;  %v2310_v3 = vadd.f32 %v2309_v43, %v2308_v34  ;;  %v2387_v0 = vrot.slane %v2386_v37, 2  ;;  %v2464_v57 = vadd.f32 %v2463_v46, %v2462_v38  ;;  %v2103_v38 = vpop.permute.xlu0 %2102 }
 0x1f4   : > { %v2233_v10 = vrot.slane %v2232_v22, 1  ;;  %v2172_v27 = vrot.slane %v2171_v40, 4  ;;  %v2249_v52 = vsel %vm271_vm0, %v2205_v24, 0.0  ;;  %v2289_v19 = vmul.f32 %v6303_v15, %v5218_v33 }
 0x1f5   : > { %v2156_v51 = vadd.f32 %v2155_v28, %v2154_v30  ;;  %v2311_v31 = vrot.slane %v2310_v3, 1  ;;  %v2388_v59 = vadd.f32 %v2387_v0, %v2386_v37  ;;  %v2465_v6 = vrot.slane %v2464_v57, 2 }
 0x1f6   : > { %v2234_v2 = vadd.f32 %v2233_v10, %v2232_v22  ;;  %v2173_v49 = vadd.f32 %v2172_v27, %v2171_v40  ;;  %v2250_v36 = vrot.slane %v2249_v52, 4  ;;  %v2272_v44 = vsel %vm338_vm2, %v6278_v35, %v2271_v47 }
 0x1f7   : > { %v2356_v29 = vsel %vm336_vm1, %v6280_v56, %v2298_v23  ;;  %v2163_v39 = vadd.f32 %v2162_v1, %v6284_v58  ;;  %v2552_v20 = vrot.slane %v2551_v53, 1  ;;  %v2241_v16 = vadd.f32 %v2240_v61, %v2239_v62 }
 0x1f8   : > { %v2189_v63 = vsel %vm342_vm4, %v2156_v51, %v6288_v48  ;;  %v2312_v14 = vadd.f32 %v2311_v31, %v2310_v3  ;;  %v2251_v8 = vadd.f32 %v2250_v36, %v2249_v52  ;;  %v2319_v60 = vadd.f32 %v2318_v21, %v6293_v25 }
 0x1f9   : > { %v2397_v55 = vadd.f32 %v2396_v12, %v2395_v32  ;;  %v2273_v54 = vsel %vm340_vm3, %v2234_v2, %v2272_v44  ;;  %v2389_v34 = vrot.slane %v2388_v59, 1  ;;  %v2475_v50 = vadd.f32 %v2474_v41, %v2473_v45 }
 0x1fa   : > { %v2466_v35 = vadd.f32 %v2465_v6, %v2464_v57  ;;  %v2174_v47 = vrot.slane %v2173_v49, 2  ;;  %v2327_v56 = vsel %vm271_vm0, %v2289_v19, 0.0  ;;  %v6326_v23 = vadd.f32 %v2552_v20, %v2551_v53 }
 0x1fb   : > { %v6329_v58 = vsel %vm344_vm5, %v2163_v39, %v2189_v63  ;;  %v2328_v62 = vrot.slane %v2327_v56, 4  ;;  %v2373_v48 = vmul.f32 %v6303_v15, %v5211_v26  ;;  %v6334_v25 = vsel %vm342_vm4, %v2241_v16, %v2273_v54 }
 0x1fc   : > { %v2357_v1 = vsel %vm338_vm2, %v2312_v14, %v2356_v29  ;;  %v2252_v32 = vrot.slane %v2251_v8, 2  ;;  %v2457_v61 = vmul.f32 %v6303_v15, %v5147_v13  ;;  %v2390_v21 = vadd.f32 %v2389_v34, %v2388_v59 }
 0x1fd   : > { %v2329_v12 = vadd.f32 %v2328_v62, %v2327_v56  ;;  %v2405_v45 = vsel %vm271_vm0, %v2373_v48, 0.0  ;;  %v2541_v42 = vmul.f32 %v6303_v15, %v5133_v7  ;;  %v2467_v9 = vrot.slane %v2466_v35, 1 }
 0x1fe   : > { %v2175_v30 = vadd.f32 %v2174_v47, %v2173_v49  ;;  %v2406_v43 = vrot.slane %v2405_v45, 4  ;;  %v2483_v37 = vsel %vm271_vm0, %v2457_v61, 0.0  ;;  %v2625_v40 = vmul.f32 %v6303_v15, %v5128_v5 }
 0x1ff   : > { %v2330_v46 = vrot.slane %v2329_v12, 2  ;;  %v2484_v53 = vrot.slane %v2483_v37, 4  ;;  %v2561_v22 = vsel %vm271_vm0, %v2541_v42, 0.0  ;;  %v2253_v24 = vadd.f32 %v2252_v32, %v2251_v8 }
 0x200   : > { %v2407_v28 = vadd.f32 %v2406_v43, %v2405_v45  ;;  %v2562_v3 = vrot.slane %v2561_v22, 4  ;;  %v2120_v0 = vmul.f32 %v2103_v38, %v5298_v17  ;;  %v2441_v57 = vsel %vm336_vm1, %v2390_v21, %v6282_v11 }
 0x201   : > { %v2331_v41 = vadd.f32 %v2330_v46, %v2329_v12  ;;  %v2639_v10 = vsel %vm271_vm0, %v2625_v40, 0.0  ;;  %v2204_v27 = vmul.f32 %v2103_v38, %v5218_v33  ;;  %v2485_v51 = vadd.f32 %v2484_v53, %v2483_v37 }
 0x202   : > { %v2408_v52 = vrot.slane %v2407_v28, 2  ;;  %v2563_v31 = vadd.f32 %v2562_v3, %v2561_v22  ;;  %v2164_v59 = vsel %vm271_vm0, %v2120_v0, 0.0  ;;  %v6353_v15 = vsel %vm340_vm3, %v2319_v60, %v2357_v1 }
 0x203   : > { %v2468_v6 = vadd.f32 %v2467_v9, %v2466_v35  ;;  %v2165_v2 = vrot.slane %v2164_v59, 4  ;;  %v2242_v49 = vsel %vm271_vm0, %v2204_v27, 0.0  ;;  %v2176_v36 = vrot.slane %v2175_v30, 1 }
 0x204   : > { %v2254_v19 = vrot.slane %v2253_v24, 1  ;;  %v2640_v11 = vrot.slane %v2639_v10, 4  ;;  %v2243_v44 = vrot.slane %v2242_v49, 4  ;;  %v6357_v29 = vsel %vm338_vm2, %v2397_v55, %v2441_v57 }
 0x205   : > { %v2332_v39 = vrot.slane %v2331_v41, 1  ;;  %v2166_v20 = vadd.f32 %v2165_v2, %v2164_v59  ;;  %v2288_v16 = vmul.f32 %v2103_v38, %v5211_v26  ;;  %v2409_v63 = vadd.f32 %v2408_v52, %v2407_v28 }
 0x206   : > { %v2486_v14 = vrot.slane %v2485_v51, 2  ;;  %v2564_v8 = vrot.slane %v2563_v31, 2  ;;  %v2244_v60 = vadd.f32 %v2243_v44, %v2242_v49  ;;  %v6361_v54 = vsel %vm336_vm1, %v2475_v50, %v2468_v6 }
 0x207   : > { %v2167_v34 = vrot.slane %v2166_v20, 2  ;;  %v2320_v35 = vsel %vm271_vm0, %v2288_v16, 0.0  ;;  %v2372_v47 = vmul.f32 %v2103_v38, %v5147_v13  ;;  %v2177_v56 = vadd.f32 %v2176_v36, %v2175_v30 }
 0x208   : > { %v6365_v62 = vadd.f32 %v2254_v19, %v2253_v24  ;;  %v2641_v55 = vadd.f32 %v2640_v11, %v2639_v10  ;;  %v2245_v48 = vrot.slane %v2244_v60, 2  ;;  %v6367_v1 = vadd.f32 %v2332_v39, %v2331_v41  ;;  %v2282_v24 = vpop.permute.xlu1 %2281 }
 0x209   : > { %v2168_v32 = vadd.f32 %v2167_v34, %v2166_v20  ;;  %v2321_v61 = vrot.slane %v2320_v35, 4  ;;  %v2398_v21 = vsel %vm271_vm0, %v2372_v47, 0.0  ;;  %v2410_v12 = vrot.slane %v2409_v63, 1 }
 0x20a   : > { %v2487_v45 = vadd.f32 %v2486_v14, %v2485_v51  ;;  %v6370_v50 = vadd.f32 %v2564_v8, %v2563_v31  ;;  %v2399_v42 = vrot.slane %v2398_v21, 4  ;;  %v2456_v37 = vmul.f32 %v2103_v38, %v5133_v7 }
 0x20b   : > { %v2169_v9 = vrot.slane %v2168_v32, 1  ;;  %v2322_v43 = vadd.f32 %v2321_v61, %v2320_v35  ;;  %v2540_v30 = vmul.f32 %v2103_v38, %v5128_v5  ;;  %v2642_v46 = vrot.slane %v2641_v55, 2 }
 0x20c   : > { %v2246_v53 = vadd.f32 %v2245_v48, %v2244_v60  ;;  %v2400_v22 = vadd.f32 %v2399_v42, %v2398_v21  ;;  %v2624_v40 = vmul.f32 %v2103_v38, %v5126_v4  ;;  %v2476_v0 = vsel %vm271_vm0, %v2456_v37, 0.0 }
 0x20d   : > { %v2170_v28 = vadd.f32 %v2169_v9, %v2168_v32  ;;  %v2323_v3 = vrot.slane %v2322_v43, 2  ;;  %v2554_v57 = vsel %vm271_vm0, %v2540_v30, 0.0  ;;  %v6377_v41 = vadd.f32 %v2410_v12, %v2409_v63 }
 0x20e   : > { %v2488_v10 = vrot.slane %v2487_v45, 1  ;;  %v2477_v27 = vrot.slane %v2476_v0, 4  ;;  %v2555_v52 = vrot.slane %v2554_v57, 4  ;;  %v2401_v31 = vrot.slane %v2400_v22, 2 }
 0x20f   : > { %v2191_v51 = vsel %vm346_vm6, %v2170_v28, %v6329_v58  ;;  %v2632_v59 = vsel %vm271_vm0, %v2624_v40, 0.0  ;;  %v2291_v38 = vmul.f32 %v2282_v24, %v5300_v18  ;;  %v2643_v6 = vadd.f32 %v2642_v46, %v2641_v55  ;;  %v2197_v40 = vpop.permute.xlu0 %2196 }
 0x210   : > { %v2192_v2 = vsel %vm348_vm7, %v2177_v56, %v2191_v51  ;;  %v2324_v49 = vadd.f32 %v2323_v3, %v2322_v43  ;;  %v2478_v36 = vadd.f32 %v2477_v27, %v2476_v0  ;;  %v2247_v19 = vrot.slane %v2246_v53, 1 }
 0x211   : > { %4701 = vst.msk [vmem:[%s5411_s8 + $0x18] sm:$0xff] %vm271_vm0, %v2192_v2  ;;  %v2556_v11 = vadd.f32 %v2555_v52, %v2554_v57  ;;  %v2633_v44 = vrot.slane %v2632_v59, 4  ;;  %v2341_v39 = vsel %vm271_vm0, %v2291_v38, 0.0  ;;  %v2566_v20 = vrot.slane %v6370_v50, 1 }
 0x212   : > { %v2479_v58 = vrot.slane %v2478_v36, 2  ;;  %v2342_v16 = vrot.slane %v2341_v39, 4  ;;  %v2375_v63 = vmul.f32 %v2282_v24, %v5298_v17  ;;  %v2402_v14 = vadd.f32 %v2401_v31, %v2400_v22 }
 0x213   : > { %v2557_v8 = vrot.slane %v2556_v11, 2  ;;  %v2634_v60 = vadd.f32 %v2633_v44, %v2632_v59  ;;  %v2459_v34 = vmul.f32 %v2282_v24, %v5218_v33  ;;  %v2644_v35 = vrot.slane %v2643_v6, 1 }
 0x214   : > { %v2325_v47 = vrot.slane %v2324_v49, 1  ;;  %v2343_v56 = vadd.f32 %v2342_v16, %v2341_v39  ;;  %v2419_v55 = vsel %vm271_vm0, %v2375_v63, 0.0  ;;  %v2248_v48 = vadd.f32 %v2247_v19, %v2246_v53 }
 0x215   : > { %v2480_v32 = vadd.f32 %v2479_v58, %v2478_v36  ;;  %v2635_v61 = vrot.slane %v2634_v60, 2  ;;  %v2420_v21 = vrot.slane %v2419_v55, 4  ;;  %v2558_v12 = vadd.f32 %v2557_v8, %v2556_v11 }
 0x216   : > { %v2344_v42 = vrot.slane %v2343_v56, 2  ;;  %v2497_v9 = vsel %vm271_vm0, %v2459_v34, 0.0  ;;  %v2543_v43 = vmul.f32 %v2282_v24, %v5211_v26  ;;  %v2403_v37 = vrot.slane %v2402_v14, 1 }
 0x217   : > { %v2636_v30 = vadd.f32 %v2635_v61, %v2634_v60  ;;  %v2421_v46 = vadd.f32 %v2420_v21, %v2419_v55  ;;  %v2498_v22 = vrot.slane %v2497_v9, 4  ;;  %v2326_v28 = vadd.f32 %v2325_v47, %v2324_v49 }
 0x218   : > { %v2345_v3 = vadd.f32 %v2344_v42, %v2343_v56  ;;  %v2575_v0 = vsel %vm271_vm0, %v2543_v43, 0.0  ;;  %v2627_v53 = vmul.f32 %v2282_v24, %v5147_v13  ;;  %v6395_v57 = vadd.f32 %v2488_v10, %v2487_v45 }
 0x219   : > { %v2481_v27 = vrot.slane %v2480_v32, 1  ;;  %v2422_v52 = vrot.slane %v2421_v46, 2  ;;  %v2499_v51 = vadd.f32 %v2498_v22, %v2497_v9  ;;  %v6398_v31 = vadd.f32 %v2566_v20, %v6370_v50 }
 0x21a   : > { %v6400_v59 = vadd.f32 %v2644_v35, %v2643_v6  ;;  %v2559_v38 = vrot.slane %v2558_v12, 1  ;;  %v2206_v2 = vmul.f32 %v2197_v40, %v5300_v18  ;;  %v2637_v36 = vrot.slane %v2636_v30, 1 }
 0x21b   : > { %v2346_v49 = vrot.slane %v2345_v3, 1  ;;  %v2576_v19 = vrot.slane %v2575_v0, 4  ;;  %v2653_v11 = vsel %vm271_vm0, %v2627_v53, 0.0  ;;  %v2275_v45 = vsel %vm344_vm5, %v2248_v48, %v6334_v25 }
 0x21c   : > { %v2359_v24 = vsel %vm342_vm4, %v2326_v28, %v6353_v15  ;;  %v6408_v10 = vadd.f32 %v2403_v37, %v2402_v14  ;;  %v2256_v50 = vsel %vm271_vm0, %v2206_v2, 0.0  ;;  %v6411_v6 = vadd.f32 %v2481_v27, %v2480_v32 }
 0x21d   : > { %v2423_v44 = vadd.f32 %v2422_v52, %v2421_v46  ;;  %v2500_v39 = vrot.slane %v2499_v51, 2  ;;  %v2257_v20 = vrot.slane %v2256_v50, 4  ;;  %v6413_v58 = vadd.f32 %v2559_v38, %v2558_v12  ;;  %v2452_v46 = vpop.permute.xlu1 %2451 }
 0x21e   : > { %v2654_v16 = vrot.slane %v2653_v11, 4  ;;  %v2290_v63 = vmul.f32 %v2197_v40, %v5298_v17  ;;  %v2374_v8 = vmul.f32 %v2197_v40, %v5218_v33  ;;  %v6417_v25 = vadd.f32 %v2637_v36, %v2636_v30 }
 0x21f   : > { %v6419_v60 = vadd.f32 %v2346_v49, %v2345_v3  ;;  %v2577_v15 = vadd.f32 %v2576_v19, %v2575_v0  ;;  %v2258_v14 = vadd.f32 %v2257_v20, %v2256_v50  ;;  %v2276_v34 = vsel %vm346_vm6, %v6365_v62, %v2275_v45 }
 0x220   : > { %v2334_v35 = vsel %vm271_vm0, %v2290_v63, 0.0  ;;  %v2412_v47 = vsel %vm271_vm0, %v2374_v8, 0.0  ;;  %v2458_v56 = vmul.f32 %v2197_v40, %v5211_v26  ;;  %v2424_v55 = vrot.slane %v2423_v44, 1 }
 0x221   : > { %v2501_v48 = vadd.f32 %v2500_v39, %v2499_v51  ;;  %v2259_v32 = vrot.slane %v2258_v14, 2  ;;  %v2335_v61 = vrot.slane %v2334_v35, 4  ;;  %v2655_v21 = vadd.f32 %v2654_v16, %v2653_v11 }
 0x222   : > { %v2413_v12 = vrot.slane %v2412_v47, 4  ;;  %v2490_v42 = vsel %vm271_vm0, %v2458_v56, 0.0  ;;  %v2542_v9 = vmul.f32 %v2197_v40, %v5147_v13  ;;  %v2578_v43 = vrot.slane %v2577_v15, 2 }
 0x223   : > { %v2260_v37 = vadd.f32 %v2259_v32, %v2258_v14  ;;  %v2336_v30 = vadd.f32 %v2335_v61, %v2334_v35  ;;  %v2491_v62 = vrot.slane %v2490_v42, 4  ;;  %v2360_v22 = vsel %vm344_vm5, %v6367_v1, %v2359_v24 }
 0x224   : > { %v2414_v28 = vadd.f32 %v2413_v12, %v2412_v47  ;;  %v2568_v3 = vsel %vm271_vm0, %v2542_v9, 0.0  ;;  %v2626_v0 = vmul.f32 %v2197_v40, %v5133_v7  ;;  %v6432_v53 = vadd.f32 %v2424_v55, %v2423_v44 }
 0x225   : > { %v2261_v27 = vrot.slane %v2260_v37, 1  ;;  %v2337_v52 = vrot.slane %v2336_v30, 2  ;;  %v2492_v51 = vadd.f32 %v2491_v62, %v2490_v42  ;;  %v2569_v2 = vrot.slane %v2568_v3, 4 }
 0x226   : > { %v2415_v38 = vrot.slane %v2414_v28, 2  ;;  %v2646_v36 = vsel %vm271_vm0, %v2626_v0, 0.0  ;;  %v2461_v49 = vmul.f32 %v2452_v46, %v5300_v18  ;;  %v2502_v19 = vrot.slane %v2501_v48, 1 }
 0x227   : > { %v2262_v11 = vadd.f32 %v2261_v27, %v2260_v37  ;;  %v2338_v1 = vadd.f32 %v2337_v52, %v2336_v30  ;;  %v2647_v45 = vrot.slane %v2646_v36, 4  ;;  %v2656_v24 = vrot.slane %v2655_v21, 2  ;;  %v2367_v37 = vpop.permute.xlu0 %2366 }
 0x228   : > { %v2570_v50 = vadd.f32 %v2569_v2, %v2568_v3  ;;  %v2511_v40 = vsel %vm271_vm0, %v2461_v49, 0.0  ;;  %v2545_v44 = vmul.f32 %v2452_v46, %v5298_v17  ;;  %v2493_v16 = vrot.slane %v2492_v51, 2 }
 0x229   : > { %v2277_v39 = vsel %vm348_vm7, %v2262_v11, %v2276_v34  ;;  %v2339_v20 = vrot.slane %v2338_v1, 1  ;;  %v2648_v63 = vadd.f32 %v2647_v45, %v2646_v36  ;;  %v2416_v8 = vadd.f32 %v2415_v38, %v2414_v28 }
 0x22a   : > { %4702 = vst.msk [vmem:[%s5411_s8 + $0x50] sm:$0xff] %vm271_vm0, %v2277_v39  ;;  %v2571_v14 = vrot.slane %v2570_v50, 2  ;;  %v2512_v35 = vrot.slane %v2511_v40, 4  ;;  %v2589_v47 = vsel %vm271_vm0, %v2545_v44, 0.0  ;;  %v2579_v56 = vadd.f32 %v2578_v43, %v2577_v15 }
 0x22b   : > { %v2340_v55 = vadd.f32 %v2339_v20, %v2338_v1  ;;  %v2649_v32 = vrot.slane %v2648_v63, 2  ;;  %v2590_v61 = vrot.slane %v2589_v47, 4  ;;  %v6442_v12 = vadd.f32 %v2502_v19, %v2501_v48 }
 0x22c   : > { %v2657_v42 = vadd.f32 %v2656_v24, %v2655_v21  ;;  %v2513_v9 = vadd.f32 %v2512_v35, %v2511_v40  ;;  %v2629_v34 = vmul.f32 %v2452_v46, %v5218_v33  ;;  %v2494_v62 = vadd.f32 %v2493_v16, %v2492_v51 }
 0x22d   : > { %v2361_v30 = vsel %vm346_vm6, %v2340_v55, %v2360_v22  ;;  %v2572_v28 = vadd.f32 %v2571_v14, %v2570_v50  ;;  %v2591_v3 = vadd.f32 %v2590_v61, %v2589_v47  ;;  %v2417_v15 = vrot.slane %v2416_v8, 1 }
 0x22e   : > { %v2362_v0 = vsel %vm348_vm7, %v6419_v60, %v2361_v30  ;;  %v2514_v43 = vrot.slane %v2513_v9, 2  ;;  %v2667_v27 = vsel %vm271_vm0, %v2629_v34, 0.0  ;;  %v2650_v48 = vadd.f32 %v2649_v32, %v2648_v63  ;;  %v2622_v30 = vpop.permute.xlu1 %2621 }
 0x22f   : > { %4703 = vst.msk [vmem:[%s5411_s8 + $0x88] sm:$0xff] %vm271_vm0, %v2362_v0  ;;  %v2592_v21 = vrot.slane %v2591_v3, 2  ;;  %v2668_v52 = vrot.slane %v2667_v27, 4  ;;  %v2376_v46 = vmul.f32 %v2367_v37, %v5300_v18  ;;  %v2580_v38 = vrot.slane %v2579_v56, 1 }
 0x230   : > { %v2658_v2 = vrot.slane %v2657_v42, 1  ;;  %v2515_v22 = vadd.f32 %v2514_v43, %v2513_v9  ;;  %v2460_v51 = vmul.f32 %v2367_v37, %v5298_v17  ;;  %v2495_v36 = vrot.slane %v2494_v62, 1  ;;  %v2537_v43 = vpop.permute.xlu0 %2536 }
 0x231   : > { %v2573_v49 = vrot.slane %v2572_v28, 1  ;;  %v2669_v19 = vadd.f32 %v2668_v52, %v2667_v27  ;;  %v2426_v60 = vsel %vm271_vm0, %v2376_v46, 0.0  ;;  %v2418_v11 = vadd.f32 %v2417_v15, %v2416_v8 }
 0x232   : > { %v2427_v1 = vrot.slane %v2426_v60, 4  ;;  %v2443_v45 = vsel %vm340_vm3, %v6408_v10, %v6357_v29  ;;  %v2504_v24 = vsel %vm271_vm0, %v2460_v51, 0.0  ;;  %v2651_v50 = vrot.slane %v2650_v48, 1 }
 0x233   : > { %v2516_v40 = vrot.slane %v2515_v22, 1  ;;  %v6458_v44 = vadd.f32 %v2592_v21, %v2591_v3  ;;  %v2505_v39 = vrot.slane %v2504_v24, 4  ;;  %v6460_v20 = vadd.f32 %v2580_v38, %v2579_v56 }
 0x234   : > { %v6462_v16 = vadd.f32 %v2658_v2, %v2657_v42  ;;  %v2670_v63 = vrot.slane %v2669_v19, 2  ;;  %v2428_v14 = vadd.f32 %v2427_v1, %v2426_v60  ;;  %v2496_v35 = vadd.f32 %v2495_v36, %v2494_v62 }
 0x235   : > { %v6464_v8 = vadd.f32 %v2573_v49, %v2572_v28  ;;  %v2444_v47 = vsel %vm342_vm4, %v6377_v41, %v2443_v45  ;;  %v2506_v29 = vadd.f32 %v2505_v39, %v2504_v24  ;;  %v2527_v32 = vsel %vm338_vm2, %v6411_v6, %v6361_v54 }
 0x236   : > { %v2429_v10 = vrot.slane %v2428_v14, 2  ;;  %v2445_v55 = vsel %vm344_vm5, %v2418_v11, %v2444_v47  ;;  %v2544_v56 = vmul.f32 %v2367_v37, %v5218_v33  ;;  %v2652_v61 = vadd.f32 %v2651_v50, %v2650_v48  ;;  %v2709_v11 = vpop.permute.xlu1 %2708 }
 0x237   : > { %v2517_v42 = vadd.f32 %v2516_v40, %v2515_v22  ;;  %v2594_v9 = vrot.slane %v6458_v44, 1  ;;  %v2507_v34 = vrot.slane %v2506_v29, 2  ;;  %v2671_v62 = vadd.f32 %v2670_v63, %v2669_v19  ;;  %v2707_v63 = vpop.permute.xlu0 %2706 }
 0x238   : > { %v2430_v28 = vadd.f32 %v2429_v10, %v2428_v14  ;;  %v2582_v41 = vsel %vm271_vm0, %v2544_v56, 0.0  ;;  %v2628_v3 = vmul.f32 %v2367_v37, %v5211_v26  ;;  %v2446_v0 = vsel %vm346_vm6, %v6432_v53, %v2445_v55 }
 0x239   : > { %v2508_v15 = vadd.f32 %v2507_v34, %v2506_v29  ;;  %v2528_v54 = vsel %vm340_vm3, %v6395_v57, %v2527_v32  ;;  %v2583_v6 = vrot.slane %v2582_v41, 4  ;;  %v2631_v52 = vmul.f32 %v2622_v30, %v5300_v18 }
 0x23a   : > { %v2431_v27 = vrot.slane %v2430_v28, 1  ;;  %v2529_v48 = vsel %vm342_vm4, %v2496_v35, %v2528_v54  ;;  %v2660_v21 = vsel %vm271_vm0, %v2628_v3, 0.0  ;;  %v2611_v53 = vsel %vm336_vm1, %v6413_v58, %v6326_v23 }
 0x23b   : > { %v2509_v46 = vrot.slane %v2508_v15, 1  ;;  %v2584_v38 = vadd.f32 %v2583_v6, %v2582_v41  ;;  %v2661_v37 = vrot.slane %v2660_v21, 4  ;;  %v2672_v2 = vrot.slane %v2671_v62, 1 }
 0x23c   : > { %v2432_v22 = vadd.f32 %v2431_v27, %v2430_v28  ;;  %v2681_v57 = vsel %vm271_vm0, %v2631_v52, 0.0  ;;  %v2546_v51 = vmul.f32 %v2537_v43, %v5300_v18  ;;  %v2530_v45 = vsel %vm344_vm5, %v6442_v12, %v2529_v48 }
 0x23d   : > { %v2510_v36 = vadd.f32 %v2509_v46, %v2508_v15  ;;  %v2585_v49 = vrot.slane %v2584_v38, 2  ;;  %v2662_v19 = vadd.f32 %v2661_v37, %v2660_v21  ;;  %v2682_v60 = vrot.slane %v2681_v57, 4 }
 0x23e   : > { %v2447_v1 = vsel %vm348_vm7, %v2432_v22, %v2446_v0  ;;  %v2596_v23 = vsel %vm271_vm0, %v2546_v51, 0.0  ;;  %v2630_v58 = vmul.f32 %v2537_v43, %v5298_v17  ;;  %v2731_v29 = vmul.f32 %v2709_v11, %v5128_v5 }
 0x23f   : > { %4704 = vst.msk [vmem:[%s5411_s8 + $0xc0] sm:$0xff] %vm271_vm0, %v2447_v1  ;;  %v2531_v24 = vsel %vm346_vm6, %v2510_v36, %v2530_v45  ;;  %v2586_v50 = vadd.f32 %v2585_v49, %v2584_v38  ;;  %v2663_v40 = vrot.slane %v2662_v19, 2  ;;  %v2683_v39 = vadd.f32 %v2682_v60, %v2681_v57  ;;  %v2713_v38 = vpop.permute.xlu1 %2712 }
 0x240   : > { %v2532_v14 = vsel %vm348_vm7, %v2517_v42, %v2531_v24  ;;  %v2597_v35 = vrot.slane %v2596_v23, 4  ;;  %v2674_v47 = vsel %vm271_vm0, %v2630_v58, 0.0  ;;  %v2612_v56 = vsel %vm338_vm2, %v6398_v31, %v2611_v53 }
 0x241   : > { %4705 = vst.msk [vmem:[%s5411_s8 + $0xf8] sm:$0xff] %vm271_vm0, %v2532_v14  ;;  %v2587_v12 = vrot.slane %v2586_v50, 1  ;;  %v2664_v10 = vadd.f32 %v2663_v40, %v2662_v19  ;;  %v2684_v55 = vrot.slane %v2683_v39, 2  ;;  %v2675_v32 = vrot.slane %v2674_v47, 4  ;;  %v2711_v40 = vpop.permute.xlu0 %2710 }
 0x242   : > { %v2696_v34 = vsel %vm336_vm1, %v6400_v59, %v6417_v25  ;;  %v2598_v30 = vadd.f32 %v2597_v35, %v2596_v23  ;;  %v2730_v42 = vmul.f32 %v2707_v63, %v5126_v4  ;;  %v2815_v0 = vmul.f32 %v2709_v11, %v5126_v4 }
 0x243   : > { %v2665_v28 = vrot.slane %v2664_v10, 1  ;;  %v2685_v41 = vadd.f32 %v2684_v55, %v2683_v39  ;;  %v2676_v3 = vadd.f32 %v2675_v32, %v2674_v47  ;;  %v2588_v15 = vadd.f32 %v2587_v12, %v2586_v50 }
 0x244   : > { %v2613_v54 = vsel %vm340_vm3, %v6464_v8, %v2612_v56  ;;  %v2697_v6 = vsel %vm338_vm2, %v2652_v61, %v2696_v34  ;;  %v2599_v43 = vrot.slane %v2598_v30, 2  ;;  %v2745_v48 = vsel %vm271_vm0, %v2731_v29, 0.0 }
 0x245   : > { %v2666_v31 = vadd.f32 %v2665_v28, %v2664_v10  ;;  %v2677_v27 = vrot.slane %v2676_v3, 2  ;;  %v2738_v59 = vsel %vm271_vm0, %v2730_v42, 0.0  ;;  %v2595_v25 = vadd.f32 %v2594_v9, %v6458_v44 }
 0x246   : > { %v2673_v21 = vadd.f32 %v2672_v2, %v2671_v62  ;;  %v2686_v52 = vrot.slane %v2685_v41, 1  ;;  %v2600_v46 = vadd.f32 %v2599_v43, %v2598_v30  ;;  %v2614_v8 = vsel %vm342_vm4, %v6460_v20, %v2613_v54  ;;  %v2717_v54 = vpop.permute.xlu1 %2716 }
 0x247   : > { %v2698_v61 = vsel %vm340_vm3, %v6462_v16, %v2697_v6  ;;  %v2678_v53 = vadd.f32 %v2677_v27, %v2676_v3  ;;  %v2823_v37 = vsel %vm271_vm0, %v2815_v0, 0.0  ;;  %v2615_v22 = vsel %vm344_vm5, %v2588_v15, %v2614_v8 }
 0x248   : > { %v2601_v57 = vrot.slane %v2600_v46, 1  ;;  %v2746_v51 = vrot.slane %v2745_v48, 4  ;;  %v2739_v36 = vrot.slane %v2738_v59, 4  ;;  %v2699_v44 = vsel %vm342_vm4, %v2666_v31, %v2698_v61 }
 0x249   : > { %v2679_v9 = vrot.slane %v2678_v53, 1  ;;  %v2733_v62 = vmul.f32 %v2713_v38, %v5147_v13  ;;  %v2817_v2 = vmul.f32 %v2713_v38, %v5133_v7  ;;  %v2687_v20 = vadd.f32 %v2686_v52, %v2685_v41 }
 0x24a   : > { %v2602_v49 = vadd.f32 %v2601_v57, %v2600_v46  ;;  %v2824_v19 = vrot.slane %v2823_v37, 4  ;;  %v2901_v16 = vmul.f32 %v2713_v38, %v5128_v5  ;;  %v2616_v60 = vsel %vm346_vm6, %v2595_v25, %v2615_v22 }
 0x24b   : > { %v2680_v11 = vadd.f32 %v2679_v9, %v2678_v53  ;;  %v2759_v1 = vsel %vm271_vm0, %v2733_v62, 0.0  ;;  %v2837_v45 = vsel %vm271_vm0, %v2817_v2, 0.0  ;;  %v2700_v58 = vsel %vm344_vm5, %v2673_v21, %v2699_v44 }
 0x24c   : > { %v2617_v23 = vsel %vm348_vm7, %v2602_v49, %v2616_v60  ;;  %v2747_v24 = vadd.f32 %v2746_v51, %v2745_v48  ;;  %v2740_v50 = vadd.f32 %v2739_v36, %v2738_v59  ;;  %v2760_v63 = vrot.slane %v2759_v1, 4 }
 0x24d   : > { %4706 = vst.msk [vmem:[%s5411_s8 + $0x130] sm:$0xff] %vm271_vm0, %v2617_v23  ;;  %v2701_v39 = vsel %vm346_vm6, %v2680_v11, %v2700_v58  ;;  %v2915_v14 = vsel %vm271_vm0, %v2901_v16, 0.0  ;;  %v2825_v47 = vadd.f32 %v2824_v19, %v2823_v37  ;;  %v2838_v29 = vrot.slane %v2837_v45, 4 }
 0x24e   : > { %v2702_v35 = vsel %vm348_vm7, %v2687_v20, %v2701_v39  ;;  %v2916_v12 = vrot.slane %v2915_v14, 4  ;;  %v2985_v10 = vmul.f32 %v2713_v38, %v5126_v4  ;;  %v2732_v55 = vmul.f32 %v2711_v40, %v5133_v7 }
 0x24f   : > { %4707 = vst.msk [vmem:[%s5411_s8 + $0x168] sm:$0xff] %vm271_vm0, %v2702_v35  ;;  %v2748_v32 = vrot.slane %v2747_v24, 2  ;;  %v2741_v56 = vrot.slane %v2740_v50, 2  ;;  %v2816_v34 = vmul.f32 %v2711_v40, %v5128_v5  ;;  %v2761_v30 = vadd.f32 %v2760_v63, %v2759_v1 }
 0x250   : > { %v2993_v42 = vsel %vm271_vm0, %v2985_v10, 0.0  ;;  %v2752_v28 = vsel %vm271_vm0, %v2732_v55, 0.0  ;;  %v2826_v41 = vrot.slane %v2825_v47, 2  ;;  %v2839_v3 = vadd.f32 %v2838_v29, %v2837_v45 }
 0x251   : > { %v2994_v0 = vrot.slane %v2993_v42, 4  ;;  %v2753_v15 = vrot.slane %v2752_v28, 4  ;;  %v2917_v6 = vadd.f32 %v2916_v12, %v2915_v14  ;;  %v2830_v43 = vsel %vm271_vm0, %v2816_v34, 0.0 }
 0x252   : > { %v2900_v31 = vmul.f32 %v2711_v40, %v5126_v4  ;;  %v2749_v27 = vadd.f32 %v2748_v32, %v2747_v24  ;;  %v2742_v48 = vadd.f32 %v2741_v56, %v2740_v50  ;;  %v2762_v21 = vrot.slane %v2761_v30, 2 }
 0x253   : > { %v2995_v59 = vadd.f32 %v2994_v0, %v2993_v42  ;;  %v2754_v25 = vadd.f32 %v2753_v15, %v2752_v28  ;;  %v2831_v52 = vrot.slane %v2830_v43, 4  ;;  %v2735_v38 = vmul.f32 %v2717_v54, %v5218_v33 }
 0x254   : > { %v2908_v46 = vsel %vm271_vm0, %v2900_v31, 0.0  ;;  %v2827_v8 = vadd.f32 %v2826_v41, %v2825_v47  ;;  %v2840_v61 = vrot.slane %v2839_v3, 2  ;;  %v2918_v37 = vrot.slane %v2917_v6, 2 }
 0x255   : > { %v2755_v53 = vrot.slane %v2754_v25, 2  ;;  %v2996_v22 = vrot.slane %v2995_v59, 2  ;;  %v2773_v57 = vsel %vm271_vm0, %v2735_v38, 0.0  ;;  %v2832_v51 = vadd.f32 %v2831_v52, %v2830_v43  ;;  %v2715_v43 = vpop.permute.xlu0 %2714 }
 0x256   : > { %v2909_v36 = vrot.slane %v2908_v46, 4  ;;  %v2750_v44 = vrot.slane %v2749_v27, 1  ;;  %v2743_v9 = vrot.slane %v2742_v48, 1  ;;  %v2763_v62 = vadd.f32 %v2762_v21, %v2761_v30 }
 0x257   : > { %v2756_v2 = vadd.f32 %v2755_v53, %v2754_v25  ;;  %v2828_v20 = vrot.slane %v2827_v8, 1  ;;  %v2841_v49 = vadd.f32 %v2840_v61, %v2839_v3  ;;  %v2774_v19 = vrot.slane %v2773_v57, 4 }
 0x258   : > { %v2919_v16 = vadd.f32 %v2918_v37, %v2917_v6  ;;  %v2997_v60 = vadd.f32 %v2996_v22, %v2995_v59  ;;  %v2819_v11 = vmul.f32 %v2717_v54, %v5211_v26  ;;  %v2903_v1 = vmul.f32 %v2717_v54, %v5147_v13 }
 0x259   : > { %v2833_v45 = vrot.slane %v2832_v51, 2  ;;  %v2910_v23 = vadd.f32 %v2909_v36, %v2908_v46  ;;  %v2987_v58 = vmul.f32 %v2717_v54, %v5133_v7  ;;  %v2751_v24 = vadd.f32 %v2750_v44, %v2749_v27 }
 0x25a   : > { %v2744_v50 = vadd.f32 %v2743_v9, %v2742_v48  ;;  %v2764_v40 = vrot.slane %v2763_v62, 1  ;;  %v2757_v39 = vrot.slane %v2756_v2, 1  ;;  %v6551_v63 = vadd.f32 %v2828_v20, %v2827_v8 }
 0x25b   : > { %v2842_v14 = vrot.slane %v2841_v49, 1  ;;  %v2775_v35 = vadd.f32 %v2774_v19, %v2773_v57  ;;  %v2920_v47 = vrot.slane %v2919_v16, 1  ;;  %v2998_v29 = vrot.slane %v2997_v60, 1 }
 0x25c   : > { %v2851_v12 = vsel %vm271_vm0, %v2819_v11, 0.0  ;;  %v2929_v10 = vsel %vm271_vm0, %v2903_v1, 0.0  ;;  %v2834_v55 = vadd.f32 %v2833_v45, %v2832_v51  ;;  %v2911_v32 = vrot.slane %v2910_v23, 2  ;;  %v6579_v1 = vpop.permute.xlu1 %2720 }
 0x25d   : > { %v3007_v56 = vsel %vm271_vm0, %v2987_v58, 0.0  ;;  %v3071_v34 = vmul.f32 %v2717_v54, %v5128_v5  ;;  %v2802_v30 = vsel %vm336_vm1, %v2751_v24, %v2744_v50  ;;  %v2765_v42 = vadd.f32 %v2764_v40, %v2763_v62 }
 0x25e   : > { %v2758_v28 = vadd.f32 %v2757_v39, %v2756_v2  ;;  %v3155_v41 = vmul.f32 %v2717_v54, %v5126_v4  ;;  %v6559_v3 = vadd.f32 %v2842_v14, %v2841_v49  ;;  %v2776_v0 = vrot.slane %v2775_v35, 2 }
 0x25f   : > { %v2852_v15 = vrot.slane %v2851_v12, 4  ;;  %v2930_v6 = vrot.slane %v2929_v10, 4  ;;  %v6561_v31 = vadd.f32 %v2920_v47, %v2919_v16  ;;  %v3008_v27 = vrot.slane %v3007_v56, 4 }
 0x260   : > { %v3085_v48 = vsel %vm271_vm0, %v3071_v34, 0.0  ;;  %v3163_v59 = vsel %vm271_vm0, %v3155_v41, 0.0  ;;  %v6565_v25 = vadd.f32 %v2998_v29, %v2997_v60  ;;  %v2835_v21 = vrot.slane %v2834_v55, 1 }
 0x261   : > { %v2912_v52 = vadd.f32 %v2911_v32, %v2910_v23  ;;  %v3086_v46 = vrot.slane %v3085_v48, 4  ;;  %v2803_v54 = vsel %vm338_vm2, %v2758_v28, %v2802_v30  ;;  %v2734_v38 = vmul.f32 %v2715_v43, %v5211_v26 }
 0x262   : > { %v2818_v8 = vmul.f32 %v2715_v43, %v5147_v13  ;;  %v2902_v61 = vmul.f32 %v2715_v43, %v5133_v7  ;;  %v2777_v53 = vadd.f32 %v2776_v0, %v2775_v35  ;;  %v2853_v37 = vadd.f32 %v2852_v15, %v2851_v12 }
 0x263   : > { %v2931_v22 = vadd.f32 %v2930_v6, %v2929_v10  ;;  %v3164_v57 = vrot.slane %v3163_v59, 4  ;;  %v3009_v51 = vadd.f32 %v3008_v27, %v3007_v56  ;;  %v2766_v36 = vsel %vm271_vm0, %v2734_v38, 0.0 }
 0x264   : > { %v2844_v44 = vsel %vm271_vm0, %v2818_v8, 0.0  ;;  %v2922_v9 = vsel %vm271_vm0, %v2902_v61, 0.0  ;;  %v6575_v62 = vsel %vm340_vm3, %v2765_v42, %v2803_v54  ;;  %v2836_v2 = vadd.f32 %v2835_v21, %v2834_v55 }
 0x265   : > { %v3087_v20 = vadd.f32 %v3086_v46, %v3085_v48  ;;  %v2767_v49 = vrot.slane %v2766_v36, 4  ;;  %v2845_v19 = vrot.slane %v2844_v44, 4  ;;  %v2923_v16 = vrot.slane %v2922_v9, 4 }
 0x266   : > { %v2986_v60 = vmul.f32 %v2715_v43, %v5128_v5  ;;  %v3070_v11 = vmul.f32 %v2715_v43, %v5126_v4  ;;  %v2854_v45 = vrot.slane %v2853_v37, 2  ;;  %v2932_v23 = vrot.slane %v2931_v22, 2 }
 0x267   : > { %v3165_v58 = vadd.f32 %v3164_v57, %v3163_v59  ;;  %v2768_v24 = vadd.f32 %v2767_v49, %v2766_v36  ;;  %v3010_v50 = vrot.slane %v3009_v51, 2  ;;  %v2846_v40 = vadd.f32 %v2845_v19, %v2844_v44 }
 0x268   : > { %v2924_v39 = vadd.f32 %v2923_v16, %v2922_v9  ;;  %v3000_v14 = vsel %vm271_vm0, %v2986_v60, 0.0  ;;  %v3078_v29 = vsel %vm271_vm0, %v3070_v11, 0.0  ;;  %v2737_v12 = vmul.f32 %v6579_v1, %v5300_v18 }
 0x269   : > { %v2769_v35 = vrot.slane %v2768_v24, 2  ;;  %v3001_v47 = vrot.slane %v3000_v14, 4  ;;  %v2913_v10 = vrot.slane %v2912_v52, 1  ;;  %v2778_v55 = vrot.slane %v2777_v53, 1 }
 0x26a   : > { %v3088_v32 = vrot.slane %v3087_v20, 2  ;;  %v2847_v56 = vrot.slane %v2846_v40, 2  ;;  %v3166_v34 = vrot.slane %v3165_v58, 2  ;;  %v2925_v42 = vrot.slane %v2924_v39, 2 }
 0x26b   : > { %v2770_v30 = vadd.f32 %v2769_v35, %v2768_v24  ;;  %v3002_v28 = vadd.f32 %v3001_v47, %v3000_v14  ;;  %v2887_v41 = vsel %vm336_vm1, %v2836_v2, %v6551_v63  ;;  %v2855_v0 = vadd.f32 %v2854_v45, %v2853_v37 }
 0x26c   : > { %v2933_v15 = vadd.f32 %v2932_v23, %v2931_v22  ;;  %v3079_v6 = vrot.slane %v3078_v29, 4  ;;  %v3011_v43 = vadd.f32 %v3010_v50, %v3009_v51  ;;  %v2787_v48 = vsel %vm271_vm0, %v2737_v12, 0.0  ;;  %v2719_v12 = vpop.permute.xlu0 %2718 }
 0x26d   : > { %v2771_v27 = vrot.slane %v2770_v30, 1  ;;  %v2821_v59 = vmul.f32 %v6579_v1, %v5298_v17  ;;  %v2914_v21 = vadd.f32 %v2913_v10, %v2912_v52  ;;  %v3089_v46 = vadd.f32 %v3088_v32, %v3087_v20 }
 0x26e   : > { %v2848_v54 = vadd.f32 %v2847_v56, %v2846_v40  ;;  %v3003_v38 = vrot.slane %v3002_v28, 2  ;;  %v2888_v8 = vsel %vm338_vm2, %v6559_v3, %v2887_v41  ;;  %v3167_v61 = vadd.f32 %v3166_v34, %v3165_v58 }
 0x26f   : > { %v2926_v57 = vadd.f32 %v2925_v42, %v2924_v39  ;;  %v2905_v63 = vmul.f32 %v6579_v1, %v5218_v33  ;;  %v2856_v37 = vrot.slane %v2855_v0, 1  ;;  %v3080_v22 = vadd.f32 %v3079_v6, %v3078_v29 }
 0x270   : > { %v2788_v51 = vrot.slane %v2787_v48, 4  ;;  %v2865_v36 = vsel %vm271_vm0, %v2821_v59, 0.0  ;;  %v2779_v44 = vadd.f32 %v2778_v55, %v2777_v53  ;;  %v2934_v9 = vrot.slane %v2933_v15, 1 }
 0x271   : > { %v3012_v2 = vrot.slane %v3011_v43, 1  ;;  %v2772_v52 = vadd.f32 %v2771_v27, %v2770_v30  ;;  %v2972_v20 = vsel %vm336_vm1, %v6561_v31, %v2914_v21  ;;  %v3090_v49 = vrot.slane %v3089_v46, 1 }
 0x272   : > { %v2849_v19 = vrot.slane %v2848_v54, 1  ;;  %v3004_v3 = vadd.f32 %v3003_v38, %v3002_v28  ;;  %v3168_v16 = vrot.slane %v3167_v61, 1  ;;  %v2927_v60 = vrot.slane %v2926_v57, 1 }
 0x273   : > { %v2866_v11 = vrot.slane %v2865_v36, 4  ;;  %v2943_v45 = vsel %vm271_vm0, %v2905_v63, 0.0  ;;  %v2857_v23 = vadd.f32 %v2856_v37, %v2855_v0  ;;  %v3081_v58 = vrot.slane %v3080_v22, 2 }
 0x274   : > { %v2789_v24 = vadd.f32 %v2788_v51, %v2787_v48  ;;  %v2989_v53 = vmul.f32 %v6579_v1, %v5211_v26  ;;  %v2935_v50 = vadd.f32 %v2934_v9, %v2933_v15  ;;  %v3013_v40 = vadd.f32 %v3012_v2, %v3011_v43 }
 0x275   : > { %v2805_v39 = vsel %vm342_vm4, %v2772_v52, %v6575_v62  ;;  %v3073_v31 = vmul.f32 %v6579_v1, %v5147_v13  ;;  %v2850_v14 = vadd.f32 %v2849_v19, %v2848_v54  ;;  %v3005_v35 = vrot.slane %v3004_v3, 1 }
 0x276   : > { %v2944_v47 = vrot.slane %v2943_v45, 4  ;;  %v3157_v29 = vmul.f32 %v6579_v1, %v5133_v7  ;;  %v3091_v10 = vadd.f32 %v3090_v49, %v3089_v46  ;;  %v6606_v55 = vadd.f32 %v3168_v16, %v3167_v61 }
 0x277   : > { %v2928_v32 = vadd.f32 %v2927_v60, %v2926_v57  ;;  %v2867_v56 = vadd.f32 %v2866_v11, %v2865_v36  ;;  %v6609_v34 = vsel %vm344_vm5, %v2779_v44, %v2805_v39  ;;  %v3082_v30 = vadd.f32 %v3081_v58, %v3080_v22 }
 0x278   : > { %7484 = vst [vmem:[#allocation8_spill] sm:$0xff] %v6606_v55  ;;  %v2790_v62 = vrot.slane %v2789_v24, 2  ;;  %v3021_v42 = vsel %vm271_vm0, %v2989_v53, 0.0  ;;  %v3099_v28 = vsel %vm271_vm0, %v3073_v31, 0.0  ;;  %v3241_v41 = vmul.f32 %v6579_v1, %v5128_v5 }
 0x279   : > { %v2736_v0 = vmul.f32 %v2719_v12, %v5298_v17  ;;  %v2820_v15 = vmul.f32 %v2719_v12, %v5218_v33  ;;  %v2889_v6 = vsel %vm340_vm3, %v2850_v14, %v2888_v8  ;;  %v3006_v43 = vadd.f32 %v3005_v35, %v3004_v3 }
 0x27a   : > { %v2945_v27 = vadd.f32 %v2944_v47, %v2943_v45  ;;  %v3177_v48 = vsel %vm271_vm0, %v3157_v29, 0.0  ;;  %v2868_v59 = vrot.slane %v2867_v56, 2  ;;  %v3255_v21 = vsel %vm271_vm0, %v3241_v41, 0.0 }
 0x27b   : > { %v2780_v46 = vsel %vm271_vm0, %v2736_v0, 0.0  ;;  %v2858_v54 = vsel %vm271_vm0, %v2820_v15, 0.0  ;;  %v2973_v38 = vsel %vm338_vm2, %v2928_v32, %v2972_v20  ;;  %v3083_v1 = vrot.slane %v3082_v30, 1 }
 0x27c   : > { %v3022_v61 = vrot.slane %v3021_v42, 4  ;;  %v3100_v57 = vrot.slane %v3099_v28, 4  ;;  %v6624_v63 = vsel %vm342_vm4, %v2857_v23, %v2889_v6  ;;  %v3178_v8 = vrot.slane %v3177_v48, 4  ;;  %v3325_v6 = vpop.permute.xlu1 %3324 }
 0x27d   : > { %v3256_v37 = vrot.slane %v3255_v21, 4  ;;  %v2781_v22 = vrot.slane %v2780_v46, 4  ;;  %v2791_v51 = vadd.f32 %v2790_v62, %v2789_v24  ;;  %v2946_v36 = vrot.slane %v2945_v27, 2 }
 0x27e   : > { %v2859_v44 = vrot.slane %v2858_v54, 4  ;;  %v2904_v9 = vmul.f32 %v2719_v12, %v5211_v26  ;;  %v3057_v2 = vsel %vm336_vm1, %v3006_v43, %v6565_v25  ;;  %v2869_v52 = vadd.f32 %v2868_v59, %v2867_v56 }
 0x27f   : > { %v2782_v49 = vadd.f32 %v2781_v22, %v2780_v46  ;;  %v2988_v20 = vmul.f32 %v2719_v12, %v5147_v13  ;;  %v6631_v19 = vsel %vm340_vm3, %v2935_v50, %v2973_v38  ;;  %v3023_v3 = vadd.f32 %v3022_v61, %v3021_v42 }
 0x280   : > { %v3101_v16 = vadd.f32 %v3100_v57, %v3099_v28  ;;  %v2936_v60 = vsel %vm271_vm0, %v2904_v9, 0.0  ;;  %v3084_v11 = vadd.f32 %v3083_v1, %v3082_v30  ;;  %v3179_v45 = vadd.f32 %v3178_v8, %v3177_v48  ;;  %v3323_v57 = vpop.permute.xlu0 %3322 }
 0x281   : > { %v3257_v23 = vadd.f32 %v3256_v37, %v3255_v21  ;;  %v2783_v58 = vrot.slane %v2782_v49, 2  ;;  %v6635_v24 = vsel %vm338_vm2, %v3013_v40, %v3057_v2  ;;  %v2792_v53 = vrot.slane %v2791_v51, 1 }
 0x282   : > { %7485 = vst [vmem:[#allocation9_spill] sm:$0xff] %v6635_v24  ;;  %v2947_v25 = vadd.f32 %v2946_v36, %v2945_v27  ;;  %v2860_v39 = vadd.f32 %v2859_v44, %v2858_v54  ;;  %v2870_v31 = vrot.slane %v2869_v52, 1  ;;  %v2937_v35 = vrot.slane %v2936_v60, 4 }
 0x283   : > { %v2784_v14 = vadd.f32 %v2783_v58, %v2782_v49  ;;  %v3014_v50 = vsel %vm271_vm0, %v2988_v20, 0.0  ;;  %v3024_v47 = vrot.slane %v3023_v3, 2  ;;  %v3102_v29 = vrot.slane %v3101_v16, 2 }
 0x284   : > { %v3072_v32 = vmul.f32 %v2719_v12, %v5133_v7  ;;  %v3156_v56 = vmul.f32 %v2719_v12, %v5128_v5  ;;  %v3180_v30 = vrot.slane %v3179_v45, 2  ;;  %v3258_v62 = vrot.slane %v3257_v23, 2 }
 0x285   : > { %v2785_v42 = vrot.slane %v2784_v14, 1  ;;  %v3240_v40 = vmul.f32 %v2719_v12, %v5126_v4  ;;  %v6642_v28 = vsel %vm336_vm1, %v3091_v10, %v3084_v11  ;;  %v2793_v41 = vadd.f32 %v2792_v53, %v2791_v51 }
 0x286   : > { %7486 = vst [vmem:[#allocation10_spill] sm:$0xff] %v6642_v28  ;;  %v2861_v0 = vrot.slane %v2860_v39, 2  ;;  %v3015_v15 = vrot.slane %v3014_v50, 4  ;;  %v2948_v43 = vrot.slane %v2947_v25, 1  ;;  %v2938_v48 = vadd.f32 %v2937_v35, %v2936_v60 }
 0x287   : > { %v2786_v27 = vadd.f32 %v2785_v42, %v2784_v14  ;;  %v3092_v59 = vsel %vm271_vm0, %v3072_v32, 0.0  ;;  %v6645_v21 = vadd.f32 %v2870_v31, %v2869_v52  ;;  %v3025_v46 = vadd.f32 %v3024_v47, %v3023_v3  ;;  %v3329_v3 = vpop.permute.xlu1 %3328 }
 0x288   : > { %v3170_v54 = vsel %vm271_vm0, %v3156_v56, 0.0  ;;  %v3248_v12 = vsel %vm271_vm0, %v3240_v40, 0.0  ;;  %v3103_v38 = vadd.f32 %v3102_v29, %v3101_v16  ;;  %v3181_v10 = vadd.f32 %v3180_v30, %v3179_v45 }
 0x289   : > { %v3259_v1 = vadd.f32 %v3258_v62, %v3257_v23  ;;  %v2807_v61 = vsel %vm346_vm6, %v2786_v27, %v6609_v34  ;;  %v2862_v37 = vadd.f32 %v2861_v0, %v2860_v39  ;;  %v3016_v22 = vadd.f32 %v3015_v15, %v3014_v50 }
 0x28a   : > { %v2808_v8 = vsel %vm348_vm7, %v2793_v41, %v2807_v61  ;;  %v3093_v51 = vrot.slane %v3092_v59, 4  ;;  %v2939_v36 = vrot.slane %v2938_v48, 2  ;;  %v3171_v44 = vrot.slane %v3170_v54, 4 }
 0x28b   : > { %4708 = vst.msk [vmem:[%s5411_s8 + $0x20] sm:$0xff] %vm271_vm0, %v2808_v8  ;;  %v3249_v9 = vrot.slane %v3248_v12, 4  ;;  %v3347_v2 = vmul.f32 %v3325_v6, %v5128_v5  ;;  %v6655_v52 = vadd.f32 %v2948_v43, %v2947_v25  ;;  %v3026_v49 = vrot.slane %v3025_v46, 1 }
 0x28c   : > { %v3431_v20 = vmul.f32 %v3325_v6, %v5126_v4  ;;  %v3346_v34 = vmul.f32 %v3323_v57, %v5126_v4  ;;  %v3104_v16 = vrot.slane %v3103_v38, 1  ;;  %v3182_v60 = vrot.slane %v3181_v10, 1  ;;  %v3327_v6 = vpop.permute.xlu0 %3326 }
 0x28d   : > { %v3260_v11 = vrot.slane %v3259_v1, 1  ;;  %v3361_v45 = vsel %vm271_vm0, %v3347_v2, 0.0  ;;  %v2863_v23 = vrot.slane %v2862_v37, 1  ;;  %v3017_v58 = vrot.slane %v3016_v22, 2 }
 0x28e   : > { %v3094_v53 = vadd.f32 %v3093_v51, %v3092_v59  ;;  %v3354_v39 = vsel %vm271_vm0, %v3346_v34, 0.0  ;;  %v2940_v31 = vadd.f32 %v2939_v36, %v2938_v48  ;;  %v3172_v14 = vadd.f32 %v3171_v44, %v3170_v54 }
 0x28f   : > { %v3250_v25 = vadd.f32 %v3249_v9, %v3248_v12  ;;  %v3349_v35 = vmul.f32 %v3329_v3, %v5147_v13  ;;  %v3362_v50 = vrot.slane %v3361_v45, 4  ;;  %v3439_v47 = vsel %vm271_vm0, %v3431_v20, 0.0 }
 0x290   : > { %v3355_v29 = vrot.slane %v3354_v39, 4  ;;  %v3433_v32 = vmul.f32 %v3329_v3, %v5133_v7  ;;  %v6664_v56 = vadd.f32 %v3026_v49, %v3025_v46  ;;  %v6666_v30 = vadd.f32 %v3104_v16, %v3103_v38 }
 0x291   : > { %v6668_v62 = vadd.f32 %v3182_v60, %v3181_v10  ;;  %v6670_v42 = vadd.f32 %v3260_v11, %v3259_v1  ;;  %v2864_v40 = vadd.f32 %v2863_v23, %v2862_v37  ;;  %v3018_v41 = vadd.f32 %v3017_v58, %v3016_v22 }
 0x292   : > { %7487 = vst [vmem:[#allocation11_spill] sm:$0xff] %v6664_v56  ;;  %7488 = vst [vmem:[#allocation12_spill] sm:$0xff] %v6666_v30  ;;  %v3095_v0 = vrot.slane %v3094_v53, 2  ;;  %v3375_v15 = vsel %vm271_vm0, %v3349_v35, 0.0  ;;  %v2941_v43 = vrot.slane %v2940_v31, 1  ;;  %v3440_v27 = vrot.slane %v3439_v47, 4 }
 0x293   : > { %7489 = vst [vmem:[#allocation13_spill] sm:$0xff] %v6668_v62  ;;  %7490 = vst [vmem:[#allocation14_spill] sm:$0xff] %v6670_v42  ;;  %v3453_v48 = vsel %vm271_vm0, %v3433_v32, 0.0  ;;  %v3517_v59 = vmul.f32 %v3329_v3, %v5128_v5  ;;  %v3173_v46 = vrot.slane %v3172_v14, 2  ;;  %v3251_v54 = vrot.slane %v3250_v25, 2 }
 0x294   : > { %v3363_v12 = vadd.f32 %v3362_v50, %v3361_v45  ;;  %v3356_v38 = vadd.f32 %v3355_v29, %v3354_v39  ;;  %v3376_v10 = vrot.slane %v3375_v15, 4  ;;  %v3601_v61 = vmul.f32 %v3329_v3, %v5126_v4 }
 0x295   : > { %v3531_v1 = vsel %vm271_vm0, %v3517_v59, 0.0  ;;  %v3348_v57 = vmul.f32 %v3327_v6, %v5133_v7  ;;  %v6680_v8 = vsel %vm344_vm5, %v2864_v40, %v6624_v63  ;;  %v3019_v37 = vrot.slane %v3018_v41, 1 }
 0x296   : > { %v3096_v22 = vadd.f32 %v3095_v0, %v3094_v53  ;;  %v3454_v51 = vrot.slane %v3453_v48, 4  ;;  %v3441_v36 = vadd.f32 %v3440_v27, %v3439_v47  ;;  %v3532_v44 = vrot.slane %v3531_v1, 4 }
 0x297   : > { %v3609_v9 = vsel %vm271_vm0, %v3601_v61, 0.0  ;;  %v3368_v2 = vsel %vm271_vm0, %v3348_v57, 0.0  ;;  %v6684_v49 = vadd.f32 %v2941_v43, %v2940_v31  ;;  %v3174_v20 = vadd.f32 %v3173_v46, %v3172_v14 }
 0x298   : > { %v3364_v34 = vrot.slane %v3363_v12, 2  ;;  %v3357_v3 = vrot.slane %v3356_v38, 2  ;;  %v3252_v16 = vadd.f32 %v3251_v54, %v3250_v25  ;;  %v3377_v60 = vadd.f32 %v3376_v10, %v3375_v15  ;;  %v3333_v25 = vpop.permute.xlu1 %3332 }
 0x299   : > { %v3610_v11 = vrot.slane %v3609_v9, 4  ;;  %v3369_v45 = vrot.slane %v3368_v2, 4  ;;  %v3455_v63 = vadd.f32 %v3454_v51, %v3453_v48  ;;  %v3533_v23 = vadd.f32 %v3532_v44, %v3531_v1 }
 0x29a   : > { %v3432_v58 = vmul.f32 %v3327_v6, %v5128_v5  ;;  %v3516_v53 = vmul.f32 %v3327_v6, %v5126_v4  ;;  %v3097_v39 = vrot.slane %v3096_v22, 1  ;;  %v3442_v35 = vrot.slane %v3441_v36, 2 }
 0x29b   : > { %v3611_v50 = vadd.f32 %v3610_v11, %v3609_v9  ;;  %v3370_v47 = vadd.f32 %v3369_v45, %v3368_v2  ;;  %v3365_v29 = vadd.f32 %v3364_v34, %v3363_v12  ;;  %v3358_v31 = vadd.f32 %v3357_v3, %v3356_v38 }
 0x29c   : > { %v3446_v14 = vsel %vm271_vm0, %v3432_v58, 0.0  ;;  %v3524_v32 = vsel %vm271_vm0, %v3516_v53, 0.0  ;;  %v3175_v40 = vrot.slane %v3174_v20, 1  ;;  %v3378_v0 = vrot.slane %v3377_v60, 2 }
 0x29d   : > { %v3371_v15 = vrot.slane %v3370_v47, 2  ;;  %v3447_v43 = vrot.slane %v3446_v14, 4  ;;  %v6690_v27 = vadd.f32 %v3019_v37, %v3018_v41  ;;  %v3253_v48 = vrot.slane %v3252_v16, 1 }
 0x29e   : > { %v3456_v59 = vrot.slane %v3455_v63, 2  ;;  %v3534_v6 = vrot.slane %v3533_v23, 2  ;;  %v3443_v46 = vadd.f32 %v3442_v35, %v3441_v36  ;;  %v3612_v54 = vrot.slane %v3611_v50, 2 }
 0x29f   : > { %7491 = vst [vmem:[#allocation15_spill] sm:$0xff] %v6690_v27  ;;  %v3525_v10 = vrot.slane %v3524_v32, 4  ;;  %v3351_v12 = vmul.f32 %v3333_v25, %v5218_v33  ;;  %v6693_v38 = vadd.f32 %v3097_v39, %v3096_v22  ;;  %v3366_v1 = vrot.slane %v3365_v29, 1 }
 0x2a0   : > { %v3359_v61 = vrot.slane %v3358_v31, 1  ;;  %v3372_v57 = vadd.f32 %v3371_v15, %v3370_v47  ;;  %v6695_v51 = vadd.f32 %v3175_v40, %v3174_v20  ;;  %v3379_v44 = vadd.f32 %v3378_v0, %v3377_v60 }
 0x2a1   : > { %7492 = vst [vmem:[#allocation16_spill] sm:$0xff] %v6693_v38  ;;  %v3448_v9 = vadd.f32 %v3447_v43, %v3446_v14  ;;  %v3435_v41 = vmul.f32 %v3333_v25, %v5211_v26  ;;  %v6698_v37 = vadd.f32 %v3253_v48, %v3252_v16  ;;  %v3457_v2 = vadd.f32 %v3456_v59, %v3455_v63 }
 0x2a2   : > { %7493 = vst [vmem:[#allocation17_spill] sm:$0xff] %v6695_v51  ;;  %v3535_v34 = vadd.f32 %v3534_v6, %v3533_v23  ;;  %v3519_v36 = vmul.f32 %v3333_v25, %v5147_v13  ;;  %v3444_v3 = vrot.slane %v3443_v46, 1  ;;  %v3613_v11 = vadd.f32 %v3612_v54, %v3611_v50 }
 0x2a3   : > { %7494 = vst [vmem:[#allocation18_spill] sm:$0xff] %v6698_v37  ;;  %v3526_v45 = vadd.f32 %v3525_v10, %v3524_v32  ;;  %v3389_v22 = vsel %vm271_vm0, %v3351_v12, 0.0  ;;  %v3367_v58 = vadd.f32 %v3366_v1, %v3365_v29  ;;  %v3360_v53 = vadd.f32 %v3359_v61, %v3358_v31  ;;  %v3331_v12 = vpop.permute.xlu0 %3330 }
 0x2a4   : > { %v3373_v39 = vrot.slane %v3372_v57, 1  ;;  %v3603_v20 = vmul.f32 %v3333_v25, %v5133_v7  ;;  %v3380_v60 = vrot.slane %v3379_v44, 1  ;;  %v3449_v35 = vrot.slane %v3448_v9, 2 }
 0x2a5   : > { %v3467_v47 = vsel %vm271_vm0, %v3435_v41, 0.0  ;;  %v3687_v16 = vmul.f32 %v3333_v25, %v5128_v5  ;;  %v3458_v63 = vrot.slane %v3457_v2, 1  ;;  %v3536_v23 = vrot.slane %v3535_v34, 1 }
 0x2a6   : > { %v3390_v14 = vrot.slane %v3389_v22, 4  ;;  %v3545_v40 = vsel %vm271_vm0, %v3519_v36, 0.0  ;;  %v6706_v50 = vadd.f32 %v3444_v3, %v3443_v46  ;;  %v3614_v32 = vrot.slane %v3613_v11, 1 }
 0x2a7   : > { %v3527_v0 = vrot.slane %v3526_v45, 2  ;;  %v3623_v29 = vsel %vm271_vm0, %v3603_v20, 0.0  ;;  %v3418_v31 = vsel %vm336_vm1, %v3367_v58, %v3360_v53  ;;  %v3374_v15 = vadd.f32 %v3373_v39, %v3372_v57 }
 0x2a8   : > { %v3468_v43 = vrot.slane %v3467_v47, 4  ;;  %v3701_v48 = vsel %vm271_vm0, %v3687_v16, 0.0  ;;  %v3450_v59 = vadd.f32 %v3449_v35, %v3448_v9  ;;  %v3546_v6 = vrot.slane %v3545_v40, 4 }
 0x2a9   : > { %v3624_v54 = vrot.slane %v3623_v29, 4  ;;  %v3771_v10 = vmul.f32 %v3333_v25, %v5126_v4  ;;  %v3381_v1 = vadd.f32 %v3380_v60, %v3379_v44  ;;  %v6712_v61 = vadd.f32 %v3458_v63, %v3457_v2 }
 0x2aa   : > { %v6714_v46 = vadd.f32 %v3536_v23, %v3535_v34  ;;  %v3391_v41 = vadd.f32 %v3390_v14, %v3389_v22  ;;  %v6716_v36 = vadd.f32 %v3614_v32, %v3613_v11  ;;  %v3528_v3 = vadd.f32 %v3527_v0, %v3526_v45 }
 0x2ab   : > { %v3702_v58 = vrot.slane %v3701_v48, 4  ;;  %v3779_v57 = vsel %vm271_vm0, %v3771_v10, 0.0  ;;  %v3419_v53 = vsel %vm338_vm2, %v3374_v15, %v3418_v31  ;;  %v3469_v9 = vadd.f32 %v3468_v43, %v3467_v47 }
 0x2ac   : > { %v3780_v39 = vrot.slane %v3779_v57, 4  ;;  %v3350_v20 = vmul.f32 %v3331_v12, %v5211_v26  ;;  %v3451_v25 = vrot.slane %v3450_v59, 1  ;;  %v3547_v35 = vadd.f32 %v3546_v6, %v3545_v40 }
 0x2ad   : > { %v3625_v44 = vadd.f32 %v3624_v54, %v3623_v29  ;;  %v3434_v2 = vmul.f32 %v3331_v12, %v5147_v13  ;;  %v3392_v34 = vrot.slane %v3391_v41, 2  ;;  %v3518_v11 = vmul.f32 %v3331_v12, %v5133_v7 }
 0x2ae   : > { %v3382_v22 = vsel %vm271_vm0, %v3350_v20, 0.0  ;;  %v3602_v45 = vmul.f32 %v3331_v12, %v5128_v5  ;;  %v3703_v60 = vadd.f32 %v3702_v58, %v3701_v48  ;;  %v3781_v16 = vadd.f32 %v3780_v39, %v3779_v57  ;;  %v3337_v20 = vpop.permute.xlu1 %3336 }
 0x2af   : > { %v3383_v63 = vrot.slane %v3382_v22, 4  ;;  %v3460_v47 = vsel %vm271_vm0, %v3434_v2, 0.0  ;;  %v3470_v23 = vrot.slane %v3469_v9, 2  ;;  %v3538_v32 = vsel %vm271_vm0, %v3518_v11, 0.0 }
 0x2b0   : > { %v3461_v14 = vrot.slane %v3460_v47, 4  ;;  %v3616_v40 = vsel %vm271_vm0, %v3602_v45, 0.0  ;;  %v3548_v0 = vrot.slane %v3547_v35, 2  ;;  %v3626_v29 = vrot.slane %v3625_v44, 2 }
 0x2b1   : > { %v3384_v31 = vadd.f32 %v3383_v63, %v3382_v22  ;;  %v3539_v15 = vrot.slane %v3538_v32, 4  ;;  %v3529_v43 = vrot.slane %v3528_v3, 1  ;;  %v3617_v54 = vrot.slane %v3616_v40, 4 }
 0x2b2   : > { %v3462_v6 = vadd.f32 %v3461_v14, %v3460_v47  ;;  %v3686_v10 = vmul.f32 %v3331_v12, %v5126_v4  ;;  %v3704_v48 = vrot.slane %v3703_v60, 2  ;;  %v3782_v58 = vrot.slane %v3781_v16, 2 }
 0x2b3   : > { %v3385_v57 = vrot.slane %v3384_v31, 2  ;;  %v3540_v39 = vadd.f32 %v3539_v15, %v3538_v32  ;;  %v3452_v2 = vadd.f32 %v3451_v25, %v3450_v59  ;;  %v3393_v42 = vadd.f32 %v3392_v34, %v3391_v41 }
 0x2b4   : > { %v3463_v37 = vrot.slane %v3462_v6, 2  ;;  %v3694_v11 = vsel %vm271_vm0, %v3686_v10, 0.0  ;;  %v3471_v45 = vadd.f32 %v3470_v23, %v3469_v9  ;;  %v3549_v62 = vadd.f32 %v3548_v0, %v3547_v35 }
 0x2b5   : > { %v3627_v51 = vadd.f32 %v3626_v29, %v3625_v44  ;;  %v3386_v22 = vadd.f32 %v3385_v57, %v3384_v31  ;;  %v3420_v63 = vsel %vm340_vm3, %v3381_v1, %v3419_v53  ;;  %v3541_v47 = vrot.slane %v3540_v39, 2 }
 0x2b6   : > { %v3618_v14 = vadd.f32 %v3617_v54, %v3616_v40  ;;  %v3353_v12 = vmul.f32 %v3337_v20, %v5300_v18  ;;  %v3530_v55 = vadd.f32 %v3529_v43, %v3528_v3  ;;  %v3705_v30 = vadd.f32 %v3704_v48, %v3703_v60 }
 0x2b7   : > { %v3783_v38 = vadd.f32 %v3782_v58, %v3781_v16  ;;  %v3695_v32 = vrot.slane %v3694_v11, 4  ;;  %v3503_v59 = vsel %vm336_vm1, %v3452_v2, %v6706_v50  ;;  %v3394_v41 = vrot.slane %v3393_v42, 1 }
 0x2b8   : > { %v3464_v25 = vadd.f32 %v3463_v37, %v3462_v6  ;;  %v3437_v9 = vmul.f32 %v3337_v20, %v5298_v17  ;;  %v3472_v35 = vrot.slane %v3471_v45, 1  ;;  %v3550_v44 = vrot.slane %v3549_v62, 1 }
 0x2b9   : > { %v3628_v34 = vrot.slane %v3627_v51, 1  ;;  %v3387_v23 = vrot.slane %v3386_v22, 1  ;;  %v3542_v1 = vadd.f32 %v3541_v47, %v3540_v39  ;;  %v3619_v53 = vrot.slane %v3618_v14, 2 }
 0x2ba   : > { %v3403_v40 = vsel %vm271_vm0, %v3353_v12, 0.0  ;;  %v3521_v3 = vmul.f32 %v3337_v20, %v5218_v33  ;;  %v3504_v60 = vsel %vm338_vm2, %v6712_v61, %v3503_v59  ;;  %v3706_v16 = vrot.slane %v3705_v30, 1  ;;  %v6754_v12 = vpop.permute.xlu0 %3334 }
 0x2bb   : > { %v3784_v0 = vrot.slane %v3783_v38, 1  ;;  %v3696_v50 = vadd.f32 %v3695_v32, %v3694_v11  ;;  %v3588_v37 = vsel %vm336_vm1, %v6714_v46, %v3530_v55  ;;  %v3395_v29 = vadd.f32 %v3394_v41, %v3393_v42 }
 0x2bc   : > { %v3465_v31 = vrot.slane %v3464_v25, 1  ;;  %v3481_v15 = vsel %vm271_vm0, %v3437_v9, 0.0  ;;  %v3473_v43 = vadd.f32 %v3472_v35, %v3471_v45  ;;  %v3551_v6 = vadd.f32 %v3550_v44, %v3549_v62 }
 0x2bd   : > { %v3388_v54 = vadd.f32 %v3387_v23, %v3386_v22  ;;  %v3404_v10 = vrot.slane %v3403_v40, 4  ;;  %v6742_v48 = vadd.f32 %v3628_v34, %v3627_v51  ;;  %v3543_v58 = vrot.slane %v3542_v1, 1 }
 0x2be   : > { %v3620_v57 = vadd.f32 %v3619_v53, %v3618_v14  ;;  %v3559_v61 = vsel %vm271_vm0, %v3521_v3, 0.0  ;;  %v6745_v39 = vadd.f32 %v3706_v16, %v3705_v30  ;;  %v6747_v2 = vadd.f32 %v3784_v0, %v3783_v38 }
 0x2bf   : > { %v3697_v11 = vrot.slane %v3696_v50, 2  ;;  %v3482_v55 = vrot.slane %v3481_v15, 4  ;;  %v3466_v42 = vadd.f32 %v3465_v31, %v3464_v25  ;;  %v3605_v46 = vmul.f32 %v3337_v20, %v5211_v26 }
 0x2c0   : > { %7495 = vst [vmem:[#allocation19_spill] sm:$0xff] %v6747_v2  ;;  %v3689_v45 = vmul.f32 %v3337_v20, %v5147_v13  ;;  %v3773_v62 = vmul.f32 %v3337_v20, %v5133_v7  ;;  %v3421_v51 = vsel %vm342_vm4, %v3388_v54, %v3420_v63  ;;  %v3405_v22 = vadd.f32 %v3404_v10, %v3403_v40 }
 0x2c1   : > { %v3560_v47 = vrot.slane %v3559_v61, 4  ;;  %v3857_v14 = vmul.f32 %v3337_v20, %v5128_v5  ;;  %v3544_v30 = vadd.f32 %v3543_v58, %v3542_v1  ;;  %v3621_v38 = vrot.slane %v3620_v57, 1 }
 0x2c2   : > { %v3637_v32 = vsel %vm271_vm0, %v3605_v46, 0.0  ;;  %v3715_v59 = vsel %vm271_vm0, %v3689_v45, 0.0  ;;  %v3698_v41 = vadd.f32 %v3697_v11, %v3696_v50  ;;  %v3483_v25 = vadd.f32 %v3482_v55, %v3481_v15 }
 0x2c3   : > { %v3638_v9 = vrot.slane %v3637_v32, 4  ;;  %v3793_v35 = vsel %vm271_vm0, %v3773_v62, 0.0  ;;  %v6760_v44 = vsel %vm344_vm5, %v3395_v29, %v3421_v51  ;;  %v3505_v63 = vsel %vm340_vm3, %v3466_v42, %v3504_v60 }
 0x2c4   : > { %v3352_v20 = vmul.f32 %v6754_v12, %v5298_v17  ;;  %v3436_v34 = vmul.f32 %v6754_v12, %v5218_v33  ;;  %v3406_v23 = vrot.slane %v3405_v22, 2  ;;  %v3561_v1 = vadd.f32 %v3560_v47, %v3559_v61 }
 0x2c5   : > { %v3716_v53 = vrot.slane %v3715_v59, 4  ;;  %v3871_v40 = vsel %vm271_vm0, %v3857_v14, 0.0  ;;  %v3794_v3 = vrot.slane %v3793_v35, 4  ;;  %v3520_v50 = vmul.f32 %v6754_v12, %v5211_v26 }
 0x2c6   : > { %v3396_v16 = vsel %vm271_vm0, %v3352_v20, 0.0  ;;  %v3474_v0 = vsel %vm271_vm0, %v3436_v34, 0.0  ;;  %v6773_v60 = vsel %vm342_vm4, %v3473_v43, %v3505_v63  ;;  %v3589_v29 = vsel %vm338_vm2, %v3544_v30, %v3588_v37 }
 0x2c7   : > { %v3622_v31 = vadd.f32 %v3621_v38, %v3620_v57  ;;  %v3639_v15 = vadd.f32 %v3638_v9, %v3637_v32  ;;  %v3699_v54 = vrot.slane %v3698_v41, 1  ;;  %v3872_v10 = vrot.slane %v3871_v40, 4 }
 0x2c8   : > { %v3397_v58 = vrot.slane %v3396_v16, 4  ;;  %v3475_v61 = vrot.slane %v3474_v0, 4  ;;  %v3407_v11 = vadd.f32 %v3406_v23, %v3405_v22  ;;  %v3484_v55 = vrot.slane %v3483_v25, 2 }
 0x2c9   : > { %v3562_v42 = vrot.slane %v3561_v1, 2  ;;  %v3552_v46 = vsel %vm271_vm0, %v3520_v50, 0.0  ;;  %v3717_v45 = vadd.f32 %v3716_v53, %v3715_v59  ;;  %v3795_v62 = vadd.f32 %v3794_v3, %v3793_v35 }
 0x2ca   : > { %v3398_v51 = vadd.f32 %v3397_v58, %v3396_v16  ;;  %v3476_v47 = vadd.f32 %v3475_v61, %v3474_v0  ;;  %v6778_v43 = vsel %vm340_vm3, %v3551_v6, %v3589_v29  ;;  %v3673_v37 = vsel %vm336_vm1, %v3622_v31, %v6716_v36 }
 0x2cb   : > { %v3640_v57 = vrot.slane %v3639_v15, 2  ;;  %v3604_v14 = vmul.f32 %v6754_v12, %v5147_v13  ;;  %v3700_v30 = vadd.f32 %v3699_v54, %v3698_v41  ;;  %v3873_v22 = vadd.f32 %v3872_v10, %v3871_v40  ;;  %v3941_v40 = vpop.permute.xlu1 %3940 }
 0x2cc   : > { %v3399_v38 = vrot.slane %v3398_v51, 2  ;;  %v3553_v32 = vrot.slane %v3552_v46, 4  ;;  %v3408_v9 = vrot.slane %v3407_v11, 1  ;;  %v3485_v63 = vadd.f32 %v3484_v55, %v3483_v25 }
 0x2cd   : > { %v3563_v59 = vadd.f32 %v3562_v42, %v3561_v1  ;;  %v3630_v35 = vsel %vm271_vm0, %v3604_v14, 0.0  ;;  %v3718_v20 = vrot.slane %v3717_v45, 2  ;;  %v3796_v34 = vrot.slane %v3795_v62, 2 }
 0x2ce   : > { %v3400_v6 = vadd.f32 %v3399_v38, %v3398_v51  ;;  %v3477_v23 = vrot.slane %v3476_v47, 2  ;;  %v3641_v53 = vadd.f32 %v3640_v57, %v3639_v15  ;;  %v3631_v3 = vrot.slane %v3630_v35, 4 }
 0x2cf   : > { %v3688_v36 = vmul.f32 %v6754_v12, %v5133_v7  ;;  %v3772_v41 = vmul.f32 %v6754_v12, %v5128_v5  ;;  %v6791_v16 = vsel %vm338_vm2, %v6742_v48, %v3673_v37  ;;  %v3874_v25 = vrot.slane %v3873_v22, 2  ;;  %v3939_v37 = vpop.permute.xlu0 %3938 }
 0x2d0   : > { %v3401_v1 = vrot.slane %v3400_v6, 1  ;;  %v3554_v0 = vadd.f32 %v3553_v32, %v3552_v46  ;;  %v6795_v50 = vsel %vm336_vm1, %v6745_v39, %v3700_v30  ;;  %v3409_v29 = vadd.f32 %v3408_v9, %v3407_v11  ;;  %v3945_v32 = vpop.permute.xlu1 %3944 }
 0x2d1   : > { %7496 = vst [vmem:[#allocation20_spill] sm:$0xff] %v6795_v50  ;;  %v3486_v31 = vrot.slane %v3485_v63, 1  ;;  %v3632_v15 = vadd.f32 %v3631_v3, %v3630_v35  ;;  %v3564_v54 = vrot.slane %v3563_v59, 1  ;;  %v3478_v58 = vadd.f32 %v3477_v23, %v3476_v47 }
 0x2d2   : > { %v3402_v10 = vadd.f32 %v3401_v1, %v3400_v6  ;;  %v3708_v61 = vsel %vm271_vm0, %v3688_v36, 0.0  ;;  %v3642_v55 = vrot.slane %v3641_v53, 1  ;;  %v3719_v42 = vadd.f32 %v3718_v20, %v3717_v45 }
 0x2d3   : > { %v3797_v48 = vadd.f32 %v3796_v34, %v3795_v62  ;;  %v3786_v51 = vsel %vm271_vm0, %v3772_v41, 0.0  ;;  %v3875_v46 = vadd.f32 %v3874_v25, %v3873_v22  ;;  %v3555_v57 = vrot.slane %v3554_v0, 2 }
 0x2d4   : > { %v3423_v39 = vsel %vm346_vm6, %v3402_v10, %v6760_v44  ;;  %v3963_v11 = vmul.f32 %v3941_v40, %v5128_v5  ;;  %v3633_v30 = vrot.slane %v3632_v15, 2  ;;  %v3709_v47 = vrot.slane %v3708_v61, 4 }
 0x2d5   : > { %v3424_v14 = vsel %vm348_vm7, %v3409_v29, %v3423_v39  ;;  %v3856_v38 = vmul.f32 %v6754_v12, %v5126_v4  ;;  %v3479_v45 = vrot.slane %v3478_v58, 1  ;;  %v3787_v62 = vrot.slane %v3786_v51, 4 }
 0x2d6   : > { %4715 = vst.msk [vmem:[%s5411_s8 + $0x28] sm:$0xff] %vm271_vm0, %v3424_v14  ;;  %v4047_v22 = vmul.f32 %v3941_v40, %v5126_v4  ;;  %v3962_v9 = vmul.f32 %v3939_v37, %v5126_v4  ;;  %v6809_v44 = vadd.f32 %v3486_v31, %v3485_v63  ;;  %v6811_v35 = vadd.f32 %v3564_v54, %v3563_v59 }
 0x2d7   : > { %v3720_v20 = vrot.slane %v3719_v42, 1  ;;  %v3798_v34 = vrot.slane %v3797_v48, 1  ;;  %v3556_v6 = vadd.f32 %v3555_v57, %v3554_v0  ;;  %v3977_v23 = vsel %vm271_vm0, %v3963_v11, 0.0 }
 0x2d8   : > { %v3970_v12 = vsel %vm271_vm0, %v3962_v9, 0.0  ;;  %v3965_v3 = vmul.f32 %v3945_v32, %v5147_v13  ;;  %v3876_v36 = vrot.slane %v3875_v46, 1  ;;  %v3634_v41 = vadd.f32 %v3633_v30, %v3632_v15 }
 0x2d9   : > { %v3710_v25 = vadd.f32 %v3709_v47, %v3708_v61  ;;  %v3864_v40 = vsel %vm271_vm0, %v3856_v38, 0.0  ;;  %v6817_v1 = vadd.f32 %v3642_v55, %v3641_v53  ;;  %v3480_v63 = vadd.f32 %v3479_v45, %v3478_v58  ;;  %v3943_v45 = vpop.permute.xlu0 %3942 }
 0x2da   : > { %v3788_v29 = vadd.f32 %v3787_v62, %v3786_v51  ;;  %v4055_v59 = vsel %vm271_vm0, %v4047_v22, 0.0  ;;  %v6820_v31 = vadd.f32 %v3720_v20, %v3719_v42  ;;  %v6822_v0 = vadd.f32 %v3798_v34, %v3797_v48 }
 0x2db   : > { %7497 = vst [vmem:[#allocation21_spill] sm:$0xff] %v6817_v1  ;;  %v3978_v54 = vrot.slane %v3977_v23, 4  ;;  %v3971_v10 = vrot.slane %v3970_v12, 4  ;;  %v3557_v37 = vrot.slane %v3556_v6, 1  ;;  %v3865_v39 = vrot.slane %v3864_v40, 4 }
 0x2dc   : > { %7498 = vst [vmem:[#allocation22_spill] sm:$0xff] %v6820_v31  ;;  %7499 = vst [vmem:[#allocation23_spill] sm:$0xff] %v6822_v0  ;;  %v3991_v57 = vsel %vm271_vm0, %v3965_v3, 0.0  ;;  %v4049_v15 = vmul.f32 %v3945_v32, %v5133_v7  ;;  %v6826_v61 = vadd.f32 %v3876_v36, %v3875_v46  ;;  %v3635_v53 = vrot.slane %v3634_v41, 1 }
 0x2dd   : > { %v3711_v55 = vrot.slane %v3710_v25, 2  ;;  %v4056_v58 = vrot.slane %v4055_v59, 4  ;;  %v6830_v51 = vsel %vm344_vm5, %v3480_v63, %v6773_v60  ;;  %v3789_v42 = vrot.slane %v3788_v29, 2 }
 0x2de   : > { %7500 = vst [vmem:[#allocation24_spill] sm:$0xff] %v6826_v61  ;;  %v4069_v48 = vsel %vm271_vm0, %v4049_v15, 0.0  ;;  %v4133_v11 = vmul.f32 %v3945_v32, %v5128_v5  ;;  %v3979_v14 = vadd.f32 %v3978_v54, %v3977_v23  ;;  %v3972_v30 = vadd.f32 %v3971_v10, %v3970_v12 }
 0x2df   : > { %v3992_v47 = vrot.slane %v3991_v57, 4  ;;  %v4070_v38 = vrot.slane %v4069_v48, 4  ;;  %v6834_v62 = vadd.f32 %v3557_v37, %v3556_v6  ;;  %v3866_v46 = vadd.f32 %v3865_v39, %v3864_v40 }
 0x2e0   : > { %v4147_v22 = vsel %vm271_vm0, %v4133_v11, 0.0  ;;  %v4217_v9 = vmul.f32 %v3945_v32, %v5126_v4  ;;  %v6838_v20 = vadd.f32 %v3635_v53, %v3634_v41  ;;  %v3712_v60 = vadd.f32 %v3711_v55, %v3710_v25  ;;  %v3949_v53 = vpop.permute.xlu1 %3948 }
 0x2e1   : > { %v4057_v34 = vadd.f32 %v4056_v58, %v4055_v59  ;;  %v4148_v3 = vrot.slane %v4147_v22, 4  ;;  %v3790_v36 = vadd.f32 %v3789_v42, %v3788_v29  ;;  %v3964_v23 = vmul.f32 %v3943_v45, %v5133_v7 }
 0x2e2   : > { %7501 = vst [vmem:[#allocation25_spill] sm:$0xff] %v6838_v20  ;;  %v4225_v63 = vsel %vm271_vm0, %v4217_v9, 0.0  ;;  %v4048_v12 = vmul.f32 %v3943_v45, %v5128_v5  ;;  %v3980_v54 = vrot.slane %v3979_v14, 2  ;;  %v3973_v6 = vrot.slane %v3972_v30, 2 }
 0x2e3   : > { %v3993_v10 = vadd.f32 %v3992_v47, %v3991_v57  ;;  %v4071_v40 = vadd.f32 %v4070_v38, %v4069_v48  ;;  %v4149_v37 = vadd.f32 %v4148_v3, %v4147_v22  ;;  %v4226_v39 = vrot.slane %v4225_v63, 4 }
 0x2e4   : > { %v3984_v32 = vsel %vm271_vm0, %v3964_v23, 0.0  ;;  %v4062_v41 = vsel %vm271_vm0, %v4048_v12, 0.0  ;;  %v3713_v25 = vrot.slane %v3712_v60, 1  ;;  %v3867_v59 = vrot.slane %v3866_v46, 2 }
 0x2e5   : > { %v4058_v15 = vrot.slane %v4057_v34, 2  ;;  %v3985_v29 = vrot.slane %v3984_v32, 4  ;;  %v3791_v55 = vrot.slane %v3790_v36, 1  ;;  %v4227_v58 = vadd.f32 %v4226_v39, %v4225_v63 }
 0x2e6   : > { %v4063_v42 = vrot.slane %v4062_v41, 4  ;;  %v4132_v11 = vmul.f32 %v3943_v45, %v5126_v4  ;;  %v3981_v9 = vadd.f32 %v3980_v54, %v3979_v14  ;;  %v3974_v61 = vadd.f32 %v3973_v6, %v3972_v30 }
 0x2e7   : > { %v3994_v57 = vrot.slane %v3993_v10, 2  ;;  %v3986_v48 = vadd.f32 %v3985_v29, %v3984_v32  ;;  %v4072_v47 = vrot.slane %v4071_v40, 2  ;;  %v4150_v38 = vrot.slane %v4149_v37, 2 }
 0x2e8   : > { %v4140_v22 = vsel %vm271_vm0, %v4132_v11, 0.0  ;;  %v3967_v3 = vmul.f32 %v3949_v53, %v5218_v33  ;;  %v3868_v23 = vadd.f32 %v3867_v59, %v3866_v46  ;;  %v4059_v12 = vadd.f32 %v4058_v15, %v4057_v34 }
 0x2e9   : > { %v4228_v0 = vrot.slane %v4227_v58, 2  ;;  %v4064_v31 = vadd.f32 %v4063_v42, %v4062_v41  ;;  %v6848_v2 = vadd.f32 %v3713_v25, %v3712_v60  ;;  %v3987_v63 = vrot.slane %v3986_v48, 2 }
 0x2ea   : > { %v4141_v39 = vrot.slane %v4140_v22, 4  ;;  %v4051_v45 = vmul.f32 %v3949_v53, %v5211_v26  ;;  %v6851_v14 = vadd.f32 %v3791_v55, %v3790_v36  ;;  %v3982_v30 = vrot.slane %v3981_v9, 1 }
 0x2eb   : > { %7502 = vst [vmem:[#allocation26_spill] sm:$0xff] %v6848_v2  ;;  %v3975_v54 = vrot.slane %v3974_v61, 1  ;;  %v3995_v6 = vadd.f32 %v3994_v57, %v3993_v10  ;;  %v4073_v32 = vadd.f32 %v4072_v47, %v4071_v40  ;;  %v4151_v29 = vadd.f32 %v4150_v38, %v4149_v37 }
 0x2ec   : > { %7503 = vst [vmem:[#allocation27_spill] sm:$0xff] %v6851_v14  ;;  %v4005_v11 = vsel %vm271_vm0, %v3967_v3, 0.0  ;;  %v4135_v46 = vmul.f32 %v3949_v53, %v5147_v13  ;;  %v3869_v34 = vrot.slane %v3868_v23, 1  ;;  %v4060_v59 = vrot.slane %v4059_v12, 1 }
 0x2ed   : > { %v4229_v41 = vadd.f32 %v4228_v0, %v4227_v58  ;;  %v4065_v60 = vrot.slane %v4064_v31, 2  ;;  %v3988_v25 = vadd.f32 %v3987_v63, %v3986_v48  ;;  %v4142_v15 = vadd.f32 %v4141_v39, %v4140_v22 }
 0x2ee   : > { %v4083_v42 = vsel %vm271_vm0, %v4051_v45, 0.0  ;;  %v4219_v36 = vmul.f32 %v3949_v53, %v5133_v7  ;;  %v3983_v55 = vadd.f32 %v3982_v30, %v3981_v9  ;;  %v3976_v14 = vadd.f32 %v3975_v54, %v3974_v61  ;;  %v3947_v54 = vpop.permute.xlu0 %3946 }
 0x2ef   : > { %v3996_v2 = vrot.slane %v3995_v6, 1  ;;  %v4006_v10 = vrot.slane %v4005_v11, 4  ;;  %v4074_v40 = vrot.slane %v4073_v32, 1  ;;  %v4152_v37 = vrot.slane %v4151_v29, 1 }
 0x2f0   : > { %v4161_v57 = vsel %vm271_vm0, %v4135_v46, 0.0  ;;  %v4303_v47 = vmul.f32 %v3949_v53, %v5128_v5  ;;  %v6859_v38 = vadd.f32 %v3869_v34, %v3868_v23  ;;  %v4230_v0 = vrot.slane %v4229_v41, 1 }
 0x2f1   : > { %v4066_v58 = vadd.f32 %v4065_v60, %v4064_v31  ;;  %v4084_v48 = vrot.slane %v4083_v42, 4  ;;  %v6861_v22 = vadd.f32 %v4060_v59, %v4059_v12  ;;  %v3989_v3 = vrot.slane %v3988_v25, 1 }
 0x2f2   : > { %7504 = vst [vmem:[#allocation28_spill] sm:$0xff] %v6859_v38  ;;  %v4143_v63 = vrot.slane %v4142_v15, 2  ;;  %v4239_v9 = vsel %vm271_vm0, %v4219_v36, 0.0  ;;  %v4034_v61 = vsel %vm336_vm1, %v3983_v55, %v3976_v14  ;;  %v6865_v39 = vadd.f32 %v3996_v2, %v3995_v6 }
 0x2f3   : > { %v4007_v45 = vadd.f32 %v4006_v10, %v4005_v11  ;;  %v4162_v30 = vrot.slane %v4161_v57, 4  ;;  %v6867_v46 = vadd.f32 %v4074_v40, %v4073_v32  ;;  %v6869_v23 = vadd.f32 %v4152_v37, %v4151_v29 }
 0x2f4   : > { %v4317_v31 = vsel %vm271_vm0, %v4303_v47, 0.0  ;;  %v4387_v12 = vmul.f32 %v3949_v53, %v5126_v4  ;;  %v6873_v34 = vadd.f32 %v4230_v0, %v4229_v41  ;;  %v4067_v59 = vrot.slane %v4066_v58, 1 }
 0x2f5   : > { %v4085_v60 = vadd.f32 %v4084_v48, %v4083_v42  ;;  %v4240_v36 = vrot.slane %v4239_v9, 4  ;;  %v3990_v38 = vadd.f32 %v3989_v3, %v3988_v25  ;;  %v4144_v14 = vadd.f32 %v4143_v63, %v4142_v15 }
 0x2f6   : > { %v4395_v2 = vsel %vm271_vm0, %v4387_v12, 0.0  ;;  %v3966_v6 = vmul.f32 %v3947_v54, %v5211_v26  ;;  %v4008_v11 = vrot.slane %v4007_v45, 2  ;;  %v4163_v32 = vadd.f32 %v4162_v30, %v4161_v57 }
 0x2f7   : > { %v4318_v55 = vrot.slane %v4317_v31, 4  ;;  %v4050_v29 = vmul.f32 %v3947_v54, %v5147_v13  ;;  %v4396_v10 = vrot.slane %v4395_v2, 4  ;;  %v4134_v53 = vmul.f32 %v3947_v54, %v5133_v7 }
 0x2f8   : > { %v3998_v40 = vsel %vm271_vm0, %v3966_v6, 0.0  ;;  %v4218_v41 = vmul.f32 %v3947_v54, %v5128_v5  ;;  %v4068_v42 = vadd.f32 %v4067_v59, %v4066_v58  ;;  %v4086_v37 = vrot.slane %v4085_v60, 2  ;;  %v6885_v6 = vpop.permute.xlu1 %3952 }
 0x2f9   : > { %v4241_v25 = vadd.f32 %v4240_v36, %v4239_v9  ;;  %v3999_v15 = vrot.slane %v3998_v40, 4  ;;  %v4035_v47 = vsel %vm338_vm2, %v3990_v38, %v4034_v61  ;;  %v4076_v0 = vsel %vm271_vm0, %v4050_v29, 0.0 }
 0x2fa   : > { %v4154_v57 = vsel %vm271_vm0, %v4134_v53, 0.0  ;;  %v4232_v48 = vsel %vm271_vm0, %v4218_v41, 0.0  ;;  %v4164_v3 = vrot.slane %v4163_v32, 2  ;;  %v4319_v63 = vadd.f32 %v4318_v55, %v4317_v31 }
 0x2fb   : > { %v4000_v30 = vadd.f32 %v3999_v15, %v3998_v40  ;;  %v4077_v12 = vrot.slane %v4076_v0, 4  ;;  %v4397_v50 = vadd.f32 %v4396_v10, %v4395_v2  ;;  %v4155_v28 = vrot.slane %v4154_v57, 4 }
 0x2fc   : > { %v4233_v58 = vrot.slane %v4232_v48, 4  ;;  %v4302_v9 = vmul.f32 %v3947_v54, %v5126_v4  ;;  %v4145_v59 = vrot.slane %v4144_v14, 1  ;;  %v4242_v36 = vrot.slane %v4241_v25, 2 }
 0x2fd   : > { %v4001_v38 = vrot.slane %v4000_v30, 2  ;;  %v4078_v61 = vadd.f32 %v4077_v12, %v4076_v0  ;;  %v4009_v29 = vadd.f32 %v4008_v11, %v4007_v45  ;;  %v4156_v56 = vadd.f32 %v4155_v28, %v4154_v57 }
 0x2fe   : > { %v4234_v53 = vadd.f32 %v4233_v58, %v4232_v48  ;;  %v3969_v41 = vmul.f32 %v6885_v6, %v5300_v18  ;;  %v4087_v31 = vadd.f32 %v4086_v37, %v4085_v60  ;;  %v4165_v55 = vadd.f32 %v4164_v3, %v4163_v32 }
 0x2ff   : > { %v4002_v40 = vadd.f32 %v4001_v38, %v4000_v30  ;;  %v4079_v15 = vrot.slane %v4078_v61, 2  ;;  %v4320_v27 = vrot.slane %v4319_v63, 2  ;;  %v4398_v2 = vrot.slane %v4397_v50, 2 }
 0x300   : > { %v4310_v10 = vsel %vm271_vm0, %v4302_v9, 0.0  ;;  %v4019_v54 = vsel %vm271_vm0, %v3969_v41, 0.0  ;;  %v4119_v24 = vsel %vm336_vm1, %v4068_v42, %v6861_v22  ;;  %v4243_v0 = vadd.f32 %v4242_v36, %v4241_v25 }
 0x301   : > { %v4003_v45 = vrot.slane %v4002_v40, 1  ;;  %v4157_v28 = vrot.slane %v4156_v56, 2  ;;  %v4146_v11 = vadd.f32 %v4145_v59, %v4144_v14  ;;  %v4080_v57 = vadd.f32 %v4079_v15, %v4078_v61 }
 0x302   : > { %v4235_v48 = vrot.slane %v4234_v53, 2  ;;  %v4053_v60 = vmul.f32 %v6885_v6, %v5298_v17  ;;  %v4010_v32 = vrot.slane %v4009_v29, 1  ;;  %v4088_v37 = vrot.slane %v4087_v31, 1 }
 0x303   : > { %v4311_v3 = vrot.slane %v4310_v10, 4  ;;  %v4020_v30 = vrot.slane %v4019_v54, 4  ;;  %v4036_v12 = vsel %vm340_vm3, %v6865_v39, %v4035_v47  ;;  %v4166_v58 = vrot.slane %v4165_v55, 1 }
 0x304   : > { %v4321_v9 = vadd.f32 %v4320_v27, %v4319_v63  ;;  %v4399_v38 = vadd.f32 %v4398_v2, %v4397_v50  ;;  %v4120_v22 = vsel %vm338_vm2, %v6867_v46, %v4119_v24  ;;  %v4244_v42 = vrot.slane %v4243_v0, 1 }
 0x305   : > { %v4004_v14 = vadd.f32 %v4003_v45, %v4002_v40  ;;  %v4158_v25 = vadd.f32 %v4157_v28, %v4156_v56  ;;  %v4204_v59 = vsel %vm336_vm1, %v6869_v23, %v4146_v11  ;;  %v4081_v36 = vrot.slane %v4080_v57, 1 }
 0x306   : > { %v4236_v61 = vadd.f32 %v4235_v48, %v4234_v53  ;;  %v4097_v41 = vsel %vm271_vm0, %v4053_v60, 0.0  ;;  %v4011_v15 = vadd.f32 %v4010_v32, %v4009_v29  ;;  %v4089_v1 = vadd.f32 %v4088_v37, %v4087_v31 }
 0x307   : > { %v4312_v20 = vadd.f32 %v4311_v3, %v4310_v10  ;;  %v4021_v39 = vadd.f32 %v4020_v30, %v4019_v54  ;;  %v4167_v47 = vadd.f32 %v4166_v58, %v4165_v55  ;;  %v4322_v27 = vrot.slane %v4321_v9, 1 }
 0x308   : > { %v4400_v50 = vrot.slane %v4399_v38, 1  ;;  %v4137_v24 = vmul.f32 %v6885_v6, %v5218_v33  ;;  %v4245_v46 = vadd.f32 %v4244_v42, %v4243_v0  ;;  %v4037_v56 = vsel %vm342_vm4, %v4004_v14, %v4036_v12  ;;  %v6914_v0 = vpop.permute.xlu0 %3950 }
 0x309   : > { %v4159_v63 = vrot.slane %v4158_v25, 1  ;;  %v4098_v40 = vrot.slane %v4097_v41, 4  ;;  %v4082_v23 = vadd.f32 %v4081_v36, %v4080_v57  ;;  %v4237_v2 = vrot.slane %v4236_v61, 1 }
 0x30a   : > { %v4221_v53 = vmul.f32 %v6885_v6, %v5211_v26  ;;  %v4305_v29 = vmul.f32 %v6885_v6, %v5147_v13  ;;  %v4313_v31 = vrot.slane %v4312_v20, 2  ;;  %v4022_v55 = vrot.slane %v4021_v39, 2 }
 0x30b   : > { %v4389_v10 = vmul.f32 %v6885_v6, %v5133_v7  ;;  %v4473_v54 = vmul.f32 %v6885_v6, %v5128_v5  ;;  %v6916_v45 = vadd.f32 %v4322_v27, %v4321_v9  ;;  %v6918_v28 = vadd.f32 %v4400_v50, %v4399_v38 }
 0x30c   : > { %v6921_v11 = vsel %vm344_vm5, %v4011_v15, %v4037_v56  ;;  %v4175_v57 = vsel %vm271_vm0, %v4137_v24, 0.0  ;;  %v4160_v48 = vadd.f32 %v4159_v63, %v4158_v25  ;;  %v4099_v60 = vadd.f32 %v4098_v40, %v4097_v41 }
 0x30d   : > { %v4253_v32 = vsel %vm271_vm0, %v4221_v53, 0.0  ;;  %v4331_v37 = vsel %vm271_vm0, %v4305_v29, 0.0  ;;  %v4121_v3 = vsel %vm340_vm3, %v4082_v23, %v4120_v22  ;;  %v4238_v6 = vadd.f32 %v4237_v2, %v4236_v61 }
 0x30e   : > { %v4409_v30 = vsel %vm271_vm0, %v4389_v10, 0.0  ;;  %v3968_v12 = vmul.f32 %v6914_v0, %v5298_v17  ;;  %v4314_v58 = vadd.f32 %v4313_v31, %v4312_v20  ;;  %v4023_v9 = vadd.f32 %v4022_v55, %v4021_v39 }
 0x30f   : > { %v4176_v38 = vrot.slane %v4175_v57, 4  ;;  %v4487_v42 = vsel %vm271_vm0, %v4473_v54, 0.0  ;;  %v4254_v14 = vrot.slane %v4253_v32, 4  ;;  %v4332_v25 = vrot.slane %v4331_v37, 4 }
 0x310   : > { %v4012_v36 = vsel %vm271_vm0, %v3968_v12, 0.0  ;;  %v4052_v41 = vmul.f32 %v6914_v0, %v5218_v33  ;;  %v6935_v22 = vsel %vm342_vm4, %v4089_v1, %v4121_v3  ;;  %v4100_v61 = vrot.slane %v4099_v60, 2 }
 0x311   : > { %v4410_v15 = vrot.slane %v4409_v30, 4  ;;  %v4013_v27 = vrot.slane %v4012_v36, 4  ;;  %v4205_v50 = vsel %vm338_vm2, %v4160_v48, %v4204_v59  ;;  %v4488_v20 = vrot.slane %v4487_v42, 4 }
 0x312   : > { %v4090_v39 = vsel %vm271_vm0, %v4052_v41, 0.0  ;;  %v4136_v24 = vmul.f32 %v6914_v0, %v5211_v26  ;;  %v4289_v56 = vsel %vm336_vm1, %v4238_v6, %v6873_v34  ;;  %v4315_v63 = vrot.slane %v4314_v58, 1 }
 0x313   : > { %v4024_v40 = vrot.slane %v4023_v9, 1  ;;  %v4014_v23 = vadd.f32 %v4013_v27, %v4012_v36  ;;  %v4177_v2 = vadd.f32 %v4176_v38, %v4175_v57  ;;  %v4255_v1 = vadd.f32 %v4254_v14, %v4253_v32 }
 0x314   : > { %v4333_v53 = vadd.f32 %v4332_v25, %v4331_v37  ;;  %v4091_v29 = vrot.slane %v4090_v39, 4  ;;  %v6944_v31 = vsel %vm340_vm3, %v4167_v47, %v4205_v50  ;;  %v4101_v59 = vadd.f32 %v4100_v61, %v4099_v60 }
 0x315   : > { %v4411_v55 = vadd.f32 %v4410_v15, %v4409_v30  ;;  %v4015_v10 = vrot.slane %v4014_v23, 2  ;;  %v4489_v54 = vadd.f32 %v4488_v20, %v4487_v42  ;;  %v4168_v3 = vsel %vm271_vm0, %v4136_v24, 0.0  ;;  %v6953_v30 = vpop.permute.xlu1 %3428 }
 0x316   : > { %v4092_v48 = vadd.f32 %v4091_v29, %v4090_v39  ;;  %v4220_v34 = vmul.f32 %v6914_v0, %v5147_v13  ;;  %v6950_v6 = vsel %vm338_vm2, %v4245_v46, %v4289_v56  ;;  %v4316_v57 = vadd.f32 %v4315_v63, %v4314_v58 }
 0x317   : > { %v4025_v32 = vadd.f32 %v4024_v40, %v4023_v9  ;;  %v4016_v37 = vadd.f32 %v4015_v10, %v4014_v23  ;;  %v4178_v12 = vrot.slane %v4177_v2, 2  ;;  %v4256_v38 = vrot.slane %v4255_v1, 2 }
 0x318   : > { %v4334_v47 = vrot.slane %v4333_v53, 2  ;;  %v4246_v60 = vsel %vm271_vm0, %v4220_v34, 0.0  ;;  %v4102_v42 = vrot.slane %v4101_v59, 1  ;;  %v4169_v25 = vrot.slane %v4168_v3, 4 }
 0x319   : > { %v4017_v14 = vrot.slane %v4016_v37, 1  ;;  %v4304_v36 = vmul.f32 %v6914_v0, %v5133_v7  ;;  %v4412_v41 = vrot.slane %v4411_v55, 2  ;;  %v4490_v61 = vrot.slane %v4489_v54, 2 }
 0x31a   : > { %v4093_v46 = vrot.slane %v4092_v48, 2  ;;  %v4388_v58 = vmul.f32 %v6914_v0, %v5128_v5  ;;  %v4247_v15 = vrot.slane %v4246_v60, 4  ;;  %v3438_v50 = vmul.f32 %v6953_v30, %v5300_v18 }
 0x31b   : > { %v4018_v9 = vadd.f32 %v4017_v14, %v4016_v37  ;;  %v4324_v27 = vsel %vm271_vm0, %v4304_v36, 0.0  ;;  %v4179_v20 = vadd.f32 %v4178_v12, %v4177_v2  ;;  %v4257_v39 = vadd.f32 %v4256_v38, %v4255_v1 }
 0x31c   : > { %v4335_v24 = vadd.f32 %v4334_v47, %v4333_v53  ;;  %v4402_v56 = vsel %vm271_vm0, %v4388_v58, 0.0  ;;  %v4170_v40 = vadd.f32 %v4169_v25, %v4168_v3  ;;  %v4325_v23 = vrot.slane %v4324_v27, 4 }
 0x31d   : > { %v4039_v63 = vsel %vm346_vm6, %v4018_v9, %v6921_v11  ;;  %v4472_v5 = vmul.f32 %v6914_v0, %v5126_v4  ;;  %v6969_v29 = vsel %vm336_vm1, %v6916_v45, %v4316_v57  ;;  %v4413_v10 = vadd.f32 %v4412_v41, %v4411_v55 }
 0x31e   : > { %v4040_v34 = vsel %vm348_vm7, %v4025_v32, %v4039_v63  ;;  %v4403_v2 = vrot.slane %v4402_v56, 4  ;;  %v4491_v1 = vadd.f32 %v4490_v61, %v4489_v54  ;;  %v4094_v53 = vadd.f32 %v4093_v46, %v4092_v48 }
 0x31f   : > { %4722 = vst.msk [vmem:[%s5411_s8 + $0x30] sm:$0xff] %vm271_vm0, %v4040_v34  ;;  %v4248_v37 = vadd.f32 %v4247_v15, %v4246_v60  ;;  %v3488_v11 = vsel %vm271_vm0, %v3438_v50, 0.0  ;;  %v6975_v3 = vadd.f32 %v4102_v42, %v4101_v59  ;;  %v4180_v12 = vrot.slane %v4179_v20, 1 }
 0x320   : > { %v4258_v38 = vrot.slane %v4257_v39, 1  ;;  %v3489_v4 = vrot.slane %v3488_v11, 4  ;;  %v4336_v0 = vrot.slane %v4335_v24, 1  ;;  %v4171_v47 = vrot.slane %v4170_v40, 2 }
 0x321   : > { %v4326_v45 = vadd.f32 %v4325_v23, %v4324_v27  ;;  %v4480_v55 = vsel %vm271_vm0, %v4472_v5, 0.0  ;;  %v4404_v57 = vadd.f32 %v4403_v2, %v4402_v56  ;;  %v3522_v54 = vmul.f32 %v6953_v30, %v5298_v17  ;;  %v2813_v2 = vpop.permute.xlu0 %2812 }
 0x322   : > { %v3490_v32 = vadd.f32 %v3489_v4, %v3488_v11  ;;  %v3606_v48 = vmul.f32 %v6953_v30, %v5218_v33  ;;  %v4414_v60 = vrot.slane %v4413_v10, 1  ;;  %v4492_v14 = vrot.slane %v4491_v1, 1 }
 0x323   : > { %v4095_v59 = vrot.slane %v4094_v53, 1  ;;  %v4249_v42 = vrot.slane %v4248_v37, 2  ;;  %v6982_v25 = vadd.f32 %v4180_v12, %v4179_v20  ;;  %v4481_v36 = vrot.slane %v4480_v55, 4 }
 0x324   : > { %v3491_v41 = vrot.slane %v3490_v32, 2  ;;  %v3690_v61 = vmul.f32 %v6953_v30, %v5211_v26  ;;  %v6986_v46 = vadd.f32 %v4258_v38, %v4257_v39  ;;  %v6988_v58 = vadd.f32 %v4336_v0, %v4335_v24 }
 0x325   : > { %v4172_v9 = vadd.f32 %v4171_v47, %v4170_v40  ;;  %v4327_v15 = vrot.slane %v4326_v45, 2  ;;  %v4405_v27 = vrot.slane %v4404_v57, 2  ;;  %v3566_v56 = vsel %vm271_vm0, %v3522_v54, 0.0 }
 0x326   : > { %v3492_v50 = vadd.f32 %v3491_v41, %v3490_v32  ;;  %v3644_v63 = vsel %vm271_vm0, %v3606_v48, 0.0  ;;  %v6992_v23 = vadd.f32 %v4414_v60, %v4413_v10  ;;  %v6994_v20 = vadd.f32 %v4492_v14, %v4491_v1 }
 0x327   : > { %v4096_v5 = vadd.f32 %v4095_v59, %v4094_v53  ;;  %v4250_v34 = vadd.f32 %v4249_v42, %v4248_v37  ;;  %v4482_v11 = vadd.f32 %v4481_v36, %v4480_v55  ;;  %v3722_v24 = vsel %vm271_vm0, %v3690_v61, 0.0 }
 0x328   : > { %7505 = vst [vmem:[#allocation29_spill] sm:$0xff] %v6994_v20  ;;  %v3493_v39 = vrot.slane %v3492_v50, 1  ;;  %v3774_v40 = vmul.f32 %v6953_v30, %v5147_v13  ;;  %v4328_v12 = vadd.f32 %v4327_v15, %v4326_v45  ;;  %v3567_v38 = vrot.slane %v3566_v56, 4 }
 0x329   : > { %v3645_v4 = vrot.slane %v3644_v63, 4  ;;  %v3858_v10 = vmul.f32 %v6953_v30, %v5133_v7  ;;  %v4173_v0 = vrot.slane %v4172_v9, 1  ;;  %v4406_v1 = vadd.f32 %v4405_v27, %v4404_v57 }
 0x32a   : > { %v3494_v47 = vadd.f32 %v3493_v39, %v3492_v50  ;;  %v2822_v53 = vmul.f32 %v2813_v2, %v5300_v18  ;;  %v7004_v37 = vsel %vm344_vm5, %v4096_v5, %v6935_v22  ;;  %v4251_v55 = vrot.slane %v4250_v34, 1 }
 0x32b   : > { %v3508_v45 = vsel %vm346_vm6, %v6809_v44, %v6830_v51  ;;  %v3723_v32 = vrot.slane %v3722_v24, 4  ;;  %v4483_v54 = vrot.slane %v4482_v11, 2  ;;  %v3800_v30 = vsel %vm271_vm0, %v3774_v40, 0.0 }
 0x32c   : > { %v3509_v48 = vsel %vm348_vm7, %v3494_v47, %v3508_v45  ;;  %v2872_v57 = vsel %vm271_vm0, %v2822_v53, 0.0  ;;  %v4329_v60 = vrot.slane %v4328_v12, 1  ;;  %v3568_v14 = vadd.f32 %v3567_v38, %v3566_v56 }
 0x32d   : > { %4716 = vst.msk [vmem:[%s5411_s8 + $0x60] sm:$0xff] %vm271_vm0, %v3509_v48  ;;  %v3646_v59 = vadd.f32 %v3645_v4, %v3644_v63  ;;  %v3878_v22 = vsel %vm271_vm0, %v3858_v10, 0.0  ;;  %v4407_v42 = vrot.slane %v4406_v1, 1  ;;  %v2873_v36 = vrot.slane %v2872_v57, 4 }
 0x32e   : > { %v2906_v41 = vmul.f32 %v2813_v2, %v5298_v17  ;;  %v2990_v44 = vmul.f32 %v2813_v2, %v5218_v33  ;;  %v7017_v51 = vadd.f32 %v4173_v0, %v4172_v9  ;;  %v7019_v61 = vadd.f32 %v4251_v55, %v4250_v34  ;;  %v2898_v55 = vpop.permute.xlu1 %2897 }
 0x32f   : > { %v3724_v15 = vadd.f32 %v3723_v32, %v3722_v24  ;;  %v3801_v27 = vrot.slane %v3800_v30, 4  ;;  %v4484_v50 = vadd.f32 %v4483_v54, %v4482_v11  ;;  %v3879_v5 = vrot.slane %v3878_v22, 4 }
 0x330   : > { %v2874_v39 = vadd.f32 %v2873_v36, %v2872_v57  ;;  %v2950_v56 = vsel %vm271_vm0, %v2906_v41, 0.0  ;;  %v7022_v63 = vadd.f32 %v4329_v60, %v4328_v12  ;;  %v3569_v40 = vrot.slane %v3568_v14, 2 }
 0x331   : > { %v3647_v38 = vrot.slane %v3646_v59, 2  ;;  %v2951_v4 = vrot.slane %v2950_v56, 4  ;;  %v7024_v10 = vadd.f32 %v4407_v42, %v4406_v1  ;;  %v3028_v9 = vsel %vm271_vm0, %v2990_v44, 0.0 }
 0x332   : > { %v2875_v47 = vrot.slane %v2874_v39, 2  ;;  %v3074_v34 = vmul.f32 %v2813_v2, %v5211_v26  ;;  %v3725_v0 = vrot.slane %v3724_v15, 2  ;;  %v3802_v24 = vadd.f32 %v3801_v27, %v3800_v30 }
 0x333   : > { %v2952_v53 = vadd.f32 %v2951_v4, %v2950_v56  ;;  %v3158_v11 = vmul.f32 %v2813_v2, %v5147_v13  ;;  %v3880_v45 = vadd.f32 %v3879_v5, %v3878_v22  ;;  %v3242_v54 = vmul.f32 %v2813_v2, %v5133_v7 }
 0x334   : > { %v2876_v32 = vadd.f32 %v2875_v47, %v2874_v39  ;;  %v3106_v12 = vsel %vm271_vm0, %v3074_v34, 0.0  ;;  %v3570_v48 = vadd.f32 %v3569_v40, %v3568_v14  ;;  %v3648_v1 = vadd.f32 %v3647_v38, %v3646_v59 }
 0x335   : > { %v2953_v57 = vrot.slane %v2952_v53, 2  ;;  %v3029_v60 = vrot.slane %v3028_v9, 4  ;;  %v4485_v42 = vrot.slane %v4484_v50, 1  ;;  %v2892_v30 = vsel %vm346_vm6, %v6645_v21, %v6680_v8 }
 0x336   : > { %v2877_v36 = vrot.slane %v2876_v32, 1  ;;  %v2907_v41 = vmul.f32 %v2898_v55, %v5300_v18  ;;  %v3726_v44 = vadd.f32 %v3725_v0, %v3724_v15  ;;  %v3803_v27 = vrot.slane %v3802_v24, 2 }
 0x337   : > { %v3107_v22 = vrot.slane %v3106_v12, 4  ;;  %v3184_v5 = vsel %vm271_vm0, %v3158_v11, 0.0  ;;  %v3881_v39 = vrot.slane %v3880_v45, 2  ;;  %v3262_v14 = vsel %vm271_vm0, %v3242_v54, 0.0 }
 0x338   : > { %v2878_v2 = vadd.f32 %v2877_v36, %v2876_v32  ;;  %v2957_v59 = vsel %vm271_vm0, %v2907_v41, 0.0  ;;  %v3571_v56 = vrot.slane %v3570_v48, 1  ;;  %v3649_v40 = vrot.slane %v3648_v1, 1 }
 0x339   : > { %v2954_v38 = vadd.f32 %v2953_v57, %v2952_v53  ;;  %v3030_v4 = vadd.f32 %v3029_v60, %v3028_v9  ;;  %v7038_v47 = vadd.f32 %v4485_v42, %v4484_v50  ;;  %v3185_v8 = vrot.slane %v3184_v5, 4 }
 0x33a   : > { %v2893_v21 = vsel %vm348_vm7, %v2878_v2, %v2892_v30  ;;  %v2958_v15 = vrot.slane %v2957_v59, 4  ;;  %v3727_v34 = vrot.slane %v3726_v44, 1  ;;  %v3804_v0 = vadd.f32 %v3803_v27, %v3802_v24 }
 0x33b   : > { %7506 = vst [vmem:[#allocation30_spill] sm:$0xff] %v7038_v47  ;;  %4709 = vst.msk [vmem:[%s5411_s8 + $0x58] sm:$0xff] %vm271_vm0, %v2893_v21  ;;  %v3108_v11 = vadd.f32 %v3107_v22, %v3106_v12  ;;  %v3263_v32 = vrot.slane %v3262_v14, 4  ;;  %v3882_v36 = vadd.f32 %v3881_v39, %v3880_v45  ;;  %v2991_v41 = vmul.f32 %v2898_v55, %v5298_v17  ;;  %v7052_v39 = vpop.permute.xlu0 %4044 }
 0x33c   : > { %v2959_v54 = vadd.f32 %v2958_v15, %v2957_v59  ;;  %v3075_v20 = vmul.f32 %v2898_v55, %v5218_v33  ;;  %v7045_v53 = vadd.f32 %v3571_v56, %v3570_v48  ;;  %v7047_v50 = vadd.f32 %v3649_v40, %v3648_v1 }
 0x33d   : > { %v2955_v9 = vrot.slane %v2954_v38, 1  ;;  %v3031_v57 = vrot.slane %v3030_v4, 2  ;;  %v3186_v60 = vadd.f32 %v3185_v8, %v3184_v5  ;;  %v3035_v24 = vsel %vm271_vm0, %v2991_v41, 0.0 }
 0x33e   : > { %v2960_v42 = vrot.slane %v2959_v54, 2  ;;  %v3113_v30 = vsel %vm271_vm0, %v3075_v20, 0.0  ;;  %v3805_v12 = vrot.slane %v3804_v0, 1  ;;  %v3109_v27 = vrot.slane %v3108_v11, 2 }
 0x33f   : > { %v3264_v45 = vadd.f32 %v3263_v32, %v3262_v14  ;;  %v3159_v22 = vmul.f32 %v2898_v55, %v5211_v26  ;;  %v7054_v2 = vadd.f32 %v3727_v34, %v3726_v44  ;;  %v3883_v48 = vrot.slane %v3882_v36, 1 }
 0x340   : > { %v2961_v1 = vadd.f32 %v2960_v42, %v2959_v54  ;;  %v2975_v5 = vsel %vm342_vm4, %v6684_v49, %v6631_v19  ;;  %v2956_v59 = vadd.f32 %v2955_v9, %v2954_v38  ;;  %v3036_v56 = vrot.slane %v3035_v24, 4 }
 0x341   : > { %7507 = vst [vmem:[#allocation31_spill] sm:$0xff] %v7054_v2  ;;  %v3114_v40 = vrot.slane %v3113_v30, 4  ;;  %v3243_v20 = vmul.f32 %v2898_v55, %v5147_v13  ;;  %v3032_v21 = vadd.f32 %v3031_v57, %v3030_v4  ;;  %v3187_v8 = vrot.slane %v3186_v60, 2 }
 0x342   : > { %v2962_v14 = vrot.slane %v2961_v1, 1  ;;  %v4054_v15 = vmul.f32 %v7052_v39, %v5300_v18  ;;  %v3110_v32 = vadd.f32 %v3109_v27, %v3108_v11  ;;  %v3265_v44 = vrot.slane %v3264_v45, 2 }
 0x343   : > { %v2976_v34 = vsel %vm344_vm5, %v6655_v52, %v2975_v5  ;;  %v3191_v54 = vsel %vm271_vm0, %v3159_v22, 0.0  ;;  %v4138_v55 = vmul.f32 %v7052_v39, %v5298_v17  ;;  %v4222_v38 = vmul.f32 %v7052_v39, %v5218_v33 }
 0x344   : > { %v2963_v19 = vadd.f32 %v2962_v14, %v2961_v1  ;;  %v4104_v49 = vsel %vm271_vm0, %v4054_v15, 0.0  ;;  %v2977_v4 = vsel %vm346_vm6, %v2956_v59, %v2976_v34  ;;  %v3037_v41 = vadd.f32 %v3036_v56, %v3035_v24 }
 0x345   : > { %v3115_v11 = vadd.f32 %v3114_v40, %v3113_v30  ;;  %v3269_v9 = vsel %vm271_vm0, %v3243_v20, 0.0  ;;  %v7072_v57 = vadd.f32 %v3805_v12, %v3804_v0  ;;  %v4105_v42 = vrot.slane %v4104_v49, 4 }
 0x346   : > { %v2978_v52 = vsel %vm348_vm7, %v2963_v19, %v2977_v4  ;;  %v4182_v27 = vsel %vm271_vm0, %v4138_v55, 0.0  ;;  %v3033_v22 = vrot.slane %v3032_v21, 1  ;;  %v3188_v1 = vadd.f32 %v3187_v8, %v3186_v60  ;;  %v7083_v8 = vpop.permute.xlu1 %4129 }
 0x347   : > { %7508 = vst [vmem:[#allocation32_spill] sm:$0xff] %v7072_v57  ;;  %4710 = vst.msk [vmem:[%s5411_s8 + $0x90] sm:$0xff] %vm271_vm0, %v2978_v52  ;;  %v3192_v5 = vrot.slane %v3191_v54, 4  ;;  %v4260_v14 = vsel %vm271_vm0, %v4222_v38, 0.0  ;;  %v3266_v15 = vadd.f32 %v3265_v44, %v3264_v45  ;;  %v3270_v59 = vrot.slane %v3269_v9, 4 }
 0x348   : > { %v4106_v24 = vadd.f32 %v4105_v42, %v4104_v49  ;;  %v4183_v30 = vrot.slane %v4182_v27, 4  ;;  %v7079_v56 = vadd.f32 %v3883_v48, %v3882_v36  ;;  %v3111_v0 = vrot.slane %v3110_v32, 1 }
 0x349   : > { %v3038_v12 = vrot.slane %v3037_v41, 2  ;;  %v3116_v40 = vrot.slane %v3115_v11, 2  ;;  %v4261_v19 = vrot.slane %v4260_v14, 4  ;;  %v4306_v60 = vmul.f32 %v7052_v39, %v5211_v26 }
 0x34a   : > { %7509 = vst [vmem:[#allocation33_spill] sm:$0xff] %v7079_v56  ;;  %v4107_v20 = vrot.slane %v4106_v24, 2  ;;  %v4184_v34 = vadd.f32 %v4183_v30, %v4182_v27  ;;  %v7085_v55 = vadd.f32 %v3033_v22, %v3032_v21  ;;  %v3189_v38 = vrot.slane %v3188_v1, 1 }
 0x34b   : > { %v3193_v45 = vadd.f32 %v3192_v5, %v3191_v54  ;;  %v4390_v44 = vmul.f32 %v7052_v39, %v5147_v13  ;;  %v3267_v36 = vrot.slane %v3266_v15, 1  ;;  %v3271_v48 = vadd.f32 %v3270_v59, %v3269_v9 }
 0x34c   : > { %v4108_v49 = vadd.f32 %v4107_v20, %v4106_v24  ;;  %v4185_v4 = vrot.slane %v4184_v34, 2  ;;  %v7089_v52 = vadd.f32 %v3111_v0, %v3110_v32  ;;  %v3039_v42 = vadd.f32 %v3038_v12, %v3037_v41 }
 0x34d   : > { %v3117_v27 = vadd.f32 %v3116_v40, %v3115_v11  ;;  %v4139_v30 = vmul.f32 %v7083_v8, %v5300_v18  ;;  %v4262_v57 = vadd.f32 %v4261_v19, %v4260_v14  ;;  %v4338_v21 = vsel %vm271_vm0, %v4306_v60, 0.0 }
 0x34e   : > { %v4109_v56 = vrot.slane %v4108_v49, 1  ;;  %v4416_v54 = vsel %vm271_vm0, %v4390_v44, 0.0  ;;  %v7095_v22 = vadd.f32 %v3189_v38, %v3188_v1  ;;  %v3194_v5 = vrot.slane %v3193_v45, 2 }
 0x34f   : > { %v4474_v9 = vmul.f32 %v7052_v39, %v5133_v7  ;;  %v4189_v32 = vsel %vm271_vm0, %v4139_v30, 0.0  ;;  %v7100_v41 = vadd.f32 %v3267_v36, %v3266_v15  ;;  %v3272_v11 = vrot.slane %v3271_v48, 2 }
 0x350   : > { %v4110_v59 = vadd.f32 %v4109_v56, %v4108_v49  ;;  %v4186_v24 = vadd.f32 %v4185_v4, %v4184_v34  ;;  %v4124_v14 = vsel %vm346_vm6, %v6975_v3, %v7004_v37  ;;  %v4339_v0 = vrot.slane %v4338_v21, 4  ;;  %v7116_v4 = vpop.permute.xlu0 %3513 }
 0x351   : > { %v4417_v12 = vrot.slane %v4416_v54, 4  ;;  %v4190_v1 = vrot.slane %v4189_v32, 4  ;;  %v3040_v40 = vrot.slane %v3039_v42, 1  ;;  %v3118_v20 = vrot.slane %v3117_v27, 1 }
 0x352   : > { %v4125_v19 = vsel %vm348_vm7, %v4110_v59, %v4124_v14  ;;  %v4263_v60 = vrot.slane %v4262_v57, 2  ;;  %v3195_v7 = vadd.f32 %v3194_v5, %v3193_v45  ;;  %v4494_v39 = vsel %vm271_vm0, %v4474_v9, 0.0 }
 0x353   : > { %4723 = vst.msk [vmem:[%s5411_s8 + $0x68] sm:$0xff] %vm271_vm0, %v4125_v19  ;;  %v4191_v15 = vadd.f32 %v4190_v1, %v4189_v32  ;;  %v4223_v56 = vmul.f32 %v7083_v8, %v5298_v17  ;;  %v3273_v34 = vadd.f32 %v3272_v11, %v3271_v48  ;;  %v4187_v38 = vrot.slane %v4186_v24, 1 }
 0x354   : > { %v4307_v3 = vmul.f32 %v7083_v8, %v5218_v33  ;;  %v4391_v37 = vmul.f32 %v7083_v8, %v5211_v26  ;;  %v4340_v44 = vadd.f32 %v4339_v0, %v4338_v21  ;;  %v4418_v36 = vadd.f32 %v4417_v12, %v4416_v54 }
 0x355   : > { %v4192_v49 = vrot.slane %v4191_v15, 2  ;;  %v4267_v45 = vsel %vm271_vm0, %v4223_v56, 0.0  ;;  %v7118_v30 = vadd.f32 %v3040_v40, %v3039_v42  ;;  %v4264_v5 = vadd.f32 %v4263_v60, %v4262_v57 }
 0x356   : > { %v4495_v9 = vrot.slane %v4494_v39, 4  ;;  %v4345_v48 = vsel %vm271_vm0, %v4307_v3, 0.0  ;;  %v3196_v32 = vrot.slane %v3195_v7, 1  ;;  %v4268_v59 = vrot.slane %v4267_v45, 4 }
 0x357   : > { %v4193_v11 = vadd.f32 %v4192_v49, %v4191_v15  ;;  %v4423_v14 = vsel %vm271_vm0, %v4391_v37, 0.0  ;;  %v4188_v1 = vadd.f32 %v4187_v38, %v4186_v24  ;;  %v4207_v21 = vsel %vm342_vm4, %v7017_v51, %v6944_v31 }
 0x358   : > { %v4346_v54 = vrot.slane %v4345_v48, 4  ;;  %v3523_v0 = vmul.f32 %v7116_v4, %v5300_v18  ;;  %v3274_v42 = vrot.slane %v3273_v34, 1  ;;  %v4341_v12 = vrot.slane %v4340_v44, 2 }
 0x359   : > { %v4419_v57 = vrot.slane %v4418_v36, 2  ;;  %v4194_v40 = vrot.slane %v4193_v11, 1  ;;  %v4265_v19 = vrot.slane %v4264_v5, 1  ;;  %v4496_v60 = vadd.f32 %v4495_v9, %v4494_v39 }
 0x35a   : > { %v4424_v15 = vrot.slane %v4423_v14, 4  ;;  %v3573_v56 = vsel %vm271_vm0, %v3523_v0, 0.0  ;;  %v4208_v24 = vsel %vm344_vm5, %v6982_v25, %v4207_v21  ;;  %v4269_v38 = vadd.f32 %v4268_v59, %v4267_v45 }
 0x35b   : > { %v4195_v3 = vadd.f32 %v4194_v40, %v4193_v11  ;;  %v4475_v31 = vmul.f32 %v7083_v8, %v5147_v13  ;;  %v7132_v51 = vadd.f32 %v3118_v20, %v3117_v27  ;;  %v4209_v37 = vsel %vm346_vm6, %v4188_v1, %v4208_v24  ;;  %v3599_v1 = vpop.permute.xlu1 %3598 }
 0x35c   : > { %v4347_v49 = vadd.f32 %v4346_v54, %v4345_v48  ;;  %v3574_v2 = vrot.slane %v3573_v56, 4  ;;  %v7135_v47 = vadd.f32 %v3196_v32, %v3195_v7  ;;  %v4342_v39 = vadd.f32 %v4341_v12, %v4340_v44 }
 0x35d   : > { %v4420_v9 = vadd.f32 %v4419_v57, %v4418_v36  ;;  %v4210_v0 = vsel %vm348_vm7, %v4195_v3, %v4209_v37  ;;  %v4497_v11 = vrot.slane %v4496_v60, 2  ;;  %v4425_v25 = vadd.f32 %v4424_v15, %v4423_v14 }
 0x35e   : > { %4724 = vst.msk [vmem:[%s5411_s8 + $0xa0] sm:$0xff] %vm271_vm0, %v4210_v0  ;;  %v3575_v45 = vadd.f32 %v3574_v2, %v3573_v56  ;;  %v3607_v8 = vmul.f32 %v7116_v4, %v5298_v17  ;;  %v7142_v27 = vadd.f32 %v3274_v42, %v3273_v34  ;;  %v7144_v20 = vadd.f32 %v4265_v19, %v4264_v5 }
 0x35f   : > { %v4270_v48 = vrot.slane %v4269_v38, 2  ;;  %v4501_v7 = vsel %vm271_vm0, %v4475_v31, 0.0  ;;  %v4348_v32 = vrot.slane %v4347_v49, 2  ;;  %v3691_v59 = vmul.f32 %v7116_v4, %v5218_v33 }
 0x360   : > { %v3576_v44 = vrot.slane %v3575_v45, 2  ;;  %v3651_v36 = vsel %vm271_vm0, %v3607_v8, 0.0  ;;  %v4343_v14 = vrot.slane %v4342_v39, 1  ;;  %v3591_v2 = vsel %vm342_vm4, %v6834_v62, %v6778_v43 }
 0x361   : > { %v3652_v34 = vrot.slane %v3651_v36, 4  ;;  %v3775_v5 = vmul.f32 %v7116_v4, %v5211_v26  ;;  %v4421_v21 = vrot.slane %v4420_v9, 1  ;;  %v4498_v54 = vadd.f32 %v4497_v11, %v4496_v60 }
 0x362   : > { %v4426_v42 = vrot.slane %v4425_v25, 2  ;;  %v3577_v12 = vadd.f32 %v3576_v44, %v3575_v45  ;;  %v4271_v57 = vadd.f32 %v4270_v48, %v4269_v38  ;;  %v4502_v40 = vrot.slane %v4501_v7, 4 }
 0x363   : > { %v3653_v19 = vadd.f32 %v3652_v34, %v3651_v36  ;;  %v3608_v15 = vmul.f32 %v3599_v1, %v5300_v18  ;;  %v4349_v56 = vadd.f32 %v4348_v32, %v4347_v49  ;;  %v3592_v24 = vsel %vm344_vm5, %v6811_v35, %v3591_v2 }
 0x364   : > { %v3578_v3 = vrot.slane %v3577_v12, 1  ;;  %v3729_v43 = vsel %vm271_vm0, %v3691_v59, 0.0  ;;  %v3807_v31 = vsel %vm271_vm0, %v3775_v5, 0.0  ;;  %v3859_v60 = vmul.f32 %v7116_v4, %v5147_v13 }
 0x365   : > { %v3654_v62 = vrot.slane %v3653_v19, 2  ;;  %v3658_v38 = vsel %vm271_vm0, %v3608_v15, 0.0  ;;  %v4499_v37 = vrot.slane %v4498_v54, 1  ;;  %v7163_v0 = vadd.f32 %v4426_v42, %v4425_v25  ;;  %v2983_v15 = vpop.permute.xlu0 %2982 }
 0x366   : > { %v3579_v11 = vadd.f32 %v3578_v3, %v3577_v12  ;;  %v3593_v49 = vsel %vm346_vm6, %v7045_v53, %v3592_v24  ;;  %v4503_v45 = vadd.f32 %v4502_v40, %v4501_v7  ;;  %v3730_v8 = vrot.slane %v3729_v43, 4 }
 0x367   : > { %v3655_v35 = vadd.f32 %v3654_v62, %v3653_v19  ;;  %v3659_v48 = vrot.slane %v3658_v38, 4  ;;  %v4272_v32 = vrot.slane %v4271_v57, 1  ;;  %v4350_v44 = vrot.slane %v4349_v56, 1 }
 0x368   : > { %v3594_v36 = vsel %vm348_vm7, %v3579_v11, %v3593_v49  ;;  %v3808_v59 = vrot.slane %v3807_v31, 4  ;;  %v3885_v4 = vsel %vm271_vm0, %v3859_v60, 0.0  ;;  %v3692_v2 = vmul.f32 %v3599_v1, %v5298_v17  ;;  %v7512_v60 = vld [vmem:[#allocation25_spill] sm:$0xff] }
 0x369   : > { %4717 = vst.msk [vmem:[%s5411_s8 + $0x98] sm:$0xff] %vm271_vm0, %v3594_v36  ;;  %v3656_v13 = vrot.slane %v3655_v35, 1  ;;  %v3660_v25 = vadd.f32 %v3659_v48, %v3658_v38  ;;  %v7172_v34 = vadd.f32 %v4343_v14, %v4342_v39  ;;  %v7174_v53 = vadd.f32 %v4421_v21, %v4420_v9  ;;  %v7513_v48 = vld [vmem:[#allocation21_spill] sm:$0xff] }
 0x36a   : > { %v7176_v7 = vadd.f32 %v4499_v37, %v4498_v54  ;;  %v3776_v5 = vmul.f32 %v3599_v1, %v5218_v33  ;;  %v4504_v42 = vrot.slane %v4503_v45, 2  ;;  %v3731_v12 = vadd.f32 %v3730_v8, %v3729_v43 }
 0x36b   : > { %7510 = vst [vmem:[#allocation34_spill] sm:$0xff] %v7174_v53  ;;  %v3661_v40 = vrot.slane %v3660_v25, 2  ;;  %v3736_v19 = vsel %vm271_vm0, %v3692_v2, 0.0  ;;  %v3809_v24 = vadd.f32 %v3808_v59, %v3807_v31  ;;  %v3886_v62 = vrot.slane %v3885_v4, 4 }
 0x36c   : > { %7511 = vst [vmem:[#allocation35_spill] sm:$0xff] %v7176_v7  ;;  %v3675_v39 = vsel %vm340_vm3, %v7512_v60, %v6791_v16  ;;  %v7184_v9 = vadd.f32 %v4272_v32, %v4271_v57  ;;  %v7186_v14 = vadd.f32 %v4350_v44, %v4349_v56  ;;  %v3657_v21 = vadd.f32 %v3656_v13, %v3655_v35  ;;  %v7516_v7 = vld [vmem:[#allocation11_spill] sm:$0xff] }
 0x36d   : > { %v3662_v54 = vadd.f32 %v3661_v40, %v3660_v25  ;;  %v3737_v38 = vrot.slane %v3736_v19, 4  ;;  %v3814_v43 = vsel %vm271_vm0, %v3776_v5, 0.0  ;;  %v3860_v37 = vmul.f32 %v3599_v1, %v5211_v26  ;;  %v3068_v40 = vpop.permute.xlu1 %3067 }
 0x36e   : > { %v2992_v11 = vmul.f32 %v2983_v15, %v5300_v18  ;;  %v7191_v49 = vadd.f32 %v4504_v42, %v4503_v45  ;;  %v3732_v31 = vrot.slane %v3731_v12, 2  ;;  %v3676_v16 = vsel %vm342_vm4, %v7513_v48, %v3675_v39 }
 0x36f   : > { %v3663_v8 = vrot.slane %v3662_v54, 1  ;;  %v3810_v57 = vrot.slane %v3809_v24, 2  ;;  %v3887_v32 = vadd.f32 %v3886_v62, %v3885_v4  ;;  %v3677_v56 = vsel %vm344_vm5, %v7047_v50, %v3676_v16 }
 0x370   : > { %v3042_v35 = vsel %vm271_vm0, %v2992_v11, 0.0  ;;  %v3678_v1 = vsel %vm346_vm6, %v3657_v21, %v3677_v56  ;;  %v3815_v36 = vrot.slane %v3814_v43, 4  ;;  %v3738_v45 = vadd.f32 %v3737_v38, %v3736_v19 }
 0x371   : > { %v3664_v44 = vadd.f32 %v3663_v8, %v3662_v54  ;;  %v3043_v59 = vrot.slane %v3042_v35, 4  ;;  %v3892_v13 = vsel %vm271_vm0, %v3860_v37, 0.0  ;;  %v3076_v25 = vmul.f32 %v2983_v15, %v5298_v17 }
 0x372   : > { %v3160_v2 = vmul.f32 %v2983_v15, %v5218_v33  ;;  %v4506_v4 = vrot.slane %v7191_v49, 1  ;;  %v3733_v5 = vadd.f32 %v3732_v31, %v3731_v12  ;;  %v3811_v62 = vadd.f32 %v3810_v57, %v3809_v24  ;;  %v7514_v24 = vld [vmem:[#allocation9_spill] sm:$0xff]  ;;  %v7515_v57 = vld [vmem:[#allocation15_spill] sm:$0xff] }
 0x373   : > { %v3679_v50 = vsel %vm348_vm7, %v3664_v44, %v3678_v1  ;;  %v3044_v42 = vadd.f32 %v3043_v59, %v3042_v35  ;;  %v3888_v60 = vrot.slane %v3887_v32, 2  ;;  %v3120_v39 = vsel %vm271_vm0, %v3076_v25, 0.0 }
 0x374   : > { %4718 = vst.msk [vmem:[%s5411_s8 + $0xd0] sm:$0xff] %vm271_vm0, %v3679_v50  ;;  %v3198_v19 = vsel %vm271_vm0, %v3160_v2, 0.0  ;;  %v3816_v21 = vadd.f32 %v3815_v36, %v3814_v43  ;;  %v3893_v54 = vrot.slane %v3892_v13, 4  ;;  %v3121_v37 = vrot.slane %v3120_v39, 4 }
 0x375   : > { %v3045_v38 = vrot.slane %v3044_v42, 2  ;;  %v3739_v11 = vrot.slane %v3738_v45, 2  ;;  %v3199_v8 = vrot.slane %v3198_v19, 4  ;;  %v3244_v12 = vmul.f32 %v2983_v15, %v5211_v26 }
 0x376   : > { %v3077_v31 = vmul.f32 %v3068_v40, %v5300_v18  ;;  %v3734_v48 = vrot.slane %v3733_v5, 1  ;;  %v3059_v56 = vsel %vm340_vm3, %v7515_v57, %v7514_v24  ;;  %v3122_v35 = vadd.f32 %v3121_v37, %v3120_v39 }
 0x377   : > { %v3046_v16 = vadd.f32 %v3045_v38, %v3044_v42  ;;  %v3812_v44 = vrot.slane %v3811_v62, 1  ;;  %v3200_v1 = vadd.f32 %v3199_v8, %v3198_v19  ;;  %v3276_v43 = vsel %vm271_vm0, %v3244_v12, 0.0 }
 0x378   : > { %v3127_v36 = vsel %vm271_vm0, %v3077_v31, 0.0  ;;  %v3889_v59 = vadd.f32 %v3888_v60, %v3887_v32  ;;  %v3817_v25 = vrot.slane %v3816_v21, 2  ;;  %v3123_v50 = vrot.slane %v3122_v35, 2 }
 0x379   : > { %v3047_v2 = vrot.slane %v3046_v16, 1  ;;  %v3740_v15 = vadd.f32 %v3739_v11, %v3738_v45  ;;  %v3894_v3 = vadd.f32 %v3893_v54, %v3892_v13  ;;  %v3060_v42 = vsel %vm342_vm4, %v7516_v7, %v3059_v56  ;;  %v7518_v56 = vld [vmem:[#allocation10_spill] sm:$0xff] }
 0x37a   : > { %v3128_v38 = vrot.slane %v3127_v36, 4  ;;  %v3061_v39 = vsel %vm344_vm5, %v7085_v55, %v3060_v42  ;;  %v3124_v19 = vadd.f32 %v3123_v50, %v3122_v35  ;;  %v3277_v37 = vrot.slane %v3276_v43, 4  ;;  %v4215_v50 = vpop.permute.xlu0 %4214 }
 0x37b   : > { %v3048_v53 = vadd.f32 %v3047_v2, %v3046_v16  ;;  %v3062_v8 = vsel %vm346_vm6, %v7118_v30, %v3061_v39  ;;  %v3201_v32 = vrot.slane %v3200_v1, 2  ;;  %v3161_v12 = vmul.f32 %v3068_v40, %v5298_v17 }
 0x37c   : > { %v3129_v60 = vadd.f32 %v3128_v38, %v3127_v36  ;;  %v3890_v45 = vrot.slane %v3889_v59, 1  ;;  %v3818_v13 = vadd.f32 %v3817_v25, %v3816_v21  ;;  %v3125_v7 = vrot.slane %v3124_v19, 1 }
 0x37d   : > { %v3063_v54 = vsel %vm348_vm7, %v3048_v53, %v3062_v8  ;;  %v7517_v11 = vrot.slane %v7163_v0, 1  ;;  %v3895_v55 = vrot.slane %v3894_v3, 2  ;;  %v3245_v30 = vmul.f32 %v3068_v40, %v5218_v33  ;;  %v7519_v53 = vld [vmem:[#allocation16_spill] sm:$0xff] }
 0x37e   : > { %4711 = vst.msk [vmem:[%s5411_s8 + $0xc8] sm:$0xff] %vm271_vm0, %v3063_v54  ;;  %v3130_v16 = vrot.slane %v3129_v60, 2  ;;  %v7232_v24 = vadd.f32 %v4506_v4, %v7191_v49  ;;  %v7234_v57 = vadd.f32 %v3734_v48, %v3733_v5  ;;  %v3278_v21 = vadd.f32 %v3277_v37, %v3276_v43  ;;  %v7520_v48 = vld [vmem:[#allocation12_spill] sm:$0xff] }
 0x37f   : > { %v7226_v31 = vadd.f32 %v7517_v11, %v7163_v0  ;;  %v3143_v35 = vsel %vm338_vm2, %v7519_v53, %v7518_v56  ;;  %v3741_v36 = vrot.slane %v3740_v15, 1  ;;  %v3202_v25 = vadd.f32 %v3201_v32, %v3200_v1 }
 0x380   : > { %v3131_v0 = vadd.f32 %v3130_v16, %v3129_v60  ;;  %v3205_v2 = vsel %vm271_vm0, %v3161_v12, 0.0  ;;  %v7240_v42 = vadd.f32 %v3812_v44, %v3811_v62  ;;  %v7242_v38 = vadd.f32 %v3890_v45, %v3889_v59  ;;  %v7521_v60 = vld [vmem:[#allocation8_spill] sm:$0xff]  ;;  %v7522_v12 = vld [vmem:[#allocation17_spill] sm:$0xff] }
 0x381   : > { %v3819_v40 = vrot.slane %v3818_v13, 1  ;;  %v3126_v49 = vadd.f32 %v3125_v7, %v3124_v19  ;;  %v7244_v4 = vadd.f32 %v3895_v55, %v3894_v3  ;;  %v3144_v43 = vsel %vm340_vm3, %v7520_v48, %v3143_v35  ;;  %v7261_v7 = vpop.permute.xlu1 %4299  ;;  %v7523_v35 = vld [vmem:[#allocation13_spill] sm:$0xff] }
 0x382   : > { %v3132_v5 = vrot.slane %v3131_v0, 1  ;;  %v3283_v39 = vsel %vm271_vm0, %v3245_v30, 0.0  ;;  %v3279_v37 = vrot.slane %v3278_v21, 2  ;;  %v3145_v1 = vsel %vm342_vm4, %v7089_v52, %v3144_v43 }
 0x383   : > { %v3206_v8 = vrot.slane %v3205_v2, 4  ;;  %v4224_v62 = vmul.f32 %v4215_v50, %v5300_v18  ;;  %v7252_v44 = vadd.f32 %v3741_v36, %v3740_v15  ;;  %v3203_v59 = vrot.slane %v3202_v25, 1 }
 0x384   : > { %v3133_v19 = vadd.f32 %v3132_v5, %v3131_v0  ;;  %v3146_v3 = vsel %vm344_vm5, %v7132_v51, %v3145_v1  ;;  %v3227_v45 = vsel %vm336_vm1, %v7522_v12, %v7521_v60  ;;  %v3284_v54 = vrot.slane %v3283_v39, 4 }
 0x385   : > { %v3147_v32 = vsel %vm346_vm6, %v3126_v49, %v3146_v3  ;;  %v4274_v52 = vsel %vm271_vm0, %v4224_v62, 0.0  ;;  %v7263_v11 = vadd.f32 %v3819_v40, %v3818_v13  ;;  %v3897_v15 = vrot.slane %v7244_v4, 1 }
 0x386   : > { %v3148_v55 = vsel %vm348_vm7, %v3133_v19, %v3147_v32  ;;  %v4275_v16 = vrot.slane %v4274_v52, 4  ;;  %v3280_v30 = vadd.f32 %v3279_v37, %v3278_v21  ;;  %v3207_v51 = vadd.f32 %v3206_v8, %v3205_v2 }
 0x387   : > { %4712 = vst.msk [vmem:[%s5411_s8 + $0x100] sm:$0xff] %vm271_vm0, %v3148_v55  ;;  %v4308_v56 = vmul.f32 %v4215_v50, %v5298_v17  ;;  %v4392_v53 = vmul.f32 %v4215_v50, %v5218_v33  ;;  %v3228_v36 = vsel %vm338_vm2, %v7523_v35, %v3227_v45  ;;  %v4476_v13 = vmul.f32 %v4215_v50, %v5211_v26 }
 0x388   : > { %v4276_v0 = vadd.f32 %v4275_v16, %v4274_v52  ;;  %v4309_v40 = vmul.f32 %v7261_v7, %v5300_v18  ;;  %v3204_v49 = vadd.f32 %v3203_v59, %v3202_v25  ;;  %v3285_v5 = vadd.f32 %v3284_v54, %v3283_v39 }
 0x389   : > { %v4352_v21 = vsel %vm271_vm0, %v4308_v56, 0.0  ;;  %v4430_v48 = vsel %vm271_vm0, %v4392_v53, 0.0  ;;  %v3229_v2 = vsel %vm340_vm3, %v7095_v22, %v3228_v36  ;;  %v3281_v8 = vrot.slane %v3280_v30, 1 }
 0x38a   : > { %v4277_v43 = vrot.slane %v4276_v0, 2  ;;  %v4353_v37 = vrot.slane %v4352_v21, 4  ;;  %v4431_v1 = vrot.slane %v4430_v48, 4  ;;  %v4291_v26 = vsel %vm340_vm3, %v7019_v61, %v6950_v6 }
 0x38b   : > { %v4359_v50 = vsel %vm271_vm0, %v4309_v40, 0.0  ;;  %v4393_v25 = vmul.f32 %v7261_v7, %v5298_v17  ;;  %v3208_v39 = vrot.slane %v3207_v51, 2  ;;  %v4508_v19 = vsel %vm271_vm0, %v4476_v13, 0.0 }
 0x38c   : > { %v4278_v62 = vadd.f32 %v4277_v43, %v4276_v0  ;;  %v4354_v59 = vadd.f32 %v4353_v37, %v4352_v21  ;;  %v3230_v22 = vsel %vm342_vm4, %v7135_v47, %v3229_v2  ;;  %v3286_v3 = vrot.slane %v3285_v5, 2  ;;  %v7524_v2 = vld [vmem:[#allocation18_spill] sm:$0xff] }
 0x38d   : > { %v4360_v32 = vrot.slane %v4359_v50, 4  ;;  %v4437_v60 = vsel %vm271_vm0, %v4393_v25, 0.0  ;;  %v4292_v6 = vsel %vm342_vm4, %v6986_v46, %v4291_v26  ;;  %v4432_v45 = vadd.f32 %v4431_v1, %v4430_v48 }
 0x38e   : > { %v4279_v12 = vrot.slane %v4278_v62, 1  ;;  %v4355_v61 = vrot.slane %v4354_v59, 2  ;;  %v4293_v54 = vsel %vm344_vm5, %v7144_v20, %v4292_v6  ;;  %v4509_v52 = vrot.slane %v4508_v19, 4 }
 0x38f   : > { %v4361_v55 = vadd.f32 %v4360_v32, %v4359_v50  ;;  %v4438_v16 = vrot.slane %v4437_v60, 4  ;;  %v3209_v56 = vadd.f32 %v3208_v39, %v3207_v51  ;;  %v4294_v47 = vsel %vm346_vm6, %v7184_v9, %v4293_v54  ;;  %v7525_v51 = vld [vmem:[#allocation14_spill] sm:$0xff] }
 0x390   : > { %v4280_v53 = vadd.f32 %v4279_v12, %v4278_v62  ;;  %v4356_v35 = vadd.f32 %v4355_v61, %v4354_v59  ;;  %v3287_v36 = vadd.f32 %v3286_v3, %v3285_v5  ;;  %v4375_v46 = vsel %vm338_vm2, %v7022_v63, %v6969_v29  ;;  %v3684_v62 = vpop.permute.xlu0 %3683 }
 0x391   : > { %v4362_v0 = vrot.slane %v4361_v55, 2  ;;  %v4439_v13 = vadd.f32 %v4438_v16, %v4437_v60  ;;  %v3231_v40 = vsel %vm344_vm5, %v3204_v49, %v3230_v22  ;;  %v4433_v48 = vrot.slane %v4432_v45, 2 }
 0x392   : > { %v4295_v20 = vsel %vm348_vm7, %v4280_v53, %v4294_v47  ;;  %v4357_v21 = vrot.slane %v4356_v35, 1  ;;  %v3312_v43 = vsel %vm336_vm1, %v7525_v51, %v7524_v2  ;;  %v4510_v9 = vadd.f32 %v4509_v52, %v4508_v19  ;;  %v7526_v53 = vld [vmem:[#allocation34_spill] sm:$0xff] }
 0x393   : > { %4725 = vst.msk [vmem:[%s5411_s8 + $0xd8] sm:$0xff] %vm271_vm0, %v4295_v20  ;;  %v4363_v5 = vadd.f32 %v4362_v0, %v4361_v55  ;;  %v4440_v37 = vrot.slane %v4439_v13, 2  ;;  %v3282_v1 = vadd.f32 %v3281_v8, %v3280_v30  ;;  %v4376_v29 = vsel %vm340_vm3, %v6988_v58, %v4375_v46  ;;  %v7528_v2 = vld [vmem:[#allocation26_spill] sm:$0xff] }
 0x394   : > { %v4358_v26 = vadd.f32 %v4357_v21, %v4356_v35  ;;  %v4477_v63 = vmul.f32 %v7261_v7, %v5218_v33  ;;  %v3210_v49 = vrot.slane %v3209_v56, 1  ;;  %v3288_v50 = vrot.slane %v3287_v36, 1 }
 0x395   : > { %v4364_v25 = vrot.slane %v4363_v5, 1  ;;  %v4377_v39 = vsel %vm342_vm4, %v7172_v34, %v4376_v29  ;;  %v3313_v59 = vsel %vm338_vm2, %v7100_v41, %v3312_v43  ;;  %v4434_v19 = vadd.f32 %v4433_v48, %v4432_v45  ;;  %v7527_v48 = vld [vmem:[#allocation20_spill] sm:$0xff] }
 0x396   : > { %v4378_v30 = vsel %vm344_vm5, %v7186_v14, %v4377_v39  ;;  %v4515_v58 = vsel %vm271_vm0, %v4477_v63, 0.0  ;;  %v4511_v8 = vrot.slane %v4510_v9, 2  ;;  %v4441_v7 = vadd.f32 %v4440_v37, %v4439_v13  ;;  %v3153_v63 = vpop.permute.xlu0 %3152 }
 0x397   : > { %v4365_v22 = vadd.f32 %v4364_v25, %v4363_v5  ;;  %v4459_v3 = vsel %vm336_vm1, %v7024_v10, %v6918_v28  ;;  %v4379_v34 = vsel %vm346_vm6, %v4358_v26, %v4378_v30  ;;  %v4516_v32 = vrot.slane %v4515_v58, 4  ;;  %v7534_v30 = vld [vmem:[#allocation23_spill] sm:$0xff] }
 0x398   : > { %v3693_v60 = vmul.f32 %v3684_v62, %v5300_v18  ;;  %v3777_v41 = vmul.f32 %v3684_v62, %v5298_v17  ;;  %v3211_v12 = vadd.f32 %v3210_v49, %v3209_v56  ;;  %v3289_v6 = vadd.f32 %v3288_v50, %v3287_v36 }
 0x399   : > { %v3314_v14 = vsel %vm340_vm3, %v7142_v27, %v3313_v59  ;;  %v4380_v61 = vsel %vm348_vm7, %v4365_v22, %v4379_v34  ;;  %v4435_v54 = vrot.slane %v4434_v19, 1  ;;  %v7331_v52 = vadd.f32 %v4511_v8, %v4510_v9  ;;  %v7530_v9 = vld [vmem:[#allocation27_spill] sm:$0xff]  ;;  %v7533_v59 = vld [vmem:[#allocation22_spill] sm:$0xff] }
 0x39a   : > { %v3315_v45 = vsel %vm342_vm4, %v3282_v1, %v3314_v14  ;;  %4726 = vst.msk [vmem:[%s5411_s8 + $0x110] sm:$0xff] %vm271_vm0, %v4380_v61  ;;  %v3743_v28 = vsel %vm271_vm0, %v3693_v60, 0.0  ;;  %v3821_v10 = vsel %vm271_vm0, %v3777_v41, 0.0  ;;  %v4442_v55 = vrot.slane %v4441_v7, 1  ;;  %v7531_v1 = vld [vmem:[#allocation30_spill] sm:$0xff]  ;;  %v7535_v22 = vld [vmem:[#allocation31_spill] sm:$0xff] }
 0x39b   : > { %v4460_v16 = vsel %vm338_vm2, %v6992_v23, %v4459_v3  ;;  %v3744_v56 = vrot.slane %v3743_v28, 4  ;;  %v4517_v47 = vadd.f32 %v4516_v32, %v4515_v58  ;;  %v3822_v35 = vrot.slane %v3821_v10, 4  ;;  %v3769_v23 = vpop.permute.xlu1 %3768 }
 0x39c   : > { %v4461_v27 = vsel %vm340_vm3, %v7526_v53, %v4460_v16  ;;  %v3861_v36 = vmul.f32 %v3684_v62, %v5218_v33  ;;  %v7339_v0 = vsel %vm346_vm6, %v3211_v12, %v3231_v40  ;;  %v7342_v46 = vsel %vm344_vm5, %v3289_v6, %v3315_v45  ;;  %v7529_v33 = vld [vmem:[#allocation19_spill] sm:$0xff]  ;;  %v7536_v45 = vld [vmem:[#allocation32_spill] sm:$0xff] }
 0x39d   : > { %v7346_v13 = vsel %vm342_vm4, %v7226_v31, %v4461_v27  ;;  %v3745_v20 = vadd.f32 %v3744_v56, %v3743_v28  ;;  %v7348_v21 = vadd.f32 %v4435_v54, %v4434_v19  ;;  %v3759_v51 = vsel %vm338_vm2, %v7528_v2, %v7527_v48  ;;  %v7532_v31 = vld [vmem:[#allocation29_spill] sm:$0xff]  ;;  %v4385_v2 = vpop.permute.xlu0 %4384 }
 0x39e   : > { %v3823_v43 = vadd.f32 %v3822_v35, %v3821_v10  ;;  %v3843_v40 = vsel %vm336_vm1, %v7530_v9, %v7529_v33  ;;  %v4513_v5 = vrot.slane %v7331_v52, 1  ;;  %v7357_v37 = vadd.f32 %v4442_v55, %v4441_v7 }
 0x39f   : > { %v7362_v26 = vsel %vm336_vm1, %v7532_v31, %v7531_v1  ;;  %v3746_v29 = vrot.slane %v3745_v20, 2  ;;  %v4518_v49 = vrot.slane %v4517_v47, 2  ;;  %v3899_v25 = vsel %vm271_vm0, %v3861_v36, 0.0  ;;  %v3238_v14 = vpop.permute.xlu1 %3237 }
 0x3a0   : > { %v3824_v50 = vrot.slane %v3823_v43, 2  ;;  %v3778_v39 = vmul.f32 %v3769_v23, %v5300_v18  ;;  %v3760_v19 = vsel %vm340_vm3, %v7533_v59, %v3759_v51  ;;  %v3844_v58 = vsel %vm338_vm2, %v7534_v30, %v3843_v40 }
 0x3a1   : > { %v3747_v62 = vadd.f32 %v3746_v29, %v3745_v20  ;;  %v3862_v8 = vmul.f32 %v3769_v23, %v5298_v17  ;;  %v3761_v7 = vsel %vm342_vm4, %v7535_v22, %v3760_v19  ;;  %v3162_v32 = vmul.f32 %v3153_v63, %v5300_v18 }
 0x3a2   : > { %v3825_v3 = vadd.f32 %v3824_v50, %v3823_v43  ;;  %v3828_v34 = vsel %vm271_vm0, %v3778_v39, 0.0  ;;  %v3762_v41 = vsel %vm344_vm5, %v7234_v57, %v3761_v7  ;;  %v3900_v12 = vrot.slane %v3899_v25, 4 }
 0x3a3   : > { %v3748_v60 = vrot.slane %v3747_v62, 1  ;;  %v3829_v6 = vrot.slane %v3828_v34, 4  ;;  %v7377_v61 = vadd.f32 %v4518_v49, %v4517_v47  ;;  %v3845_v54 = vsel %vm340_vm3, %v7536_v45, %v3844_v58  ;;  %v4470_v59 = vpop.permute.xlu1 %4469  ;;  %v3854_v45 = vpop.permute.xlu0 %3853 }
 0x3a4   : > { %v3212_v28 = vsel %vm271_vm0, %v3162_v32, 0.0  ;;  %v3246_v10 = vmul.f32 %v3153_v63, %v5298_v17  ;;  %v3906_v56 = vsel %vm271_vm0, %v3862_v8, 0.0  ;;  %v3763_v57 = vsel %vm346_vm6, %v7252_v44, %v3762_v41 }
 0x3a5   : > { %v3749_v55 = vadd.f32 %v3748_v60, %v3747_v62  ;;  %v3830_v16 = vadd.f32 %v3829_v6, %v3828_v34  ;;  %v3213_v53 = vrot.slane %v3212_v28, 4  ;;  %v3826_v27 = vrot.slane %v3825_v3, 1 }
 0x3a6   : > { %v3290_v47 = vsel %vm271_vm0, %v3246_v10, 0.0  ;;  %v3247_v35 = vmul.f32 %v3238_v14, %v5300_v18  ;;  %v3901_v20 = vadd.f32 %v3900_v12, %v3899_v25  ;;  %v3846_v51 = vsel %vm342_vm4, %v7240_v42, %v3845_v54 }
 0x3a7   : > { %v3764_v36 = vsel %vm348_vm7, %v3749_v55, %v3763_v57  ;;  %v3831_v23 = vrot.slane %v3830_v16, 2  ;;  %v3214_v48 = vadd.f32 %v3213_v53, %v3212_v28  ;;  %v3907_v43 = vrot.slane %v3906_v56, 4 }
 0x3a8   : > { %4719 = vst.msk [vmem:[%s5411_s8 + $0x108] sm:$0xff] %vm271_vm0, %v3764_v36  ;;  %v3291_v33 = vrot.slane %v3290_v47, 4  ;;  %v3297_v44 = vsel %vm271_vm0, %v3247_v35, 0.0  ;;  %v3847_v9 = vsel %vm344_vm5, %v7263_v11, %v3846_v51  ;;  %v3827_v29 = vadd.f32 %v3826_v27, %v3825_v3 }
 0x3a9   : > { %v3832_v40 = vadd.f32 %v3831_v23, %v3830_v16  ;;  %v3215_v1 = vrot.slane %v3214_v48, 2  ;;  %v3298_v31 = vrot.slane %v3297_v44, 4  ;;  %v4394_v49 = vmul.f32 %v4385_v2, %v5300_v18 }
 0x3aa   : > { %v3292_v63 = vadd.f32 %v3291_v33, %v3290_v47  ;;  %v4478_v50 = vmul.f32 %v4385_v2, %v5298_v17  ;;  %v3902_v25 = vrot.slane %v3901_v20, 2  ;;  %v3908_v19 = vadd.f32 %v3907_v43, %v3906_v56 }
 0x3ab   : > { %v3833_v39 = vrot.slane %v3832_v40, 1  ;;  %v3216_v62 = vadd.f32 %v3215_v1, %v3214_v48  ;;  %v3299_v42 = vadd.f32 %v3298_v31, %v3297_v44  ;;  %v4444_v58 = vsel %vm271_vm0, %v4394_v49, 0.0 }
 0x3ac   : > { %v3293_v30 = vrot.slane %v3292_v63, 2  ;;  %v4522_v11 = vsel %vm271_vm0, %v4478_v50, 0.0  ;;  %v4445_v3 = vrot.slane %v4444_v58, 4  ;;  %v3848_v34 = vsel %vm346_vm6, %v3827_v29, %v3847_v9 }
 0x3ad   : > { %v3834_v8 = vadd.f32 %v3833_v39, %v3832_v40  ;;  %v3217_v22 = vrot.slane %v3216_v62, 1  ;;  %v3300_v7 = vrot.slane %v3299_v42, 2  ;;  %v4523_v17 = vrot.slane %v4522_v11, 4 }
 0x3ae   : > { %v3294_v32 = vadd.f32 %v3293_v30, %v3292_v63  ;;  %v4479_v60 = vmul.f32 %v4470_v59, %v5300_v18  ;;  %v4446_v14 = vadd.f32 %v4445_v3, %v4444_v58  ;;  %v3909_v54 = vrot.slane %v3908_v19, 2  ;;  %v7538_v30 = vld [vmem:[#allocation28_spill] sm:$0xff] }
 0x3af   : > { %v3849_v41 = vsel %vm348_vm7, %v3834_v8, %v3848_v34  ;;  %v3218_v12 = vadd.f32 %v3217_v22, %v3216_v62  ;;  %v3301_v6 = vadd.f32 %v3300_v7, %v3299_v42  ;;  %v4524_v10 = vadd.f32 %v4523_v17, %v4522_v11  ;;  %v7537_v62 = vld [vmem:[#allocation35_spill] sm:$0xff]  ;;  %v7539_v58 = vld [vmem:[#allocation24_spill] sm:$0xff]  ;;  %v7540_v7 = vld [vmem:[#allocation33_spill] sm:$0xff] }
 0x3b0   : > { %4720 = vst.msk [vmem:[%s5411_s8 + $0x140] sm:$0xff] %vm271_vm0, %v3849_v41  ;;  %v3295_v28 = vrot.slane %v3294_v32, 1  ;;  %v4529_v55 = vsel %vm271_vm0, %v4479_v60, 0.0  ;;  %v4447_v53 = vrot.slane %v4446_v14, 2  ;;  %v4520_v27 = vrot.slane %v7377_v61, 1 }
 0x3b1   : > { %v3233_v16 = vsel %vm348_vm7, %v3218_v12, %v7339_v0  ;;  %v3302_v56 = vrot.slane %v3301_v6, 1  ;;  %v4530_v57 = vrot.slane %v4529_v55, 4  ;;  %v4525_v35 = vrot.slane %v4524_v10, 2 }
 0x3b2   : > { %4713 = vst.msk [vmem:[%s5411_s8 + $0x138] sm:$0xff] %vm271_vm0, %v3233_v16  ;;  %v3296_v47 = vadd.f32 %v3295_v28, %v3294_v32  ;;  %v3863_v36 = vmul.f32 %v3854_v45, %v5300_v18  ;;  %v3903_v23 = vadd.f32 %v3902_v25, %v3901_v20  ;;  %v4448_v2 = vadd.f32 %v4447_v53, %v4446_v14 }
 0x3b3   : > { %v3303_v48 = vadd.f32 %v3302_v56, %v3301_v6  ;;  %v4531_v51 = vadd.f32 %v4530_v57, %v4529_v55  ;;  %v3910_v43 = vadd.f32 %v3909_v54, %v3908_v19  ;;  %v4526_v33 = vadd.f32 %v4525_v35, %v4524_v10 }
 0x3b4   : > { %v3317_v0 = vsel %vm346_vm6, %v3296_v47, %v7342_v46  ;;  %v3913_v44 = vsel %vm271_vm0, %v3863_v36, 0.0  ;;  %v4449_v40 = vrot.slane %v4448_v2, 1  ;;  %v4514_v18 = vadd.f32 %v4513_v5, %v7331_v52 }
 0x3b5   : > { %v3318_v9 = vsel %vm348_vm7, %v3303_v48, %v3317_v0  ;;  %v4532_v1 = vrot.slane %v4531_v51, 2  ;;  %v3914_v31 = vrot.slane %v3913_v44, 4  ;;  %v4463_v20 = vsel %vm344_vm5, %v7348_v21, %v7346_v13 }
 0x3b6   : > { %v4521_v29 = vadd.f32 %v4520_v27, %v7377_v61  ;;  %4714 = vst.msk [vmem:[%s5411_s8 + $0x170] sm:$0xff] %vm271_vm0, %v3318_v9  ;;  %v4527_v46 = vrot.slane %v4526_v33, 1  ;;  %v3904_v63 = vrot.slane %v3903_v23, 1  ;;  %v4450_v49 = vadd.f32 %v4449_v40, %v4448_v2 }
 0x3b7   : > { %v4533_v50 = vadd.f32 %v4532_v1, %v4531_v51  ;;  %v3915_v25 = vadd.f32 %v3914_v31, %v3913_v44  ;;  %v4464_v39 = vsel %vm346_vm6, %v7357_v37, %v4463_v20  ;;  %v4545_v52 = vsel %vm338_vm2, %v7537_v62, %v7362_v26 }
 0x3b8   : > { %v3911_v5 = vrot.slane %v3910_v43, 1  ;;  %v4528_v42 = vadd.f32 %v4527_v46, %v4526_v33  ;;  %v4546_v13 = vsel %vm340_vm3, %v7232_v24, %v4545_v52  ;;  %v4465_v21 = vsel %vm348_vm7, %v4450_v49, %v4464_v39 }
 0x3b9   : > { %v4534_v61 = vrot.slane %v4533_v50, 1  ;;  %v3916_v59 = vrot.slane %v3915_v25, 2  ;;  %v3898_v19 = vadd.f32 %v3897_v15, %v7244_v4  ;;  %v4547_v37 = vsel %vm342_vm4, %v4514_v18, %v4546_v13  ;;  %4727 = vst.msk [vmem:[%s5411_s8 + $0x148] sm:$0xff] %vm271_vm0, %v4465_v21 }
 0x3ba   : > { %v3928_v26 = vsel %vm336_vm1, %v7539_v58, %v7538_v30  ;;  %v4548_v11 = vsel %vm344_vm5, %v4521_v29, %v4547_v37  ;;  %v3905_v24 = vadd.f32 %v3904_v63, %v3903_v23  ;;  %v3912_v34 = vadd.f32 %v3911_v5, %v3910_v43 }
 0x3bb   : > { %v4535_v8 = vadd.f32 %v4534_v61, %v4533_v50  ;;  %v3917_v22 = vadd.f32 %v3916_v59, %v3915_v25  ;;  %v3929_v3 = vsel %vm338_vm2, %v7540_v7, %v3928_v26  ;;  %v4549_v4 = vsel %vm346_vm6, %v4528_v42, %v4548_v11 }
 0x3bc   : > { %v3930_v15 = vsel %vm340_vm3, %v7242_v38, %v3929_v3 }
 0x3bd   : > { %v4550_v32 = vsel %vm348_vm7, %v4535_v8, %v4549_v4  ;;  %v3918_v17 = vrot.slane %v3917_v22, 1  ;;  %v3931_v60 = vsel %vm342_vm4, %v3898_v19, %v3930_v15 }
 0x3be   : > { %4728 = vst.msk [vmem:[%s5411_s8 + $0x180] sm:$0xff] %vm271_vm0, %v4550_v32  ;;  %v3932_v41 = vsel %vm344_vm5, %v3905_v24, %v3931_v60 }
 0x3bf   : > { %v3919_v12 = vadd.f32 %v3918_v17, %v3917_v22  ;;  %v3933_v6 = vsel %vm346_vm6, %v3912_v34, %v3932_v41 }
 0x3c1   : > { %v3934_v14 = vsel %vm348_vm7, %v3919_v12, %v3933_v6 }
 0x3c2   : > { %4721 = vst.msk [vmem:[%s5411_s8 + $0x178] sm:$0xff] %vm271_vm0, %v3934_v14 }
 0x3c3 PF: > { %s18_s14 = sadd.s32 1, %s4932_s14   ;;  %s7541_s9 = smov %s4916_s10 }
 0x3c4   : > { %p15_p11 = scmp.ge.s32.totalorder %s18_s14, 4   ;;  %s7542_s10 = smov %s4920_s11 }
 0x3c5   : > { %s7543_s11 = smov %s5008_s21  ;;  %s7544_s12 = smov %s4928_s13 }
 0x3c6   : > { %s7545_s13 = smov %s7547_s16  ;;  %17 = sbr.rel (!%p15_p11) target bundleno = 6 (0x6), region = 129 }
 0x3cd   :  { %4581 = vsyncpa [#allocation3], 1 }
 0x3ce   :  { %4583 = vsyncpa [#allocation3 + $0x1], 1 }
 0x3cf   :  { %4584 = vsyncpa [#allocation5], 1 }
 0x3d0   :  { %4586 = vsyncpa [#allocation5 + $0x1], 1 }

</bundles_post_ra>
